<compile_context>
chip_gen: v5e
topology: v5e:2x2
jax: 0.10.0
libtpu: 0.0.40
codegen_flags: <defaults>
</compile_context>

<pallas_src>
import functools

import jax
import jax.numpy as jnp
from jax.experimental import pallas as pl
from jax.experimental.pallas import tpu as pltpu


# --------------------------- layer configuration ----------------------------
# Standard beta-VAE dSprites stack used by disenn: 1->32->32->64->64 convs
# (k=4, s=2, p=1), FC 1024->128->z, mirrored ConvTranspose2d decoder.
_ENC = [("e1", 1, 32, 64), ("e2", 32, 32, 32), ("e3", 32, 64, 16), ("e4", 64, 64, 8)]
_DEC = [("d1", 64, 64, 4), ("d2", 64, 32, 8), ("d3", 32, 32, 16), ("d4", 32, 1, 32)]
_K, _STRIDE, _PAD = 4, 2, 1


# ----------------------------- Pallas kernels -------------------------------

def _gemm_kernel(*refs, activation, has_bias):
    """One M-tile of: out = act(A @ W (+ b)).  A/W are bf16, accumulation f32.

    The output block last dim is always a multiple of 128 (lane-dense slab) by
    construction of the grouped / block-diagonal weights, so stores are
    unmasked and the HBM writeback is dense.
    """
    if has_bias:
        a_ref, w_ref, b_ref, o_ref = refs
    else:
        a_ref, w_ref, o_ref = refs
    acc = jnp.dot(a_ref[...], w_ref[...], preferred_element_type=jnp.float32)
    if has_bias:
        acc = acc + b_ref[...]
    if activation == "relu":
        acc = jnp.maximum(acc, 0.0)
    elif activation == "sigmoid":
        acc = jax.nn.sigmoid(acc)
    o_ref[...] = acc.astype(o_ref.dtype)


def _pick_tile_m(m, target):
    """Largest tile that divides m exactly, <= min(target, m//2) so the
    "parallel" grid keeps >=2 steps (both v7x TensorCores get work), preferring
    multiples of 16 (bf16 sublane packing), then 8, else the full dim."""
    if m <= 16:
        return m
    cap = max(min(target, m // 2), 16)
    start = min(cap, m)
    for t in range(start // 16 * 16, 0, -16):
        if m % t == 0:
            return t
    for t in range(start // 8 * 8, 0, -8):
        if m % t == 0:
            return t
    return m


def fused_linear(a, w, b_row, activation="none", out_dtype=jnp.float32):
    """(M,K) @ (K,N) (+ b) with fused activation, Pallas-tiled over M."""
    M, K = a.shape
    Kw, N = w.shape
    assert K == Kw, (K, Kw)
    # ~2 MiB per A/O block => per-grid-step overhead (~0.35us) is amortized,
    # while double-buffered blocks stay far below the 32 MiB VMEM budget.
    row_bytes = max(K * a.dtype.itemsize, N * jnp.dtype(out_dtype).itemsize, 1)
    target = max(128, min(2048, (2 * 1024 * 1024) // row_bytes))
    tm = _pick_tile_m(M, target)

    has_bias = b_row is not None
    kernel = functools.partial(_gemm_kernel, activation=activation,
                               has_bias=has_bias)
    in_specs = [
        pl.BlockSpec((tm, K), lambda i: (i, 0)),   # A tile (double-buffered)
        pl.BlockSpec((K, N), lambda i: (0, 0)),    # full weight, VMEM-resident
    ]
    args = [a, w]
    if has_bias:
        in_specs.append(pl.BlockSpec((1, N), lambda i: (0, 0)))
        args.append(b_row.astype(jnp.float32))

    return pl.pallas_call(
        kernel,
        out_shape=jax.ShapeDtypeStruct((M, N), out_dtype),
        grid=(M // tm,),
        in_specs=in_specs,
        out_specs=pl.BlockSpec((tm, N), lambda i: (i, 0)),
        compiler_params=pltpu.CompilerParams(
            dimension_semantics=("parallel",),
            # Explicit budget sized for v7x (64 MiB physical); also valid on
            # v5e/v6e.  Blocks here are <= ~5 MiB including double buffering.
            vmem_limit_bytes=32 * 1024 * 1024,
        ),
    )(*args)


def _fc_head_kernel(h_ref, eps_ref,
                    w_efc, b_efc, w_mu, b_mu, w_lv, b_lv,
                    w_dfc1, b_dfc1, w_dfc2, b_dfc2,
                    mu_ref, lv_ref, dec_ref):
    """Fused FC head: efc->relu, (mu, logvar), reparameterize, dfc1->relu,
    dfc2->relu.  All weights are VMEM-resident; the two 1024-wide matmuls run
    in bf16, accumulation and mu/logvar/epilogue stay f32."""
    h = jnp.dot(h_ref[...], w_efc[...], preferred_element_type=jnp.float32)
    h = jnp.maximum(h + b_efc[...], 0.0)

    mu = jnp.dot(h, w_mu[...], preferred_element_type=jnp.float32) + b_mu[...]
    lv = jnp.dot(h, w_lv[...], preferred_element_type=jnp.float32) + b_lv[...]

    # reparameterization trick (torch training mode): z = mu + exp(0.5*logvar)*eps
    z = mu + jnp.exp(0.5 * lv) * eps_ref[...]

    d = jnp.dot(z, w_dfc1[...], preferred_element_type=jnp.float32)
    d = jnp.maximum(d + b_dfc1[...], 0.0)
    d = jnp.dot(d.astype(jnp.bfloat16), w_dfc2[...],
                preferred_element_type=jnp.float32)
    d = jnp.maximum(d + b_dfc2[...], 0.0)

    mu_ref[...] = mu
    lv_ref[...] = lv
    dec_ref[...] = d.astype(dec_ref.dtype)


def fc_head(prep, h, eps, z_dim):
    """Single pallas_call for the whole encoder/decoder FC stack + sampling."""
    B = h.shape[0]
    n_dec = prep["dfc2_w"].shape[1]
    return pl.pallas_call(
        _fc_head_kernel,
        out_shape=(
            jax.ShapeDtypeStruct((B, z_dim), jnp.float32),   # concept_mean
            jax.ShapeDtypeStruct((B, z_dim), jnp.float32),   # concept_logvar
            jax.ShapeDtypeStruct((B, n_dec), jnp.bfloat16),  # decoder FC output
        ),
        compiler_params=pltpu.CompilerParams(vmem_limit_bytes=32 * 1024 * 1024),
    )(h, eps,
      prep["efc_w"], prep["efc_b"], prep["emu_w"], prep["emu_b"],
      prep["elv_w"], prep["elv_b"], prep["dfc1_w"], prep["dfc1_b"],
      prep["dfc2_w"], prep["dfc2_b"])


# --------------------------- grouping / weight prep --------------------------

def _pick_group(n, k, w_spatial, max_wbd_bytes=512 * 1024):
    """Number of consecutive output pixels g packed into one GEMM row.

    (1) grow g until the output slab is lane-dense (g*n >= 128 lanes);
    (2) for tiny contraction dims keep doubling while the block-diag weight
        still fits one MXU K-tile (g*k <= 256 after doubling) and stays small:
        MXU pass count is unchanged-or-better, A/O HBM bytes are unchanged.
    g always divides the spatial width, so reshapes to (B,H,W,C) stay free.
    """
    g = 1
    while g * n < 128 and w_spatial % (2 * g) == 0:
        g *= 2
    while (2 * g * k) <= 256 and w_spatial % (2 * g) == 0 \
            and (2 * g * k) * (2 * g * n) * 2 <= max_wbd_bytes:
        g *= 2
    return g


def _block_diag(w, g):
    if g == 1:
        return w
    K, N = w.shape
    out = jnp.zeros((g * K, g * N), w.dtype)
    for i in range(g):
        out = out.at[i * K:(i + 1) * K, i * N:(i + 1) * N].set(w)
    return out


def prepare_params(p):
    """One-time conversion of raw torch-layout params into GEMM-ready form
    (transposed, block-diagonal-expanded, bf16) -- no per-forward weight
    transposes/casts remain in the hot path."""
    prep = {}
    for name, cin, cout, hin in _ENC:
        w = p[f"{name}_w"]                                 # (Cout, Cin, 4, 4)
        K = _K * _K * cin
        g = _pick_group(cout, K, hin // _STRIDE)
        wmat = jnp.transpose(w, (2, 3, 1, 0)).reshape(K, cout)   # (kh,kw,ci) x co
        prep[f"{name}_w"] = _block_diag(wmat, g).astype(jnp.bfloat16)
        prep[f"{name}_b"] = jnp.tile(p[f"{name}_b"], g).reshape(1, g * cout) \
                               .astype(jnp.float32)
    for name, cin, cout, hin in _DEC:
        w = p[f"{name}_w"]                                 # (Cin, Cout, 4, 4)
        N = _K * _K * cout
        g = _pick_group(N, cin, hin)
        wmat = jnp.transpose(w, (0, 2, 3, 1)).reshape(cin, N)    # ci x (kh,kw,co)
        prep[f"{name}_w"] = _block_diag(wmat, g).astype(jnp.bfloat16)
        prep[f"{name}_b"] = p[f"{name}_b"].astype(jnp.float32)   # added post-col2im
    prep["efc_w"] = p["efc_w"].astype(jnp.bfloat16)
    prep["efc_b"] = p["efc_b"].reshape(1, -1).astype(jnp.float32)
    prep["emu_w"] = p["emu_w"].astype(jnp.float32)
    prep["emu_b"] = p["emu_b"].reshape(1, -1).astype(jnp.float32)
    prep["elv_w"] = p["elv_w"].astype(jnp.float32)
    prep["elv_b"] = p["elv_b"].reshape(1, -1).astype(jnp.float32)
    prep["dfc1_w"] = p["dfc1_w"].astype(jnp.float32)
    prep["dfc1_b"] = p["dfc1_b"].reshape(1, -1).astype(jnp.float32)
    prep["dfc2_w"] = p["dfc2_w"].astype(jnp.bfloat16)
    prep["dfc2_b"] = p["dfc2_b"].reshape(1, -1).astype(jnp.float32)
    return prep


# ------------------------------- conv glue -----------------------------------

def _im2col_nhwc(x, k, stride, pad):
    """x: (B,H,W,C) NHWC -> patches (B,Ho,Wo,k*k,C); patch order = (kh, kw, c)."""
    if pad > 0:
        x = jnp.pad(x, ((0, 0), (pad, pad), (pad, pad), (0, 0)))
    B, H, W, C = x.shape
    Ho = (H - k) // stride + 1
    Wo = (W - k) // stride + 1
    slabs = []
    for i in range(k):
        for j in range(k):
            slabs.append(x[:, i:i + stride * Ho:stride, j:j + stride * Wo:stride, :])
    return jnp.stack(slabs, axis=3), Ho, Wo


def conv2d_grouped(x, w_bd, b_row, activation="relu", out_dtype=jnp.bfloat16):
    """Conv2d(k=4,s=2,p=1) as a grouped, block-diagonal GEMM (lane-dense out)."""
    B, H, W, Cin = x.shape
    K = _K * _K * Cin
    g = w_bd.shape[0] // K                       # static group size from weight shape
    patches, Ho, Wo = _im2col_nhwc(x.astype(jnp.bfloat16), _K, _STRIDE, _PAD)
    a = patches.reshape((B * Ho * Wo) // g, g * K)          # free reshape
    out = fused_linear(a, w_bd, b_row, activation, out_dtype)
    return out.reshape(B, Ho, Wo, -1)                        # free reshape


def _shift(t, axis, d):
    """d=+1: out[m] = t[m-1] (zero at m=0); d=-1: out[m] = t[m+1] (zero at end)."""
    pad = [(0, 0)] * t.ndim
    pad[axis] = (1, 0) if d > 0 else (0, 1)
    t = jnp.pad(t, pad)
    idx = [slice(None)] * t.ndim
    idx[axis] = slice(0, -1) if d > 0 else slice(1, None)
    return t[tuple(idx)]


def _col2im_stride2_k4(cols, bias, relu, out_dtype):
    """Parity col2im for ConvTranspose2d(k=4,s=2,p=1).

    Every output pixel receives exactly 4 contributions selected by its
    (row, col) parity, so the 4 parity planes are built as fused sums of
    shifted slices of `cols` and interleaved once -- no 16 full-canvas
    read-modify-writes.  cols: (B,Hi,Wi,4,4,Cout) f32.
    """
    B, Hi, Wi, _, _, C = cols.shape
    squeeze = (C == 1)
    if squeeze:
        cols = cols.reshape(B, Hi, Wi, _K, _K)   # keep W on the lane axis for Cout=1

    def kh(i):                                    # -> (B,Hi,Wi,4[,C])
        return cols[:, :, :, i]

    def kw(t, i):                                 # -> (B,Hi,Wi[,C])
        return t[:, :, :, i] if squeeze else t[:, :, :, i, :]

    h_even = kh(1) + _shift(kh(3), 1, +1)         # output rows 2m
    h_odd = kh(2) + _shift(kh(0), 1, -1)          # output rows 2m+1
    planes = []
    for t in (h_even, h_odd):
        w_even = kw(t, 1) + _shift(kw(t, 3), 2, +1)
        w_odd = kw(t, 2) + _shift(kw(t, 0), 2, -1)
        planes.append((w_even, w_odd))
    ph0 = jnp.stack(planes[0], axis=3)            # (B,Hi,Wi,2[,C])  axis3 = col parity
    ph1 = jnp.stack(planes[1], axis=3)
    full = jnp.stack([ph0, ph1], axis=2)          # (B,Hi,2,Wi,2[,C]) axis2 = row parity
    out = full.reshape(B, 2 * Hi, 2 * Wi, C)
    out = out + bias.reshape(1, 1, 1, C)
    if relu:
        out = jnp.maximum(out, 0.0)
    return out.astype(out_dtype)


def conv_transpose2d_grouped(x, w_bd, bias, activation="relu",
                             out_dtype=jnp.bfloat16):
    """ConvTranspose2d(k=4,s=2,p=1): direct input-space grouped GEMM (Pallas,
    lane-dense bf16 `cols`) + parity col2im (XLA)."""
    B, Hi, Wi, Cin = x.shape
    g = w_bd.shape[0] // Cin
    Cout = w_bd.shape[1] // (g * _K * _K)
    a = x.astype(jnp.bfloat16).reshape((B * Hi * Wi) // g, g * Cin)
    cols = fused_linear(a, w_bd, None, "none", out_dtype=jnp.bfloat16)
    cols = cols.reshape(B, Hi, Wi, _K, _K, Cout).astype(jnp.float32)
    return _col2im_stride2_k4(cols, bias, relu=(activation == "relu"),
                              out_dtype=out_dtype)


# ------------------------------ Parameters -----------------------------------

def init_params(key, z_dim):
    keys = jax.random.split(key, 13)
    s = 0.05

    def nrm(k, shape):
        return (jax.random.normal(k, shape) * s).astype(jnp.float32)

    def zb(n):
        return jnp.zeros((n,), jnp.float32)

    p = {}
    # Encoder convs: PyTorch Conv2d weight layout (C_out, C_in, 4, 4), s=2, p=1
    p["e1_w"] = nrm(keys[0], (32, 1, 4, 4));   p["e1_b"] = zb(32)
    p["e2_w"] = nrm(keys[1], (32, 32, 4, 4));  p["e2_b"] = zb(32)
    p["e3_w"] = nrm(keys[2], (64, 32, 4, 4));  p["e3_b"] = zb(64)
    p["e4_w"] = nrm(keys[3], (64, 64, 4, 4));  p["e4_b"] = zb(64)
    # Encoder FCs (stored as (in, out), i.e. transposed vs torch nn.Linear.weight)
    p["efc_w"] = nrm(keys[4], (64 * 4 * 4, 128)); p["efc_b"] = zb(128)
    p["emu_w"] = nrm(keys[5], (128, z_dim));      p["emu_b"] = zb(z_dim)
    p["elv_w"] = nrm(keys[6], (128, z_dim));      p["elv_b"] = zb(z_dim)
    # Decoder FCs
    p["dfc1_w"] = nrm(keys[7], (z_dim, 128));       p["dfc1_b"] = zb(128)
    p["dfc2_w"] = nrm(keys[8], (128, 64 * 4 * 4));  p["dfc2_b"] = zb(64 * 4 * 4)
    # Decoder transposed convs: PyTorch ConvTranspose2d layout (C_in, C_out, 4, 4)
    p["d1_w"] = nrm(keys[9], (64, 64, 4, 4));   p["d1_b"] = zb(64)
    p["d2_w"] = nrm(keys[10], (64, 32, 4, 4));  p["d2_b"] = zb(32)
    p["d3_w"] = nrm(keys[11], (32, 32, 4, 4));  p["d3_b"] = zb(32)
    p["d4_w"] = nrm(keys[12], (32, 1, 4, 4));   p["d4_b"] = zb(1)
    return p


# ------------------------------ Forward pass ----------------------------------

def vae_conceptizer_forward(prep, x, eps):
    """Returns (concept_mean, concept_logvar, x_reconstruct) like the torch module."""
    assert x.ndim == 4 and x.shape[2] == 64 and x.shape[3] == 64
    B = x.shape[0]
    z_dim = eps.shape[1]

    # --- ConvEncoder: NHWC, bf16 activations, grouped block-diag GEMMs ---
    h = jnp.transpose(x, (0, 2, 3, 1)).astype(jnp.bfloat16)            # NCHW -> NHWC
    h = conv2d_grouped(h, prep["e1_w"], prep["e1_b"], "relu")           # (B,32,32,32)
    h = conv2d_grouped(h, prep["e2_w"], prep["e2_b"], "relu")           # (B,16,16,32)
    h = conv2d_grouped(h, prep["e3_w"], prep["e3_b"], "relu")           # (B, 8, 8,64)
    h = conv2d_grouped(h, prep["e4_w"], prep["e4_b"], "relu")           # (B, 4, 4,64)
    # flatten in torch's (C,H,W) order so the FC weights keep PyTorch semantics
    h = jnp.transpose(h, (0, 3, 1, 2)).reshape(B, -1)                   # (B,1024) bf16

    # --- fused FC head: efc -> (mu, logvar) -> sample() -> dfc1 -> dfc2 ---
    concept_mean, concept_logvar, d = fc_head(prep, h, eps, z_dim)

    # --- ConvDecoder: direct transposed-conv GEMM + parity col2im ---
    d = jnp.transpose(d.reshape(B, 64, 4, 4), (0, 2, 3, 1))             # (B,4,4,64) NHWC
    d = conv_transpose2d_grouped(d, prep["d1_w"], prep["d1_b"], "relu")  # (B, 8, 8,64)
    d = conv_transpose2d_grouped(d, prep["d2_w"], prep["d2_b"], "relu")  # (B,16,16,32)
    d = conv_transpose2d_grouped(d, prep["d3_w"], prep["d3_b"], "relu")  # (B,32,32,32)
    d = conv_transpose2d_grouped(d, prep["d4_w"], prep["d4_b"], "none",
                                 out_dtype=jnp.float32)                  # (B,64,64, 1)
    # final layer left as reconstruction logits (loss-side sigmoid), matching disenn
    x_reconstruct = jnp.transpose(d, (0, 3, 1, 2)).reshape(x.shape)      # view_as(x)

    return concept_mean, concept_logvar, x_reconstruct


# --------------------------------- Main ---------------------------------------

if __name__ == "__main__":
    key = jax.random.PRNGKey(0)
    k_param, k_x, k_eps = jax.random.split(key, 3)

    num_concepts = 5
    batch = 2

    raw_params = init_params(k_param, num_concepts)
    prep = prepare_params(raw_params)            # one-time weight preparation

    x = jax.random.uniform(k_x, (batch, 1, 64, 64), dtype=jnp.float32)
    # epsilon for torch.randn_like in the reparameterization trick
    eps = jax.random.normal(k_eps, (batch, num_concepts), dtype=jnp.float32)

    fwd = jax.jit(vae_conceptizer_forward)
    concept_mean, concept_logvar, x_rec = fwd(prep, x, eps)
    jax.block_until_ready((concept_mean, concept_logvar, x_rec))

    assert concept_mean.shape == (batch, num_concepts)
    assert concept_logvar.shape == (batch, num_concepts)
    assert x_rec.shape == x.shape
    assert jnp.all(jnp.isfinite(concept_mean))
    assert jnp.all(jnp.isfinite(concept_logvar))
    assert jnp.all(jnp.isfinite(x_rec))

    print("KERNEL_OK")
</pallas_src>

<mosaic_0001>
module attributes {stable_mosaic.version = 11 : i64} {
  func.func @_gemm_kernel(%arg0: i32, %arg1: memref<64x256xbf16, #tpu.memory_space<vmem>>, %arg2: memref<256x512xbf16, #tpu.memory_space<vmem>>, %arg3: memref<1x512xf32, #tpu.memory_space<vmem>>, %arg4: memref<64x512xbf16, #tpu.memory_space<vmem>>) attributes {dimension_semantics = [#tpu.dimension_semantics<parallel>], iteration_bounds = array<i64: 2>, scalar_prefetch = 0 : i64, scratch_operands = 0 : i64, tpu.core_type = #tpu.core_type<tc>, window_params = [{transform_indices = @transform_0, window_bounds = array<i64: 64, 256>}, {pipeline_mode = #tpu.pipeline_mode<synchronous>, transform_indices = @transform_1, window_bounds = array<i64: 256, 512>}, {pipeline_mode = #tpu.pipeline_mode<synchronous>, transform_indices = @transform_2, window_bounds = array<i64: 1, 512>}, {transform_indices = @transform_3, window_bounds = array<i64: 64, 512>}]} {
    %c0 = arith.constant 0 : index
    %c0_0 = arith.constant 0 : index
    %0 = vector.load %arg1[%c0, %c0_0] : memref<64x256xbf16, #tpu.memory_space<vmem>>, vector<64x256xbf16>
    %c0_1 = arith.constant 0 : index
    %c0_2 = arith.constant 0 : index
    %1 = vector.load %arg2[%c0_1, %c0_2] : memref<256x512xbf16, #tpu.memory_space<vmem>>, vector<256x512xbf16>
    %cst = arith.constant dense<0.000000e+00> : vector<64x512xf32>
    %2 = tpu.matmul %0, %1, %cst {dimension_numbers = #tpu.dot_dimension_numbers<[1], [0], [0], [1], [0, 0, 1, 1], [], []>} : vector<64x256xbf16>, vector<256x512xbf16>, vector<64x512xf32> -> vector<64x512xf32>
    %c0_3 = arith.constant 0 : index
    %c0_4 = arith.constant 0 : index
    %3 = vector.load %arg3[%c0_3, %c0_4] : memref<1x512xf32, #tpu.memory_space<vmem>>, vector<1x512xf32>
    %4 = vector.broadcast %3 : vector<1x512xf32> to vector<64x512xf32>
    %5 = arith.addf %2, %4 : vector<64x512xf32>
    %cst_5 = arith.constant 0.000000e+00 : f32
    %6 = vector.broadcast %cst_5 : f32 to vector<64x512xf32>
    %7 = arith.maximumf %5, %6 : vector<64x512xf32>
    %8 = arith.truncf %7 : vector<64x512xf32> to vector<64x512xbf16>
    %c0_6 = arith.constant 0 : index
    %c0_7 = arith.constant 0 : index
    %9 = vector.load %arg4[%c0_6, %c0_7] : memref<64x512xbf16, #tpu.memory_space<vmem>>, vector<64x512xbf16>
    tpu.vector_store %arg4[%c0_6, %c0_7], %8 {strides = array<i32>} : memref<64x512xbf16, #tpu.memory_space<vmem>>, vector<64x512xbf16>,
    return
  }
  func.func @transform_0(%arg0: i32) -> (i32, i32) {
    %c0_i32 = arith.constant 0 : i32
    %c0_i32_0 = arith.constant 0 : i32
    return %arg0, %c0_i32 : i32, i32
  }
  func.func @transform_1(%arg0: i32) -> (i32, i32) {
    %c0_i32 = arith.constant 0 : i32
    %c0_i32_0 = arith.constant 0 : i32
    %c0_i32_1 = arith.constant 0 : i32
    return %c0_i32, %c0_i32_0 : i32, i32
  }
  func.func @transform_2(%arg0: i32) -> (i32, i32) {
    %c0_i32 = arith.constant 0 : i32
    %c0_i32_0 = arith.constant 0 : i32
    %c0_i32_1 = arith.constant 0 : i32
    return %c0_i32, %c0_i32_0 : i32, i32
  }
  func.func @transform_3(%arg0: i32) -> (i32, i32) {
    %c0_i32 = arith.constant 0 : i32
    %c0_i32_0 = arith.constant 0 : i32
    return %arg0, %c0_i32 : i32, i32
  }
}

module attributes {stable_mosaic.version = 11 : i64} {
  func.func @_gemm_kernel(%arg0: i32, %arg1: memref<64x2048xbf16, #tpu.memory_space<vmem>>, %arg2: memref<2048x128xbf16, #tpu.memory_space<vmem>>, %arg3: memref<1x128xf32, #tpu.memory_space<vmem>>, %arg4: memref<64x128xbf16, #tpu.memory_space<vmem>>) attributes {dimension_semantics = [#tpu.dimension_semantics<parallel>], iteration_bounds = array<i64: 2>, scalar_prefetch = 0 : i64, scratch_operands = 0 : i64, tpu.core_type = #tpu.core_type<tc>, window_params = [{transform_indices = @transform_0, window_bounds = array<i64: 64, 2048>}, {pipeline_mode = #tpu.pipeline_mode<synchronous>, transform_indices = @transform_1, window_bounds = array<i64: 2048, 128>}, {pipeline_mode = #tpu.pipeline_mode<synchronous>, transform_indices = @transform_2, window_bounds = array<i64: 1, 128>}, {transform_indices = @transform_3, window_bounds = array<i64: 64, 128>}]} {
    %c0 = arith.constant 0 : index
    %c0_0 = arith.constant 0 : index
    %0 = vector.load %arg1[%c0, %c0_0] : memref<64x2048xbf16, #tpu.memory_space<vmem>>, vector<64x2048xbf16>
    %c0_1 = arith.constant 0 : index
    %c0_2 = arith.constant 0 : index
    %1 = vector.load %arg2[%c0_1, %c0_2] : memref<2048x128xbf16, #tpu.memory_space<vmem>>, vector<2048x128xbf16>
    %cst = arith.constant dense<0.000000e+00> : vector<64x128xf32>
    %2 = tpu.matmul %0, %1, %cst {dimension_numbers = #tpu.dot_dimension_numbers<[1], [0], [0], [1], [0, 0, 1, 1], [], []>} : vector<64x2048xbf16>, vector<2048x128xbf16>, vector<64x128xf32> -> vector<64x128xf32>
    %c0_3 = arith.constant 0 : index
    %c0_4 = arith.constant 0 : index
    %3 = vector.load %arg3[%c0_3, %c0_4] : memref<1x128xf32, #tpu.memory_space<vmem>>, vector<1x128xf32>
    %4 = vector.broadcast %3 : vector<1x128xf32> to vector<64x128xf32>
    %5 = arith.addf %2, %4 : vector<64x128xf32>
    %cst_5 = arith.constant 0.000000e+00 : f32
    %6 = vector.broadcast %cst_5 : f32 to vector<64x128xf32>
    %7 = arith.maximumf %5, %6 : vector<64x128xf32>
    %8 = arith.truncf %7 : vector<64x128xf32> to vector<64x128xbf16>
    %c0_6 = arith.constant 0 : index
    %c0_7 = arith.constant 0 : index
    %9 = vector.load %arg4[%c0_6, %c0_7] : memref<64x128xbf16, #tpu.memory_space<vmem>>, vector<64x128xbf16>
    tpu.vector_store %arg4[%c0_6, %c0_7], %8 {strides = array<i32>} : memref<64x128xbf16, #tpu.memory_space<vmem>>, vector<64x128xbf16>,
    return
  }
  func.func @transform_0(%arg0: i32) -> (i32, i32) {
    %c0_i32 = arith.constant 0 : i32
    %c0_i32_0 = arith.constant 0 : i32
    return %arg0, %c0_i32 : i32, i32
  }
  func.func @transform_1(%arg0: i32) -> (i32, i32) {
    %c0_i32 = arith.constant 0 : i32
    %c0_i32_0 = arith.constant 0 : i32
    %c0_i32_1 = arith.constant 0 : i32
    return %c0_i32, %c0_i32_0 : i32, i32
  }
  func.func @transform_2(%arg0: i32) -> (i32, i32) {
    %c0_i32 = arith.constant 0 : i32
    %c0_i32_0 = arith.constant 0 : i32
    %c0_i32_1 = arith.constant 0 : i32
    return %c0_i32, %c0_i32_0 : i32, i32
  }
  func.func @transform_3(%arg0: i32) -> (i32, i32) {
    %c0_i32 = arith.constant 0 : i32
    %c0_i32_0 = arith.constant 0 : i32
    return %arg0, %c0_i32 : i32, i32
  }
}

module attributes {stable_mosaic.version = 11 : i64} {
  func.func @_gemm_kernel(%arg0: i32, %arg1: memref<32x1024xbf16, #tpu.memory_space<vmem>>, %arg2: memref<1024x128xbf16, #tpu.memory_space<vmem>>, %arg3: memref<1x128xf32, #tpu.memory_space<vmem>>, %arg4: memref<32x128xbf16, #tpu.memory_space<vmem>>) attributes {dimension_semantics = [#tpu.dimension_semantics<parallel>], iteration_bounds = array<i64: 2>, scalar_prefetch = 0 : i64, scratch_operands = 0 : i64, tpu.core_type = #tpu.core_type<tc>, window_params = [{transform_indices = @transform_0, window_bounds = array<i64: 32, 1024>}, {pipeline_mode = #tpu.pipeline_mode<synchronous>, transform_indices = @transform_1, window_bounds = array<i64: 1024, 128>}, {pipeline_mode = #tpu.pipeline_mode<synchronous>, transform_indices = @transform_2, window_bounds = array<i64: 1, 128>}, {transform_indices = @transform_3, window_bounds = array<i64: 32, 128>}]} {
    %c0 = arith.constant 0 : index
    %c0_0 = arith.constant 0 : index
    %0 = vector.load %arg1[%c0, %c0_0] : memref<32x1024xbf16, #tpu.memory_space<vmem>>, vector<32x1024xbf16>
    %c0_1 = arith.constant 0 : index
    %c0_2 = arith.constant 0 : index
    %1 = vector.load %arg2[%c0_1, %c0_2] : memref<1024x128xbf16, #tpu.memory_space<vmem>>, vector<1024x128xbf16>
    %cst = arith.constant dense<0.000000e+00> : vector<32x128xf32>
    %2 = tpu.matmul %0, %1, %cst {dimension_numbers = #tpu.dot_dimension_numbers<[1], [0], [0], [1], [0, 0, 1, 1], [], []>} : vector<32x1024xbf16>, vector<1024x128xbf16>, vector<32x128xf32> -> vector<32x128xf32>
    %c0_3 = arith.constant 0 : index
    %c0_4 = arith.constant 0 : index
    %3 = vector.load %arg3[%c0_3, %c0_4] : memref<1x128xf32, #tpu.memory_space<vmem>>, vector<1x128xf32>
    %4 = vector.broadcast %3 : vector<1x128xf32> to vector<32x128xf32>
    %5 = arith.addf %2, %4 : vector<32x128xf32>
    %cst_5 = arith.constant 0.000000e+00 : f32
    %6 = vector.broadcast %cst_5 : f32 to vector<32x128xf32>
    %7 = arith.maximumf %5, %6 : vector<32x128xf32>
    %8 = arith.truncf %7 : vector<32x128xf32> to vector<32x128xbf16>
    %c0_6 = arith.constant 0 : index
    %c0_7 = arith.constant 0 : index
    %9 = vector.load %arg4[%c0_6, %c0_7] : memref<32x128xbf16, #tpu.memory_space<vmem>>, vector<32x128xbf16>
    tpu.vector_store %arg4[%c0_6, %c0_7], %8 {strides = array<i32>} : memref<32x128xbf16, #tpu.memory_space<vmem>>, vector<32x128xbf16>,
    return
  }
  func.func @transform_0(%arg0: i32) -> (i32, i32) {
    %c0_i32 = arith.constant 0 : i32
    %c0_i32_0 = arith.constant 0 : i32
    return %arg0, %c0_i32 : i32, i32
  }
  func.func @transform_1(%arg0: i32) -> (i32, i32) {
    %c0_i32 = arith.constant 0 : i32
    %c0_i32_0 = arith.constant 0 : i32
    %c0_i32_1 = arith.constant 0 : i32
    return %c0_i32, %c0_i32_0 : i32, i32
  }
  func.func @transform_2(%arg0: i32) -> (i32, i32) {
    %c0_i32 = arith.constant 0 : i32
    %c0_i32_0 = arith.constant 0 : i32
    %c0_i32_1 = arith.constant 0 : i32
    return %c0_i32, %c0_i32_0 : i32, i32
  }
  func.func @transform_3(%arg0: i32) -> (i32, i32) {
    %c0_i32 = arith.constant 0 : i32
    %c0_i32_0 = arith.constant 0 : i32
    return %arg0, %c0_i32 : i32, i32
  }
}

module attributes {stable_mosaic.version = 11 : i64} {
  func.func @_gemm_kernel(%arg0: i32, %arg1: memref<16x2048xbf16, #tpu.memory_space<vmem>>, %arg2: memref<2048x128xbf16, #tpu.memory_space<vmem>>, %arg3: memref<1x128xf32, #tpu.memory_space<vmem>>, %arg4: memref<16x128xbf16, #tpu.memory_space<vmem>>) attributes {dimension_semantics = [#tpu.dimension_semantics<parallel>], iteration_bounds = array<i64: 1>, scalar_prefetch = 0 : i64, scratch_operands = 0 : i64, tpu.core_type = #tpu.core_type<tc>, window_params = [{transform_indices = @transform_0, window_bounds = array<i64: 16, 2048>}, {pipeline_mode = #tpu.pipeline_mode<synchronous>, transform_indices = @transform_1, window_bounds = array<i64: 2048, 128>}, {pipeline_mode = #tpu.pipeline_mode<synchronous>, transform_indices = @transform_2, window_bounds = array<i64: 1, 128>}, {transform_indices = @transform_3, window_bounds = array<i64: 16, 128>}]} {
    %c0 = arith.constant 0 : index
    %c0_0 = arith.constant 0 : index
    %0 = vector.load %arg1[%c0, %c0_0] : memref<16x2048xbf16, #tpu.memory_space<vmem>>, vector<16x2048xbf16>
    %c0_1 = arith.constant 0 : index
    %c0_2 = arith.constant 0 : index
    %1 = vector.load %arg2[%c0_1, %c0_2] : memref<2048x128xbf16, #tpu.memory_space<vmem>>, vector<2048x128xbf16>
    %cst = arith.constant dense<0.000000e+00> : vector<16x128xf32>
    %2 = tpu.matmul %0, %1, %cst {dimension_numbers = #tpu.dot_dimension_numbers<[1], [0], [0], [1], [0, 0, 1, 1], [], []>} : vector<16x2048xbf16>, vector<2048x128xbf16>, vector<16x128xf32> -> vector<16x128xf32>
    %c0_3 = arith.constant 0 : index
    %c0_4 = arith.constant 0 : index
    %3 = vector.load %arg3[%c0_3, %c0_4] : memref<1x128xf32, #tpu.memory_space<vmem>>, vector<1x128xf32>
    %4 = vector.broadcast %3 : vector<1x128xf32> to vector<16x128xf32>
    %5 = arith.addf %2, %4 : vector<16x128xf32>
    %cst_5 = arith.constant 0.000000e+00 : f32
    %6 = vector.broadcast %cst_5 : f32 to vector<16x128xf32>
    %7 = arith.maximumf %5, %6 : vector<16x128xf32>
    %8 = arith.truncf %7 : vector<16x128xf32> to vector<16x128xbf16>
    %c0_6 = arith.constant 0 : index
    %c0_7 = arith.constant 0 : index
    %9 = vector.load %arg4[%c0_6, %c0_7] : memref<16x128xbf16, #tpu.memory_space<vmem>>, vector<16x128xbf16>
    tpu.vector_store %arg4[%c0_6, %c0_7], %8 {strides = array<i32>} : memref<16x128xbf16, #tpu.memory_space<vmem>>, vector<16x128xbf16>,
    return
  }
  func.func @transform_0(%arg0: i32) -> (i32, i32) {
    %c0_i32 = arith.constant 0 : i32
    %c0_i32_0 = arith.constant 0 : i32
    return %arg0, %c0_i32 : i32, i32
  }
  func.func @transform_1(%arg0: i32) -> (i32, i32) {
    %c0_i32 = arith.constant 0 : i32
    %c0_i32_0 = arith.constant 0 : i32
    %c0_i32_1 = arith.constant 0 : i32
    return %c0_i32, %c0_i32_0 : i32, i32
  }
  func.func @transform_2(%arg0: i32) -> (i32, i32) {
    %c0_i32 = arith.constant 0 : i32
    %c0_i32_0 = arith.constant 0 : i32
    %c0_i32_1 = arith.constant 0 : i32
    return %c0_i32, %c0_i32_0 : i32, i32
  }
  func.func @transform_3(%arg0: i32) -> (i32, i32) {
    %c0_i32 = arith.constant 0 : i32
    %c0_i32_0 = arith.constant 0 : i32
    return %arg0, %c0_i32 : i32, i32
  }
}

module attributes {stable_mosaic.version = 11 : i64} {
  func.func @_fc_head_kernel(%arg0: memref<2x1024xbf16, #tpu.memory_space<vmem>>, %arg1: memref<2x5xf32, #tpu.memory_space<vmem>>, %arg2: memref<1024x128xbf16, #tpu.memory_space<vmem>>, %arg3: memref<1x128xf32, #tpu.memory_space<vmem>>, %arg4: memref<128x5xf32, #tpu.memory_space<vmem>>, %arg5: memref<1x5xf32, #tpu.memory_space<vmem>>, %arg6: memref<128x5xf32, #tpu.memory_space<vmem>>, %arg7: memref<1x5xf32, #tpu.memory_space<vmem>>, %arg8: memref<5x128xf32, #tpu.memory_space<vmem>>, %arg9: memref<1x128xf32, #tpu.memory_space<vmem>>, %arg10: memref<128x1024xbf16, #tpu.memory_space<vmem>>, %arg11: memref<1x1024xf32, #tpu.memory_space<vmem>>, %arg12: memref<2x5xf32, #tpu.memory_space<vmem>>, %arg13: memref<2x5xf32, #tpu.memory_space<vmem>>, %arg14: memref<2x1024xbf16, #tpu.memory_space<vmem>>) attributes {dimension_semantics = [], scalar_prefetch = 0 : i64, scratch_operands = 0 : i64, tpu.core_type = #tpu.core_type<tc>} {
    %c0 = arith.constant 0 : index
    %c0_0 = arith.constant 0 : index
    %0 = vector.load %arg0[%c0, %c0_0] : memref<2x1024xbf16, #tpu.memory_space<vmem>>, vector<2x1024xbf16>
    %c0_1 = arith.constant 0 : index
    %c0_2 = arith.constant 0 : index
    %1 = vector.load %arg2[%c0_1, %c0_2] : memref<1024x128xbf16, #tpu.memory_space<vmem>>, vector<1024x128xbf16>
    %cst = arith.constant dense<0.000000e+00> : vector<2x128xf32>
    %2 = tpu.matmul %0, %1, %cst {dimension_numbers = #tpu.dot_dimension_numbers<[1], [0], [0], [1], [0, 0, 1, 1], [], []>} : vector<2x1024xbf16>, vector<1024x128xbf16>, vector<2x128xf32> -> vector<2x128xf32>
    %c0_3 = arith.constant 0 : index
    %c0_4 = arith.constant 0 : index
    %3 = vector.load %arg3[%c0_3, %c0_4] : memref<1x128xf32, #tpu.memory_space<vmem>>, vector<1x128xf32>
    %4 = vector.broadcast %3 : vector<1x128xf32> to vector<2x128xf32>
    %5 = arith.addf %2, %4 : vector<2x128xf32>
    %cst_5 = arith.constant 0.000000e+00 : f32
    %6 = vector.broadcast %cst_5 : f32 to vector<2x128xf32>
    %7 = arith.maximumf %5, %6 : vector<2x128xf32>
    %c0_6 = arith.constant 0 : index
    %c0_7 = arith.constant 0 : index
    %8 = vector.load %arg4[%c0_6, %c0_7] : memref<128x5xf32, #tpu.memory_space<vmem>>, vector<128x5xf32>
    %cst_8 = arith.constant dense<0.000000e+00> : vector<2x5xf32>
    %9 = tpu.matmul %7, %8, %cst_8 {dimension_numbers = #tpu.dot_dimension_numbers<[1], [0], [0], [1], [0, 0, 1, 1], [], []>} : vector<2x128xf32>, vector<128x5xf32>, vector<2x5xf32> -> vector<2x5xf32>
    %c0_9 = arith.constant 0 : index
    %c0_10 = arith.constant 0 : index
    %10 = vector.load %arg5[%c0_9, %c0_10] : memref<1x5xf32, #tpu.memory_space<vmem>>, vector<1x5xf32>
    %11 = vector.broadcast %10 : vector<1x5xf32> to vector<2x5xf32>
    %12 = arith.addf %9, %11 : vector<2x5xf32>
    %c0_11 = arith.constant 0 : index
    %c0_12 = arith.constant 0 : index
    %13 = vector.load %arg6[%c0_11, %c0_12] : memref<128x5xf32, #tpu.memory_space<vmem>>, vector<128x5xf32>
    %cst_13 = arith.constant dense<0.000000e+00> : vector<2x5xf32>
    %14 = tpu.matmul %7, %13, %cst_13 {dimension_numbers = #tpu.dot_dimension_numbers<[1], [0], [0], [1], [0, 0, 1, 1], [], []>} : vector<2x128xf32>, vector<128x5xf32>, vector<2x5xf32> -> vector<2x5xf32>
    %c0_14 = arith.constant 0 : index
    %c0_15 = arith.constant 0 : index
    %15 = vector.load %arg7[%c0_14, %c0_15] : memref<1x5xf32, #tpu.memory_space<vmem>>, vector<1x5xf32>
    %16 = vector.broadcast %15 : vector<1x5xf32> to vector<2x5xf32>
    %17 = arith.addf %14, %16 : vector<2x5xf32>
    %cst_16 = arith.constant 5.000000e-01 : f32
    %18 = vector.broadcast %cst_16 : f32 to vector<2x5xf32>
    %19 = arith.mulf %18, %17 : vector<2x5xf32>
    %20 = math.exp %19 : vector<2x5xf32>
    %c0_17 = arith.constant 0 : index
    %c0_18 = arith.constant 0 : index
    %21 = vector.load %arg1[%c0_17, %c0_18] : memref<2x5xf32, #tpu.memory_space<vmem>>, vector<2x5xf32>
    %22 = arith.mulf %20, %21 : vector<2x5xf32>
    %23 = arith.addf %12, %22 : vector<2x5xf32>
    %c0_19 = arith.constant 0 : index
    %c0_20 = arith.constant 0 : index
    %24 = vector.load %arg8[%c0_19, %c0_20] : memref<5x128xf32, #tpu.memory_space<vmem>>, vector<5x128xf32>
    %cst_21 = arith.constant dense<0.000000e+00> : vector<2x128xf32>
    %25 = tpu.matmul %23, %24, %cst_21 {dimension_numbers = #tpu.dot_dimension_numbers<[1], [0], [0], [1], [0, 0, 1, 1], [], []>} : vector<2x5xf32>, vector<5x128xf32>, vector<2x128xf32> -> vector<2x128xf32>
    %c0_22 = arith.constant 0 : index
    %c0_23 = arith.constant 0 : index
    %26 = vector.load %arg9[%c0_22, %c0_23] : memref<1x128xf32, #tpu.memory_space<vmem>>, vector<1x128xf32>
    %27 = vector.broadcast %26 : vector<1x128xf32> to vector<2x128xf32>
    %28 = arith.addf %25, %27 : vector<2x128xf32>
    %cst_24 = arith.constant 0.000000e+00 : f32
    %29 = vector.broadcast %cst_24 : f32 to vector<2x128xf32>
    %30 = arith.maximumf %28, %29 : vector<2x128xf32>
    %31 = arith.truncf %30 : vector<2x128xf32> to vector<2x128xbf16>
    %c0_25 = arith.constant 0 : index
    %c0_26 = arith.constant 0 : index
    %32 = vector.load %arg10[%c0_25, %c0_26] : memref<128x1024xbf16, #tpu.memory_space<vmem>>, vector<128x1024xbf16>
    %cst_27 = arith.constant dense<0.000000e+00> : vector<2x1024xf32>
    %33 = tpu.matmul %31, %32, %cst_27 {dimension_numbers = #tpu.dot_dimension_numbers<[1], [0], [0], [1], [0, 0, 1, 1], [], []>} : vector<2x128xbf16>, vector<128x1024xbf16>, vector<2x1024xf32> -> vector<2x1024xf32>
    %c0_28 = arith.constant 0 : index
    %c0_29 = arith.constant 0 : index
    %34 = vector.load %arg11[%c0_28, %c0_29] : memref<1x1024xf32, #tpu.memory_space<vmem>>, vector<1x1024xf32>
    %35 = vector.broadcast %34 : vector<1x1024xf32> to vector<2x1024xf32>
    %36 = arith.addf %33, %35 : vector<2x1024xf32>
    %cst_30 = arith.constant 0.000000e+00 : f32
    %37 = vector.broadcast %cst_30 : f32 to vector<2x1024xf32>
    %38 = arith.maximumf %36, %37 : vector<2x1024xf32>
    %c0_31 = arith.constant 0 : index
    %c0_32 = arith.constant 0 : index
    %39 = vector.load %arg12[%c0_31, %c0_32] : memref<2x5xf32, #tpu.memory_space<vmem>>, vector<2x5xf32>
    tpu.vector_store %arg12[%c0_31, %c0_32], %12 {strides = array<i32>} : memref<2x5xf32, #tpu.memory_space<vmem>>, vector<2x5xf32>,
    %c0_33 = arith.constant 0 : index
    %c0_34 = arith.constant 0 : index
    %40 = vector.load %arg13[%c0_33, %c0_34] : memref<2x5xf32, #tpu.memory_space<vmem>>, vector<2x5xf32>
    tpu.vector_store %arg13[%c0_33, %c0_34], %17 {strides = array<i32>} : memref<2x5xf32, #tpu.memory_space<vmem>>, vector<2x5xf32>,
    %41 = arith.truncf %38 : vector<2x1024xf32> to vector<2x1024xbf16>
    %c0_35 = arith.constant 0 : index
    %c0_36 = arith.constant 0 : index
    %42 = vector.load %arg14[%c0_35, %c0_36] : memref<2x1024xbf16, #tpu.memory_space<vmem>>, vector<2x1024xbf16>
    tpu.vector_store %arg14[%c0_35, %c0_36], %41 {strides = array<i32>} : memref<2x1024xbf16, #tpu.memory_space<vmem>>, vector<2x1024xbf16>,
    return
  }
}

module attributes {stable_mosaic.version = 11 : i64} {
  func.func @_gemm_kernel(%arg0: i32, %arg1: memref<16x128xbf16, #tpu.memory_space<vmem>>, %arg2: memref<128x2048xbf16, #tpu.memory_space<vmem>>, %arg3: memref<16x2048xbf16, #tpu.memory_space<vmem>>) attributes {dimension_semantics = [#tpu.dimension_semantics<parallel>], iteration_bounds = array<i64: 1>, scalar_prefetch = 0 : i64, scratch_operands = 0 : i64, tpu.core_type = #tpu.core_type<tc>, window_params = [{transform_indices = @transform_0, window_bounds = array<i64: 16, 128>}, {pipeline_mode = #tpu.pipeline_mode<synchronous>, transform_indices = @transform_1, window_bounds = array<i64: 128, 2048>}, {transform_indices = @transform_2, window_bounds = array<i64: 16, 2048>}]} {
    %c0 = arith.constant 0 : index
    %c0_0 = arith.constant 0 : index
    %0 = vector.load %arg1[%c0, %c0_0] : memref<16x128xbf16, #tpu.memory_space<vmem>>, vector<16x128xbf16>
    %c0_1 = arith.constant 0 : index
    %c0_2 = arith.constant 0 : index
    %1 = vector.load %arg2[%c0_1, %c0_2] : memref<128x2048xbf16, #tpu.memory_space<vmem>>, vector<128x2048xbf16>
    %cst = arith.constant dense<0.000000e+00> : vector<16x2048xf32>
    %2 = tpu.matmul %0, %1, %cst {dimension_numbers = #tpu.dot_dimension_numbers<[1], [0], [0], [1], [0, 0, 1, 1], [], []>} : vector<16x128xbf16>, vector<128x2048xbf16>, vector<16x2048xf32> -> vector<16x2048xf32>
    %3 = arith.truncf %2 : vector<16x2048xf32> to vector<16x2048xbf16>
    %c0_3 = arith.constant 0 : index
    %c0_4 = arith.constant 0 : index
    %4 = vector.load %arg3[%c0_3, %c0_4] : memref<16x2048xbf16, #tpu.memory_space<vmem>>, vector<16x2048xbf16>
    tpu.vector_store %arg3[%c0_3, %c0_4], %3 {strides = array<i32>} : memref<16x2048xbf16, #tpu.memory_space<vmem>>, vector<16x2048xbf16>,
    return
  }
  func.func @transform_0(%arg0: i32) -> (i32, i32) {
    %c0_i32 = arith.constant 0 : i32
    %c0_i32_0 = arith.constant 0 : i32
    return %arg0, %c0_i32 : i32, i32
  }
  func.func @transform_1(%arg0: i32) -> (i32, i32) {
    %c0_i32 = arith.constant 0 : i32
    %c0_i32_0 = arith.constant 0 : i32
    %c0_i32_1 = arith.constant 0 : i32
    return %c0_i32, %c0_i32_0 : i32, i32
  }
  func.func @transform_2(%arg0: i32) -> (i32, i32) {
    %c0_i32 = arith.constant 0 : i32
    %c0_i32_0 = arith.constant 0 : i32
    return %arg0, %c0_i32 : i32, i32
  }
}

module attributes {stable_mosaic.version = 11 : i64} {
  func.func @_gemm_kernel(%arg0: i32, %arg1: memref<32x128xbf16, #tpu.memory_space<vmem>>, %arg2: memref<128x1024xbf16, #tpu.memory_space<vmem>>, %arg3: memref<32x1024xbf16, #tpu.memory_space<vmem>>) attributes {dimension_semantics = [#tpu.dimension_semantics<parallel>], iteration_bounds = array<i64: 2>, scalar_prefetch = 0 : i64, scratch_operands = 0 : i64, tpu.core_type = #tpu.core_type<tc>, window_params = [{transform_indices = @transform_0, window_bounds = array<i64: 32, 128>}, {pipeline_mode = #tpu.pipeline_mode<synchronous>, transform_indices = @transform_1, window_bounds = array<i64: 128, 1024>}, {transform_indices = @transform_2, window_bounds = array<i64: 32, 1024>}]} {
    %c0 = arith.constant 0 : index
    %c0_0 = arith.constant 0 : index
    %0 = vector.load %arg1[%c0, %c0_0] : memref<32x128xbf16, #tpu.memory_space<vmem>>, vector<32x128xbf16>
    %c0_1 = arith.constant 0 : index
    %c0_2 = arith.constant 0 : index
    %1 = vector.load %arg2[%c0_1, %c0_2] : memref<128x1024xbf16, #tpu.memory_space<vmem>>, vector<128x1024xbf16>
    %cst = arith.constant dense<0.000000e+00> : vector<32x1024xf32>
    %2 = tpu.matmul %0, %1, %cst {dimension_numbers = #tpu.dot_dimension_numbers<[1], [0], [0], [1], [0, 0, 1, 1], [], []>} : vector<32x128xbf16>, vector<128x1024xbf16>, vector<32x1024xf32> -> vector<32x1024xf32>
    %3 = arith.truncf %2 : vector<32x1024xf32> to vector<32x1024xbf16>
    %c0_3 = arith.constant 0 : index
    %c0_4 = arith.constant 0 : index
    %4 = vector.load %arg3[%c0_3, %c0_4] : memref<32x1024xbf16, #tpu.memory_space<vmem>>, vector<32x1024xbf16>
    tpu.vector_store %arg3[%c0_3, %c0_4], %3 {strides = array<i32>} : memref<32x1024xbf16, #tpu.memory_space<vmem>>, vector<32x1024xbf16>,
    return
  }
  func.func @transform_0(%arg0: i32) -> (i32, i32) {
    %c0_i32 = arith.constant 0 : i32
    %c0_i32_0 = arith.constant 0 : i32
    return %arg0, %c0_i32 : i32, i32
  }
  func.func @transform_1(%arg0: i32) -> (i32, i32) {
    %c0_i32 = arith.constant 0 : i32
    %c0_i32_0 = arith.constant 0 : i32
    %c0_i32_1 = arith.constant 0 : i32
    return %c0_i32, %c0_i32_0 : i32, i32
  }
  func.func @transform_2(%arg0: i32) -> (i32, i32) {
    %c0_i32 = arith.constant 0 : i32
    %c0_i32_0 = arith.constant 0 : i32
    return %arg0, %c0_i32 : i32, i32
  }
}

module attributes {stable_mosaic.version = 11 : i64} {
  func.func @_gemm_kernel(%arg0: i32, %arg1: memref<64x128xbf16, #tpu.memory_space<vmem>>, %arg2: memref<128x2048xbf16, #tpu.memory_space<vmem>>, %arg3: memref<64x2048xbf16, #tpu.memory_space<vmem>>) attributes {dimension_semantics = [#tpu.dimension_semantics<parallel>], iteration_bounds = array<i64: 2>, scalar_prefetch = 0 : i64, scratch_operands = 0 : i64, tpu.core_type = #tpu.core_type<tc>, window_params = [{transform_indices = @transform_0, window_bounds = array<i64: 64, 128>}, {pipeline_mode = #tpu.pipeline_mode<synchronous>, transform_indices = @transform_1, window_bounds = array<i64: 128, 2048>}, {transform_indices = @transform_2, window_bounds = array<i64: 64, 2048>}]} {
    %c0 = arith.constant 0 : index
    %c0_0 = arith.constant 0 : index
    %0 = vector.load %arg1[%c0, %c0_0] : memref<64x128xbf16, #tpu.memory_space<vmem>>, vector<64x128xbf16>
    %c0_1 = arith.constant 0 : index
    %c0_2 = arith.constant 0 : index
    %1 = vector.load %arg2[%c0_1, %c0_2] : memref<128x2048xbf16, #tpu.memory_space<vmem>>, vector<128x2048xbf16>
    %cst = arith.constant dense<0.000000e+00> : vector<64x2048xf32>
    %2 = tpu.matmul %0, %1, %cst {dimension_numbers = #tpu.dot_dimension_numbers<[1], [0], [0], [1], [0, 0, 1, 1], [], []>} : vector<64x128xbf16>, vector<128x2048xbf16>, vector<64x2048xf32> -> vector<64x2048xf32>
    %3 = arith.truncf %2 : vector<64x2048xf32> to vector<64x2048xbf16>
    %c0_3 = arith.constant 0 : index
    %c0_4 = arith.constant 0 : index
    %4 = vector.load %arg3[%c0_3, %c0_4] : memref<64x2048xbf16, #tpu.memory_space<vmem>>, vector<64x2048xbf16>
    tpu.vector_store %arg3[%c0_3, %c0_4], %3 {strides = array<i32>} : memref<64x2048xbf16, #tpu.memory_space<vmem>>, vector<64x2048xbf16>,
    return
  }
  func.func @transform_0(%arg0: i32) -> (i32, i32) {
    %c0_i32 = arith.constant 0 : i32
    %c0_i32_0 = arith.constant 0 : i32
    return %arg0, %c0_i32 : i32, i32
  }
  func.func @transform_1(%arg0: i32) -> (i32, i32) {
    %c0_i32 = arith.constant 0 : i32
    %c0_i32_0 = arith.constant 0 : i32
    %c0_i32_1 = arith.constant 0 : i32
    return %c0_i32, %c0_i32_0 : i32, i32
  }
  func.func @transform_2(%arg0: i32) -> (i32, i32) {
    %c0_i32 = arith.constant 0 : i32
    %c0_i32_0 = arith.constant 0 : i32
    return %arg0, %c0_i32 : i32, i32
  }
}

module attributes {stable_mosaic.version = 11 : i64} {
  func.func @_gemm_kernel(%arg0: i32, %arg1: memref<128x256xbf16, #tpu.memory_space<vmem>>, %arg2: memref<256x128xbf16, #tpu.memory_space<vmem>>, %arg3: memref<128x128xbf16, #tpu.memory_space<vmem>>) attributes {dimension_semantics = [#tpu.dimension_semantics<parallel>], iteration_bounds = array<i64: 2>, scalar_prefetch = 0 : i64, scratch_operands = 0 : i64, tpu.core_type = #tpu.core_type<tc>, window_params = [{transform_indices = @transform_0, window_bounds = array<i64: 128, 256>}, {pipeline_mode = #tpu.pipeline_mode<synchronous>, transform_indices = @transform_1, window_bounds = array<i64: 256, 128>}, {transform_indices = @transform_2, window_bounds = array<i64: 128, 128>}]} {
    %c0 = arith.constant 0 : index
    %c0_0 = arith.constant 0 : index
    %0 = vector.load %arg1[%c0, %c0_0] : memref<128x256xbf16, #tpu.memory_space<vmem>>, vector<128x256xbf16>
    %c0_1 = arith.constant 0 : index
    %c0_2 = arith.constant 0 : index
    %1 = vector.load %arg2[%c0_1, %c0_2] : memref<256x128xbf16, #tpu.memory_space<vmem>>, vector<256x128xbf16>
    %cst = arith.constant dense<0.000000e+00> : vector<128x128xf32>
    %2 = tpu.matmul %0, %1, %cst {dimension_numbers = #tpu.dot_dimension_numbers<[1], [0], [0], [1], [0, 0, 1, 1], [], []>} : vector<128x256xbf16>, vector<256x128xbf16>, vector<128x128xf32> -> vector<128x128xf32>
    %3 = arith.truncf %2 : vector<128x128xf32> to vector<128x128xbf16>
    %c0_3 = arith.constant 0 : index
    %c0_4 = arith.constant 0 : index
    %4 = vector.load %arg3[%c0_3, %c0_4] : memref<128x128xbf16, #tpu.memory_space<vmem>>, vector<128x128xbf16>
    tpu.vector_store %arg3[%c0_3, %c0_4], %3 {strides = array<i32>} : memref<128x128xbf16, #tpu.memory_space<vmem>>, vector<128x128xbf16>,
    return
  }
  func.func @transform_0(%arg0: i32) -> (i32, i32) {
    %c0_i32 = arith.constant 0 : i32
    %c0_i32_0 = arith.constant 0 : i32
    return %arg0, %c0_i32 : i32, i32
  }
  func.func @transform_1(%arg0: i32) -> (i32, i32) {
    %c0_i32 = arith.constant 0 : i32
    %c0_i32_0 = arith.constant 0 : i32
    %c0_i32_1 = arith.constant 0 : i32
    return %c0_i32, %c0_i32_0 : i32, i32
  }
  func.func @transform_2(%arg0: i32) -> (i32, i32) {
    %c0_i32 = arith.constant 0 : i32
    %c0_i32_0 = arith.constant 0 : i32
    return %arg0, %c0_i32 : i32, i32
  }
}

</mosaic_0001>

<bundles_post_ra>
// kernel: vae_conceptizer_forward.9
= control target key start
LH: loop header
LB: loop body
LE: loop exit
PB: predicated region body
PF: predicated region fallthrough
CT: control target
= control target key end

     0   :  { %s1386_s12 = smov 0   ;;  %s1902_s0 = inlined_call_operand.vmem [shape: bf16[128,256], index: 0, kind: input, shape index: {}]   ;;  %s1903_s1 = inlined_call_operand.vmem [shape: bf16[256,512], index: 1, kind: input, shape index: {}]   ;;  %s1904_s2 = inlined_call_operand.vmem [shape: f32[1,512], index: 2, kind: input, shape index: {}]   ;;  %s1905_s3 = inlined_call_operand.vmem [shape: bf16[128,512], index: 3, kind: output, shape index: {}]  }
   0x1 LB: > { %s975_s13 = sadd.s32 4294967295, %s1364_s12   ;;  %p979_p0 = scmp.ge.s32.totalorder %s1364_s12, 1  ;;  %s1364_s12 = sphi %s1386_s12, %s13_s12  }
   0x2   : > { %p139_p1 = scmp.lt.s32.totalorder %s1364_s12, 3 }
   0x4   : > { %p140_p2 = pnand %p979_p0, %p139_p1 }
   0x5   : > { %s980_s22 = sshll.u32 (!%p140_p2), %s975_s13, 3 }
   0x6   : > { %143 = sbr.rel (%p140_p2) target bundleno = 307 (0x133), region = 32  ;;  %p166_p3 = scmp.lt.s32.totalorder (!%p140_p2), %s980_s22, 15 }
   0xb   : > { %v1132_v0 = vld [vmem:[%s1903_s1 + $0xe0] sm:$0xf]  ;;  %v1316_v1 = vld [vmem:[%s1903_s1 + $0xec] sm:$0xf0]  ;;  %v1314_v5 = vld [vmem:[%s1903_s1 + $0xe4] sm:$0xf] }
   0xc   : > { %v1260_v2 = vld [vmem:[%s1903_s1 + $0x1e0] sm:$0xf]  ;;  %v1133_v3 = vor.u32 %v1316_v1, %v1132_v0  ;;  %v1348_v4 = vld [vmem:[%s1903_s1 + $0x1ec] sm:$0xf0]  ;;  %v1134_v6 = vld [vmem:[%s1903_s1 + $0xf0] sm:$0xf0] }
   0xd   : > { %v1261_v7 = vor.u32 %v1348_v4, %v1260_v2  ;;  %v1137_v8 = vor.u32 %v1314_v5, %v1134_v6  ;;  %v1346_v9 = vld [vmem:[%s1903_s1 + $0x1e4] sm:$0xf]  ;;  %v1262_v10 = vld [vmem:[%s1903_s1 + $0x1f0] sm:$0xf0]  ;;  %v1116_v11 = vld [vmem:[%s1903_s1 + $0xc0] sm:$0xf] }
   0xe   : > { %621 = vmatpush.bf16.msra.mxu0 %v1133_v3  ;;  %v1265_v12 = vor.u32 %v1346_v9, %v1262_v10  ;;  %v1312_v13 = vld [vmem:[%s1903_s1 + $0xcc] sm:$0xf0]  ;;  %v1244_v14 = vld [vmem:[%s1903_s1 + $0x1c0] sm:$0xf]  ;;  %v1310_v18 = vld [vmem:[%s1903_s1 + $0xc4] sm:$0xf] }
   0xf   : > { %v1344_v15 = vld [vmem:[%s1903_s1 + $0x1cc] sm:$0xf0]  ;;  %650 = vmatpush.bf16.msra.mxu1 %v1261_v7  ;;  %679 = vmatpush.bf16.msra.mxu2 %v1137_v8  ;;  %v1117_v16 = vor.u32 %v1312_v13, %v1116_v11  ;;  %v1118_v19 = vld [vmem:[%s1903_s1 + $0xd0] sm:$0xf0]  ;;  %v1342_v20 = vld [vmem:[%s1903_s1 + $0x1c4] sm:$0xf] }
  0x10   : > { %v1245_v17 = vor.u32 %v1344_v15, %v1244_v14  ;;  %708 = vmatpush.bf16.msra.mxu3 %v1265_v12  ;;  %v1121_v21 = vor.u32 %v1310_v18, %v1118_v19  ;;  %v1246_v22 = vld [vmem:[%s1903_s1 + $0x1d0] sm:$0xf0]  ;;  %v1100_v23 = vld [vmem:[%s1903_s1 + $0xa0] sm:$0xf]  ;;  %v1308_v24 = vld [vmem:[%s1903_s1 + $0xac] sm:$0xf0] }
  0x11   : > { %v1249_v25 = vor.u32 %v1342_v20, %v1246_v22  ;;  %v1228_v26 = vld [vmem:[%s1903_s1 + $0x1a0] sm:$0xf]  ;;  %v1340_v27 = vld [vmem:[%s1903_s1 + $0x1ac] sm:$0xf0]  ;;  %v1306_v28 = vld [vmem:[%s1903_s1 + $0xa4] sm:$0xf]  ;;  %v1101_v29 = vor.u32 %v1308_v24, %v1100_v23 }
  0x12   : > { %622 = vmatpush.bf16.msra.mxu0 %v1117_v16  ;;  %v1102_v30 = vld [vmem:[%s1903_s1 + $0xb0] sm:$0xf0]  ;;  %v1338_v31 = vld [vmem:[%s1903_s1 + $0x1a4] sm:$0xf]  ;;  %v1229_v33 = vor.u32 %v1340_v27, %v1228_v26  ;;  %v1084_v35 = vld [vmem:[%s1903_s1 + $0x80] sm:$0xf] }
  0x13   : > { %v1230_v32 = vld [vmem:[%s1903_s1 + $0x1b0] sm:$0xf0]  ;;  %651 = vmatpush.bf16.msra.mxu1 %v1245_v17  ;;  %680 = vmatpush.bf16.msra.mxu2 %v1121_v21  ;;  %v1105_v34 = vor.u32 %v1306_v28, %v1102_v30  ;;  %v1304_v36 = vld [vmem:[%s1903_s1 + $0x8c] sm:$0xf0]  ;;  %v1212_v37 = vld [vmem:[%s1903_s1 + $0x180] sm:$0xf] }
  0x14   : > { %709 = vmatpush.bf16.msra.mxu3 %v1249_v25  ;;  %v1233_v38 = vor.u32 %v1338_v31, %v1230_v32  ;;  %v1336_v39 = vld [vmem:[%s1903_s1 + $0x18c] sm:$0xf0]  ;;  %v1302_v40 = vld [vmem:[%s1903_s1 + $0x84] sm:$0xf]  ;;  %v1086_v41 = vld [vmem:[%s1903_s1 + $0x90] sm:$0xf0]  ;;  %v1085_v44 = vor.u32 %v1304_v36, %v1084_v35 }
  0x15   : > { %v1334_v42 = vld [vmem:[%s1903_s1 + $0x184] sm:$0xf]  ;;  %v1214_v43 = vld [vmem:[%s1903_s1 + $0x190] sm:$0xf0]  ;;  %v1213_v45 = vor.u32 %v1336_v39, %v1212_v37  ;;  %v1089_v46 = vor.u32 %v1302_v40, %v1086_v41  ;;  %v1068_v47 = vld [vmem:[%s1903_s1 + $0x60] sm:$0xf] }
  0x16   : > { %623 = vmatpush.bf16.msra.mxu0 %v1101_v29  ;;  %v1300_v48 = vld [vmem:[%s1903_s1 + $0x6c] sm:$0xf0]  ;;  %v1196_v49 = vld [vmem:[%s1903_s1 + $0x160] sm:$0xf]  ;;  %v1217_v50 = vor.u32 %v1334_v42, %v1214_v43  ;;  %v1298_v52 = vld [vmem:[%s1903_s1 + $0x64] sm:$0xf] }
  0x17   : > { %652 = vmatpush.bf16.msra.mxu1 %v1229_v33  ;;  %681 = vmatpush.bf16.msra.mxu2 %v1105_v34  ;;  %v1332_v51 = vld [vmem:[%s1903_s1 + $0x16c] sm:$0xf0]  ;;  %v1070_v53 = vld [vmem:[%s1903_s1 + $0x70] sm:$0xf0]  ;;  %v1330_v54 = vld [vmem:[%s1903_s1 + $0x164] sm:$0xf]  ;;  %v1069_v56 = vor.u32 %v1300_v48, %v1068_v47 }
  0x18   : > { %710 = vmatpush.bf16.msra.mxu3 %v1233_v38  ;;  %v1198_v55 = vld [vmem:[%s1903_s1 + $0x170] sm:$0xf0]  ;;  %v1197_v57 = vor.u32 %v1332_v51, %v1196_v49  ;;  %v1073_v58 = vor.u32 %v1298_v52, %v1070_v53  ;;  %v1052_v59 = vld [vmem:[%s1903_s1 + $0x40] sm:$0xf]  ;;  %v1296_v60 = vld [vmem:[%s1903_s1 + $0x4c] sm:$0xf0] }
  0x19   : > { %v1180_v61 = vld [vmem:[%s1903_s1 + $0x140] sm:$0xf]  ;;  %v1201_v62 = vor.u32 %v1330_v54, %v1198_v55  ;;  %v1328_v63 = vld [vmem:[%s1903_s1 + $0x14c] sm:$0xf0]  ;;  %v1294_v0 = vld [vmem:[%s1903_s1 + $0x44] sm:$0xf]  ;;  %v1053_v4 = vor.u32 %v1296_v60, %v1052_v59 }
  0x1a   : > { %624 = vmatpush.bf16.msra.mxu0 %v1085_v44  ;;  %v1054_v1 = vld [vmem:[%s1903_s1 + $0x50] sm:$0xf0]  ;;  %v1326_v2 = vld [vmem:[%s1903_s1 + $0x144] sm:$0xf]  ;;  %v1036_v5 = vld [vmem:[%s1903_s1 + $0x20] sm:$0xf]  ;;  %v1181_v6 = vor.u32 %v1328_v63, %v1180_v61 }
  0x1b   : > { %653 = vmatpush.bf16.msra.mxu1 %v1213_v45  ;;  %682 = vmatpush.bf16.msra.mxu2 %v1089_v46  ;;  %v1182_v3 = vld [vmem:[%s1903_s1 + $0x150] sm:$0xf0]  ;;  %v1057_v7 = vor.u32 %v1294_v0, %v1054_v1  ;;  %v1292_v8 = vld [vmem:[%s1903_s1 + $0x2c] sm:$0xf0]  ;;  %v1164_v9 = vld [vmem:[%s1903_s1 + $0x120] sm:$0xf] }
  0x1c   : > { %711 = vmatpush.bf16.msra.mxu3 %v1217_v50  ;;  %v1324_v10 = vld [vmem:[%s1903_s1 + $0x12c] sm:$0xf0]  ;;  %v1185_v11 = vor.u32 %v1326_v2, %v1182_v3  ;;  %v1290_v12 = vld [vmem:[%s1903_s1 + $0x24] sm:$0xf]  ;;  %v1038_v13 = vld [vmem:[%s1903_s1 + $0x30] sm:$0xf0]  ;;  %v1037_v16 = vor.u32 %v1292_v8, %v1036_v5 }
  0x1d   : > { %v1322_v14 = vld [vmem:[%s1903_s1 + $0x124] sm:$0xf]  ;;  %v1166_v15 = vld [vmem:[%s1903_s1 + $0x130] sm:$0xf0]  ;;  %v1020_v17 = vld [vmem:[%s1903_s1] sm:$0xf]  ;;  %v1165_v20 = vor.u32 %v1324_v10, %v1164_v9  ;;  %v1041_v21 = vor.u32 %v1290_v12, %v1038_v13 }
  0x1e   : > { %625 = vmatpush.bf16.msra.mxu0 %v1069_v56  ;;  %v1288_v18 = vld [vmem:[%s1903_s1 + $0xc] sm:$0xf0]  ;;  %v1148_v19 = vld [vmem:[%s1903_s1 + $0x100] sm:$0xf]  ;;  %v1286_v23 = vld [vmem:[%s1903_s1 + $0x4] sm:$0xf]  ;;  %v1169_v24 = vor.u32 %v1322_v14, %v1166_v15 }
  0x1f   : > { %654 = vmatpush.bf16.msra.mxu1 %v1197_v57  ;;  %683 = vmatpush.bf16.msra.mxu2 %v1073_v58  ;;  %v1320_v22 = vld [vmem:[%s1903_s1 + $0x10c] sm:$0xf0]  ;;  %s1907_s22 = smov (!%p166_p3, %s980_s22), 15  ;;  %v1022_v25 = vld [vmem:[%s1903_s1 + $0x10] sm:$0xf0]  ;;  %v1021_v30 = vor.u32 %v1288_v18, %v1020_v17 }
  0x20   : > { %712 = vmatpush.bf16.msra.mxu3 %v1201_v62  ;;  %v1318_v26 = vld [vmem:[%s1903_s1 + $0x104] sm:$0xf]  ;;  %v1150_v27 = vld [vmem:[%s1903_s1 + $0x110] sm:$0xf0]  ;;  %s1276_s17 = sshll.u32 %s1907_s22, 3  ;;  %v1149_v34 = vor.u32 %v1320_v22, %v1148_v19  ;;  %v1025_v35 = vor.u32 %v1286_v23, %v1022_v25  ;;  %s1277_s13 = sshll.u32 %s1907_s22, 4 }
  0x21   : > { %v1315_v28 = vld [vmem:[%s1903_s1 + $0xec] sm:$0xf]  ;;  %v1142_v29 = vld [vmem:[%s1903_s1 + $0xf8] sm:$0xf0]  ;;  %s1600_s25 = scalar_lea.vmem %s1902_s0, %s1276_s17  ;;  %v1140_v33 = vld [vmem:[%s1903_s1 + $0xe8] sm:$0xf]  ;;  %v1153_v39 = vor.u32 %v1318_v26, %v1150_v27  ;;  %s1846_s6 = scalar_lea.vmem %s1905_s3, %s1277_s13 }
  0x22   : > { %626 = vmatpush.bf16.msra.mxu0 %v1053_v4  ;;  %v1347_v31 = vld [vmem:[%s1903_s1 + $0x1ec] sm:$0xf]  ;;  %v1270_v32 = vld [vmem:[%s1903_s1 + $0x1f8] sm:$0xf0]  ;;  %v988_v36 = vld [vmem:[%s1600_s25] sm:$0xf]  ;;  %v1145_v41 = vor.u32 %v1315_v28, %v1142_v29 }
  0x23   : > { %655 = vmatpush.bf16.msra.mxu1 %v1181_v6  ;;  %684 = vmatpush.bf16.msra.mxu2 %v1057_v7  ;;  %v1279_v37 = vld [vmem:[%s1600_s25 + $0x4] sm:$0xf0]  ;;  %v1278_v38 = vld [vmem:[%s1600_s25 + $0x4] sm:$0xf]  ;;  %v990_v40 = vld [vmem:[%s1600_s25 + $0x8] sm:$0xf0]  ;;  %v1273_v45 = vor.u32 %v1347_v31, %v1270_v32 }
  0x24   : > { %713 = vmatpush.bf16.msra.mxu3 %v1185_v11  ;;  %v1317_v42 = vld [vmem:[%s1903_s1 + $0xf4] sm:$0xf0]  ;;  %v1268_v43 = vld [vmem:[%s1903_s1 + $0x1e8] sm:$0xf]  ;;  %v1621_v44 = vor.u32 %v1279_v37, %v988_v36  ;;  %v1311_v47 = vld [vmem:[%s1903_s1 + $0xcc] sm:$0xf]  ;;  %v1632_v49 = vor.u32 %v1278_v38, %v990_v40 }
  0x25   : > { %v1349_v46 = vld [vmem:[%s1903_s1 + $0x1f4] sm:$0xf0]  ;;  %v1126_v48 = vld [vmem:[%s1903_s1 + $0xd8] sm:$0xf0]  ;;  %v1343_v50 = vld [vmem:[%s1903_s1 + $0x1cc] sm:$0xf]  ;;  %v1141_v52 = vor.u32 %v1317_v42, %v1140_v33 }
  0x26   : > { %627 = vmatpush.bf16.msra.mxu0 %v1037_v16  ;;  %v1254_v51 = vld [vmem:[%s1903_s1 + $0x1d8] sm:$0xf0]  ;;  %v1269_v53 = vor.u32 %v1349_v46, %v1268_v43  ;;  %v1129_v54 = vor.u32 %v1311_v47, %v1126_v48  ;;  %v1124_v55 = vld [vmem:[%s1903_s1 + $0xc8] sm:$0xf]  ;;  %v1313_v56 = vld [vmem:[%s1903_s1 + $0xd4] sm:$0xf0] }
  0x27   : > { %656 = vmatpush.bf16.msra.mxu1 %v1165_v20  ;;  %685 = vmatpush.bf16.msra.mxu2 %v1041_v21  ;;  %v1252_v57 = vld [vmem:[%s1903_s1 + $0x1c8] sm:$0xf]  ;;  %v1257_v58 = vor.u32 %v1343_v50, %v1254_v51  ;;  %v1345_v59 = vld [vmem:[%s1903_s1 + $0x1d4] sm:$0xf0]  ;;  %v1307_v60 = vld [vmem:[%s1903_s1 + $0xac] sm:$0xf]  ;;  %v1125_v0 = vor.u32 %v1313_v56, %v1124_v55 }
  0x28   : > { %714 = vmatpush.bf16.msra.mxu3 %v1169_v24  ;;  %v1110_v61 = vld [vmem:[%s1903_s1 + $0xb8] sm:$0xf0]  ;;  %v1339_v62 = vld [vmem:[%s1903_s1 + $0x1ac] sm:$0xf]  ;;  %v1253_v1 = vor.u32 %v1345_v59, %v1252_v57  ;;  %v1108_v3 = vld [vmem:[%s1903_s1 + $0xa8] sm:$0xf] }
  0x29   : > { %v1238_v63 = vld [vmem:[%s1903_s1 + $0x1b8] sm:$0xf0]  ;;  %v1113_v2 = vor.u32 %v1307_v60, %v1110_v61  ;;  %v1309_v4 = vld [vmem:[%s1903_s1 + $0xb4] sm:$0xf0]  ;;  %v1236_v5 = vld [vmem:[%s1903_s1 + $0x1a8] sm:$0xf] }
  0x2a   : > { %628 = vmatpush.bf16.msra.mxu0 %v1021_v30  ;;  %v1241_v6 = vor.u32 %v1339_v62, %v1238_v63  ;;  %v1341_v7 = vld [vmem:[%s1903_s1 + $0x1b4] sm:$0xf0]  ;;  %v1303_v8 = vld [vmem:[%s1903_s1 + $0x8c] sm:$0xf]  ;;  %v1094_v9 = vld [vmem:[%s1903_s1 + $0x98] sm:$0xf0]  ;;  %v1109_v12 = vor.u32 %v1309_v4, %v1108_v3 }
  0x2b   : > { %657 = vmatpush.bf16.msra.mxu1 %v1149_v34  ;;  %686 = vmatpush.bf16.msra.mxu2 %v1025_v35  ;;  %v1335_v10 = vld [vmem:[%s1903_s1 + $0x18c] sm:$0xf]  ;;  %v1222_v11 = vld [vmem:[%s1903_s1 + $0x198] sm:$0xf0]  ;;  %v996_v13 = vld [vmem:[%s1600_s25 + $0x10] sm:$0xf]  ;;  %v1237_v14 = vor.u32 %v1341_v7, %v1236_v5  ;;  %v1097_v15 = vor.u32 %v1303_v8, %v1094_v9 }
  0x2c   : > { %715 = vmatpush.bf16.msra.mxu3 %v1153_v39  ;;  %v1092_v16 = vld [vmem:[%s1903_s1 + $0x88] sm:$0xf]  ;;  %v1305_v17 = vld [vmem:[%s1903_s1 + $0x94] sm:$0xf0]  ;;  %v1225_v19 = vor.u32 %v1335_v10, %v1222_v11  ;;  %v1299_v21 = vld [vmem:[%s1903_s1 + $0x6c] sm:$0xf] }
  0x2d   : > { %629 = vmatmul.bf16.vlgmr.msra.gmra.mxu0 %v1621_v44  ;;  %v1220_v18 = vld [vmem:[%s1903_s1 + $0x188] sm:$0xf]  ;;  %v1337_v20 = vld [vmem:[%s1903_s1 + $0x194] sm:$0xf0]  ;;  %v1078_v22 = vld [vmem:[%s1903_s1 + $0x78] sm:$0xf0]  ;;  %v1093_v28 = vor.u32 %v1305_v17, %v1092_v16 }
  0x2e   : > { %658 = vmatmul.bf16.vlgmr.msra.gmra.mxu1 %v1632_v49  ;;  %687 = vmatmul.bf16.vlgmr.msra.gmra.mxu2 %v1621_v44  ;;  %v1281_v23 = vld [vmem:[%s1600_s25 + $0x14] sm:$0xf0]  ;;  %v1331_v24 = vld [vmem:[%s1903_s1 + $0x16c] sm:$0xf]  ;;  %v1206_v25 = vld [vmem:[%s1903_s1 + $0x178] sm:$0xf0]  ;;  %v1221_v29 = vor.u32 %v1337_v20, %v1220_v18  ;;  %v1081_v30 = vor.u32 %v1299_v21, %v1078_v22 }
  0x2f   : > { %795 = vmatpush.bf16.msrb.mxu2 %v1145_v41  ;;  %716 = vmatmul.bf16.vlgmr.msra.gmra.mxu3 %v1632_v49  ;;  %v1280_v26 = vld [vmem:[%s1600_s25 + $0x14] sm:$0xf]  ;;  %v998_v27 = vld [vmem:[%s1600_s25 + $0x18] sm:$0xf0]  ;;  %v1076_v31 = vld [vmem:[%s1903_s1 + $0x68] sm:$0xf]  ;;  %v1729_v34 = vor.u32 %v1281_v23, %v996_v13  ;;  %v1209_v35 = vor.u32 %v1331_v24, %v1206_v25 }
  0x30   : > { %824 = vmatpush.bf16.msrb.mxu3 %v1273_v45  ;;  %737 = vmatpush.bf16.msrb.mxu0 %v1141_v52  ;;  %v1301_v32 = vld [vmem:[%s1903_s1 + $0x74] sm:$0xf0]  ;;  %v1204_v33 = vld [vmem:[%s1903_s1 + $0x168] sm:$0xf]  ;;  %v1295_v37 = vld [vmem:[%s1903_s1 + $0x4c] sm:$0xf]  ;;  %v1740_v39 = vor.u32 %v1280_v26, %v998_v27 }
  0x31   : > { %766 = vmatpush.bf16.msrb.mxu1 %v1269_v53  ;;  %v1333_v36 = vld [vmem:[%s1903_s1 + $0x174] sm:$0xf0]  ;;  %v1062_v38 = vld [vmem:[%s1903_s1 + $0x58] sm:$0xf0]  ;;  %v1327_v40 = vld [vmem:[%s1903_s1 + $0x14c] sm:$0xf]  ;;  %v1077_v42 = vor.u32 %v1301_v32, %v1076_v31 }
  0x32   : > { %v1190_v41 = vld [vmem:[%s1903_s1 + $0x158] sm:$0xf0]  ;;  %v1205_v43 = vor.u32 %v1333_v36, %v1204_v33  ;;  %v1065_v45 = vor.u32 %v1295_v37, %v1062_v38  ;;  %v1060_v46 = vld [vmem:[%s1903_s1 + $0x48] sm:$0xf]  ;;  %v1297_v47 = vld [vmem:[%s1903_s1 + $0x54] sm:$0xf0] }
  0x33   : > { %796 = vmatpush.bf16.msrb.mxu2 %v1129_v54  ;;  %v1193_v48 = vor.u32 %v1327_v40, %v1190_v41  ;;  %v1061_v50 = vor.u32 %v1297_v47, %v1060_v46  ;;  %v1188_v51 = vld [vmem:[%s1903_s1 + $0x148] sm:$0xf]  ;;  %v1329_v52 = vld [vmem:[%s1903_s1 + $0x154] sm:$0xf0]  ;;  %v1291_v53 = vld [vmem:[%s1903_s1 + $0x2c] sm:$0xf] }
  0x34   : > { %825 = vmatpush.bf16.msrb.mxu3 %v1257_v58  ;;  %738 = vmatpush.bf16.msrb.mxu0 %v1125_v0  ;;  %v1189_v54 = vor.u32 %v1329_v52, %v1188_v51  ;;  %v1046_v55 = vld [vmem:[%s1903_s1 + $0x38] sm:$0xf0]  ;;  %v1323_v56 = vld [vmem:[%s1903_s1 + $0x12c] sm:$0xf]  ;;  %v1044_v60 = vld [vmem:[%s1903_s1 + $0x28] sm:$0xf] }
  0x35   : > { %767 = vmatpush.bf16.msrb.mxu1 %v1253_v1  ;;  %v1174_v57 = vld [vmem:[%s1903_s1 + $0x138] sm:$0xf0]  ;;  %v1049_v58 = vor.u32 %v1291_v53, %v1046_v55  ;;  %v1293_v61 = vld [vmem:[%s1903_s1 + $0x34] sm:$0xf0]  ;;  %v1172_v62 = vld [vmem:[%s1903_s1 + $0x128] sm:$0xf] }
  0x36   : > { %v1177_v59 = vor.u32 %v1323_v56, %v1174_v57  ;;  %v1325_v63 = vld [vmem:[%s1903_s1 + $0x134] sm:$0xf0]  ;;  %v1287_v0 = vld [vmem:[%s1903_s1 + $0xc] sm:$0xf]  ;;  %v1030_v1 = vld [vmem:[%s1903_s1 + $0x18] sm:$0xf0] }
  0x37   : > { %797 = vmatpush.bf16.msrb.mxu2 %v1113_v2  ;;  %v1045_v2 = vor.u32 %v1293_v61, %v1044_v60  ;;  %v1319_v3 = vld [vmem:[%s1903_s1 + $0x10c] sm:$0xf]  ;;  %v1158_v4 = vld [vmem:[%s1903_s1 + $0x118] sm:$0xf0]  ;;  %v1173_v5 = vor.u32 %v1325_v63, %v1172_v62  ;;  %v1028_v7 = vld [vmem:[%s1903_s1 + $0x8] sm:$0xf] }
  0x38   : > { %826 = vmatpush.bf16.msrb.mxu3 %v1241_v6  ;;  %739 = vmatpush.bf16.msrb.mxu0 %v1109_v12  ;;  %v1033_v6 = vor.u32 %v1287_v0, %v1030_v1  ;;  %v1289_v8 = vld [vmem:[%s1903_s1 + $0x14] sm:$0xf0]  ;;  %v1161_v9 = vor.u32 %v1319_v3, %v1158_v4  ;;  %v1156_v10 = vld [vmem:[%s1903_s1 + $0x108] sm:$0xf]  ;;  %v1004_v12 = vld [vmem:[%s1600_s25 + $0x20] sm:$0xf] }
  0x39   : > { %768 = vmatpush.bf16.msrb.mxu1 %v1237_v14  ;;  %v1321_v11 = vld [vmem:[%s1903_s1 + $0x114] sm:$0xf0]  ;;  %v1283_v13 = vld [vmem:[%s1600_s25 + $0x24] sm:$0xf0]  ;;  %v1282_v14 = vld [vmem:[%s1600_s25 + $0x24] sm:$0xf]  ;;  %v1029_v16 = vor.u32 %v1289_v8, %v1028_v7 }
  0x3a   : > { %v1157_v17 = vor.u32 %v1321_v11, %v1156_v10  ;;  %v1005_v18 = vor.u32 %v1283_v13, %v1004_v12  ;;  %v1012_v20 = vld [vmem:[%s1600_s25 + $0x30] sm:$0xf]  ;;  %v1285_v21 = vld [vmem:[%s1600_s25 + $0x34] sm:$0xf0]  ;;  %v1284_v22 = vld [vmem:[%s1600_s25 + $0x34] sm:$0xf] }
  0x3b   : > { %798 = vmatpush.bf16.msrb.mxu2 %v1097_v15  ;;  %v1006_v15 = vld [vmem:[%s1600_s25 + $0x28] sm:$0xf0]  ;;  %v1014_v23 = vld [vmem:[%s1600_s25 + $0x38] sm:$0xf0]  ;;  %v1013_v24 = vor.u32 %v1285_v21, %v1012_v20 }
  0x3c   : > { %827 = vmatpush.bf16.msrb.mxu3 %v1225_v19  ;;  %740 = vmatpush.bf16.msrb.mxu0 %v1093_v28  ;;  %v1009_v19 = vor.u32 %v1282_v14, %v1006_v15  ;;  %v1017_v25 = vor.u32 %v1284_v22, %v1014_v23 }
  0x3d   : > { %769 = vmatpush.bf16.msrb.mxu1 %v1221_v29  ;;  %634 = vmatmul.bf16.gmra.mxu0 %v1729_v34 }
  0x3e   : > { %663 = vmatmul.bf16.gmra.mxu1 %v1740_v39  ;;  %692 = vmatmul.bf16.gmra.mxu2 %v1729_v34 }
  0x3f   : > { %799 = vmatpush.bf16.msrb.mxu2 %v1081_v30  ;;  %721 = vmatmul.bf16.gmra.mxu3 %v1740_v39 }
  0x40   : > { %828 = vmatpush.bf16.msrb.mxu3 %v1209_v35  ;;  %741 = vmatpush.bf16.msrb.mxu0 %v1077_v42 }
  0x41   : > { %770 = vmatpush.bf16.msrb.mxu1 %v1205_v43 }
  0x43   : > { %800 = vmatpush.bf16.msrb.mxu2 %v1065_v45 }
  0x44   : > { %829 = vmatpush.bf16.msrb.mxu3 %v1193_v48  ;;  %742 = vmatpush.bf16.msrb.mxu0 %v1061_v50 }
  0x45   : > { %771 = vmatpush.bf16.msrb.mxu1 %v1189_v54 }
  0x47   : > { %801 = vmatpush.bf16.msrb.mxu2 %v1049_v58 }
  0x48   : > { %830 = vmatpush.bf16.msrb.mxu3 %v1177_v59  ;;  %743 = vmatpush.bf16.msrb.mxu0 %v1045_v2 }
  0x49   : > { %772 = vmatpush.bf16.msrb.mxu1 %v1173_v5 }
  0x4b   : > { %802 = vmatpush.bf16.msrb.mxu2 %v1033_v6 }
  0x4c   : > { %831 = vmatpush.bf16.msrb.mxu3 %v1161_v9  ;;  %744 = vmatpush.bf16.msrb.mxu0 %v1029_v16 }
  0x4d   : > { %773 = vmatpush.bf16.msrb.mxu1 %v1157_v17  ;;  %639 = vmatmul.bf16.gmra.mxu0 %v1005_v18 }
  0x4e   : > { %668 = vmatmul.bf16.gmra.mxu1 %v1009_v19  ;;  %697 = vmatmul.bf16.gmra.mxu2 %v1005_v18 }
  0x4f   : > { %726 = vmatmul.bf16.gmra.mxu3 %v1009_v19 }
  0x5d   : > { %644 = vmatmul.bf16.gmra.mxu0 %v1013_v24 }
  0x5e   : > { %673 = vmatmul.bf16.gmra.mxu1 %v1017_v25  ;;  %702 = vmatmul.bf16.gmra.mxu2 %v1013_v24 }
  0x5f   : > { %731 = vmatmul.bf16.gmra.mxu3 %v1017_v25 }
  0x6d   : > { %745 = vmatmul.bf16.vlgmr.msrb.gmra.mxu0 %v1621_v44 }
  0x6e   : > { %774 = vmatmul.bf16.vlgmr.msrb.gmra.mxu1 %v1632_v49  ;;  %803 = vmatmul.bf16.vlgmr.msrb.gmra.mxu2 %v1621_v44  ;;  %v1831_v44 = vld [vmem:[%s1904_s2] sm:$0xf] }
  0x6f   : > { %832 = vmatmul.bf16.vlgmr.msrb.gmra.mxu3 %v1632_v49  ;;  %v1834_v49 = vperm.slane %v1831_v44, 0  ;;  %v1838_v29 = vperm.slane %v1831_v44, 1 }
  0x7d   : > { %750 = vmatmul.bf16.gmra.mxu0 %v1729_v34 }
  0x7e   : > { %779 = vmatmul.bf16.gmra.mxu1 %v1740_v39  ;;  %808 = vmatmul.bf16.gmra.mxu2 %v1729_v34 }
  0x7f   : > { %837 = vmatmul.bf16.gmra.mxu3 %v1740_v39 }
  0x8d   : > { %755 = vmatmul.bf16.gmra.mxu0 %v1005_v18 }
  0x8e   : > { %784 = vmatmul.bf16.gmra.mxu1 %v1009_v19  ;;  %813 = vmatmul.bf16.gmra.mxu2 %v1005_v18 }
  0x8f   : > { %842 = vmatmul.bf16.gmra.mxu3 %v1009_v19 }
  0x9d   : > { %760 = vmatmul.bf16.gmra.mxu0 %v1013_v24 }
  0x9e   : > { %789 = vmatmul.bf16.gmra.mxu1 %v1017_v25  ;;  %818 = vmatmul.bf16.gmra.mxu2 %v1013_v24 }
  0x9f   : > { %847 = vmatmul.bf16.gmra.mxu3 %v1017_v25 }
  0xaa   : > { %v630_v26 = vpop.f32.mrf.mxu0 }
  0xab   : > { %v659_v27 = vpop.f32.mrf.mxu1  ;;  %v631_v28 = vadd.f32 %v630_v26, %v1834_v49 }
  0xad   : > { %v660_v30 = vadd.f32 %v659_v27, %v631_v28 }
  0xaf   : > { %v853_v36 = vmax.f32 %v660_v30, 0.0 }
  0xb1   : > { %v688_v31 = vpop.f32.mrf.mxu2 }
  0xb2   : > { %v689_v32 = vadd.f32 %v688_v31, %v1838_v29  ;;  %v717_v33 = vpop.f32.mrf.mxu3  ;;  %v632_v34 = vpop.f32.mrf.mxu0 }
  0xb3   : > { %v661_v35 = vpop.f32.mrf.mxu1  ;;  %v633_v39 = vadd.f32 %v632_v34, %v1834_v49 }
  0xb4   : > { %v718_v37 = vadd.f32 %v717_v33, %v689_v32 }
  0xb5   : > { %v662_v42 = vadd.f32 %v661_v35, %v633_v39 }
  0xb6   : > { %v854_v38 = vmax.f32 %v718_v37, 0.0 }
  0xb7   : > { %v857_v51 = vmax.f32 %v662_v42, 0.0 }
  0xb8   : > { %v885_v40 = vpack.c.bf16 %v854_v38, %v853_v36 }
  0xb9   : > { %v690_v41 = vpop.f32.mrf.mxu2 }
  0xba   : > { %901 = vst [vmem:[%s1846_s6] sm:$0xff] %v885_v40  ;;  %v691_v43 = vadd.f32 %v690_v41, %v1838_v29  ;;  %v719_v45 = vpop.f32.mrf.mxu3  ;;  %v635_v46 = vpop.f32.mrf.mxu0 }
  0xbb   : > { %v664_v47 = vpop.f32.mrf.mxu1  ;;  %v636_v50 = vadd.f32 %v635_v46, %v1834_v49 }
  0xbc   : > { %v720_v48 = vadd.f32 %v719_v45, %v691_v43 }
  0xbd   : > { %v665_v54 = vadd.f32 %v664_v47, %v636_v50  ;;  %v1867_v47 = vperm.slane %v1831_v44, 2 }
  0xbe   : > { %v858_v52 = vmax.f32 %v720_v48, 0.0 }
  0xbf   : > { %v861_v60 = vmax.f32 %v665_v54, 0.0 }
  0xc0   : > { %v887_v53 = vpack.c.bf16 %v858_v52, %v857_v51 }
  0xc1   : > { %v693_v55 = vpop.f32.mrf.mxu2 }
  0xc2   : > { %903 = vst [vmem:[%s1846_s6 + $0x10] sm:$0xff] %v887_v53  ;;  %v694_v56 = vadd.f32 %v693_v55, %v1838_v29  ;;  %v722_v57 = vpop.f32.mrf.mxu3  ;;  %v637_v58 = vpop.f32.mrf.mxu0 }
  0xc3   : > { %v666_v59 = vpop.f32.mrf.mxu1  ;;  %v638_v63 = vadd.f32 %v637_v58, %v1834_v49 }
  0xc4   : > { %v723_v61 = vadd.f32 %v722_v57, %v694_v56 }
  0xc5   : > { %v667_v2 = vadd.f32 %v666_v59, %v638_v63 }
  0xc6   : > { %v862_v62 = vmax.f32 %v723_v61, 0.0 }
  0xc7   : > { %v865_v9 = vmax.f32 %v667_v2, 0.0 }
  0xc8   : > { %v889_v0 = vpack.c.bf16 %v862_v62, %v861_v60 }
  0xc9   : > { %v695_v1 = vpop.f32.mrf.mxu2 }
  0xca   : > { %905 = vst [vmem:[%s1846_s6 + $0x20] sm:$0xff] %v889_v0  ;;  %v696_v3 = vadd.f32 %v695_v1, %v1838_v29  ;;  %v724_v4 = vpop.f32.mrf.mxu3  ;;  %v640_v5 = vpop.f32.mrf.mxu0 }
  0xcb   : > { %v669_v6 = vpop.f32.mrf.mxu1  ;;  %v641_v8 = vadd.f32 %v640_v5, %v1834_v49 }
  0xcc   : > { %v725_v7 = vadd.f32 %v724_v4, %v696_v3 }
  0xcd   : > { %v670_v12 = vadd.f32 %v669_v6, %v641_v8 }
  0xce   : > { %v866_v10 = vmax.f32 %v725_v7, 0.0 }
  0xcf   : > { %v869_v18 = vmax.f32 %v670_v12, 0.0 }
  0xd0   : > { %v891_v11 = vpack.c.bf16 %v866_v10, %v865_v9 }
  0xd1   : > { %v698_v13 = vpop.f32.mrf.mxu2 }
  0xd2   : > { %907 = vst [vmem:[%s1846_s6 + $0x30] sm:$0xff] %v891_v11  ;;  %v699_v14 = vadd.f32 %v698_v13, %v1838_v29  ;;  %v727_v15 = vpop.f32.mrf.mxu3  ;;  %v642_v16 = vpop.f32.mrf.mxu0 }
  0xd3   : > { %v671_v17 = vpop.f32.mrf.mxu1  ;;  %v643_v21 = vadd.f32 %v642_v16, %v1834_v49 }
  0xd4   : > { %v728_v19 = vadd.f32 %v727_v15, %v699_v14 }
  0xd5   : > { %v672_v24 = vadd.f32 %v671_v17, %v643_v21 }
  0xd6   : > { %v870_v20 = vmax.f32 %v728_v19, 0.0 }
  0xd7   : > { %v873_v32 = vmax.f32 %v672_v24, 0.0 }
  0xd8   : > { %v893_v22 = vpack.c.bf16 %v870_v20, %v869_v18 }
  0xd9   : > { %v700_v23 = vpop.f32.mrf.mxu2 }
  0xda   : > { %909 = vst [vmem:[%s1846_s6 + $0x40] sm:$0xff] %v893_v22  ;;  %v701_v25 = vadd.f32 %v700_v23, %v1838_v29  ;;  %v729_v26 = vpop.f32.mrf.mxu3  ;;  %v645_v27 = vpop.f32.mrf.mxu0 }
  0xdb   : > { %v674_v28 = vpop.f32.mrf.mxu1  ;;  %v646_v31 = vadd.f32 %v645_v27, %v1834_v49 }
  0xdc   : > { %v730_v30 = vadd.f32 %v729_v26, %v701_v25 }
  0xdd   : > { %v675_v35 = vadd.f32 %v674_v28, %v646_v31 }
  0xde   : > { %v874_v33 = vmax.f32 %v730_v30, 0.0 }
  0xdf   : > { %v877_v41 = vmax.f32 %v675_v35, 0.0 }
  0xe0   : > { %v895_v34 = vpack.c.bf16 %v874_v33, %v873_v32 }
  0xe1   : > { %v703_v36 = vpop.f32.mrf.mxu2 }
  0xe2   : > { %911 = vst [vmem:[%s1846_s6 + $0x50] sm:$0xff] %v895_v34  ;;  %v704_v37 = vadd.f32 %v703_v36, %v1838_v29  ;;  %v732_v38 = vpop.f32.mrf.mxu3  ;;  %v647_v39 = vpop.f32.mrf.mxu0 }
  0xe3   : > { %v676_v40 = vpop.f32.mrf.mxu1  ;;  %v648_v45 = vadd.f32 %v647_v39, %v1834_v49  ;;  %v1873_v49 = vperm.slane %v1831_v44, 3 }
  0xe4   : > { %v733_v42 = vadd.f32 %v732_v38, %v704_v37 }
  0xe5   : > { %v677_v50 = vadd.f32 %v676_v40, %v648_v45 }
  0xe6   : > { %v878_v43 = vmax.f32 %v733_v42, 0.0 }
  0xe7   : > { %v881_v57 = vmax.f32 %v677_v50, 0.0 }
  0xe8   : > { %v897_v46 = vpack.c.bf16 %v878_v43, %v877_v41 }
  0xe9   : > { %v705_v48 = vpop.f32.mrf.mxu2 }
  0xea   : > { %913 = vst [vmem:[%s1846_s6 + $0x60] sm:$0xff] %v897_v46  ;;  %v706_v51 = vadd.f32 %v705_v48, %v1838_v29  ;;  %v734_v52 = vpop.f32.mrf.mxu3  ;;  %v746_v53 = vpop.f32.mrf.mxu0 }
  0xeb   : > { %v775_v54 = vpop.f32.mrf.mxu1  ;;  %v747_v56 = vadd.f32 %v746_v53, %v1867_v47 }
  0xec   : > { %v735_v55 = vadd.f32 %v734_v52, %v706_v51 }
  0xed   : > { %v776_v60 = vadd.f32 %v775_v54, %v747_v56 }
  0xee   : > { %v882_v58 = vmax.f32 %v735_v55, 0.0 }
  0xef   : > { %v855_v1 = vmax.f32 %v776_v60, 0.0 }
  0xf0   : > { %v899_v59 = vpack.c.bf16 %v882_v58, %v881_v57 }
  0xf1   : > { %v804_v61 = vpop.f32.mrf.mxu2 }
  0xf2   : > { %915 = vst [vmem:[%s1846_s6 + $0x70] sm:$0xff] %v899_v59  ;;  %v805_v62 = vadd.f32 %v804_v61, %v1873_v49  ;;  %v833_v63 = vpop.f32.mrf.mxu3  ;;  %v748_v29 = vpop.f32.mrf.mxu0 }
  0xf3   : > { %v777_v0 = vpop.f32.mrf.mxu1  ;;  %v749_v4 = vadd.f32 %v748_v29, %v1867_v47 }
  0xf4   : > { %v834_v2 = vadd.f32 %v833_v63, %v805_v62 }
  0xf5   : > { %v778_v44 = vadd.f32 %v777_v0, %v749_v4 }
  0xf6   : > { %v856_v3 = vmax.f32 %v834_v2, 0.0 }
  0xf7   : > { %v859_v13 = vmax.f32 %v778_v44, 0.0 }
  0xf8   : > { %v886_v5 = vpack.c.bf16 %v856_v3, %v855_v1 }
  0xf9   : > { %v806_v6 = vpop.f32.mrf.mxu2 }
  0xfa   : > { %902 = vst [vmem:[%s1846_s6 + $0x8] sm:$0xff] %v886_v5  ;;  %v807_v7 = vadd.f32 %v806_v6, %v1873_v49  ;;  %v835_v8 = vpop.f32.mrf.mxu3  ;;  %v751_v9 = vpop.f32.mrf.mxu0 }
  0xfb   : > { %v780_v10 = vpop.f32.mrf.mxu1  ;;  %v752_v12 = vadd.f32 %v751_v9, %v1867_v47 }
  0xfc   : > { %v836_v11 = vadd.f32 %v835_v8, %v807_v7 }
  0xfd   : > { %v781_v16 = vadd.f32 %v780_v10, %v752_v12 }
  0xfe   : > { %v860_v14 = vmax.f32 %v836_v11, 0.0 }
  0xff   : > { %v863_v22 = vmax.f32 %v781_v16, 0.0 }
 0x100   : > { %v888_v15 = vpack.c.bf16 %v860_v14, %v859_v13 }
 0x101   : > { %v809_v17 = vpop.f32.mrf.mxu2 }
 0x102   : > { %904 = vst [vmem:[%s1846_s6 + $0x18] sm:$0xff] %v888_v15  ;;  %v810_v18 = vadd.f32 %v809_v17, %v1873_v49  ;;  %v838_v19 = vpop.f32.mrf.mxu3  ;;  %v753_v20 = vpop.f32.mrf.mxu0 }
 0x103   : > { %v782_v21 = vpop.f32.mrf.mxu1  ;;  %v754_v25 = vadd.f32 %v753_v20, %v1867_v47 }
 0x104   : > { %v839_v23 = vadd.f32 %v838_v19, %v810_v18 }
 0x105   : > { %v783_v28 = vadd.f32 %v782_v21, %v754_v25 }
 0x106   : > { %v864_v24 = vmax.f32 %v839_v23, 0.0 }
 0x107   : > { %v867_v36 = vmax.f32 %v783_v28, 0.0 }
 0x108   : > { %v890_v26 = vpack.c.bf16 %v864_v24, %v863_v22 }
 0x109   : > { %v811_v27 = vpop.f32.mrf.mxu2 }
 0x10a   : > { %906 = vst [vmem:[%s1846_s6 + $0x28] sm:$0xff] %v890_v26  ;;  %v812_v30 = vadd.f32 %v811_v27, %v1873_v49  ;;  %v840_v31 = vpop.f32.mrf.mxu3  ;;  %v756_v32 = vpop.f32.mrf.mxu0 }
 0x10b   : > { %v785_v33 = vpop.f32.mrf.mxu1  ;;  %v757_v35 = vadd.f32 %v756_v32, %v1867_v47 }
 0x10c   : > { %v841_v34 = vadd.f32 %v840_v31, %v812_v30 }
 0x10d   : > { %v786_v39 = vadd.f32 %v785_v33, %v757_v35 }
 0x10e   : > { %v868_v37 = vmax.f32 %v841_v34, 0.0 }
 0x10f   : > { %v871_v45 = vmax.f32 %v786_v39, 0.0 }
 0x110   : > { %v892_v38 = vpack.c.bf16 %v868_v37, %v867_v36 }
 0x111   : > { %v814_v40 = vpop.f32.mrf.mxu2 }
 0x112   : > { %908 = vst [vmem:[%s1846_s6 + $0x38] sm:$0xff] %v892_v38  ;;  %v815_v41 = vadd.f32 %v814_v40, %v1873_v49  ;;  %v843_v42 = vpop.f32.mrf.mxu3  ;;  %v758_v43 = vpop.f32.mrf.mxu0 }
 0x113   : > { %v787_v48 = vpop.f32.mrf.mxu1  ;;  %v759_v51 = vadd.f32 %v758_v43, %v1867_v47 }
 0x114   : > { %v844_v46 = vadd.f32 %v843_v42, %v815_v41 }
 0x115   : > { %v788_v54 = vadd.f32 %v787_v48, %v759_v51 }
 0x116   : > { %v872_v50 = vmax.f32 %v844_v46, 0.0 }
 0x117   : > { %v875_v60 = vmax.f32 %v788_v54, 0.0 }
 0x118   : > { %v894_v52 = vpack.c.bf16 %v872_v50, %v871_v45 }
 0x119   : > { %v816_v53 = vpop.f32.mrf.mxu2 }
 0x11a   : > { %910 = vst [vmem:[%s1846_s6 + $0x48] sm:$0xff] %v894_v52  ;;  %v817_v55 = vadd.f32 %v816_v53, %v1873_v49  ;;  %v845_v56 = vpop.f32.mrf.mxu3  ;;  %v761_v57 = vpop.f32.mrf.mxu0 }
 0x11b   : > { %v762_v59 = vadd.f32 %v761_v57, %v1867_v47  ;;  %v790_v62 = vpop.f32.mrf.mxu1 }
 0x11c   : > { %v846_v58 = vadd.f32 %v845_v56, %v817_v55 }
 0x11d   : > { %v791_v29 = vadd.f32 %v790_v62, %v762_v59 }
 0x11e   : > { %v876_v61 = vmax.f32 %v846_v58, 0.0 }
 0x11f   : > { %v879_v4 = vmax.f32 %v791_v29, 0.0 }
 0x120   : > { %v896_v63 = vpack.c.bf16 %v876_v61, %v875_v60 }
 0x121   : > { %v819_v0 = vpop.f32.mrf.mxu2 }
 0x122   : > { %912 = vst [vmem:[%s1846_s6 + $0x58] sm:$0xff] %v896_v63  ;;  %v820_v1 = vadd.f32 %v819_v0, %v1873_v49  ;;  %v848_v2 = vpop.f32.mrf.mxu3  ;;  %v763_v3 = vpop.f32.mrf.mxu0 }
 0x123   : > { %v764_v44 = vadd.f32 %v763_v3, %v1867_v47  ;;  %v792_v8 = vpop.f32.mrf.mxu1 }
 0x124   : > { %v849_v5 = vadd.f32 %v848_v2, %v820_v1 }
 0x125   : > { %v793_v10 = vadd.f32 %v792_v8, %v764_v44 }
 0x126   : > { %v880_v6 = vmax.f32 %v849_v5, 0.0 }
 0x127   : > { %v883_v14 = vmax.f32 %v793_v10, 0.0 }
 0x128   : > { %v898_v7 = vpack.c.bf16 %v880_v6, %v879_v4 }
 0x129   : > { %v821_v9 = vpop.f32.mrf.mxu2 }
 0x12a   : > { %914 = vst [vmem:[%s1846_s6 + $0x68] sm:$0xff] %v898_v7  ;;  %v822_v11 = vadd.f32 %v821_v9, %v1873_v49  ;;  %v850_v12 = vpop.f32.mrf.mxu3 }
 0x12c   : > { %v851_v13 = vadd.f32 %v850_v12, %v822_v11 }
 0x12e   : > { %v884_v15 = vmax.f32 %v851_v13, 0.0 }
 0x130   : > { %v900_v16 = vpack.c.bf16 %v884_v15, %v883_v14 }
 0x132   : > { %916 = vst [vmem:[%s1846_s6 + $0x78] sm:$0xff] %v900_v16 }
 0x133 PF: > { %s13_s12 = sadd.s32 1, %s1364_s12  }
 0x134   : > { %p10_p4 = scmp.ge.s32.totalorder %s13_s12, 4  }
 0x136   :  { %12 = sbr.rel (!%p10_p4) target bundleno = 1 (0x1), region = 62 }

// kernel: vae_conceptizer_forward.10
= control target key start
LH: loop header
LB: loop body
LE: loop exit
PB: predicated region body
PF: predicated region fallthrough
CT: control target
= control target key end

     0   :  { %s3166_s12 = smov 0   ;;  %s3792_s0 = inlined_call_operand.vmem [shape: bf16[128,2048], index: 0, kind: input, shape index: {}]   ;;  %s3793_s1 = inlined_call_operand.vmem [shape: bf16[2048,128], index: 1, kind: input, shape index: {}]   ;;  %s3794_s2 = inlined_call_operand.vmem [shape: f32[1,128], index: 2, kind: input, shape index: {}]   ;;  %s3795_s3 = inlined_call_operand.vmem [shape: bf16[128,128], index: 3, kind: output, shape index: {}]  }
   0x1 LB: > { %s2133_s13 = sadd.s32 4294967295, %s3144_s12   ;;  %p2137_p0 = scmp.ge.s32.totalorder %s3144_s12, 1  ;;  %s3144_s12 = sphi %s3166_s12, %s13_s12  }
   0x2   : > { %p139_p1 = scmp.lt.s32.totalorder %s3144_s12, 3 }
   0x4   : > { %p140_p2 = pnand %p2137_p0, %p139_p1 }
   0x5   : > { %s2138_s11 = sshll.u32 (!%p140_p2), %s2133_s13, 3 }
   0x6   : > { %143 = sbr.rel (%p140_p2) target bundleno = 434 (0x1b2), region = 32  ;;  %p165_p3 = scmp.lt.s32.totalorder (!%p140_p2), %s2138_s11, 15 }
   0xb   : > { %v2985_v0 = vld [vmem:[%s3793_s1 + $0x38] sm:$0xff]  ;;  %v2984_v4 = vld [vmem:[%s3793_s1 + $0x30] sm:$0xff]  ;;  %v2983_v8 = vld [vmem:[%s3793_s1 + $0x28] sm:$0xff]  ;;  %s3797_s11 = smov (!%p165_p3, %s2138_s11), 15 }
   0xc   : > { %v2993_v1 = vld [vmem:[%s3793_s1 + $0x78] sm:$0xff]  ;;  %1589 = vmatpush.bf16.msra.mxu0 %v2985_v0  ;;  %v2992_v5 = vld [vmem:[%s3793_s1 + $0x70] sm:$0xff]  ;;  %v2991_v9 = vld [vmem:[%s3793_s1 + $0x68] sm:$0xff]  ;;  %s2913_s10 = sshll.u32 %s3797_s11, 6 }
   0xd   : > { %v3001_v2 = vld [vmem:[%s3793_s1 + $0xb8] sm:$0xff]  ;;  %1618 = vmatpush.bf16.msra.mxu1 %v2993_v1  ;;  %v3000_v6 = vld [vmem:[%s3793_s1 + $0xb0] sm:$0xff]  ;;  %v2999_v10 = vld [vmem:[%s3793_s1 + $0xa8] sm:$0xff]  ;;  %s3258_s20 = scalar_lea.vmem %s3792_s0, %s2913_s10 }
   0xe   : > { %v3009_v3 = vld [vmem:[%s3793_s1 + $0xf8] sm:$0xff]  ;;  %1647 = vmatpush.bf16.msra.mxu2 %v3001_v2  ;;  %v3008_v7 = vld [vmem:[%s3793_s1 + $0xf0] sm:$0xff]  ;;  %v3007_v11 = vld [vmem:[%s3793_s1 + $0xe8] sm:$0xff] }
   0xf   : > { %1676 = vmatpush.bf16.msra.mxu3 %v3009_v3  ;;  %v2982_v12 = vld [vmem:[%s3793_s1 + $0x20] sm:$0xff]  ;;  %v2981_v16 = vld [vmem:[%s3793_s1 + $0x18] sm:$0xff]  ;;  %v2980_v20 = vld [vmem:[%s3793_s1 + $0x10] sm:$0xff] }
  0x10   : > { %1590 = vmatpush.bf16.msra.mxu0 %v2984_v4  ;;  %v2990_v13 = vld [vmem:[%s3793_s1 + $0x60] sm:$0xff]  ;;  %v2989_v17 = vld [vmem:[%s3793_s1 + $0x58] sm:$0xff]  ;;  %v2988_v21 = vld [vmem:[%s3793_s1 + $0x50] sm:$0xff] }
  0x11   : > { %1619 = vmatpush.bf16.msra.mxu1 %v2992_v5  ;;  %v2998_v14 = vld [vmem:[%s3793_s1 + $0xa0] sm:$0xff]  ;;  %v2997_v18 = vld [vmem:[%s3793_s1 + $0x98] sm:$0xff]  ;;  %v2996_v22 = vld [vmem:[%s3793_s1 + $0x90] sm:$0xff] }
  0x12   : > { %1648 = vmatpush.bf16.msra.mxu2 %v3000_v6  ;;  %v3006_v15 = vld [vmem:[%s3793_s1 + $0xe0] sm:$0xff]  ;;  %v3005_v19 = vld [vmem:[%s3793_s1 + $0xd8] sm:$0xff]  ;;  %v3004_v23 = vld [vmem:[%s3793_s1 + $0xd0] sm:$0xff] }
  0x13   : > { %1677 = vmatpush.bf16.msra.mxu3 %v3008_v7  ;;  %v2979_v24 = vld [vmem:[%s3793_s1 + $0x8] sm:$0xff]  ;;  %v2978_v28 = vld [vmem:[%s3793_s1] sm:$0xff]  ;;  %v3033_v40 = vld [vmem:[%s3793_s1 + $0x1b8] sm:$0xff] }
  0x14   : > { %1591 = vmatpush.bf16.msra.mxu0 %v2983_v8  ;;  %v2987_v25 = vld [vmem:[%s3793_s1 + $0x48] sm:$0xff]  ;;  %v2986_v29 = vld [vmem:[%s3793_s1 + $0x40] sm:$0xff]  ;;  %v3017_v41 = vld [vmem:[%s3793_s1 + $0x138] sm:$0xff] }
  0x15   : > { %1620 = vmatpush.bf16.msra.mxu1 %v2991_v9  ;;  %v2995_v26 = vld [vmem:[%s3793_s1 + $0x88] sm:$0xff]  ;;  %v2994_v30 = vld [vmem:[%s3793_s1 + $0x80] sm:$0xff]  ;;  %v3041_v46 = vld [vmem:[%s3793_s1 + $0x1f8] sm:$0xff] }
  0x16   : > { %1649 = vmatpush.bf16.msra.mxu2 %v2999_v10  ;;  %v3003_v27 = vld [vmem:[%s3793_s1 + $0xc8] sm:$0xff]  ;;  %v3002_v31 = vld [vmem:[%s3793_s1 + $0xc0] sm:$0xff]  ;;  %v3025_v47 = vld [vmem:[%s3793_s1 + $0x178] sm:$0xff] }
  0x17   : > { %1678 = vmatpush.bf16.msra.mxu3 %v3007_v11  ;;  %v2145_v32 = vld [vmem:[%s3258_s20] sm:$0xf]  ;;  %v2914_v34 = vld [vmem:[%s3258_s20 + $0x4] sm:$0xf]  ;;  %v2153_v36 = vld [vmem:[%s3258_s20 + $0x8] sm:$0xf] }
  0x18   : > { %1592 = vmatpush.bf16.msra.mxu0 %v2982_v12  ;;  %v2922_v33 = vld [vmem:[%s3258_s20 + $0x3c] sm:$0xf0]  ;;  %v2147_v35 = vld [vmem:[%s3258_s20 + $0x40] sm:$0xf0]  ;;  %v2923_v37 = vld [vmem:[%s3258_s20 + $0x44] sm:$0xf0] }
  0x19   : > { %1621 = vmatpush.bf16.msra.mxu1 %v2990_v13  ;;  %v2915_v38 = vld [vmem:[%s3258_s20 + $0xc] sm:$0xf]  ;;  %v2146_v42 = vor.u32 %v2922_v33, %v2145_v32  ;;  %v2150_v43 = vor.u32 %v2914_v34, %v2147_v35  ;;  %v2154_v44 = vor.u32 %v2923_v37, %v2153_v36  ;;  %v3032_v48 = vld [vmem:[%s3793_s1 + $0x1b0] sm:$0xff]  ;;  %v2209_v56 = vld [vmem:[%s3258_s20 + $0x80] sm:$0xf] }
  0x1a   : > { %1650 = vmatpush.bf16.msra.mxu2 %v2998_v14  ;;  %v2155_v39 = vld [vmem:[%s3258_s20 + $0x48] sm:$0xf0]  ;;  %v3016_v49 = vld [vmem:[%s3793_s1 + $0x130] sm:$0xff]  ;;  %v3030_v57 = vld [vmem:[%s3793_s1 + $0x1a0] sm:$0xff] }
  0x1b   : > { %1679 = vmatpush.bf16.msra.mxu3 %v3006_v15  ;;  %v2158_v45 = vor.u32 %v2915_v38, %v2155_v39  ;;  %v3040_v50 = vld [vmem:[%s3793_s1 + $0x1f0] sm:$0xff]  ;;  %v3031_v52 = vld [vmem:[%s3793_s1 + $0x1a8] sm:$0xff]  ;;  %v3014_v58 = vld [vmem:[%s3793_s1 + $0x120] sm:$0xff] }
  0x1c   : > { %1593 = vmatpush.bf16.msra.mxu0 %v2981_v16  ;;  %v3024_v51 = vld [vmem:[%s3793_s1 + $0x170] sm:$0xff]  ;;  %v3015_v53 = vld [vmem:[%s3793_s1 + $0x128] sm:$0xff]  ;;  %v2938_v59 = vld [vmem:[%s3258_s20 + $0xbc] sm:$0xf0] }
  0x1d   : > { %1622 = vmatpush.bf16.msra.mxu1 %v2989_v17  ;;  %v3039_v54 = vld [vmem:[%s3793_s1 + $0x1e8] sm:$0xff]  ;;  %v2930_v60 = vld [vmem:[%s3258_s20 + $0x84] sm:$0xf]  ;;  %v3029_v4 = vld [vmem:[%s3793_s1 + $0x198] sm:$0xff]  ;;  %v2210_v6 = vor.u32 %v2938_v59, %v2209_v56 }
  0x1e   : > { %1651 = vmatpush.bf16.msra.mxu2 %v2997_v18  ;;  %v3023_v55 = vld [vmem:[%s3793_s1 + $0x168] sm:$0xff]  ;;  %v2211_v61 = vld [vmem:[%s3258_s20 + $0xc0] sm:$0xf0]  ;;  %v3013_v5 = vld [vmem:[%s3793_s1 + $0x118] sm:$0xff] }
  0x1f   : > { %1680 = vmatpush.bf16.msra.mxu3 %v3005_v19  ;;  %v2217_v62 = vld [vmem:[%s3258_s20 + $0x88] sm:$0xf]  ;;  %v2931_v0 = vld [vmem:[%s3258_s20 + $0x8c] sm:$0xf]  ;;  %v3038_v2 = vld [vmem:[%s3793_s1 + $0x1e0] sm:$0xff]  ;;  %v2214_v7 = vor.u32 %v2930_v60, %v2211_v61 }
  0x20   : > { %1594 = vmatpush.bf16.msra.mxu0 %v2980_v20  ;;  %v2939_v63 = vld [vmem:[%s3258_s20 + $0xc4] sm:$0xf0]  ;;  %v2219_v1 = vld [vmem:[%s3258_s20 + $0xc8] sm:$0xf0]  ;;  %v3022_v3 = vld [vmem:[%s3793_s1 + $0x160] sm:$0xff] }
  0x21   : > { %1623 = vmatpush.bf16.msra.mxu1 %v2988_v21  ;;  %v2218_v8 = vor.u32 %v2939_v63, %v2217_v62  ;;  %v2222_v9 = vor.u32 %v2931_v0, %v2219_v1  ;;  %v3037_v10 = vld [vmem:[%s3793_s1 + $0x1d8] sm:$0xff]  ;;  %v3028_v12 = vld [vmem:[%s3793_s1 + $0x190] sm:$0xff]  ;;  %v3027_v16 = vld [vmem:[%s3793_s1 + $0x188] sm:$0xff] }
  0x22   : > { %1652 = vmatpush.bf16.msra.mxu2 %v2996_v22  ;;  %v3021_v11 = vld [vmem:[%s3793_s1 + $0x158] sm:$0xff]  ;;  %v3012_v13 = vld [vmem:[%s3793_s1 + $0x110] sm:$0xff]  ;;  %v3011_v17 = vld [vmem:[%s3793_s1 + $0x108] sm:$0xff] }
  0x23   : > { %1681 = vmatpush.bf16.msra.mxu3 %v3004_v23  ;;  %v3036_v14 = vld [vmem:[%s3793_s1 + $0x1d0] sm:$0xff]  ;;  %v3035_v18 = vld [vmem:[%s3793_s1 + $0x1c8] sm:$0xff]  ;;  %v2273_v20 = vld [vmem:[%s3258_s20 + $0x100] sm:$0xf] }
  0x24   : > { %1595 = vmatpush.bf16.msra.mxu0 %v2979_v24  ;;  %v3020_v15 = vld [vmem:[%s3793_s1 + $0x150] sm:$0xff]  ;;  %v3019_v19 = vld [vmem:[%s3793_s1 + $0x148] sm:$0xff]  ;;  %v3026_v21 = vld [vmem:[%s3793_s1 + $0x180] sm:$0xff] }
  0x25   : > { %1624 = vmatpush.bf16.msra.mxu1 %v2987_v25  ;;  %v3010_v22 = vld [vmem:[%s3793_s1 + $0x100] sm:$0xff]  ;;  %v3065_v36 = vld [vmem:[%s3793_s1 + $0x2b8] sm:$0xff]  ;;  %v3063_v56 = vld [vmem:[%s3793_s1 + $0x2a8] sm:$0xff] }
  0x26   : > { %1653 = vmatpush.bf16.msra.mxu2 %v2995_v26  ;;  %v2954_v23 = vld [vmem:[%s3258_s20 + $0x13c] sm:$0xf0]  ;;  %v2946_v24 = vld [vmem:[%s3258_s20 + $0x104] sm:$0xf]  ;;  %v2281_v26 = vld [vmem:[%s3258_s20 + $0x108] sm:$0xf] }
  0x27   : > { %1682 = vmatpush.bf16.msra.mxu3 %v3003_v27  ;;  %v2275_v25 = vld [vmem:[%s3258_s20 + $0x140] sm:$0xf0]  ;;  %v2955_v27 = vld [vmem:[%s3258_s20 + $0x144] sm:$0xf0]  ;;  %v2274_v32 = vor.u32 %v2954_v23, %v2273_v20  ;;  %v3049_v37 = vld [vmem:[%s3793_s1 + $0x238] sm:$0xff] }
  0x28   : > { %1596 = vmatpush.bf16.msra.mxu0 %v2978_v28  ;;  %v2947_v28 = vld [vmem:[%s3258_s20 + $0x10c] sm:$0xf]  ;;  %v2278_v33 = vor.u32 %v2946_v24, %v2275_v25  ;;  %v2282_v34 = vor.u32 %v2955_v27, %v2281_v26  ;;  %v3073_v38 = vld [vmem:[%s3793_s1 + $0x2f8] sm:$0xff]  ;;  %v3062_v60 = vld [vmem:[%s3793_s1 + $0x2a0] sm:$0xff] }
  0x29   : > { %1625 = vmatpush.bf16.msra.mxu1 %v2986_v29  ;;  %v2283_v29 = vld [vmem:[%s3258_s20 + $0x148] sm:$0xf0]  ;;  %v3057_v39 = vld [vmem:[%s3793_s1 + $0x278] sm:$0xff]  ;;  %v3046_v61 = vld [vmem:[%s3793_s1 + $0x220] sm:$0xff] }
  0x2a   : > { %1654 = vmatpush.bf16.msra.mxu2 %v2994_v30  ;;  %v3034_v30 = vld [vmem:[%s3793_s1 + $0x1c0] sm:$0xff]  ;;  %v2286_v35 = vor.u32 %v2947_v28, %v2283_v29  ;;  %v3055_v59 = vld [vmem:[%s3793_s1 + $0x268] sm:$0xff]  ;;  %v2161_v0 = vld [vmem:[%s3258_s20 + $0x10] sm:$0xf] }
  0x2b   : > { %1683 = vmatpush.bf16.msra.mxu3 %v3002_v31  ;;  %1597 = vmatmul.bf16.vlgmr.msra.gmra.mxu0 %v2146_v42  ;;  %v3018_v31 = vld [vmem:[%s3793_s1 + $0x140] sm:$0xff]  ;;  %v3072_v42 = vld [vmem:[%s3793_s1 + $0x2f0] sm:$0xff]  ;;  %v2233_v24 = vld [vmem:[%s3258_s20 + $0x98] sm:$0xf] }
  0x2c   : > { %1705 = vmatpush.bf16.msrb.mxu0 %v3017_v41  ;;  %1626 = vmatmul.bf16.vlgmr.msra.gmra.mxu1 %v2150_v43  ;;  %v3048_v41 = vld [vmem:[%s3793_s1 + $0x230] sm:$0xff]  ;;  %v3070_v62 = vld [vmem:[%s3793_s1 + $0x2e0] sm:$0xff]  ;;  %v2941_v25 = vld [vmem:[%s3258_s20 + $0xd4] sm:$0xf0] }
  0x2d   : > { %1655 = vmatmul.bf16.vlgmr.msra.gmra.mxu2 %v2154_v44  ;;  %1734 = vmatpush.bf16.msrb.mxu1 %v3025_v47  ;;  %v3056_v43 = vld [vmem:[%s3793_s1 + $0x270] sm:$0xff]  ;;  %v2337_v44 = vld [vmem:[%s3258_s20 + $0x180] sm:$0xf]  ;;  %v2339_v47 = vld [vmem:[%s3258_s20 + $0x1c0] sm:$0xf0] }
  0x2e   : > { %1763 = vmatpush.bf16.msrb.mxu2 %v3033_v40  ;;  %1684 = vmatmul.bf16.vlgmr.msra.gmra.mxu3 %v2158_v45  ;;  %v3064_v40 = vld [vmem:[%s3793_s1 + $0x2b0] sm:$0xff]  ;;  %v2970_v45 = vld [vmem:[%s3258_s20 + $0x1bc] sm:$0xf0]  ;;  %v2933_v26 = vld [vmem:[%s3258_s20 + $0x9c] sm:$0xf] }
  0x2f   : > { %1792 = vmatpush.bf16.msrb.mxu3 %v3041_v46  ;;  %v2962_v46 = vld [vmem:[%s3258_s20 + $0x184] sm:$0xf]  ;;  %v2924_v1 = vld [vmem:[%s3258_s20 + $0x4c] sm:$0xf0]  ;;  %v2227_v23 = vld [vmem:[%s3258_s20 + $0xd0] sm:$0xf0] }
  0x30   : > { %1706 = vmatpush.bf16.msrb.mxu0 %v3016_v49  ;;  %v2971_v49 = vld [vmem:[%s3258_s20 + $0x1c4] sm:$0xf0]  ;;  %v3054_v63 = vld [vmem:[%s3793_s1 + $0x260] sm:$0xff]  ;;  %v2225_v20 = vld [vmem:[%s3258_s20 + $0x90] sm:$0xf] }
  0x31   : > { %1735 = vmatpush.bf16.msrb.mxu1 %v3024_v51  ;;  %v2347_v51 = vld [vmem:[%s3258_s20 + $0x1c8] sm:$0xf0]  ;;  %v2235_v27 = vld [vmem:[%s3258_s20 + $0xd8] sm:$0xf0] }
  0x32   : > { %1764 = vmatpush.bf16.msrb.mxu2 %v3032_v48  ;;  %v2345_v48 = vld [vmem:[%s3258_s20 + $0x188] sm:$0xf] }
  0x33   : > { %1793 = vmatpush.bf16.msrb.mxu3 %v3040_v50  ;;  %v2963_v50 = vld [vmem:[%s3258_s20 + $0x18c] sm:$0xf] }
  0x34   : > { %1707 = vmatpush.bf16.msrb.mxu0 %v3015_v53  ;;  %v2342_v53 = vor.u32 %v2962_v46, %v2339_v47  ;;  %v2949_v46 = vld [vmem:[%s3258_s20 + $0x11c] sm:$0xf] }
  0x35   : > { %1736 = vmatpush.bf16.msrb.mxu1 %v3023_v55  ;;  %v2350_v55 = vor.u32 %v2963_v50, %v2347_v51  ;;  %v2299_v47 = vld [vmem:[%s3258_s20 + $0x158] sm:$0xf0] }
  0x36   : > { %1765 = vmatpush.bf16.msrb.mxu2 %v3031_v52  ;;  %v2338_v52 = vor.u32 %v2970_v45, %v2337_v44  ;;  %v2297_v44 = vld [vmem:[%s3258_s20 + $0x118] sm:$0xf]  ;;  %v2302_v51 = vor.u32 %v2949_v46, %v2299_v47  ;;  %v3092_v47 = vld [vmem:[%s3793_s1 + $0x390] sm:$0xff] }
  0x37   : > { %1794 = vmatpush.bf16.msrb.mxu3 %v3039_v54  ;;  %v2346_v54 = vor.u32 %v2971_v49, %v2345_v48  ;;  %v2957_v45 = vld [vmem:[%s3258_s20 + $0x154] sm:$0xf0] }
  0x38   : > { %1708 = vmatpush.bf16.msrb.mxu0 %v3014_v58  ;;  %v3071_v58 = vld [vmem:[%s3793_s1 + $0x2e8] sm:$0xff]  ;;  %v2298_v50 = vor.u32 %v2957_v45, %v2297_v44  ;;  %v2942_v44 = vld [vmem:[%s3258_s20 + $0xdc] sm:$0xf0]  ;;  %v3085_v45 = vld [vmem:[%s3793_s1 + $0x358] sm:$0xff] }
  0x39   : > { %1737 = vmatpush.bf16.msrb.mxu1 %v3022_v3  ;;  %v2163_v3 = vld [vmem:[%s3258_s20 + $0x50] sm:$0xf0] }
  0x3a   : > { %1766 = vmatpush.bf16.msrb.mxu2 %v3030_v57  ;;  %v3047_v57 = vld [vmem:[%s3793_s1 + $0x228] sm:$0xff] }
  0x3b   : > { %1795 = vmatpush.bf16.msrb.mxu3 %v3038_v2  ;;  %1602 = vmatmul.bf16.gmra.mxu0 %v2210_v6  ;;  %v2916_v2 = vld [vmem:[%s3258_s20 + $0x14] sm:$0xf]  ;;  %v2917_v6 = vld [vmem:[%s3258_s20 + $0x1c] sm:$0xf] }
  0x3c   : > { %1709 = vmatpush.bf16.msrb.mxu0 %v3013_v5  ;;  %1631 = vmatmul.bf16.gmra.mxu1 %v2214_v7  ;;  %v2925_v5 = vld [vmem:[%s3258_s20 + $0x54] sm:$0xf0]  ;;  %v2171_v7 = vld [vmem:[%s3258_s20 + $0x58] sm:$0xf0] }
  0x3d   : > { %1660 = vmatmul.bf16.gmra.mxu2 %v2218_v8  ;;  %1738 = vmatpush.bf16.msrb.mxu1 %v3021_v11  ;;  %v2162_v8 = vor.u32 %v2924_v1, %v2161_v0  ;;  %v2174_v11 = vor.u32 %v2917_v6, %v2171_v7  ;;  %v2973_v0 = vld [vmem:[%s3258_s20 + $0x1d4] sm:$0xf0]  ;;  %v2965_v1 = vld [vmem:[%s3258_s20 + $0x19c] sm:$0xf]  ;;  %v3088_v7 = vld [vmem:[%s3793_s1 + $0x370] sm:$0xff] }
  0x3e   : > { %1767 = vmatpush.bf16.msrb.mxu2 %v3029_v4  ;;  %1689 = vmatmul.bf16.gmra.mxu3 %v2222_v9  ;;  %v2169_v4 = vld [vmem:[%s3258_s20 + $0x18] sm:$0xf]  ;;  %v2166_v9 = vor.u32 %v2916_v2, %v2163_v3  ;;  %v2363_v2 = vld [vmem:[%s3258_s20 + $0x1d8] sm:$0xf0] }
  0x3f   : > { %1796 = vmatpush.bf16.msrb.mxu3 %v3037_v10  ;;  %v2170_v10 = vor.u32 %v2925_v5, %v2169_v4  ;;  %v2366_v6 = vor.u32 %v2965_v1, %v2363_v2 }
  0x40   : > { %1710 = vmatpush.bf16.msrb.mxu0 %v3012_v13  ;;  %v3045_v13 = vld [vmem:[%s3793_s1 + $0x218] sm:$0xff] }
  0x41   : > { %1739 = vmatpush.bf16.msrb.mxu1 %v3020_v15  ;;  %v3053_v15 = vld [vmem:[%s3793_s1 + $0x258] sm:$0xff] }
  0x42   : > { %1768 = vmatpush.bf16.msrb.mxu2 %v3028_v12  ;;  %v3061_v12 = vld [vmem:[%s3793_s1 + $0x298] sm:$0xff] }
  0x43   : > { %1797 = vmatpush.bf16.msrb.mxu3 %v3036_v14  ;;  %v3069_v14 = vld [vmem:[%s3793_s1 + $0x2d8] sm:$0xff] }
  0x44   : > { %1711 = vmatpush.bf16.msrb.mxu0 %v3011_v17  ;;  %v3044_v17 = vld [vmem:[%s3793_s1 + $0x210] sm:$0xff] }
  0x45   : > { %1740 = vmatpush.bf16.msrb.mxu1 %v3019_v19  ;;  %v3052_v19 = vld [vmem:[%s3793_s1 + $0x250] sm:$0xff] }
  0x46   : > { %1769 = vmatpush.bf16.msrb.mxu2 %v3027_v16  ;;  %v3060_v16 = vld [vmem:[%s3793_s1 + $0x290] sm:$0xff] }
  0x47   : > { %1798 = vmatpush.bf16.msrb.mxu3 %v3035_v18  ;;  %v3068_v18 = vld [vmem:[%s3793_s1 + $0x2d0] sm:$0xff] }
  0x48   : > { %1712 = vmatpush.bf16.msrb.mxu0 %v3010_v22  ;;  %v2932_v22 = vld [vmem:[%s3258_s20 + $0x94] sm:$0xf] }
  0x49   : > { %1741 = vmatpush.bf16.msrb.mxu1 %v3018_v31  ;;  %v2230_v29 = vor.u32 %v2932_v22, %v2227_v23  ;;  %v2238_v31 = vor.u32 %v2933_v26, %v2235_v27  ;;  %v2919_v22 = vld [vmem:[%s3258_s20 + $0x2c] sm:$0xf] }
  0x4a   : > { %1770 = vmatpush.bf16.msrb.mxu2 %v3026_v21  ;;  %v2940_v21 = vld [vmem:[%s3258_s20 + $0xcc] sm:$0xf0]  ;;  %v2187_v23 = vld [vmem:[%s3258_s20 + $0x68] sm:$0xf0] }
  0x4b   : > { %1799 = vmatpush.bf16.msrb.mxu3 %v3034_v30  ;;  %1607 = vmatmul.bf16.gmra.mxu0 %v2274_v32  ;;  %v2226_v28 = vor.u32 %v2940_v21, %v2225_v20  ;;  %v2234_v30 = vor.u32 %v2941_v25, %v2233_v24  ;;  %v3059_v32 = vld [vmem:[%s3793_s1 + $0x288] sm:$0xff] }
  0x4c   : > { %1636 = vmatmul.bf16.gmra.mxu1 %v2278_v33  ;;  %1821 = vmatpush.bf16.msra.mxu0 %v3049_v37  ;;  %v3043_v33 = vld [vmem:[%s3793_s1 + $0x208] sm:$0xff]  ;;  %v3042_v37 = vld [vmem:[%s3793_s1 + $0x200] sm:$0xff] }
  0x4d   : > { %1665 = vmatmul.bf16.gmra.mxu2 %v2282_v34  ;;  %1850 = vmatpush.bf16.msra.mxu1 %v3057_v39  ;;  %v3067_v34 = vld [vmem:[%s3793_s1 + $0x2c8] sm:$0xff]  ;;  %v3050_v39 = vld [vmem:[%s3793_s1 + $0x240] sm:$0xff] }
  0x4e   : > { %1694 = vmatmul.bf16.gmra.mxu3 %v2286_v35  ;;  %1879 = vmatpush.bf16.msra.mxu2 %v3065_v36  ;;  %v3051_v35 = vld [vmem:[%s3793_s1 + $0x248] sm:$0xff]  ;;  %v3058_v36 = vld [vmem:[%s3793_s1 + $0x280] sm:$0xff] }
  0x4f   : > { %1908 = vmatpush.bf16.msra.mxu3 %v3073_v38  ;;  %v3066_v38 = vld [vmem:[%s3793_s1 + $0x2c0] sm:$0xff]  ;;  %v2185_v20 = vld [vmem:[%s3258_s20 + $0x28] sm:$0xf] }
  0x50   : > { %1822 = vmatpush.bf16.msra.mxu0 %v3048_v41  ;;  %v2956_v41 = vld [vmem:[%s3258_s20 + $0x14c] sm:$0xf0]  ;;  %v2927_v21 = vld [vmem:[%s3258_s20 + $0x64] sm:$0xf0] }
  0x51   : > { %1851 = vmatpush.bf16.msra.mxu1 %v3056_v43  ;;  %v2291_v43 = vld [vmem:[%s3258_s20 + $0x150] sm:$0xf0] }
  0x52   : > { %1880 = vmatpush.bf16.msra.mxu2 %v3064_v40  ;;  %v2289_v40 = vld [vmem:[%s3258_s20 + $0x110] sm:$0xf] }
  0x53   : > { %1909 = vmatpush.bf16.msra.mxu3 %v3072_v42  ;;  %v2948_v42 = vld [vmem:[%s3258_s20 + $0x114] sm:$0xf]  ;;  %v2290_v48 = vor.u32 %v2956_v41, %v2289_v40 }
  0x54   : > { %1823 = vmatpush.bf16.msra.mxu0 %v3047_v57  ;;  %v2294_v49 = vor.u32 %v2948_v42, %v2291_v43  ;;  %v3089_v57 = vld [vmem:[%s3793_s1 + $0x378] sm:$0xff]  ;;  %v2241_v43 = vld [vmem:[%s3258_s20 + $0xa0] sm:$0xf] }
  0x55   : > { %1852 = vmatpush.bf16.msra.mxu1 %v3055_v59  ;;  %v3080_v59 = vld [vmem:[%s3793_s1 + $0x330] sm:$0xff] }
  0x56   : > { %1881 = vmatpush.bf16.msra.mxu2 %v3063_v56  ;;  %v2972_v56 = vld [vmem:[%s3258_s20 + $0x1cc] sm:$0xf0] }
  0x57   : > { %1910 = vmatpush.bf16.msra.mxu3 %v3071_v58  ;;  %v3096_v58 = vld [vmem:[%s3793_s1 + $0x3b0] sm:$0xff] }
  0x58   : > { %1824 = vmatpush.bf16.msra.mxu0 %v3046_v61  ;;  %v2964_v61 = vld [vmem:[%s3258_s20 + $0x194] sm:$0xf] }
  0x59   : > { %1853 = vmatpush.bf16.msra.mxu1 %v3054_v63  ;;  %v2361_v63 = vld [vmem:[%s3258_s20 + $0x198] sm:$0xf] }
  0x5a   : > { %1882 = vmatpush.bf16.msra.mxu2 %v3062_v60  ;;  %v3104_v60 = vld [vmem:[%s3793_s1 + $0x3f0] sm:$0xff]  ;;  %v2362_v5 = vor.u32 %v2973_v0, %v2361_v63 }
  0x5b   : > { %1612 = vmatmul.bf16.gmra.mxu0 %v2338_v52  ;;  %1911 = vmatpush.bf16.msra.mxu3 %v3070_v62  ;;  %v3097_v52 = vld [vmem:[%s3793_s1 + $0x3b8] sm:$0xff]  ;;  %v2355_v62 = vld [vmem:[%s3258_s20 + $0x1d0] sm:$0xf0] }
  0x5c   : > { %1641 = vmatmul.bf16.gmra.mxu1 %v2342_v53  ;;  %1825 = vmatpush.bf16.msra.mxu0 %v3045_v13  ;;  %v3081_v53 = vld [vmem:[%s3793_s1 + $0x338] sm:$0xff]  ;;  %v2358_v4 = vor.u32 %v2964_v61, %v2355_v62  ;;  %v3087_v13 = vld [vmem:[%s3793_s1 + $0x368] sm:$0xff] }
  0x5d   : > { %1670 = vmatmul.bf16.gmra.mxu2 %v2346_v54  ;;  %1854 = vmatpush.bf16.msra.mxu1 %v3053_v15  ;;  %v3105_v54 = vld [vmem:[%s3793_s1 + $0x3f8] sm:$0xff]  ;;  %v3094_v15 = vld [vmem:[%s3793_s1 + $0x3a0] sm:$0xff] }
  0x5e   : > { %1699 = vmatmul.bf16.gmra.mxu3 %v2350_v55  ;;  %1883 = vmatpush.bf16.msra.mxu2 %v3061_v12  ;;  %v2353_v55 = vld [vmem:[%s3258_s20 + $0x190] sm:$0xf]  ;;  %v2926_v12 = vld [vmem:[%s3258_s20 + $0x5c] sm:$0xf0] }
  0x5f   : > { %1912 = vmatpush.bf16.msra.mxu3 %v3069_v14  ;;  %v2354_v3 = vor.u32 %v2972_v56, %v2353_v55  ;;  %v3575_v14 = vld [vmem:[%s3794_s2] ss:$0 sm:$0xff]  ;;  %v2251_v55 = vld [vmem:[%s3258_s20 + $0xe8] sm:$0xf0] }
  0x60   : > { %1826 = vmatpush.bf16.msra.mxu0 %v3044_v17  ;;  %v3102_v17 = vld [vmem:[%s3793_s1 + $0x3e0] sm:$0xff] }
  0x61   : > { %1855 = vmatpush.bf16.msra.mxu1 %v3052_v19  ;;  %v2179_v19 = vld [vmem:[%s3258_s20 + $0x60] sm:$0xf0] }
  0x62   : > { %1884 = vmatpush.bf16.msra.mxu2 %v3060_v16  ;;  %v3078_v16 = vld [vmem:[%s3793_s1 + $0x320] sm:$0xff] }
  0x63   : > { %1913 = vmatpush.bf16.msra.mxu3 %v3068_v18  ;;  %v2918_v18 = vld [vmem:[%s3258_s20 + $0x24] sm:$0xf] }
  0x64   : > { %1827 = vmatpush.bf16.msra.mxu0 %v3043_v33  ;;  %v2182_v25 = vor.u32 %v2918_v18, %v2179_v19  ;;  %v3093_v33 = vld [vmem:[%s3793_s1 + $0x398] sm:$0xff]  ;;  %v3083_v18 = vld [vmem:[%s3793_s1 + $0x348] sm:$0xff] }
  0x65   : > { %1856 = vmatpush.bf16.msra.mxu1 %v3051_v35  ;;  %v3101_v35 = vld [vmem:[%s3793_s1 + $0x3d8] sm:$0xff] }
  0x66   : > { %1885 = vmatpush.bf16.msra.mxu2 %v3059_v32 }
  0x67   : > { %1914 = vmatpush.bf16.msra.mxu3 %v3067_v34  ;;  %v3077_v34 = vld [vmem:[%s3793_s1 + $0x318] sm:$0xff] }
  0x68   : > { %1828 = vmatpush.bf16.msra.mxu0 %v3042_v37 }
  0x69   : > { %1857 = vmatpush.bf16.msra.mxu1 %v3050_v39 }
  0x6a   : > { %1886 = vmatpush.bf16.msra.mxu2 %v3058_v36 }
  0x6b   : > { %1713 = vmatmul.bf16.vlgmr.msrb.gmra.mxu0 %v2162_v8  ;;  %1915 = vmatpush.bf16.msra.mxu3 %v3066_v38  ;;  %v3095_v8 = vld [vmem:[%s3793_s1 + $0x3a8] sm:$0xff] }
  0x6c   : > { %1742 = vmatmul.bf16.vlgmr.msrb.gmra.mxu1 %v2166_v9  ;;  %1937 = vmatpush.bf16.msrb.mxu0 %v3081_v53  ;;  %v3079_v9 = vld [vmem:[%s3793_s1 + $0x328] sm:$0xff] }
  0x6d   : > { %1771 = vmatmul.bf16.vlgmr.msrb.gmra.mxu2 %v2170_v10  ;;  %1966 = vmatpush.bf16.msrb.mxu1 %v3089_v57  ;;  %v3103_v10 = vld [vmem:[%s3793_s1 + $0x3e8] sm:$0xff] }
  0x6e   : > { %1800 = vmatmul.bf16.vlgmr.msrb.gmra.mxu3 %v2174_v11  ;;  %1995 = vmatpush.bf16.msrb.mxu2 %v3097_v52  ;;  %v2177_v11 = vld [vmem:[%s3258_s20 + $0x20] sm:$0xf]  ;;  %v2249_v52 = vld [vmem:[%s3258_s20 + $0xa8] sm:$0xf] }
  0x6f   : > { %2024 = vmatpush.bf16.msrb.mxu3 %v3105_v54  ;;  %v2178_v24 = vor.u32 %v2926_v12, %v2177_v11  ;;  %v2943_v53 = vld [vmem:[%s3258_s20 + $0xe4] sm:$0xf0]  ;;  %v2935_v54 = vld [vmem:[%s3258_s20 + $0xac] sm:$0xf] }
  0x70   : > { %1938 = vmatpush.bf16.msrb.mxu0 %v3080_v59  ;;  %v2250_v63 = vor.u32 %v2943_v53, %v2249_v52  ;;  %v2254_v0 = vor.u32 %v2935_v54, %v2251_v55  ;;  %v2974_v52 = vld [vmem:[%s3258_s20 + $0x1dc] sm:$0xf0]  ;;  %v2966_v53 = vld [vmem:[%s3258_s20 + $0x1a4] sm:$0xf]  ;;  %v2377_v55 = vld [vmem:[%s3258_s20 + $0x1a8] sm:$0xf] }
  0x71   : > { %1967 = vmatpush.bf16.msrb.mxu1 %v3088_v7  ;;  %v3099_v7 = vld [vmem:[%s3793_s1 + $0x3c8] sm:$0xff]  ;;  %v2371_v54 = vld [vmem:[%s3258_s20 + $0x1e0] sm:$0xf0] }
  0x72   : > { %1996 = vmatpush.bf16.msrb.mxu2 %v3096_v58  ;;  %v2242_v58 = vor.u32 %v2942_v44, %v2241_v43 }
  0x73   : > { %2025 = vmatpush.bf16.msrb.mxu3 %v3104_v60 }
  0x74   : > { %1939 = vmatpush.bf16.msrb.mxu0 %v3079_v9 }
  0x75   : > { %1968 = vmatpush.bf16.msrb.mxu1 %v3087_v13 }
  0x76   : > { %1997 = vmatpush.bf16.msrb.mxu2 %v3095_v8 }
  0x77   : > { %2026 = vmatpush.bf16.msrb.mxu3 %v3103_v10 }
  0x78   : > { %1940 = vmatpush.bf16.msrb.mxu0 %v3078_v16  ;;  %v2305_v16 = vld [vmem:[%s3258_s20 + $0x120] sm:$0xf] }
  0x7a   : > { %1998 = vmatpush.bf16.msrb.mxu2 %v3094_v15 }
  0x7b   : > { %1718 = vmatmul.bf16.gmra.mxu0 %v2226_v28  ;;  %2027 = vmatpush.bf16.msrb.mxu3 %v3102_v17  ;;  %v2186_v28 = vor.u32 %v2927_v21, %v2185_v20  ;;  %v2958_v17 = vld [vmem:[%s3258_s20 + $0x15c] sm:$0xf0] }
  0x7c   : > { %1747 = vmatmul.bf16.gmra.mxu1 %v2230_v29  ;;  %v2190_v29 = vor.u32 %v2919_v22, %v2187_v23  ;;  %1941 = vmatpush.bf16.msrb.mxu0 %v3077_v34  ;;  %v3090_v20 = vld [vmem:[%s3793_s1 + $0x380] sm:$0xff] }
  0x7d   : > { %1776 = vmatmul.bf16.gmra.mxu2 %v2234_v30  ;;  %v3074_v21 = vld [vmem:[%s3793_s1 + $0x300] sm:$0xff] }
  0x7e   : > { %1805 = vmatmul.bf16.gmra.mxu3 %v2238_v31  ;;  %v3086_v31 = vld [vmem:[%s3793_s1 + $0x360] sm:$0xff]  ;;  %1999 = vmatpush.bf16.msrb.mxu2 %v3093_v33 }
  0x7f   : > { %1969 = vmatpush.bf16.msrb.mxu1 %v3086_v31  ;;  %2028 = vmatpush.bf16.msrb.mxu3 %v3101_v35  ;;  %v3098_v22 = vld [vmem:[%s3793_s1 + $0x3c0] sm:$0xff]  ;;  %v2306_v31 = vor.u32 %v2958_v17, %v2305_v16 }
  0x80   : > { %v2950_v23 = vld [vmem:[%s3258_s20 + $0x124] sm:$0xf] }
  0x81   : > { %v3082_v33 = vld [vmem:[%s3793_s1 + $0x340] sm:$0xff] }
  0x82   : > { %2000 = vmatpush.bf16.msrb.mxu2 %v3092_v47 }
  0x83   : > { %1970 = vmatpush.bf16.msrb.mxu1 %v3085_v45 }
  0x8b   : > { %1723 = vmatmul.bf16.gmra.mxu0 %v2290_v48  ;;  %v3076_v48 = vld [vmem:[%s3793_s1 + $0x310] sm:$0xff] }
  0x8c   : > { %1752 = vmatmul.bf16.gmra.mxu1 %v2294_v49  ;;  %v3100_v49 = vld [vmem:[%s3793_s1 + $0x3d0] sm:$0xff]  ;;  %1942 = vmatpush.bf16.msrb.mxu0 %v3076_v48 }
  0x8d   : > { %1781 = vmatmul.bf16.gmra.mxu2 %v2298_v50  ;;  %v2934_v50 = vld [vmem:[%s3258_s20 + $0xa4] sm:$0xf]  ;;  %2029 = vmatpush.bf16.msrb.mxu3 %v3100_v49 }
  0x8e   : > { %1810 = vmatmul.bf16.gmra.mxu3 %v2302_v51  ;;  %v2243_v51 = vld [vmem:[%s3258_s20 + $0xe0] sm:$0xf0] }
  0x8f   : > { %v2246_v59 = vor.u32 %v2934_v50, %v2243_v51  ;;  %v2369_v51 = vld [vmem:[%s3258_s20 + $0x1a0] sm:$0xf] }
  0x91   : > { %2030 = vmatpush.bf16.msrb.mxu3 %v3099_v7 }
  0x95   : > { %2031 = vmatpush.bf16.msrb.mxu3 %v3098_v22  ;;  %v2201_v22 = vld [vmem:[%s3258_s20 + $0x38] sm:$0xf] }
  0x9b   : > { %1728 = vmatmul.bf16.gmra.mxu0 %v2354_v3  ;;  %v3084_v3 = vld [vmem:[%s3793_s1 + $0x350] sm:$0xff] }
  0x9c   : > { %1757 = vmatmul.bf16.gmra.mxu1 %v2358_v4 }
  0x9d   : > { %1786 = vmatmul.bf16.gmra.mxu2 %v2362_v5  ;;  %v3091_v5 = vld [vmem:[%s3793_s1 + $0x388] sm:$0xff]  ;;  %1971 = vmatpush.bf16.msrb.mxu1 %v3084_v3 }
  0x9e   : > { %1815 = vmatmul.bf16.gmra.mxu3 %v2366_v6  ;;  %v3075_v6 = vld [vmem:[%s3793_s1 + $0x308] sm:$0xff]  ;;  %2001 = vmatpush.bf16.msrb.mxu2 %v3091_v5 }
  0x9f   : > { %1943 = vmatpush.bf16.msrb.mxu0 %v3075_v6 }
  0xa1   : > { %1972 = vmatpush.bf16.msrb.mxu1 %v3083_v18  ;;  %v2193_v18 = vld [vmem:[%s3258_s20 + $0x30] sm:$0xf] }
  0xa2   : > { %2002 = vmatpush.bf16.msrb.mxu2 %v3090_v20  ;;  %v2920_v20 = vld [vmem:[%s3258_s20 + $0x34] sm:$0xf] }
  0xa3   : > { %1944 = vmatpush.bf16.msrb.mxu0 %v3074_v21  ;;  %v2195_v21 = vld [vmem:[%s3258_s20 + $0x70] sm:$0xf0] }
  0xa5   : > { %1973 = vmatpush.bf16.msrb.mxu1 %v3082_v33 }
  0xa8   : > { %v1598_v26 = vpop.f32.mrf.mxu0 }
  0xa9   : > { %v1627_v27 = vpop.f32.mrf.mxu1  ;;  %v1599_v30 = vadd.f32 %v3575_v14, %v1598_v26  ;;  %v2959_v26 = vld [vmem:[%s3258_s20 + $0x164] sm:$0xf0] }
  0xab   : > { %v1628_v32 = vadd.f32 %v1627_v27, %v1599_v30  ;;  %1829 = vmatmul.bf16.vlgmr.msra.gmra.mxu0 %v2178_v24  ;;  %v2307_v24 = vld [vmem:[%s3258_s20 + $0x160] sm:$0xf0]  ;;  %v2951_v27 = vld [vmem:[%s3258_s20 + $0x12c] sm:$0xf] }
  0xac   : > { %1858 = vmatmul.bf16.vlgmr.msra.gmra.mxu1 %v2182_v25  ;;  %v2313_v25 = vld [vmem:[%s3258_s20 + $0x128] sm:$0xf] }
  0xad   : > { %1887 = vmatmul.bf16.vlgmr.msra.gmra.mxu2 %v2186_v28  ;;  %v2315_v28 = vld [vmem:[%s3258_s20 + $0x168] sm:$0xf0] }
  0xae   : > { %1916 = vmatmul.bf16.vlgmr.msra.gmra.mxu3 %v2190_v29 }
  0xb0   : > { %v1656_v36 = vpop.f32.mrf.mxu2  ;;  %v1600_v39 = vpop.f32.mrf.mxu0 }
  0xb1   : > { %v1685_v37 = vpop.f32.mrf.mxu3  ;;  %v1657_v38 = vadd.f32 %v1656_v36, %v1628_v32  ;;  %v1629_v40 = vpop.f32.mrf.mxu1  ;;  %v1601_v41 = vadd.f32 %v3575_v14, %v1600_v39  ;;  %v2310_v32 = vor.u32 %v2950_v23, %v2307_v24  ;;  %v2929_v23 = vld [vmem:[%s3258_s20 + $0x74] sm:$0xf0]  ;;  %v2921_v24 = vld [vmem:[%s3258_s20 + $0x3c] sm:$0xf] }
  0xb2   : > { %v2202_v33 = vor.u32 %v2929_v23, %v2201_v22 }
  0xb3   : > { %v3606_v42 = vadd.f32 %v1685_v37, %v1657_v38  ;;  %v1630_v46 = vadd.f32 %v1629_v40, %v1601_v41  ;;  %v2314_v37 = vor.u32 %v2959_v26, %v2313_v25  ;;  %v2318_v38 = vor.u32 %v2951_v27, %v2315_v28  ;;  %v2203_v25 = vld [vmem:[%s3258_s20 + $0x78] sm:$0xf0] }
  0xb8   : > { %v1658_v56 = vpop.f32.mrf.mxu2  ;;  %v1603_v61 = vpop.f32.mrf.mxu0 }
  0xb9   : > { %v1687_v57 = vpop.f32.mrf.mxu3  ;;  %v1659_v60 = vadd.f32 %v1658_v56, %v1630_v46  ;;  %v1632_v62 = vpop.f32.mrf.mxu1  ;;  %v1604_v1 = vadd.f32 %v3575_v14, %v1603_v61  ;;  %v2975_v56 = vld [vmem:[%s3258_s20 + $0x1e4] sm:$0xf0]  ;;  %v2370_v61 = vor.u32 %v2974_v52, %v2369_v51  ;;  %v2265_v51 = vld [vmem:[%s3258_s20 + $0xb8] sm:$0xf] }
  0xba   : > { %v2378_v3 = vor.u32 %v2975_v56, %v2377_v55  ;;  %v2945_v52 = vld [vmem:[%s3258_s20 + $0xf4] sm:$0xf0] }
  0xbb   : > { %v3629_v2 = vadd.f32 %v1687_v57, %v1659_v60  ;;  %v1633_v4 = vadd.f32 %v1632_v62, %v1604_v1  ;;  %1834 = vmatmul.bf16.gmra.mxu0 %v2242_v58  ;;  %v2967_v57 = vld [vmem:[%s3258_s20 + $0x1ac] sm:$0xf]  ;;  %v2374_v62 = vor.u32 %v2966_v53, %v2371_v54  ;;  %v2937_v53 = vld [vmem:[%s3258_s20 + $0xbc] sm:$0xf] }
  0xbc   : > { %1863 = vmatmul.bf16.gmra.mxu1 %v2246_v59  ;;  %v2379_v58 = vld [vmem:[%s3258_s20 + $0x1e8] sm:$0xf0]  ;;  %v2267_v54 = vld [vmem:[%s3258_s20 + $0xf8] sm:$0xf0] }
  0xbd   : > { %1892 = vmatmul.bf16.gmra.mxu2 %v2250_v63 }
  0xbe   : > { %1921 = vmatmul.bf16.gmra.mxu3 %v2254_v0 }
  0xc0   : > { %v1661_v8 = vpop.f32.mrf.mxu2  ;;  %v1605_v11 = vpop.f32.mrf.mxu0 }
  0xc1   : > { %v1690_v9 = vpop.f32.mrf.mxu3  ;;  %v1662_v10 = vadd.f32 %v1661_v8, %v1633_v4  ;;  %v1634_v12 = vpop.f32.mrf.mxu1  ;;  %v1606_v13 = vadd.f32 %v3575_v14, %v1605_v11  ;;  %v2382_v4 = vor.u32 %v2967_v57, %v2379_v58 }
  0xc3   : > { %v3644_v15 = vadd.f32 %v1690_v9, %v1662_v10  ;;  %v1635_v19 = vadd.f32 %v1634_v12, %v1606_v13 }
  0xc8   : > { %v1663_v29 = vpop.f32.mrf.mxu2  ;;  %v1608_v35 = vpop.f32.mrf.mxu0 }
  0xc9   : > { %v1692_v30 = vpop.f32.mrf.mxu3  ;;  %v1664_v34 = vadd.f32 %v1663_v29, %v1635_v19  ;;  %v1637_v36 = vpop.f32.mrf.mxu1  ;;  %v1609_v39 = vadd.f32 %v3575_v14, %v1608_v35  ;;  %v2928_v19 = vld [vmem:[%s3258_s20 + $0x6c] sm:$0xf0]  ;;  %v2198_v29 = vor.u32 %v2920_v20, %v2195_v21  ;;  %v2953_v20 = vld [vmem:[%s3258_s20 + $0x13c] sm:$0xf] }
  0xca   : > { %v2194_v28 = vor.u32 %v2928_v19, %v2193_v18  ;;  %v2329_v18 = vld [vmem:[%s3258_s20 + $0x138] sm:$0xf]  ;;  %v2331_v21 = vld [vmem:[%s3258_s20 + $0x178] sm:$0xf0] }
  0xcb   : > { %v3670_v40 = vadd.f32 %v1692_v30, %v1664_v34  ;;  %v1638_v41 = vadd.f32 %v1637_v36, %v1609_v39  ;;  %1839 = vmatmul.bf16.gmra.mxu0 %v2306_v31  ;;  %v2961_v19 = vld [vmem:[%s3258_s20 + $0x174] sm:$0xf0] }
  0xcc   : > { %1868 = vmatmul.bf16.gmra.mxu1 %v2310_v32 }
  0xcd   : > { %1897 = vmatmul.bf16.gmra.mxu2 %v2314_v37 }
  0xce   : > { %1926 = vmatmul.bf16.gmra.mxu3 %v2318_v38 }
  0xd0   : > { %v1666_v43 = vpop.f32.mrf.mxu2  ;;  %v1610_v46 = vpop.f32.mrf.mxu0 }
  0xd1   : > { %v1695_v44 = vpop.f32.mrf.mxu3  ;;  %v1667_v45 = vadd.f32 %v1666_v43, %v1638_v41  ;;  %v1639_v47 = vpop.f32.mrf.mxu1  ;;  %v1611_v48 = vadd.f32 %v3575_v14, %v1610_v46  ;;  %v2257_v46 = vld [vmem:[%s3258_s20 + $0xb0] sm:$0xf] }
  0xd3   : > { %v3673_v49 = vadd.f32 %v1695_v44, %v1667_v45  ;;  %v1640_v50 = vadd.f32 %v1639_v47, %v1611_v48  ;;  %v2944_v47 = vld [vmem:[%s3258_s20 + $0xec] sm:$0xf0]  ;;  %v2936_v48 = vld [vmem:[%s3258_s20 + $0xb4] sm:$0xf] }
  0xd4   : > { %v2258_v57 = vor.u32 %v2944_v47, %v2257_v46  ;;  %v2393_v46 = vld [vmem:[%s3258_s20 + $0x1b8] sm:$0xf] }
  0xd5   : > { %v2977_v47 = vld [vmem:[%s3258_s20 + $0x1f4] sm:$0xf0] }
  0xd8   : > { %v1668_v59 = vpop.f32.mrf.mxu2  ;;  %v1613_v0 = vpop.f32.mrf.mxu0 }
  0xd9   : > { %v1697_v60 = vpop.f32.mrf.mxu3  ;;  %v1669_v63 = vadd.f32 %v1668_v59, %v1640_v50  ;;  %v1642_v1 = vpop.f32.mrf.mxu1  ;;  %v1614_v5 = vadd.f32 %v3575_v14, %v1613_v0  ;;  %v2259_v50 = vld [vmem:[%s3258_s20 + $0xf0] sm:$0xf0] }
  0xda   : > { %v2262_v58 = vor.u32 %v2936_v48, %v2259_v50  ;;  %v2969_v48 = vld [vmem:[%s3258_s20 + $0x1bc] sm:$0xf] }
  0xdb   : > { %v3684_v6 = vadd.f32 %v1697_v60, %v1669_v63  ;;  %v1643_v7 = vadd.f32 %v1642_v1, %v1614_v5  ;;  %1844 = vmatmul.bf16.gmra.mxu0 %v2370_v61  ;;  %v2395_v50 = vld [vmem:[%s3258_s20 + $0x1f8] sm:$0xf0] }
  0xdc   : > { %1873 = vmatmul.bf16.gmra.mxu1 %v2374_v62  ;;  %v2266_v62 = vor.u32 %v2945_v52, %v2265_v51 }
  0xdd   : > { %1902 = vmatmul.bf16.gmra.mxu2 %v2378_v3 }
  0xde   : > { %1931 = vmatmul.bf16.gmra.mxu3 %v2382_v4 }
  0xe0   : > { %v1671_v8 = vpop.f32.mrf.mxu2  ;;  %v1615_v11 = vpop.f32.mrf.mxu0 }
  0xe1   : > { %v1700_v9 = vpop.f32.mrf.mxu3  ;;  %v1672_v10 = vadd.f32 %v1671_v8, %v1643_v7  ;;  %v1644_v12 = vpop.f32.mrf.mxu1  ;;  %v1616_v13 = vadd.f32 %v3575_v14, %v1615_v11  ;;  %v2206_v14 = vor.u32 %v2921_v24, %v2203_v25  ;;  %v2321_v11 = vld [vmem:[%s3258_s20 + $0x130] sm:$0xf] }
  0xe3   : > { %v3687_v16 = vadd.f32 %v1700_v9, %v1672_v10  ;;  %v1645_v17 = vadd.f32 %v1644_v12, %v1616_v13  ;;  %v2960_v12 = vld [vmem:[%s3258_s20 + $0x16c] sm:$0xf0]  ;;  %v2952_v13 = vld [vmem:[%s3258_s20 + $0x134] sm:$0xf] }
  0xe4   : > { %v2322_v24 = vor.u32 %v2960_v12, %v2321_v11 }
  0xe8   : > { %v1673_v26 = vpop.f32.mrf.mxu2  ;;  %v1714_v31 = vpop.f32.mrf.mxu0 }
  0xe9   : > { %v1702_v27 = vpop.f32.mrf.mxu3  ;;  %v1674_v30 = vadd.f32 %v1673_v26, %v1645_v17  ;;  %v1743_v32 = vpop.f32.mrf.mxu1  ;;  %v1715_v34 = vadd.f32 %v1714_v31, %v3606_v42  ;;  %v2323_v17 = vld [vmem:[%s3258_s20 + $0x170] sm:$0xf0] }
  0xea   : > { %v2326_v25 = vor.u32 %v2952_v13, %v2323_v17 }
  0xeb   : > { %v3698_v35 = vadd.f32 %v1702_v27, %v1674_v30  ;;  %v1744_v36 = vadd.f32 %v1743_v32, %v1715_v34  ;;  %1945 = vmatmul.bf16.vlgmr.msrb.gmra.mxu0 %v2194_v28 }
  0xec   : > { %1974 = vmatmul.bf16.vlgmr.msrb.gmra.mxu1 %v2198_v29  ;;  %v2330_v29 = vor.u32 %v2961_v19, %v2329_v18 }
  0xed   : > { %2003 = vmatmul.bf16.vlgmr.msrb.gmra.mxu2 %v2202_v33 }
  0xee   : > { %2032 = vmatmul.bf16.vlgmr.msrb.gmra.mxu3 %v2206_v14 }
  0xf0   : > { %v1772_v37 = vpop.f32.mrf.mxu2  ;;  %v1716_v41 = vpop.f32.mrf.mxu0 }
  0xf1   : > { %v1801_v38 = vpop.f32.mrf.mxu3  ;;  %v1773_v39 = vadd.f32 %v1772_v37, %v1744_v36  ;;  %v1745_v43 = vpop.f32.mrf.mxu1  ;;  %v1717_v42 = vadd.f32 %v1716_v41, %v3629_v2  ;;  %v2270_v2 = vor.u32 %v2937_v53, %v2267_v54  ;;  %v2385_v41 = vld [vmem:[%s3258_s20 + $0x1b0] sm:$0xf] }
  0xf3   : > { %v3701_v44 = vadd.f32 %v1801_v38, %v1773_v39  ;;  %v1746_v45 = vadd.f32 %v1745_v43, %v1717_v42  ;;  %v2976_v43 = vld [vmem:[%s3258_s20 + $0x1ec] sm:$0xf0]  ;;  %v2968_v42 = vld [vmem:[%s3258_s20 + $0x1b4] sm:$0xf] }
  0xf4   : > { %v2386_v53 = vor.u32 %v2976_v43, %v2385_v41 }
  0xf8   : > { %v1774_v55 = vpop.f32.mrf.mxu2  ;;  %v1719_v60 = vpop.f32.mrf.mxu0 }
  0xf9   : > { %v1803_v56 = vpop.f32.mrf.mxu3  ;;  %v1775_v59 = vadd.f32 %v1774_v55, %v1746_v45  ;;  %v1748_v61 = vpop.f32.mrf.mxu1  ;;  %v1720_v63 = vadd.f32 %v1719_v60, %v3644_v15  ;;  %v2387_v45 = vld [vmem:[%s3258_s20 + $0x1f0] sm:$0xf0]  ;;  %s2142_s20 = sshll.u32 %s3797_s11, 2 }
  0xfa   : > { %v2390_v54 = vor.u32 %v2968_v42, %v2387_v45  ;;  %s3772_s9 = scalar_lea.vmem %s3795_s3, %s2142_s20 }
  0xfb   : > { %v3712_v0 = vadd.f32 %v1803_v56, %v1775_v59  ;;  %v1749_v1 = vadd.f32 %v1748_v61, %v1720_v63  ;;  %1950 = vmatmul.bf16.gmra.mxu0 %v2258_v57 }
  0xfc   : > { %1979 = vmatmul.bf16.gmra.mxu1 %v2262_v58  ;;  %v2394_v58 = vor.u32 %v2977_v47, %v2393_v46 }
  0xfd   : > { %2008 = vmatmul.bf16.gmra.mxu2 %v2266_v62 }
  0xfe   : > { %2037 = vmatmul.bf16.gmra.mxu3 %v2270_v2 }
 0x100   : > { %v1777_v3 = vpop.f32.mrf.mxu2  ;;  %v1721_v7 = vpop.f32.mrf.mxu0 }
 0x101   : > { %v1806_v4 = vpop.f32.mrf.mxu3  ;;  %v1778_v5 = vadd.f32 %v1777_v3, %v1749_v1  ;;  %v1750_v8 = vpop.f32.mrf.mxu1  ;;  %v1722_v15 = vadd.f32 %v1721_v7, %v3670_v40  ;;  %v2334_v40 = vor.u32 %v2953_v20, %v2331_v21 }
 0x103   : > { %v3715_v9 = vadd.f32 %v1806_v4, %v1778_v5  ;;  %v1751_v10 = vadd.f32 %v1750_v8, %v1722_v15 }
 0x108   : > { %v1779_v22 = vpop.f32.mrf.mxu2  ;;  %v1724_v27 = vpop.f32.mrf.mxu0 }
 0x109   : > { %v1808_v23 = vpop.f32.mrf.mxu3  ;;  %v1780_v26 = vadd.f32 %v1779_v22, %v1751_v10  ;;  %v1753_v28 = vpop.f32.mrf.mxu1  ;;  %v1725_v30 = vadd.f32 %v1724_v27, %v3673_v49 }
 0x10b   : > { %v3726_v31 = vadd.f32 %v1808_v23, %v1780_v26  ;;  %v1754_v32 = vadd.f32 %v1753_v28, %v1725_v30  ;;  %1955 = vmatmul.bf16.gmra.mxu0 %v2322_v24 }
 0x10c   : > { %1984 = vmatmul.bf16.gmra.mxu1 %v2326_v25 }
 0x10d   : > { %2013 = vmatmul.bf16.gmra.mxu2 %v2330_v29 }
 0x10e   : > { %2042 = vmatmul.bf16.gmra.mxu3 %v2334_v40 }
 0x110   : > { %v1782_v33 = vpop.f32.mrf.mxu2  ;;  %v1726_v36 = vpop.f32.mrf.mxu0 }
 0x111   : > { %v1811_v14 = vpop.f32.mrf.mxu3  ;;  %v1783_v34 = vadd.f32 %v1782_v33, %v1754_v32  ;;  %v1755_v37 = vpop.f32.mrf.mxu1  ;;  %v1727_v49 = vadd.f32 %v1726_v36, %v3684_v6  ;;  %v2398_v6 = vor.u32 %v2969_v48, %v2395_v50 }
 0x113   : > { %v3729_v38 = vadd.f32 %v1811_v14, %v1783_v34  ;;  %v1756_v39 = vadd.f32 %v1755_v37, %v1727_v49 }
 0x118   : > { %v1784_v51 = vpop.f32.mrf.mxu2  ;;  %v1729_v56 = vpop.f32.mrf.mxu0 }
 0x119   : > { %v1813_v52 = vpop.f32.mrf.mxu3  ;;  %v1785_v55 = vadd.f32 %v1784_v51, %v1756_v39  ;;  %v1758_v57 = vpop.f32.mrf.mxu1  ;;  %v1730_v59 = vadd.f32 %v1729_v56, %v3687_v16 }
 0x11b   : > { %v3740_v60 = vadd.f32 %v1813_v52, %v1785_v55  ;;  %v1759_v61 = vadd.f32 %v1758_v57, %v1730_v59  ;;  %1960 = vmatmul.bf16.gmra.mxu0 %v2386_v53 }
 0x11c   : > { %1989 = vmatmul.bf16.gmra.mxu1 %v2390_v54 }
 0x11d   : > { %2018 = vmatmul.bf16.gmra.mxu2 %v2394_v58 }
 0x11e   : > { %2047 = vmatmul.bf16.gmra.mxu3 %v2398_v6 }
 0x120   : > { %v1787_v62 = vpop.f32.mrf.mxu2  ;;  %v1731_v1 = vpop.f32.mrf.mxu0 }
 0x121   : > { %v1816_v2 = vpop.f32.mrf.mxu3  ;;  %v1788_v63 = vadd.f32 %v1787_v62, %v1759_v61  ;;  %v1760_v3 = vpop.f32.mrf.mxu1  ;;  %v1732_v4 = vadd.f32 %v1731_v1, %v3698_v35 }
 0x123   : > { %v1817_v5 = vadd.f32 %v1816_v2, %v1788_v63  ;;  %v1761_v7 = vadd.f32 %v1760_v3, %v1732_v4 }
 0x128   : > { %v1789_v8 = vpop.f32.mrf.mxu2  ;;  %v1830_v16 = vpop.f32.mrf.mxu0 }
 0x129   : > { %v1818_v15 = vpop.f32.mrf.mxu3  ;;  %v1790_v10 = vadd.f32 %v1789_v8, %v1761_v7  ;;  %v1859_v11 = vpop.f32.mrf.mxu1  ;;  %v1831_v12 = vadd.f32 %v1830_v16, %v3701_v44 }
 0x12b   : > { %v3744_v13 = vadd.f32 %v1818_v15, %v1790_v10  ;;  %v1860_v17 = vadd.f32 %v1859_v11, %v1831_v12 }
 0x130   : > { %v1888_v18 = vpop.f32.mrf.mxu2  ;;  %v1832_v21 = vpop.f32.mrf.mxu0 }
 0x131   : > { %v1917_v19 = vpop.f32.mrf.mxu3  ;;  %v1889_v20 = vadd.f32 %v1888_v18, %v1860_v17  ;;  %v1861_v22 = vpop.f32.mrf.mxu1  ;;  %v1833_v6 = vadd.f32 %v1832_v21, %v3712_v0 }
 0x133   : > { %v1918_v23 = vadd.f32 %v1917_v19, %v1889_v20  ;;  %v1862_v63 = vadd.f32 %v1861_v22, %v1833_v6 }
 0x138   : > { %v1890_v24 = vpop.f32.mrf.mxu2  ;;  %v1835_v25 = vpop.f32.mrf.mxu0 }
 0x139   : > { %v1919_v35 = vpop.f32.mrf.mxu3  ;;  %v1864_v26 = vpop.f32.mrf.mxu1  ;;  %v1836_v27 = vadd.f32 %v1835_v25, %v3715_v9  ;;  %v1891_v1 = vadd.f32 %v1890_v24, %v1862_v63 }
 0x13b   : > { %v1865_v28 = vadd.f32 %v1864_v26, %v1836_v27  ;;  %v1920_v7 = vadd.f32 %v1919_v35, %v1891_v1 }
 0x140   : > { %v1893_v29 = vpop.f32.mrf.mxu2  ;;  %v1837_v44 = vpop.f32.mrf.mxu0 }
 0x141   : > { %v1922_v40 = vpop.f32.mrf.mxu3  ;;  %v1894_v30 = vadd.f32 %v1893_v29, %v1865_v28  ;;  %v1866_v32 = vpop.f32.mrf.mxu1  ;;  %v1838_v0 = vadd.f32 %v1837_v44, %v3726_v31 }
 0x143   : > { %v1923_v33 = vadd.f32 %v1922_v40, %v1894_v30  ;;  %v1867_v24 = vadd.f32 %v1866_v32, %v1838_v0 }
 0x148   : > { %v1895_v14 = vpop.f32.mrf.mxu2  ;;  %v1840_v36 = vpop.f32.mrf.mxu0 }
 0x149   : > { %v1924_v34 = vpop.f32.mrf.mxu3  ;;  %v1869_v37 = vpop.f32.mrf.mxu1  ;;  %v1841_v49 = vadd.f32 %v1840_v36, %v3729_v38  ;;  %v1896_v25 = vadd.f32 %v1895_v14, %v1867_v24 }
 0x14b   : > { %v1870_v39 = vadd.f32 %v1869_v37, %v1841_v49  ;;  %v1925_v40 = vadd.f32 %v1924_v34, %v1896_v25 }
 0x150   : > { %v1898_v41 = vpop.f32.mrf.mxu2  ;;  %v1842_v45 = vpop.f32.mrf.mxu0 }
 0x151   : > { %v1927_v43 = vpop.f32.mrf.mxu3  ;;  %v1899_v42 = vadd.f32 %v1898_v41, %v1870_v39  ;;  %v3748_v46 = vpop.f32.mrf.mxu1  ;;  %v1843_v14 = vadd.f32 %v1842_v45, %v3740_v60 }
 0x153   : > { %v3750_v9 = vadd.f32 %v1927_v43, %v1899_v42 }
 0x158   : > { %v3752_v47 = vpop.f32.mrf.mxu2  ;;  %v1845_v50 = vpop.f32.mrf.mxu0 }
 0x159   : > { %v3754_v48 = vpop.f32.mrf.mxu3  ;;  %v1874_v51 = vpop.f32.mrf.mxu1  ;;  %v1846_v52 = vadd.f32 %v1845_v50, %v1817_v5 }
 0x15b   : > { %v1875_v53 = vadd.f32 %v1874_v51, %v1846_v52 }
 0x160   : > { %v1903_v54 = vpop.f32.mrf.mxu2  ;;  %v3756_v56 = vpop.f32.mrf.mxu0 }
 0x161   : > { %v1932_v55 = vpop.f32.mrf.mxu3  ;;  %v1904_v38 = vadd.f32 %v1903_v54, %v1875_v53  ;;  %v3758_v57 = vpop.f32.mrf.mxu1 }
 0x163   : > { %v3760_v58 = vadd.f32 %v1932_v55, %v1904_v38 }
 0x168   : > { %v3763_v59 = vpop.f32.mrf.mxu2  ;;  %v1946_v62 = vpop.f32.mrf.mxu0 }
 0x169   : > { %v3765_v61 = vpop.f32.mrf.mxu3  ;;  %v1975_v2 = vpop.f32.mrf.mxu1  ;;  %v1947_v3 = vadd.f32 %v1946_v62, %v1918_v23 }
 0x16b   : > { %v1976_v10 = vadd.f32 %v1975_v2, %v1947_v3 }
 0x170   : > { %v2004_v4 = vpop.f32.mrf.mxu2  ;;  %v1948_v8 = vpop.f32.mrf.mxu0 }
 0x171   : > { %v2033_v5 = vpop.f32.mrf.mxu3  ;;  %v1977_v15 = vpop.f32.mrf.mxu1  ;;  %v1949_v16 = vadd.f32 %v1948_v8, %v1920_v7  ;;  %v2005_v11 = vadd.f32 %v2004_v4, %v1976_v10 }
 0x173   : > { %v1978_v12 = vadd.f32 %v1977_v15, %v1949_v16  ;;  %v2034_v19 = vadd.f32 %v2033_v5, %v2005_v11 }
 0x175   : > { %v2053_v26 = vmax.f32 %v2034_v19, 0.0 }
 0x178   : > { %v2006_v17 = vpop.f32.mrf.mxu2  ;;  %v1951_v21 = vpop.f32.mrf.mxu0 }
 0x179   : > { %v2035_v18 = vpop.f32.mrf.mxu3  ;;  %v2007_v20 = vadd.f32 %v2006_v17, %v1978_v12  ;;  %v1980_v22 = vpop.f32.mrf.mxu1  ;;  %v1952_v27 = vadd.f32 %v1951_v21, %v1923_v33  ;;  %v1872_v33 = vadd.f32 %v3748_v46, %v1843_v14  ;;  %v1848_v46 = vadd.f32 %v3756_v56, %v3744_v13 }
 0x17b   : > { %v2036_v23 = vadd.f32 %v2035_v18, %v2007_v20  ;;  %v1981_v32 = vadd.f32 %v1980_v22, %v1952_v27  ;;  %v1901_v34 = vadd.f32 %v3752_v47, %v1872_v33  ;;  %v1877_v15 = vadd.f32 %v3758_v57, %v1848_v46 }
 0x17d   : > { %v2054_v35 = vmax.f32 %v2036_v23, 0.0  ;;  %v1930_v45 = vadd.f32 %v3754_v48, %v1901_v34  ;;  %v1906_v16 = vadd.f32 %v3763_v59, %v1877_v15 }
 0x17f   : > { %v3109_v31 = vpack.c.bf16 %v2054_v35, %v2053_v26  ;;  %v1935_v56 = vadd.f32 %v3765_v61, %v1906_v16 }
 0x180   : > { %v2009_v28 = vpop.f32.mrf.mxu2  ;;  %v1953_v30 = vpop.f32.mrf.mxu0 }
 0x181   : > { %v2038_v29 = vpop.f32.mrf.mxu3  ;;  %3110 = vst [vmem:[%s3772_s9] sm:$0xff] %v3109_v31   ;;  %v1982_v44 = vpop.f32.mrf.mxu1  ;;  %v1954_v36 = vadd.f32 %v1953_v30, %v1925_v40  ;;  %v2010_v37 = vadd.f32 %v2009_v28, %v1981_v32 }
 0x183   : > { %v1983_v49 = vadd.f32 %v1982_v44, %v1954_v36  ;;  %v2039_v43 = vadd.f32 %v2038_v29, %v2010_v37 }
 0x185   : > { %v2055_v53 = vmax.f32 %v2039_v43, 0.0 }
 0x188   : > { %v2011_v39 = vpop.f32.mrf.mxu2  ;;  %v1956_v50 = vpop.f32.mrf.mxu0 }
 0x189   : > { %v2040_v41 = vpop.f32.mrf.mxu3  ;;  %v2012_v42 = vadd.f32 %v2011_v39, %v1983_v49  ;;  %v1985_v51 = vpop.f32.mrf.mxu1  ;;  %v1957_v38 = vadd.f32 %v1956_v50, %v3750_v9 }
 0x18b   : > { %v2041_v52 = vadd.f32 %v2040_v41, %v2012_v42  ;;  %v1986_v63 = vadd.f32 %v1985_v51, %v1957_v38 }
 0x18d   : > { %v2056_v54 = vmax.f32 %v2041_v52, 0.0 }
 0x18f   : > { %v3114_v55 = vpack.c.bf16 %v2056_v54, %v2055_v53 }
 0x190   : > { %v2014_v6 = vpop.f32.mrf.mxu2  ;;  %v1958_v62 = vpop.f32.mrf.mxu0 }
 0x191   : > { %v2043_v60 = vpop.f32.mrf.mxu3  ;;  %3126 = vst [vmem:[%s3772_s9 + $0x8] sm:$0xff] %v3114_v55   ;;  %v1987_v2 = vpop.f32.mrf.mxu1  ;;  %v1959_v1 = vadd.f32 %v1958_v62, %v1930_v45  ;;  %v2015_v3 = vadd.f32 %v2014_v6, %v1986_v63 }
 0x193   : > { %v1988_v4 = vadd.f32 %v1987_v2, %v1959_v1  ;;  %v2044_v7 = vadd.f32 %v2043_v60, %v2015_v3 }
 0x195   : > { %v2057_v11 = vmax.f32 %v2044_v7, 0.0 }
 0x198   : > { %v2016_v47 = vpop.f32.mrf.mxu2  ;;  %v1961_v9 = vpop.f32.mrf.mxu0 }
 0x199   : > { %v2045_v5 = vpop.f32.mrf.mxu3  ;;  %v2017_v8 = vadd.f32 %v2016_v47, %v1988_v4  ;;  %v1990_v48 = vpop.f32.mrf.mxu1  ;;  %v1962_v17 = vadd.f32 %v1961_v9, %v3760_v58 }
 0x19b   : > { %v2046_v10 = vadd.f32 %v2045_v5, %v2017_v8  ;;  %v1991_v20 = vadd.f32 %v1990_v48, %v1962_v17 }
 0x19d   : > { %v2058_v0 = vmax.f32 %v2046_v10, 0.0 }
 0x19f   : > { %v3119_v12 = vpack.c.bf16 %v2058_v0, %v2057_v11 }
 0x1a0   : > { %v2019_v18 = vpop.f32.mrf.mxu2  ;;  %v1963_v19 = vpop.f32.mrf.mxu0 }
 0x1a1   : > { %v2048_v13 = vpop.f32.mrf.mxu3  ;;  %3127 = vst [vmem:[%s3772_s9 + $0x10] sm:$0xff] %v3119_v12   ;;  %v1964_v21 = vadd.f32 %v1963_v19, %v1935_v56  ;;  %v2020_v22 = vadd.f32 %v2019_v18, %v1991_v20  ;;  %v1992_v57 = vpop.f32.mrf.mxu1 }
 0x1a3   : > { %v1993_v24 = vadd.f32 %v1992_v57, %v1964_v21  ;;  %v2049_v25 = vadd.f32 %v2048_v13, %v2020_v22 }
 0x1a5   : > { %v2059_v31 = vmax.f32 %v2049_v25, 0.0 }
 0x1a8   : > { %v2021_v23 = vpop.f32.mrf.mxu2 }
 0x1a9   : > { %v2022_v59 = vadd.f32 %v2021_v23, %v1993_v24  ;;  %v2050_v26 = vpop.f32.mrf.mxu3 }
 0x1ab   : > { %v2051_v35 = vadd.f32 %v2050_v26, %v2022_v59 }
 0x1ad   : > { %v2060_v27 = vmax.f32 %v2051_v35, 0.0 }
 0x1af   : > { %v3124_v58 = vpack.c.bf16 %v2060_v27, %v2059_v31 }
 0x1b1   : > { %3128 = vst [vmem:[%s3772_s9 + $0x18] sm:$0xff] %v3124_v58  }
 0x1b2 PF: > { %s13_s12 = sadd.s32 1, %s3144_s12  }
 0x1b3   : > { %p10_p4 = scmp.ge.s32.totalorder %s13_s12, 4  }
 0x1b5   :  { %12 = sbr.rel (!%p10_p4) target bundleno = 1 (0x1), region = 62 }

// kernel: vae_conceptizer_forward.11
= control target key start
LH: loop header
LB: loop body
LE: loop exit
PB: predicated region body
PF: predicated region fallthrough
CT: control target
= control target key end

     0   :  { %s1470_s12 = smov 0   ;;  %s1720_s0 = inlined_call_operand.vmem [shape: bf16[64,1024], index: 0, kind: input, shape index: {}]   ;;  %s1721_s1 = inlined_call_operand.vmem [shape: bf16[1024,128], index: 1, kind: input, shape index: {}]   ;;  %s1722_s2 = inlined_call_operand.vmem [shape: f32[1,128], index: 2, kind: input, shape index: {}]   ;;  %s1723_s3 = inlined_call_operand.vmem [shape: bf16[64,128], index: 3, kind: output, shape index: {}]  }
   0x1 LB: > { %s1009_s13 = sadd.s32 4294967295, %s1448_s12   ;;  %p1013_p0 = scmp.ge.s32.totalorder %s1448_s12, 1  ;;  %s1448_s12 = sphi %s1470_s12, %s13_s12  }
   0x2   : > { %p139_p1 = scmp.lt.s32.totalorder %s1448_s12, 3 }
   0x4   : > { %p140_p2 = pnand %p1013_p0, %p139_p1 }
   0x5   : > { %s1014_s11 = sshll.u32 (!%p140_p2), %s1009_s13, 2 }
   0x6   : > { %143 = sbr.rel (%p140_p2) target bundleno = 242 (0xf2), region = 32  ;;  %p165_p3 = scmp.lt.s32.totalorder (!%p140_p2), %s1014_s11, 7 }
   0xb   : > { %v1365_v0 = vld [vmem:[%s1721_s1 + $0x38] sm:$0xff]  ;;  %v1364_v4 = vld [vmem:[%s1721_s1 + $0x30] sm:$0xff]  ;;  %v1363_v8 = vld [vmem:[%s1721_s1 + $0x28] sm:$0xff]  ;;  %s1725_s11 = smov (!%p165_p3, %s1014_s11), 7 }
   0xc   : > { %v1373_v1 = vld [vmem:[%s1721_s1 + $0x78] sm:$0xff]  ;;  %789 = vmatpush.bf16.msra.mxu0 %v1365_v0  ;;  %v1372_v5 = vld [vmem:[%s1721_s1 + $0x70] sm:$0xff]  ;;  %v1371_v9 = vld [vmem:[%s1721_s1 + $0x68] sm:$0xff]  ;;  %s1341_s10 = sshll.u32 %s1725_s11, 5  ;;  %s1018_s25 = sshll.u32 %s1725_s11, 2 }
   0xd   : > { %v1381_v2 = vld [vmem:[%s1721_s1 + $0xb8] sm:$0xff]  ;;  %808 = vmatpush.bf16.msra.mxu1 %v1373_v1  ;;  %v1380_v6 = vld [vmem:[%s1721_s1 + $0xb0] sm:$0xff]  ;;  %v1379_v10 = vld [vmem:[%s1721_s1 + $0xa8] sm:$0xff]  ;;  %s1562_s20 = scalar_lea.vmem %s1720_s0, %s1341_s10  ;;  %s175_s28 = scalar_lea.vmem %s1723_s3, %s1018_s25 }
   0xe   : > { %v1389_v3 = vld [vmem:[%s1721_s1 + $0xf8] sm:$0xff]  ;;  %827 = vmatpush.bf16.msra.mxu2 %v1381_v2  ;;  %v1388_v7 = vld [vmem:[%s1721_s1 + $0xf0] sm:$0xff]  ;;  %v1387_v11 = vld [vmem:[%s1721_s1 + $0xe8] sm:$0xff] }
   0xf   : > { %846 = vmatpush.bf16.msra.mxu3 %v1389_v3  ;;  %v1362_v12 = vld [vmem:[%s1721_s1 + $0x20] sm:$0xff]  ;;  %v1361_v16 = vld [vmem:[%s1721_s1 + $0x18] sm:$0xff]  ;;  %v1360_v20 = vld [vmem:[%s1721_s1 + $0x10] sm:$0xff] }
  0x10   : > { %790 = vmatpush.bf16.msra.mxu0 %v1364_v4  ;;  %v1370_v13 = vld [vmem:[%s1721_s1 + $0x60] sm:$0xff]  ;;  %v1369_v17 = vld [vmem:[%s1721_s1 + $0x58] sm:$0xff]  ;;  %v1368_v21 = vld [vmem:[%s1721_s1 + $0x50] sm:$0xff] }
  0x11   : > { %809 = vmatpush.bf16.msra.mxu1 %v1372_v5  ;;  %v1378_v14 = vld [vmem:[%s1721_s1 + $0xa0] sm:$0xff]  ;;  %v1377_v18 = vld [vmem:[%s1721_s1 + $0x98] sm:$0xff]  ;;  %v1376_v22 = vld [vmem:[%s1721_s1 + $0x90] sm:$0xff] }
  0x12   : > { %828 = vmatpush.bf16.msra.mxu2 %v1380_v6  ;;  %v1386_v15 = vld [vmem:[%s1721_s1 + $0xe0] sm:$0xff]  ;;  %v1385_v19 = vld [vmem:[%s1721_s1 + $0xd8] sm:$0xff]  ;;  %v1384_v23 = vld [vmem:[%s1721_s1 + $0xd0] sm:$0xff] }
  0x13   : > { %847 = vmatpush.bf16.msra.mxu3 %v1388_v7  ;;  %v1359_v24 = vld [vmem:[%s1721_s1 + $0x8] sm:$0xff]  ;;  %v1358_v28 = vld [vmem:[%s1721_s1] sm:$0xff]  ;;  %v1413_v40 = vld [vmem:[%s1721_s1 + $0x1b8] sm:$0xff] }
  0x14   : > { %791 = vmatpush.bf16.msra.mxu0 %v1363_v8  ;;  %v1367_v25 = vld [vmem:[%s1721_s1 + $0x48] sm:$0xff]  ;;  %v1366_v29 = vld [vmem:[%s1721_s1 + $0x40] sm:$0xff]  ;;  %v1397_v41 = vld [vmem:[%s1721_s1 + $0x138] sm:$0xff] }
  0x15   : > { %810 = vmatpush.bf16.msra.mxu1 %v1371_v9  ;;  %v1375_v26 = vld [vmem:[%s1721_s1 + $0x88] sm:$0xff]  ;;  %v1374_v30 = vld [vmem:[%s1721_s1 + $0x80] sm:$0xff]  ;;  %v1405_v46 = vld [vmem:[%s1721_s1 + $0x178] sm:$0xff] }
  0x16   : > { %829 = vmatpush.bf16.msra.mxu2 %v1379_v10  ;;  %v1383_v27 = vld [vmem:[%s1721_s1 + $0xc8] sm:$0xff]  ;;  %v1382_v31 = vld [vmem:[%s1721_s1 + $0xc0] sm:$0xff]  ;;  %v1421_v47 = vld [vmem:[%s1721_s1 + $0x1f8] sm:$0xff] }
  0x17   : > { %848 = vmatpush.bf16.msra.mxu3 %v1387_v11  ;;  %v1021_v32 = vld [vmem:[%s1562_s20] sm:$0xf]  ;;  %v1342_v34 = vld [vmem:[%s1562_s20 + $0x4] sm:$0xf]  ;;  %v1029_v36 = vld [vmem:[%s1562_s20 + $0x8] sm:$0xf] }
  0x18   : > { %792 = vmatpush.bf16.msra.mxu0 %v1362_v12  ;;  %v1346_v33 = vld [vmem:[%s1562_s20 + $0x1c] sm:$0xf0]  ;;  %v1023_v35 = vld [vmem:[%s1562_s20 + $0x20] sm:$0xf0]  ;;  %v1347_v37 = vld [vmem:[%s1562_s20 + $0x24] sm:$0xf0] }
  0x19   : > { %811 = vmatpush.bf16.msra.mxu1 %v1370_v13  ;;  %v1343_v38 = vld [vmem:[%s1562_s20 + $0xc] sm:$0xf]  ;;  %v1022_v42 = vor.u32 %v1346_v33, %v1021_v32  ;;  %v1026_v43 = vor.u32 %v1342_v34, %v1023_v35  ;;  %v1030_v44 = vor.u32 %v1347_v37, %v1029_v36  ;;  %v1412_v48 = vld [vmem:[%s1721_s1 + $0x1b0] sm:$0xff]  ;;  %v1410_v56 = vld [vmem:[%s1721_s1 + $0x1a0] sm:$0xff] }
  0x1a   : > { %830 = vmatpush.bf16.msra.mxu2 %v1378_v14  ;;  %v1031_v39 = vld [vmem:[%s1562_s20 + $0x28] sm:$0xf0]  ;;  %v1396_v49 = vld [vmem:[%s1721_s1 + $0x130] sm:$0xff]  ;;  %v1394_v57 = vld [vmem:[%s1721_s1 + $0x120] sm:$0xff] }
  0x1b   : > { %849 = vmatpush.bf16.msra.mxu3 %v1386_v15  ;;  %v1034_v45 = vor.u32 %v1343_v38, %v1031_v39  ;;  %v1404_v50 = vld [vmem:[%s1721_s1 + $0x170] sm:$0xff]  ;;  %v1411_v52 = vld [vmem:[%s1721_s1 + $0x1a8] sm:$0xff]  ;;  %v1402_v58 = vld [vmem:[%s1721_s1 + $0x160] sm:$0xff] }
  0x1c   : > { %793 = vmatpush.bf16.msra.mxu0 %v1361_v16  ;;  %v1420_v51 = vld [vmem:[%s1721_s1 + $0x1f0] sm:$0xff]  ;;  %v1395_v53 = vld [vmem:[%s1721_s1 + $0x128] sm:$0xff]  ;;  %v1418_v59 = vld [vmem:[%s1721_s1 + $0x1e0] sm:$0xff] }
  0x1d   : > { %812 = vmatpush.bf16.msra.mxu1 %v1369_v17  ;;  %v1403_v54 = vld [vmem:[%s1721_s1 + $0x168] sm:$0xff]  ;;  %v1053_v60 = vld [vmem:[%s1562_s20 + $0x40] sm:$0xf]  ;;  %v1350_v62 = vld [vmem:[%s1562_s20 + $0x44] sm:$0xf] }
  0x1e   : > { %831 = vmatpush.bf16.msra.mxu2 %v1377_v18  ;;  %v1419_v55 = vld [vmem:[%s1721_s1 + $0x1e8] sm:$0xff]  ;;  %v1354_v61 = vld [vmem:[%s1562_s20 + $0x5c] sm:$0xf0]  ;;  %v1055_v63 = vld [vmem:[%s1562_s20 + $0x60] sm:$0xf0] }
  0x1f   : > { %850 = vmatpush.bf16.msra.mxu3 %v1385_v19  ;;  %v1061_v0 = vld [vmem:[%s1562_s20 + $0x48] sm:$0xf]  ;;  %v1351_v2 = vld [vmem:[%s1562_s20 + $0x4c] sm:$0xf]  ;;  %v1409_v4 = vld [vmem:[%s1721_s1 + $0x198] sm:$0xff]  ;;  %v1054_v6 = vor.u32 %v1354_v61, %v1053_v60  ;;  %v1058_v7 = vor.u32 %v1350_v62, %v1055_v63 }
  0x20   : > { %794 = vmatpush.bf16.msra.mxu0 %v1360_v20  ;;  %v1355_v1 = vld [vmem:[%s1562_s20 + $0x64] sm:$0xf0]  ;;  %v1063_v3 = vld [vmem:[%s1562_s20 + $0x68] sm:$0xf0]  ;;  %v1393_v5 = vld [vmem:[%s1721_s1 + $0x118] sm:$0xff] }
  0x21   : > { %813 = vmatpush.bf16.msra.mxu1 %v1368_v21  ;;  %v1062_v8 = vor.u32 %v1355_v1, %v1061_v0  ;;  %v1066_v9 = vor.u32 %v1351_v2, %v1063_v3  ;;  %v1401_v10 = vld [vmem:[%s1721_s1 + $0x158] sm:$0xff]  ;;  %v1408_v12 = vld [vmem:[%s1721_s1 + $0x190] sm:$0xff]  ;;  %v1407_v16 = vld [vmem:[%s1721_s1 + $0x188] sm:$0xff] }
  0x22   : > { %832 = vmatpush.bf16.msra.mxu2 %v1376_v22  ;;  %v1417_v11 = vld [vmem:[%s1721_s1 + $0x1d8] sm:$0xff]  ;;  %v1392_v13 = vld [vmem:[%s1721_s1 + $0x110] sm:$0xff]  ;;  %v1391_v17 = vld [vmem:[%s1721_s1 + $0x108] sm:$0xff] }
  0x23   : > { %851 = vmatpush.bf16.msra.mxu3 %v1384_v23  ;;  %v1400_v14 = vld [vmem:[%s1721_s1 + $0x150] sm:$0xff]  ;;  %v1399_v18 = vld [vmem:[%s1721_s1 + $0x148] sm:$0xff]  ;;  %v1406_v20 = vld [vmem:[%s1721_s1 + $0x180] sm:$0xff] }
  0x24   : > { %795 = vmatpush.bf16.msra.mxu0 %v1359_v24  ;;  %v1416_v15 = vld [vmem:[%s1721_s1 + $0x1d0] sm:$0xff]  ;;  %v1415_v19 = vld [vmem:[%s1721_s1 + $0x1c8] sm:$0xff]  ;;  %v1390_v21 = vld [vmem:[%s1721_s1 + $0x100] sm:$0xff] }
  0x25   : > { %814 = vmatpush.bf16.msra.mxu1 %v1367_v25  ;;  %v1398_v22 = vld [vmem:[%s1721_s1 + $0x140] sm:$0xff]  ;;  %v1037_v24 = vld [vmem:[%s1562_s20 + $0x10] sm:$0xf]  ;;  %v1352_v38 = vld [vmem:[%s1562_s20 + $0x54] sm:$0xf] }
  0x26   : > { %833 = vmatpush.bf16.msra.mxu2 %v1375_v26  ;;  %v1414_v23 = vld [vmem:[%s1721_s1 + $0x1c0] sm:$0xff]  ;;  %v1348_v25 = vld [vmem:[%s1562_s20 + $0x2c] sm:$0xf0]  ;;  %v1344_v26 = vld [vmem:[%s1562_s20 + $0x14] sm:$0xf] }
  0x27   : > { %852 = vmatpush.bf16.msra.mxu3 %v1383_v27  ;;  %v1039_v27 = vld [vmem:[%s1562_s20 + $0x30] sm:$0xf0]  ;;  %v1038_v32 = vor.u32 %v1348_v25, %v1037_v24  ;;  %v1069_v36 = vld [vmem:[%s1562_s20 + $0x50] sm:$0xf] }
  0x28   : > { %796 = vmatpush.bf16.msra.mxu0 %v1358_v28  ;;  %v1045_v28 = vld [vmem:[%s1562_s20 + $0x18] sm:$0xf]  ;;  %v1042_v33 = vor.u32 %v1344_v26, %v1039_v27  ;;  %v1356_v37 = vld [vmem:[%s1562_s20 + $0x6c] sm:$0xf0]  ;;  %v1071_v39 = vld [vmem:[%s1562_s20 + $0x70] sm:$0xf0] }
  0x29   : > { %815 = vmatpush.bf16.msra.mxu1 %v1366_v29  ;;  %v1349_v29 = vld [vmem:[%s1562_s20 + $0x34] sm:$0xf0] }
  0x2a   : > { %834 = vmatpush.bf16.msra.mxu2 %v1374_v30  ;;  %v1345_v30 = vld [vmem:[%s1562_s20 + $0x1c] sm:$0xf]  ;;  %v1046_v34 = vor.u32 %v1349_v29, %v1045_v28 }
  0x2b   : > { %853 = vmatpush.bf16.msra.mxu3 %v1382_v31  ;;  %797 = vmatmul.bf16.vlgmr.msra.gmra.mxu0 %v1022_v42  ;;  %v1047_v31 = vld [vmem:[%s1562_s20 + $0x38] sm:$0xf0] }
  0x2c   : > { %865 = vmatpush.bf16.msrb.mxu0 %v1397_v41  ;;  %816 = vmatmul.bf16.vlgmr.msra.gmra.mxu1 %v1026_v43  ;;  %v1050_v35 = vor.u32 %v1345_v30, %v1047_v31  ;;  %v1357_v41 = vld [vmem:[%s1562_s20 + $0x74] sm:$0xf0]  ;;  %v1353_v42 = vld [vmem:[%s1562_s20 + $0x5c] sm:$0xf] }
  0x2d   : > { %835 = vmatmul.bf16.vlgmr.msra.gmra.mxu2 %v1030_v44  ;;  %884 = vmatpush.bf16.msrb.mxu1 %v1405_v46  ;;  %v1079_v43 = vld [vmem:[%s1562_s20 + $0x78] sm:$0xf0]  ;;  %v1070_v44 = vor.u32 %v1356_v37, %v1069_v36 }
  0x2e   : > { %903 = vmatpush.bf16.msrb.mxu2 %v1413_v40  ;;  %854 = vmatmul.bf16.vlgmr.msra.gmra.mxu3 %v1034_v45  ;;  %v1077_v40 = vld [vmem:[%s1562_s20 + $0x58] sm:$0xf]  ;;  %v1074_v45 = vor.u32 %v1352_v38, %v1071_v39 }
  0x2f   : > { %922 = vmatpush.bf16.msrb.mxu3 %v1421_v47  ;;  %v1078_v46 = vor.u32 %v1357_v41, %v1077_v40  ;;  %v1082_v47 = vor.u32 %v1353_v42, %v1079_v43 }
  0x30   : > { %866 = vmatpush.bf16.msrb.mxu0 %v1396_v49 }
  0x31   : > { %885 = vmatpush.bf16.msrb.mxu1 %v1404_v50 }
  0x32   : > { %904 = vmatpush.bf16.msrb.mxu2 %v1412_v48 }
  0x33   : > { %923 = vmatpush.bf16.msrb.mxu3 %v1420_v51 }
  0x34   : > { %867 = vmatpush.bf16.msrb.mxu0 %v1395_v53 }
  0x35   : > { %886 = vmatpush.bf16.msrb.mxu1 %v1403_v54 }
  0x36   : > { %905 = vmatpush.bf16.msrb.mxu2 %v1411_v52 }
  0x37   : > { %924 = vmatpush.bf16.msrb.mxu3 %v1419_v55 }
  0x38   : > { %868 = vmatpush.bf16.msrb.mxu0 %v1394_v57 }
  0x39   : > { %887 = vmatpush.bf16.msrb.mxu1 %v1402_v58  ;;  %v1441_v58 = vld [vmem:[%s1722_s2] ss:$0 sm:$0xff] }
  0x3a   : > { %906 = vmatpush.bf16.msrb.mxu2 %v1410_v56 }
  0x3b   : > { %925 = vmatpush.bf16.msrb.mxu3 %v1418_v59  ;;  %802 = vmatmul.bf16.gmra.mxu0 %v1054_v6 }
  0x3c   : > { %869 = vmatpush.bf16.msrb.mxu0 %v1393_v5  ;;  %821 = vmatmul.bf16.gmra.mxu1 %v1058_v7 }
  0x3d   : > { %840 = vmatmul.bf16.gmra.mxu2 %v1062_v8  ;;  %888 = vmatpush.bf16.msrb.mxu1 %v1401_v10 }
  0x3e   : > { %907 = vmatpush.bf16.msrb.mxu2 %v1409_v4  ;;  %859 = vmatmul.bf16.gmra.mxu3 %v1066_v9 }
  0x3f   : > { %926 = vmatpush.bf16.msrb.mxu3 %v1417_v11 }
  0x40   : > { %870 = vmatpush.bf16.msrb.mxu0 %v1392_v13 }
  0x41   : > { %889 = vmatpush.bf16.msrb.mxu1 %v1400_v14 }
  0x42   : > { %908 = vmatpush.bf16.msrb.mxu2 %v1408_v12 }
  0x43   : > { %927 = vmatpush.bf16.msrb.mxu3 %v1416_v15 }
  0x44   : > { %871 = vmatpush.bf16.msrb.mxu0 %v1391_v17 }
  0x45   : > { %890 = vmatpush.bf16.msrb.mxu1 %v1399_v18 }
  0x46   : > { %909 = vmatpush.bf16.msrb.mxu2 %v1407_v16 }
  0x47   : > { %928 = vmatpush.bf16.msrb.mxu3 %v1415_v19 }
  0x48   : > { %872 = vmatpush.bf16.msrb.mxu0 %v1390_v21 }
  0x49   : > { %891 = vmatpush.bf16.msrb.mxu1 %v1398_v22 }
  0x4a   : > { %910 = vmatpush.bf16.msrb.mxu2 %v1406_v20 }
  0x4b   : > { %929 = vmatpush.bf16.msrb.mxu3 %v1414_v23  ;;  %873 = vmatmul.bf16.vlgmr.msrb.gmra.mxu0 %v1038_v32 }
  0x4c   : > { %892 = vmatmul.bf16.vlgmr.msrb.gmra.mxu1 %v1042_v33 }
  0x4d   : > { %911 = vmatmul.bf16.vlgmr.msrb.gmra.mxu2 %v1046_v34 }
  0x4e   : > { %930 = vmatmul.bf16.vlgmr.msrb.gmra.mxu3 %v1050_v35 }
  0x5b   : > { %878 = vmatmul.bf16.gmra.mxu0 %v1070_v44 }
  0x5c   : > { %897 = vmatmul.bf16.gmra.mxu1 %v1074_v45 }
  0x5d   : > { %916 = vmatmul.bf16.gmra.mxu2 %v1078_v46 }
  0x5e   : > { %935 = vmatmul.bf16.gmra.mxu3 %v1082_v47 }
  0xa8   : > { %v798_v48 = vpop.f32.mrf.mxu0 }
  0xa9   : > { %v817_v49 = vpop.f32.mrf.mxu1  ;;  %v799_v61 = vadd.f32 %v1441_v58, %v798_v48 }
  0xab   : > { %v818_v0 = vadd.f32 %v817_v49, %v799_v61 }
  0xb0   : > { %v836_v50 = vpop.f32.mrf.mxu2  ;;  %v800_v52 = vpop.f32.mrf.mxu0 }
  0xb1   : > { %v855_v51 = vpop.f32.mrf.mxu3  ;;  %v819_v53 = vpop.f32.mrf.mxu1  ;;  %v801_v1 = vadd.f32 %v1441_v58, %v800_v52  ;;  %v837_v4 = vadd.f32 %v836_v50, %v818_v0 }
  0xb3   : > { %v820_v7 = vadd.f32 %v819_v53, %v801_v1  ;;  %v856_v8 = vadd.f32 %v855_v51, %v837_v4 }
  0xb8   : > { %v838_v54 = vpop.f32.mrf.mxu2  ;;  %v803_v56 = vpop.f32.mrf.mxu0 }
  0xb9   : > { %v857_v55 = vpop.f32.mrf.mxu3  ;;  %v822_v57 = vpop.f32.mrf.mxu1  ;;  %v839_v9 = vadd.f32 %v838_v54, %v820_v7  ;;  %v804_v13 = vadd.f32 %v1441_v58, %v803_v56 }
  0xbb   : > { %v858_v12 = vadd.f32 %v857_v55, %v839_v9  ;;  %v823_v19 = vadd.f32 %v822_v57, %v804_v13 }
  0xc0   : > { %v841_v59 = vpop.f32.mrf.mxu2  ;;  %v805_v62 = vpop.f32.mrf.mxu0 }
  0xc1   : > { %v860_v60 = vpop.f32.mrf.mxu3  ;;  %v824_v63 = vpop.f32.mrf.mxu1  ;;  %v806_v21 = vadd.f32 %v1441_v58, %v805_v62  ;;  %v842_v24 = vadd.f32 %v841_v59, %v823_v19 }
  0xc3   : > { %v825_v29 = vadd.f32 %v824_v63, %v806_v21  ;;  %v861_v32 = vadd.f32 %v860_v60, %v842_v24 }
  0xc8   : > { %v843_v2 = vpop.f32.mrf.mxu2  ;;  %v874_v5 = vpop.f32.mrf.mxu0 }
  0xc9   : > { %v862_v3 = vpop.f32.mrf.mxu3  ;;  %v893_v6 = vpop.f32.mrf.mxu1  ;;  %v875_v10 = vadd.f32 %v874_v5, %v856_v8  ;;  %v844_v33 = vadd.f32 %v843_v2, %v825_v29 }
  0xcb   : > { %v894_v17 = vadd.f32 %v893_v6, %v875_v10  ;;  %v863_v39 = vadd.f32 %v862_v3, %v844_v33 }
  0xd0   : > { %v912_v11 = vpop.f32.mrf.mxu2  ;;  %v876_v15 = vpop.f32.mrf.mxu0 }
  0xd1   : > { %v931_v14 = vpop.f32.mrf.mxu3  ;;  %v895_v16 = vpop.f32.mrf.mxu1  ;;  %v877_v18 = vadd.f32 %v876_v15, %v858_v12  ;;  %v913_v20 = vadd.f32 %v912_v11, %v894_v17 }
  0xd3   : > { %v896_v22 = vadd.f32 %v895_v16, %v877_v18  ;;  %v932_v25 = vadd.f32 %v931_v14, %v913_v20 }
  0xd5   : > { %v941_v34 = vmax.f32 %v932_v25, 0.0 }
  0xd8   : > { %v914_v23 = vpop.f32.mrf.mxu2  ;;  %v879_v28 = vpop.f32.mrf.mxu0 }
  0xd9   : > { %v915_v26 = vadd.f32 %v914_v23, %v896_v22  ;;  %v933_v27 = vpop.f32.mrf.mxu3  ;;  %v898_v31 = vpop.f32.mrf.mxu1  ;;  %v880_v37 = vadd.f32 %v879_v28, %v861_v32 }
  0xdb   : > { %v934_v30 = vadd.f32 %v933_v27, %v915_v26  ;;  %v899_v42 = vadd.f32 %v898_v31, %v880_v37 }
  0xdd   : > { %v942_v35 = vmax.f32 %v934_v30, 0.0 }
  0xdf   : > { %v1425_v36 = vpack.c.bf16 %v942_v35, %v941_v34 }
  0xe0   : > { %v917_v38 = vpop.f32.mrf.mxu2  ;;  %v881_v41 = vpop.f32.mrf.mxu0 }
  0xe1   : > { %1426 = vst [vmem:[%s175_s28] sm:$0xff] %v1425_v36   ;;  %v936_v40 = vpop.f32.mrf.mxu3  ;;  %v882_v43 = vadd.f32 %v881_v41, %v863_v39  ;;  %v918_v44 = vadd.f32 %v917_v38, %v899_v42  ;;  %v900_v45 = vpop.f32.mrf.mxu1 }
  0xe3   : > { %v901_v46 = vadd.f32 %v900_v45, %v882_v43  ;;  %v937_v48 = vadd.f32 %v936_v40, %v918_v44 }
  0xe5   : > { %v943_v52 = vmax.f32 %v937_v48, 0.0 }
  0xe8   : > { %v919_v47 = vpop.f32.mrf.mxu2 }
  0xe9   : > { %v920_v49 = vadd.f32 %v919_v47, %v901_v46  ;;  %v938_v50 = vpop.f32.mrf.mxu3 }
  0xeb   : > { %v939_v51 = vadd.f32 %v938_v50, %v920_v49 }
  0xed   : > { %v944_v53 = vmax.f32 %v939_v51, 0.0 }
  0xef   : > { %v1430_v54 = vpack.c.bf16 %v944_v53, %v943_v52 }
  0xf1   : > { %1432 = vst [vmem:[%s175_s28 + $0x8] sm:$0xff] %v1430_v54  }
  0xf2 PF: > { %s13_s12 = sadd.s32 1, %s1448_s12  }
  0xf3   : > { %p10_p4 = scmp.ge.s32.totalorder %s13_s12, 4  }
  0xf5   :  { %12 = sbr.rel (!%p10_p4) target bundleno = 1 (0x1), region = 62 }

// kernel: vae_conceptizer_forward.12
= control target key start
LH: loop header
LB: loop body
LE: loop exit
PB: predicated region body
PF: predicated region fallthrough
CT: control target
= control target key end

     0   :  { %s2604_s1 = inlined_call_operand.vmem [shape: bf16[2048,128], index: 1, kind: input, shape index: {}]   ;;  %s2605_s2 = inlined_call_operand.vmem [shape: f32[1,128], index: 2, kind: input, shape index: {}]   ;;  %s2606_s0 = inlined_call_operand.vmem [shape: bf16[16,2048], index: 0, kind: input, shape index: {}]   ;;  %s2607_s3 = inlined_call_operand.vmem [shape: bf16[16,128], index: 3, kind: output, shape index: {}]  }
   0x1   :  { %v1971_v0 = vld [vmem:[%s2604_s1 + $0x38] sm:$0xff]  ;;  %v1970_v4 = vld [vmem:[%s2604_s1 + $0x30] sm:$0xff]  ;;  %v1969_v8 = vld [vmem:[%s2604_s1 + $0x28] sm:$0xff] }
   0x2   :  { %v1979_v1 = vld [vmem:[%s2604_s1 + $0x78] sm:$0xff]  ;;  %1138 = vmatpush.bf16.msra.mxu0 %v1971_v0  ;;  %v1978_v5 = vld [vmem:[%s2604_s1 + $0x70] sm:$0xff]  ;;  %v1977_v9 = vld [vmem:[%s2604_s1 + $0x68] sm:$0xff] }
   0x3   :  { %v1987_v2 = vld [vmem:[%s2604_s1 + $0xb8] sm:$0xff]  ;;  %1152 = vmatpush.bf16.msra.mxu1 %v1979_v1  ;;  %v1986_v6 = vld [vmem:[%s2604_s1 + $0xb0] sm:$0xff]  ;;  %v1985_v10 = vld [vmem:[%s2604_s1 + $0xa8] sm:$0xff] }
   0x4   :  { %v1995_v3 = vld [vmem:[%s2604_s1 + $0xf8] sm:$0xff]  ;;  %1166 = vmatpush.bf16.msra.mxu2 %v1987_v2  ;;  %v1994_v7 = vld [vmem:[%s2604_s1 + $0xf0] sm:$0xff]  ;;  %v1993_v11 = vld [vmem:[%s2604_s1 + $0xe8] sm:$0xff] }
   0x5   :  { %1180 = vmatpush.bf16.msra.mxu3 %v1995_v3  ;;  %v1968_v12 = vld [vmem:[%s2604_s1 + $0x20] sm:$0xff]  ;;  %v1967_v16 = vld [vmem:[%s2604_s1 + $0x18] sm:$0xff]  ;;  %v1966_v20 = vld [vmem:[%s2604_s1 + $0x10] sm:$0xff] }
   0x6   :  { %1139 = vmatpush.bf16.msra.mxu0 %v1970_v4  ;;  %v1976_v13 = vld [vmem:[%s2604_s1 + $0x60] sm:$0xff]  ;;  %v1975_v17 = vld [vmem:[%s2604_s1 + $0x58] sm:$0xff]  ;;  %v1974_v21 = vld [vmem:[%s2604_s1 + $0x50] sm:$0xff] }
   0x7   :  { %1153 = vmatpush.bf16.msra.mxu1 %v1978_v5  ;;  %v1984_v14 = vld [vmem:[%s2604_s1 + $0xa0] sm:$0xff]  ;;  %v1983_v18 = vld [vmem:[%s2604_s1 + $0x98] sm:$0xff]  ;;  %v1982_v22 = vld [vmem:[%s2604_s1 + $0x90] sm:$0xff] }
   0x8   :  { %1167 = vmatpush.bf16.msra.mxu2 %v1986_v6  ;;  %v1992_v15 = vld [vmem:[%s2604_s1 + $0xe0] sm:$0xff]  ;;  %v1991_v19 = vld [vmem:[%s2604_s1 + $0xd8] sm:$0xff]  ;;  %v1990_v23 = vld [vmem:[%s2604_s1 + $0xd0] sm:$0xff] }
   0x9   :  { %1181 = vmatpush.bf16.msra.mxu3 %v1994_v7  ;;  %v1965_v24 = vld [vmem:[%s2604_s1 + $0x8] sm:$0xff]  ;;  %v1964_v28 = vld [vmem:[%s2604_s1] sm:$0xff]  ;;  %v2003_v32 = vld [vmem:[%s2604_s1 + $0x138] sm:$0xff] }
   0xa   :  { %1140 = vmatpush.bf16.msra.mxu0 %v1969_v8  ;;  %v1973_v25 = vld [vmem:[%s2604_s1 + $0x48] sm:$0xff]  ;;  %v1972_v29 = vld [vmem:[%s2604_s1 + $0x40] sm:$0xff]  ;;  %v2011_v33 = vld [vmem:[%s2604_s1 + $0x178] sm:$0xff] }
   0xb   :  { %1154 = vmatpush.bf16.msra.mxu1 %v1977_v9  ;;  %v1981_v26 = vld [vmem:[%s2604_s1 + $0x88] sm:$0xff]  ;;  %v1980_v30 = vld [vmem:[%s2604_s1 + $0x80] sm:$0xff]  ;;  %v2019_v42 = vld [vmem:[%s2604_s1 + $0x1b8] sm:$0xff] }
   0xc   :  { %1168 = vmatpush.bf16.msra.mxu2 %v1985_v10  ;;  %v1989_v27 = vld [vmem:[%s2604_s1 + $0xc8] sm:$0xff]  ;;  %v1988_v31 = vld [vmem:[%s2604_s1 + $0xc0] sm:$0xff]  ;;  %v2027_v43 = vld [vmem:[%s2604_s1 + $0x1f8] sm:$0xff] }
   0xd   :  { %1182 = vmatpush.bf16.msra.mxu3 %v1993_v11  ;;  %v1374_v34 = vld [vmem:[%s2606_s0] sm:$0xf]  ;;  %v1382_v36 = vld [vmem:[%s2606_s0 + $0x8] sm:$0xf]  ;;  %v1948_v38 = vld [vmem:[%s2606_s0 + $0x4] sm:$0xf] }
   0xe   :  { %1141 = vmatpush.bf16.msra.mxu0 %v1968_v12  ;;  %v1956_v35 = vld [vmem:[%s2606_s0 + $0x3c] sm:$0xf0]  ;;  %v1957_v37 = vld [vmem:[%s2606_s0 + $0x44] sm:$0xf0]  ;;  %v1376_v39 = vld [vmem:[%s2606_s0 + $0x40] sm:$0xf0] }
   0xf   :  { %1155 = vmatpush.bf16.msra.mxu1 %v1976_v13  ;;  %v1949_v40 = vld [vmem:[%s2606_s0 + $0xc] sm:$0xf]  ;;  %v1375_v44 = vor.u32 %v1956_v35, %v1374_v34  ;;  %v1383_v45 = vor.u32 %v1957_v37, %v1382_v36  ;;  %v1379_v46 = vor.u32 %v1948_v38, %v1376_v39  ;;  %v2002_v48 = vld [vmem:[%s2604_s1 + $0x130] sm:$0xff]  ;;  %v2000_v56 = vld [vmem:[%s2604_s1 + $0x120] sm:$0xff] }
  0x10   :  { %1169 = vmatpush.bf16.msra.mxu2 %v1984_v14  ;;  %v1384_v41 = vld [vmem:[%s2606_s0 + $0x48] sm:$0xf0]  ;;  %v2010_v49 = vld [vmem:[%s2604_s1 + $0x170] sm:$0xff]  ;;  %v2008_v57 = vld [vmem:[%s2604_s1 + $0x160] sm:$0xff] }
  0x11   :  { %1183 = vmatpush.bf16.msra.mxu3 %v1992_v15  ;;  %v1387_v47 = vor.u32 %v1949_v40, %v1384_v41  ;;  %v2018_v50 = vld [vmem:[%s2604_s1 + $0x1b0] sm:$0xff]  ;;  %v2001_v52 = vld [vmem:[%s2604_s1 + $0x128] sm:$0xff]  ;;  %v2016_v58 = vld [vmem:[%s2604_s1 + $0x1a0] sm:$0xff] }
  0x12   :  { %1142 = vmatpush.bf16.msra.mxu0 %v1967_v16  ;;  %v2026_v51 = vld [vmem:[%s2604_s1 + $0x1f0] sm:$0xff]  ;;  %v2009_v53 = vld [vmem:[%s2604_s1 + $0x168] sm:$0xff]  ;;  %v2024_v59 = vld [vmem:[%s2604_s1 + $0x1e0] sm:$0xff] }
  0x13   :  { %1156 = vmatpush.bf16.msra.mxu1 %v1975_v17  ;;  %v2017_v54 = vld [vmem:[%s2604_s1 + $0x1a8] sm:$0xff]  ;;  %v1999_v60 = vld [vmem:[%s2604_s1 + $0x118] sm:$0xff]  ;;  %v1998_v0 = vld [vmem:[%s2604_s1 + $0x110] sm:$0xff] }
  0x14   :  { %1170 = vmatpush.bf16.msra.mxu2 %v1983_v18  ;;  %v2025_v55 = vld [vmem:[%s2604_s1 + $0x1e8] sm:$0xff]  ;;  %v2007_v61 = vld [vmem:[%s2604_s1 + $0x158] sm:$0xff]  ;;  %v2006_v1 = vld [vmem:[%s2604_s1 + $0x150] sm:$0xff] }
  0x15   :  { %1184 = vmatpush.bf16.msra.mxu3 %v1991_v19  ;;  %v2015_v62 = vld [vmem:[%s2604_s1 + $0x198] sm:$0xff]  ;;  %v2014_v2 = vld [vmem:[%s2604_s1 + $0x190] sm:$0xff]  ;;  %v1997_v4 = vld [vmem:[%s2604_s1 + $0x108] sm:$0xff] }
  0x16   :  { %1143 = vmatpush.bf16.msra.mxu0 %v1966_v20  ;;  %v2023_v63 = vld [vmem:[%s2604_s1 + $0x1d8] sm:$0xff]  ;;  %v2022_v3 = vld [vmem:[%s2604_s1 + $0x1d0] sm:$0xff]  ;;  %v2005_v5 = vld [vmem:[%s2604_s1 + $0x148] sm:$0xff] }
  0x17   :  { %1157 = vmatpush.bf16.msra.mxu1 %v1974_v21  ;;  %v2013_v6 = vld [vmem:[%s2604_s1 + $0x188] sm:$0xff]  ;;  %v1996_v8 = vld [vmem:[%s2604_s1 + $0x100] sm:$0xff]  ;;  %v2035_v12 = vld [vmem:[%s2604_s1 + $0x238] sm:$0xff] }
  0x18   :  { %1171 = vmatpush.bf16.msra.mxu2 %v1982_v22  ;;  %v2021_v7 = vld [vmem:[%s2604_s1 + $0x1c8] sm:$0xff]  ;;  %v2004_v9 = vld [vmem:[%s2604_s1 + $0x140] sm:$0xff]  ;;  %v2043_v13 = vld [vmem:[%s2604_s1 + $0x278] sm:$0xff] }
  0x19   :  { %1185 = vmatpush.bf16.msra.mxu3 %v1990_v23  ;;  %v2012_v10 = vld [vmem:[%s2604_s1 + $0x180] sm:$0xff]  ;;  %v1390_v14 = vld [vmem:[%s2606_s0 + $0x10] sm:$0xf]  ;;  %v1398_v16 = vld [vmem:[%s2606_s0 + $0x18] sm:$0xf] }
  0x1a   :  { %1144 = vmatpush.bf16.msra.mxu0 %v1965_v24  ;;  %v2020_v11 = vld [vmem:[%s2604_s1 + $0x1c0] sm:$0xff]  ;;  %v1958_v15 = vld [vmem:[%s2606_s0 + $0x4c] sm:$0xf0]  ;;  %v1959_v17 = vld [vmem:[%s2606_s0 + $0x54] sm:$0xf0] }
  0x1b   :  { %1158 = vmatpush.bf16.msra.mxu1 %v1973_v25  ;;  %v1950_v18 = vld [vmem:[%s2606_s0 + $0x14] sm:$0xf]  ;;  %v1951_v20 = vld [vmem:[%s2606_s0 + $0x1c] sm:$0xf]  ;;  %v1391_v24 = vor.u32 %v1958_v15, %v1390_v14  ;;  %v1399_v25 = vor.u32 %v1959_v17, %v1398_v16  ;;  %v2049_v34 = vld [vmem:[%s2604_s1 + $0x2a8] sm:$0xff] }
  0x1c   :  { %1172 = vmatpush.bf16.msra.mxu2 %v1981_v26  ;;  %v1392_v19 = vld [vmem:[%s2606_s0 + $0x50] sm:$0xf0]  ;;  %v1400_v21 = vld [vmem:[%s2606_s0 + $0x58] sm:$0xf0]  ;;  %v2057_v35 = vld [vmem:[%s2604_s1 + $0x2e8] sm:$0xff] }
  0x1d   :  { %1186 = vmatpush.bf16.msra.mxu3 %v1989_v27  ;;  %v2051_v22 = vld [vmem:[%s2604_s1 + $0x2b8] sm:$0xff]  ;;  %v1395_v26 = vor.u32 %v1950_v18, %v1392_v19  ;;  %v1403_v27 = vor.u32 %v1951_v20, %v1400_v21  ;;  %v2032_v36 = vld [vmem:[%s2604_s1 + $0x220] sm:$0xff]  ;;  %v2081_v14 = vld [vmem:[%s2604_s1 + $0x3a8] sm:$0xff] }
  0x1e   :  { %1145 = vmatpush.bf16.msra.mxu0 %v1964_v28  ;;  %v2059_v23 = vld [vmem:[%s2604_s1 + $0x2f8] sm:$0xff]  ;;  %v2034_v28 = vld [vmem:[%s2604_s1 + $0x230] sm:$0xff]  ;;  %v2040_v37 = vld [vmem:[%s2604_s1 + $0x260] sm:$0xff] }
  0x1f   :  { %1159 = vmatpush.bf16.msra.mxu1 %v1972_v29  ;;  %v2042_v29 = vld [vmem:[%s2604_s1 + $0x270] sm:$0xff]  ;;  %v2048_v38 = vld [vmem:[%s2604_s1 + $0x2a0] sm:$0xff]  ;;  %v2031_v40 = vld [vmem:[%s2604_s1 + $0x218] sm:$0xff] }
  0x20   :  { %1173 = vmatpush.bf16.msra.mxu2 %v1980_v30  ;;  %v2050_v30 = vld [vmem:[%s2604_s1 + $0x2b0] sm:$0xff]  ;;  %v2056_v39 = vld [vmem:[%s2604_s1 + $0x2e0] sm:$0xff]  ;;  %v2039_v41 = vld [vmem:[%s2604_s1 + $0x258] sm:$0xff] }
  0x21   :  { %1187 = vmatpush.bf16.msra.mxu3 %v1988_v31  ;;  %1146 = vmatmul.bf16.vlgmr.msra.gmra.mxu0 %v1375_v44  ;;  %v2058_v31 = vld [vmem:[%s2604_s1 + $0x2f0] sm:$0xff]  ;;  %v2089_v15 = vld [vmem:[%s2604_s1 + $0x3e8] sm:$0xff]  ;;  %v2064_v16 = vld [vmem:[%s2604_s1 + $0x320] sm:$0xff] }
  0x22   :  { %1194 = vmatpush.bf16.msrb.mxu0 %v2003_v32  ;;  %1160 = vmatmul.bf16.vlgmr.msra.gmra.mxu1 %v1379_v46  ;;  %v2033_v32 = vld [vmem:[%s2604_s1 + $0x228] sm:$0xff]  ;;  %v2030_v44 = vld [vmem:[%s2604_s1 + $0x210] sm:$0xff]  ;;  %v2072_v17 = vld [vmem:[%s2604_s1 + $0x360] sm:$0xff] }
  0x23   :  { %1208 = vmatpush.bf16.msrb.mxu1 %v2011_v33  ;;  %1174 = vmatmul.bf16.vlgmr.msra.gmra.mxu2 %v1383_v45  ;;  %v2041_v33 = vld [vmem:[%s2604_s1 + $0x268] sm:$0xff]  ;;  %v2038_v45 = vld [vmem:[%s2604_s1 + $0x250] sm:$0xff]  ;;  %v2080_v18 = vld [vmem:[%s2604_s1 + $0x3a0] sm:$0xff] }
  0x24   :  { %1222 = vmatpush.bf16.msrb.mxu2 %v2019_v42  ;;  %1188 = vmatmul.bf16.vlgmr.msra.gmra.mxu3 %v1387_v47  ;;  %v2047_v42 = vld [vmem:[%s2604_s1 + $0x298] sm:$0xff]  ;;  %v2046_v46 = vld [vmem:[%s2604_s1 + $0x290] sm:$0xff]  ;;  %v2088_v19 = vld [vmem:[%s2604_s1 + $0x3e0] sm:$0xff] }
  0x25   :  { %1236 = vmatpush.bf16.msrb.mxu3 %v2027_v43  ;;  %v2055_v43 = vld [vmem:[%s2604_s1 + $0x2d8] sm:$0xff]  ;;  %v2054_v47 = vld [vmem:[%s2604_s1 + $0x2d0] sm:$0xff] }
  0x26   :  { %1195 = vmatpush.bf16.msrb.mxu0 %v2002_v48  ;;  %v2029_v48 = vld [vmem:[%s2604_s1 + $0x208] sm:$0xff]  ;;  %v2063_v20 = vld [vmem:[%s2604_s1 + $0x318] sm:$0xff] }
  0x27   :  { %1209 = vmatpush.bf16.msrb.mxu1 %v2010_v49  ;;  %v2037_v49 = vld [vmem:[%s2604_s1 + $0x248] sm:$0xff]  ;;  %v2071_v21 = vld [vmem:[%s2604_s1 + $0x358] sm:$0xff] }
  0x28   :  { %1223 = vmatpush.bf16.msrb.mxu2 %v2018_v50  ;;  %v2045_v50 = vld [vmem:[%s2604_s1 + $0x288] sm:$0xff] }
  0x29   :  { %1237 = vmatpush.bf16.msrb.mxu3 %v2026_v51  ;;  %v2053_v51 = vld [vmem:[%s2604_s1 + $0x2c8] sm:$0xff] }
  0x2a   :  { %1196 = vmatpush.bf16.msrb.mxu0 %v2001_v52  ;;  %v2028_v52 = vld [vmem:[%s2604_s1 + $0x200] sm:$0xff] }
  0x2b   :  { %1210 = vmatpush.bf16.msrb.mxu1 %v2009_v53  ;;  %v2036_v53 = vld [vmem:[%s2604_s1 + $0x240] sm:$0xff] }
  0x2c   :  { %1224 = vmatpush.bf16.msrb.mxu2 %v2017_v54  ;;  %v2044_v54 = vld [vmem:[%s2604_s1 + $0x280] sm:$0xff] }
  0x2d   :  { %1238 = vmatpush.bf16.msrb.mxu3 %v2025_v55  ;;  %v2052_v55 = vld [vmem:[%s2604_s1 + $0x2c0] sm:$0xff] }
  0x2e   :  { %1197 = vmatpush.bf16.msrb.mxu0 %v2000_v56  ;;  %v2067_v56 = vld [vmem:[%s2604_s1 + $0x338] sm:$0xff] }
  0x2f   :  { %1211 = vmatpush.bf16.msrb.mxu1 %v2008_v57  ;;  %v2075_v57 = vld [vmem:[%s2604_s1 + $0x378] sm:$0xff] }
  0x30   :  { %1225 = vmatpush.bf16.msrb.mxu2 %v2016_v58  ;;  %v1406_v58 = vld [vmem:[%s2606_s0 + $0x20] sm:$0xf] }
  0x31   :  { %1239 = vmatpush.bf16.msrb.mxu3 %v2024_v59  ;;  %v1960_v59 = vld [vmem:[%s2606_s0 + $0x5c] sm:$0xf0] }
  0x32   :  { %1198 = vmatpush.bf16.msrb.mxu0 %v1999_v60  ;;  %v1414_v60 = vld [vmem:[%s2606_s0 + $0x28] sm:$0xf] }
  0x33   :  { %1212 = vmatpush.bf16.msrb.mxu1 %v2007_v61  ;;  %v1961_v61 = vld [vmem:[%s2606_s0 + $0x64] sm:$0xf0] }
  0x34   :  { %1226 = vmatpush.bf16.msrb.mxu2 %v2015_v62  ;;  %v1952_v62 = vld [vmem:[%s2606_s0 + $0x24] sm:$0xf] }
  0x35   :  { %1240 = vmatpush.bf16.msrb.mxu3 %v2023_v63  ;;  %v1408_v63 = vld [vmem:[%s2606_s0 + $0x60] sm:$0xf0] }
  0x36   :  { %1199 = vmatpush.bf16.msrb.mxu0 %v1998_v0  ;;  %v1953_v0 = vld [vmem:[%s2606_s0 + $0x2c] sm:$0xf] }
  0x37   :  { %1213 = vmatpush.bf16.msrb.mxu1 %v2006_v1  ;;  %v1416_v1 = vld [vmem:[%s2606_s0 + $0x68] sm:$0xf0] }
  0x38   :  { %1227 = vmatpush.bf16.msrb.mxu2 %v2014_v2  ;;  %v2083_v2 = vld [vmem:[%s2604_s1 + $0x3b8] sm:$0xff] }
  0x39   :  { %1241 = vmatpush.bf16.msrb.mxu3 %v2022_v3  ;;  %v2091_v3 = vld [vmem:[%s2604_s1 + $0x3f8] sm:$0xff] }
  0x3a   :  { %1200 = vmatpush.bf16.msrb.mxu0 %v1997_v4  ;;  %v1407_v4 = vor.u32 %v1960_v59, %v1406_v58 }
  0x3b   :  { %1214 = vmatpush.bf16.msrb.mxu1 %v2005_v5  ;;  %v1415_v5 = vor.u32 %v1961_v61, %v1414_v60 }
  0x3c   :  { %1228 = vmatpush.bf16.msrb.mxu2 %v2013_v6  ;;  %v1411_v6 = vor.u32 %v1952_v62, %v1408_v63 }
  0x3d   :  { %1242 = vmatpush.bf16.msrb.mxu3 %v2021_v7  ;;  %v1419_v7 = vor.u32 %v1953_v0, %v1416_v1 }
  0x3e   :  { %1201 = vmatpush.bf16.msrb.mxu0 %v1996_v8  ;;  %v2066_v8 = vld [vmem:[%s2604_s1 + $0x330] sm:$0xff] }
  0x3f   :  { %1215 = vmatpush.bf16.msrb.mxu1 %v2004_v9  ;;  %v2074_v9 = vld [vmem:[%s2604_s1 + $0x370] sm:$0xff] }
  0x40   :  { %1229 = vmatpush.bf16.msrb.mxu2 %v2012_v10  ;;  %v2082_v10 = vld [vmem:[%s2604_s1 + $0x3b0] sm:$0xff] }
  0x41   :  { %1243 = vmatpush.bf16.msrb.mxu3 %v2020_v11  ;;  %1202 = vmatmul.bf16.vlgmr.msrb.gmra.mxu0 %v1391_v24  ;;  %v2090_v11 = vld [vmem:[%s2604_s1 + $0x3f0] sm:$0xff] }
  0x42   :  { %1250 = vmatpush.bf16.msra.mxu0 %v2035_v12  ;;  %1216 = vmatmul.bf16.vlgmr.msrb.gmra.mxu1 %v1395_v26  ;;  %v2065_v12 = vld [vmem:[%s2604_s1 + $0x328] sm:$0xff]  ;;  %v2062_v24 = vld [vmem:[%s2604_s1 + $0x310] sm:$0xff] }
  0x43   :  { %1264 = vmatpush.bf16.msra.mxu1 %v2043_v13  ;;  %1230 = vmatmul.bf16.vlgmr.msrb.gmra.mxu2 %v1399_v25  ;;  %v2073_v13 = vld [vmem:[%s2604_s1 + $0x368] sm:$0xff]  ;;  %v2070_v25 = vld [vmem:[%s2604_s1 + $0x350] sm:$0xff] }
  0x44   :  { %1278 = vmatpush.bf16.msra.mxu2 %v2051_v22  ;;  %1244 = vmatmul.bf16.vlgmr.msrb.gmra.mxu3 %v1403_v27  ;;  %v2079_v22 = vld [vmem:[%s2604_s1 + $0x398] sm:$0xff]  ;;  %v2078_v26 = vld [vmem:[%s2604_s1 + $0x390] sm:$0xff] }
  0x45   :  { %1292 = vmatpush.bf16.msra.mxu3 %v2059_v23  ;;  %v2087_v23 = vld [vmem:[%s2604_s1 + $0x3d8] sm:$0xff]  ;;  %v2086_v27 = vld [vmem:[%s2604_s1 + $0x3d0] sm:$0xff] }
  0x46   :  { %1251 = vmatpush.bf16.msra.mxu0 %v2034_v28  ;;  %v2061_v28 = vld [vmem:[%s2604_s1 + $0x308] sm:$0xff] }
  0x47   :  { %1265 = vmatpush.bf16.msra.mxu1 %v2042_v29  ;;  %v2069_v29 = vld [vmem:[%s2604_s1 + $0x348] sm:$0xff] }
  0x48   :  { %1279 = vmatpush.bf16.msra.mxu2 %v2050_v30  ;;  %v2077_v30 = vld [vmem:[%s2604_s1 + $0x388] sm:$0xff] }
  0x49   :  { %1293 = vmatpush.bf16.msra.mxu3 %v2058_v31  ;;  %v2085_v31 = vld [vmem:[%s2604_s1 + $0x3c8] sm:$0xff] }
  0x4a   :  { %1252 = vmatpush.bf16.msra.mxu0 %v2033_v32  ;;  %v2060_v32 = vld [vmem:[%s2604_s1 + $0x300] sm:$0xff] }
  0x4b   :  { %1266 = vmatpush.bf16.msra.mxu1 %v2041_v33  ;;  %v2068_v33 = vld [vmem:[%s2604_s1 + $0x340] sm:$0xff] }
  0x4c   :  { %1280 = vmatpush.bf16.msra.mxu2 %v2049_v34  ;;  %v2076_v34 = vld [vmem:[%s2604_s1 + $0x380] sm:$0xff] }
  0x4d   :  { %1294 = vmatpush.bf16.msra.mxu3 %v2057_v35  ;;  %v2084_v35 = vld [vmem:[%s2604_s1 + $0x3c0] sm:$0xff] }
  0x4e   :  { %1253 = vmatpush.bf16.msra.mxu0 %v2032_v36  ;;  %v1422_v36 = vld [vmem:[%s2606_s0 + $0x30] sm:$0xf] }
  0x4f   :  { %1267 = vmatpush.bf16.msra.mxu1 %v2040_v37  ;;  %v1962_v37 = vld [vmem:[%s2606_s0 + $0x6c] sm:$0xf0] }
  0x50   :  { %1281 = vmatpush.bf16.msra.mxu2 %v2048_v38  ;;  %v1954_v38 = vld [vmem:[%s2606_s0 + $0x34] sm:$0xf] }
  0x51   :  { %1295 = vmatpush.bf16.msra.mxu3 %v2056_v39  ;;  %v1424_v39 = vld [vmem:[%s2606_s0 + $0x70] sm:$0xf0] }
  0x52   :  { %1254 = vmatpush.bf16.msra.mxu0 %v2031_v40  ;;  %v1430_v40 = vld [vmem:[%s2606_s0 + $0x38] sm:$0xf] }
  0x53   :  { %1268 = vmatpush.bf16.msra.mxu1 %v2039_v41  ;;  %v1963_v41 = vld [vmem:[%s2606_s0 + $0x74] sm:$0xf0] }
  0x54   :  { %1282 = vmatpush.bf16.msra.mxu2 %v2047_v42  ;;  %v1955_v42 = vld [vmem:[%s2606_s0 + $0x3c] sm:$0xf] }
  0x55   :  { %1296 = vmatpush.bf16.msra.mxu3 %v2055_v43  ;;  %v1432_v43 = vld [vmem:[%s2606_s0 + $0x78] sm:$0xf0] }
  0x56   :  { %1255 = vmatpush.bf16.msra.mxu0 %v2030_v44  ;;  %v1423_v44 = vor.u32 %v1962_v37, %v1422_v36 }
  0x57   :  { %1269 = vmatpush.bf16.msra.mxu1 %v2038_v45  ;;  %v1427_v45 = vor.u32 %v1954_v38, %v1424_v39 }
  0x58   :  { %1283 = vmatpush.bf16.msra.mxu2 %v2046_v46  ;;  %v1431_v46 = vor.u32 %v1963_v41, %v1430_v40 }
  0x59   :  { %1297 = vmatpush.bf16.msra.mxu3 %v2054_v47  ;;  %v1435_v47 = vor.u32 %v1955_v42, %v1432_v43 }
  0x5a   :  { %1256 = vmatpush.bf16.msra.mxu0 %v2029_v48 }
  0x5b   :  { %1270 = vmatpush.bf16.msra.mxu1 %v2037_v49 }
  0x5c   :  { %1284 = vmatpush.bf16.msra.mxu2 %v2045_v50 }
  0x5d   :  { %1298 = vmatpush.bf16.msra.mxu3 %v2053_v51 }
  0x5e   :  { %1257 = vmatpush.bf16.msra.mxu0 %v2028_v52 }
  0x5f   :  { %1271 = vmatpush.bf16.msra.mxu1 %v2036_v53 }
  0x60   :  { %1285 = vmatpush.bf16.msra.mxu2 %v2044_v54  ;;  %v2097_v54 = vld [vmem:[%s2605_s2] ss:$0 sm:$0xff] }
  0x61   :  { %1299 = vmatpush.bf16.msra.mxu3 %v2052_v55  ;;  %1258 = vmatmul.bf16.vlgmr.msra.gmra.mxu0 %v1407_v4 }
  0x62   :  { %1306 = vmatpush.bf16.msrb.mxu0 %v2067_v56  ;;  %1272 = vmatmul.bf16.vlgmr.msra.gmra.mxu1 %v1411_v6 }
  0x63   :  { %1320 = vmatpush.bf16.msrb.mxu1 %v2075_v57  ;;  %1286 = vmatmul.bf16.vlgmr.msra.gmra.mxu2 %v1415_v5 }
  0x64   :  { %1334 = vmatpush.bf16.msrb.mxu2 %v2083_v2  ;;  %1300 = vmatmul.bf16.vlgmr.msra.gmra.mxu3 %v1419_v7 }
  0x65   :  { %1348 = vmatpush.bf16.msrb.mxu3 %v2091_v3 }
  0x66   :  { %1307 = vmatpush.bf16.msrb.mxu0 %v2066_v8 }
  0x67   :  { %1321 = vmatpush.bf16.msrb.mxu1 %v2074_v9 }
  0x68   :  { %1335 = vmatpush.bf16.msrb.mxu2 %v2082_v10 }
  0x69   :  { %1349 = vmatpush.bf16.msrb.mxu3 %v2090_v11 }
  0x6a   :  { %1308 = vmatpush.bf16.msrb.mxu0 %v2065_v12 }
  0x6b   :  { %1322 = vmatpush.bf16.msrb.mxu1 %v2073_v13 }
  0x6c   :  { %1336 = vmatpush.bf16.msrb.mxu2 %v2081_v14 }
  0x6d   :  { %1350 = vmatpush.bf16.msrb.mxu3 %v2089_v15 }
  0x6e   :  { %1309 = vmatpush.bf16.msrb.mxu0 %v2064_v16 }
  0x6f   :  { %1323 = vmatpush.bf16.msrb.mxu1 %v2072_v17 }
  0x70   :  { %1337 = vmatpush.bf16.msrb.mxu2 %v2080_v18 }
  0x71   :  { %1351 = vmatpush.bf16.msrb.mxu3 %v2088_v19 }
  0x72   :  { %1310 = vmatpush.bf16.msrb.mxu0 %v2063_v20 }
  0x73   :  { %1324 = vmatpush.bf16.msrb.mxu1 %v2071_v21 }
  0x74   :  { %1338 = vmatpush.bf16.msrb.mxu2 %v2079_v22 }
  0x75   :  { %1352 = vmatpush.bf16.msrb.mxu3 %v2087_v23 }
  0x76   :  { %1311 = vmatpush.bf16.msrb.mxu0 %v2062_v24 }
  0x77   :  { %1325 = vmatpush.bf16.msrb.mxu1 %v2070_v25 }
  0x78   :  { %1339 = vmatpush.bf16.msrb.mxu2 %v2078_v26 }
  0x79   :  { %1353 = vmatpush.bf16.msrb.mxu3 %v2086_v27 }
  0x7a   :  { %1312 = vmatpush.bf16.msrb.mxu0 %v2061_v28 }
  0x7b   :  { %1326 = vmatpush.bf16.msrb.mxu1 %v2069_v29 }
  0x7c   :  { %1340 = vmatpush.bf16.msrb.mxu2 %v2077_v30 }
  0x7d   :  { %1354 = vmatpush.bf16.msrb.mxu3 %v2085_v31 }
  0x7e   :  { %1313 = vmatpush.bf16.msrb.mxu0 %v2060_v32 }
  0x7f   :  { %1327 = vmatpush.bf16.msrb.mxu1 %v2068_v33 }
  0x80   :  { %1341 = vmatpush.bf16.msrb.mxu2 %v2076_v34 }
  0x81   :  { %1355 = vmatpush.bf16.msrb.mxu3 %v2084_v35  ;;  %1314 = vmatmul.bf16.vlgmr.msrb.gmra.mxu0 %v1423_v44 }
  0x82   :  { %1328 = vmatmul.bf16.vlgmr.msrb.gmra.mxu1 %v1427_v45 }
  0x83   :  { %1342 = vmatmul.bf16.vlgmr.msrb.gmra.mxu2 %v1431_v46 }
  0x84   :  { %1356 = vmatmul.bf16.vlgmr.msrb.gmra.mxu3 %v1435_v47 }
  0x9e   :  { %v1147_v48 = vpop.f32.mrf.mxu0 }
  0x9f   :  { %v1161_v49 = vpop.f32.mrf.mxu1  ;;  %v1148_v57 = vadd.f32 %v2097_v54, %v1147_v48 }
  0xa1   :  { %v1162_v60 = vadd.f32 %v1161_v49, %v1148_v57 }
  0xa6   :  { %v1175_v50 = vpop.f32.mrf.mxu2  ;;  %v1149_v52 = vpop.f32.mrf.mxu0 }
  0xa7   :  { %v1189_v51 = vpop.f32.mrf.mxu3  ;;  %v1163_v53 = vpop.f32.mrf.mxu1  ;;  %v1150_v61 = vadd.f32 %v2097_v54, %v1149_v52  ;;  %v1176_v0 = vadd.f32 %v1175_v50, %v1162_v60 }
  0xa9   :  { %v1164_v1 = vadd.f32 %v1163_v53, %v1150_v61  ;;  %v1190_v3 = vadd.f32 %v1189_v51, %v1176_v0 }
  0xae   :  { %v1177_v55 = vpop.f32.mrf.mxu2 }
  0xaf   :  { %v1191_v56 = vpop.f32.mrf.mxu3  ;;  %v1178_v5 = vadd.f32 %v1177_v55, %v1164_v1 }
  0xb1   :  { %v1192_v9 = vadd.f32 %v1191_v56, %v1178_v5 }
  0xbe   :  { %v1203_v58 = vpop.f32.mrf.mxu0 }
  0xbf   :  { %v1217_v59 = vpop.f32.mrf.mxu1  ;;  %v1204_v6 = vadd.f32 %v1203_v58, %v1190_v3 }
  0xc1   :  { %v1218_v11 = vadd.f32 %v1217_v59, %v1204_v6 }
  0xc6   :  { %v1231_v62 = vpop.f32.mrf.mxu2  ;;  %v1205_v2 = vpop.f32.mrf.mxu0 }
  0xc7   :  { %v1245_v63 = vpop.f32.mrf.mxu3  ;;  %v1219_v4 = vpop.f32.mrf.mxu1  ;;  %v1206_v13 = vadd.f32 %v1205_v2, %v1192_v9  ;;  %v1232_v14 = vadd.f32 %v1231_v62, %v1218_v11 }
  0xc9   :  { %v1220_v17 = vadd.f32 %v1219_v4, %v1206_v13  ;;  %v1246_v18 = vadd.f32 %v1245_v63, %v1232_v14 }
  0xce   :  { %v1233_v7 = vpop.f32.mrf.mxu2 }
  0xcf   :  { %v1247_v8 = vpop.f32.mrf.mxu3  ;;  %v1234_v19 = vadd.f32 %v1233_v7, %v1220_v17 }
  0xd1   :  { %v1248_v23 = vadd.f32 %v1247_v8, %v1234_v19 }
  0xde   :  { %v1259_v10 = vpop.f32.mrf.mxu0 }
  0xdf   :  { %v1273_v12 = vpop.f32.mrf.mxu1  ;;  %v1260_v21 = vadd.f32 %v1259_v10, %v1246_v18 }
  0xe1   :  { %v1274_v24 = vadd.f32 %v1273_v12, %v1260_v21 }
  0xe6   :  { %v1287_v15 = vpop.f32.mrf.mxu2  ;;  %v1261_v20 = vpop.f32.mrf.mxu0 }
  0xe7   :  { %v1301_v16 = vpop.f32.mrf.mxu3  ;;  %v1275_v22 = vpop.f32.mrf.mxu1  ;;  %v1262_v25 = vadd.f32 %v1261_v20, %v1248_v23  ;;  %v1288_v28 = vadd.f32 %v1287_v15, %v1274_v24 }
  0xe9   :  { %v1276_v30 = vadd.f32 %v1275_v22, %v1262_v25  ;;  %v1302_v32 = vadd.f32 %v1301_v16, %v1288_v28 }
  0xee   :  { %v1289_v26 = vpop.f32.mrf.mxu2 }
  0xef   :  { %v1303_v27 = vpop.f32.mrf.mxu3  ;;  %v1290_v33 = vadd.f32 %v1289_v26, %v1276_v30 }
  0xf1   :  { %v1304_v37 = vadd.f32 %v1303_v27, %v1290_v33 }
  0xfe   :  { %v1315_v29 = vpop.f32.mrf.mxu0 }
  0xff   :  { %v1329_v31 = vpop.f32.mrf.mxu1  ;;  %v1316_v34 = vadd.f32 %v1315_v29, %v1302_v32 }
 0x101   :  { %v1330_v39 = vadd.f32 %v1329_v31, %v1316_v34 }
 0x106   :  { %v1343_v35 = vpop.f32.mrf.mxu2  ;;  %v1317_v38 = vpop.f32.mrf.mxu0 }
 0x107   :  { %v1357_v36 = vpop.f32.mrf.mxu3  ;;  %v1318_v40 = vadd.f32 %v1317_v38, %v1304_v37  ;;  %v1344_v41 = vadd.f32 %v1343_v35, %v1330_v39  ;;  %v1331_v42 = vpop.f32.mrf.mxu1 }
 0x109   :  { %v1332_v43 = vadd.f32 %v1331_v42, %v1318_v40  ;;  %v1358_v45 = vadd.f32 %v1357_v36, %v1344_v41 }
 0x10b   :  { %v1362_v49 = vmax.f32 %v1358_v45, 0.0 }
 0x10e   :  { %v1345_v44 = vpop.f32.mrf.mxu2 }
 0x10f   :  { %v1346_v46 = vadd.f32 %v1345_v44, %v1332_v43  ;;  %v1359_v47 = vpop.f32.mrf.mxu3 }
 0x111   :  { %v1360_v48 = vadd.f32 %v1359_v47, %v1346_v46 }
 0x113   :  { %v1363_v50 = vmax.f32 %v1360_v48, 0.0 }
 0x115   :  { %v2095_v51 = vpack.c.bf16 %v1363_v50, %v1362_v49 }
 0x117   :  { %2096 = vst [vmem:[%s2607_s3] sm:$0xff] %v2095_v51  }

// kernel: vae_conceptizer_forward.13
= control target key start
LH: loop header
LB: loop body
LE: loop exit
PB: predicated region body
PF: predicated region fallthrough
CT: control target
= control target key end

     0   :  { %20 = vsyncpa [#allocation3], 0  ;;  %s2889_s0 = inlined_call_operand.vmem [shape: bf16[2,1024], index: 0, kind: input, shape index: {}]   ;;  %s2890_s1 = inlined_call_operand.vmem [shape: f32[2,5], index: 1, kind: input, shape index: {}]   ;;  %s2891_s2 = inlined_call_operand.vmem [shape: bf16[1024,128], index: 2, kind: input, shape index: {}]   ;;  %s2892_s3 = inlined_call_operand.vmem [shape: f32[1,128], index: 3, kind: input, shape index: {}]   ;;  %s2893_s4 = inlined_call_operand.vmem [shape: f32[128,5], index: 4, kind: input, shape index: {}]   ;;  %s2894_s5 = inlined_call_operand.vmem [shape: f32[1,5], index: 5, kind: input, shape index: {}]   ;;  %s2895_s6 = inlined_call_operand.vmem [shape: f32[128,5], index: 6, kind: input, shape index: {}]   ;;  %s2896_s7 = inlined_call_operand.vmem [shape: f32[1,5], index: 7, kind: input, shape index: {}]   ;;  %s2897_s8 = inlined_call_operand.vmem [shape: f32[5,128], index: 8, kind: input, shape index: {}]   ;;  %s2898_s9 = inlined_call_operand.vmem [shape: f32[1,128], index: 9, kind: input, shape index: {}]   ;;  %s2899_s10 = inlined_call_operand.vmem [shape: bf16[128,1024], index: 10, kind: input, shape index: {}]   ;;  %s2900_s11 = inlined_call_operand.vmem [shape: f32[1,1024], index: 11, kind: input, shape index: {}]   ;;  %s2901_s12 = inlined_call_operand.hbm [shape: f32[2,5], index: 12, kind: output, shape index: {0}]   ;;  %s2902_s13 = inlined_call_operand.hbm [shape: f32[2,5], index: 13, kind: output, shape index: {1}]   ;;  %s2903_s14 = inlined_call_operand.vmem [shape: bf16[2,1024], index: 14, kind: output, shape index: {2}]  }
   0x1   :  { %v1920_v0 = vld [vmem:[%s2891_s2 + $0x38] sm:$0xff]  ;;  %v1919_v4 = vld [vmem:[%s2891_s2 + $0x30] sm:$0xff]  ;;  %v1918_v8 = vld [vmem:[%s2891_s2 + $0x28] sm:$0xff] }
   0x2   :  { %v1928_v1 = vld [vmem:[%s2891_s2 + $0x78] sm:$0xff]  ;;  %581 = vmatpush.bf16.msra.mxu0 %v1920_v0  ;;  %v1927_v5 = vld [vmem:[%s2891_s2 + $0x70] sm:$0xff]  ;;  %v1926_v9 = vld [vmem:[%s2891_s2 + $0x68] sm:$0xff] }
   0x3   :  { %v1936_v2 = vld [vmem:[%s2891_s2 + $0xb8] sm:$0xff]  ;;  %594 = vmatpush.bf16.msra.mxu1 %v1928_v1  ;;  %v1935_v6 = vld [vmem:[%s2891_s2 + $0xb0] sm:$0xff]  ;;  %v1934_v10 = vld [vmem:[%s2891_s2 + $0xa8] sm:$0xff] }
   0x4   :  { %v1944_v3 = vld [vmem:[%s2891_s2 + $0xf8] sm:$0xff]  ;;  %607 = vmatpush.bf16.msra.mxu2 %v1936_v2  ;;  %v1943_v7 = vld [vmem:[%s2891_s2 + $0xf0] sm:$0xff]  ;;  %v1942_v11 = vld [vmem:[%s2891_s2 + $0xe8] sm:$0xff] }
   0x5   :  { %620 = vmatpush.bf16.msra.mxu3 %v1944_v3  ;;  %v1917_v12 = vld [vmem:[%s2891_s2 + $0x20] sm:$0xff]  ;;  %v1916_v17 = vld [vmem:[%s2891_s2 + $0x18] sm:$0xff]  ;;  %v1915_v21 = vld [vmem:[%s2891_s2 + $0x10] sm:$0xff] }
   0x6   :  { %582 = vmatpush.bf16.msra.mxu0 %v1919_v4  ;;  %v1925_v13 = vld [vmem:[%s2891_s2 + $0x60] sm:$0xff]  ;;  %v1924_v18 = vld [vmem:[%s2891_s2 + $0x58] sm:$0xff]  ;;  %v1923_v22 = vld [vmem:[%s2891_s2 + $0x50] sm:$0xff] }
   0x7   :  { %595 = vmatpush.bf16.msra.mxu1 %v1927_v5  ;;  %v1933_v14 = vld [vmem:[%s2891_s2 + $0xa0] sm:$0xff]  ;;  %v1932_v19 = vld [vmem:[%s2891_s2 + $0x98] sm:$0xff]  ;;  %v1931_v23 = vld [vmem:[%s2891_s2 + $0x90] sm:$0xff] }
   0x8   :  { %608 = vmatpush.bf16.msra.mxu2 %v1935_v6  ;;  %v1941_v15 = vld [vmem:[%s2891_s2 + $0xe0] sm:$0xff]  ;;  %v1940_v20 = vld [vmem:[%s2891_s2 + $0xd8] sm:$0xff]  ;;  %v1939_v24 = vld [vmem:[%s2891_s2 + $0xd0] sm:$0xff] }
   0x9   :  { %621 = vmatpush.bf16.msra.mxu3 %v1943_v7  ;;  %v46_v16 = vld [vmem:[%s2889_s0] sm:$0xff] }
   0xa   :  { %583 = vmatpush.bf16.msra.mxu0 %v1918_v8  ;;  %180 = vst [vmem:[#allocation1] ss:$9 sm:$0xff] %v46_v16 }
   0xb   :  { %596 = vmatpush.bf16.msra.mxu1 %v1926_v9 }
   0xc   :  { %609 = vmatpush.bf16.msra.mxu2 %v1934_v10 }
   0xd   :  { %622 = vmatpush.bf16.msra.mxu3 %v1942_v11 }
   0xe   :  { %584 = vmatpush.bf16.msra.mxu0 %v1917_v12 }
   0xf   :  { %597 = vmatpush.bf16.msra.mxu1 %v1925_v13 }
  0x10   :  { %610 = vmatpush.bf16.msra.mxu2 %v1933_v14 }
  0x11   :  { %623 = vmatpush.bf16.msra.mxu3 %v1941_v15 }
  0x12   :  { %585 = vmatpush.bf16.msra.mxu0 %v1916_v17 }
  0x13   :  { %598 = vmatpush.bf16.msra.mxu1 %v1924_v18 }
  0x14   :  { %611 = vmatpush.bf16.msra.mxu2 %v1932_v19 }
  0x15   :  { %624 = vmatpush.bf16.msra.mxu3 %v1940_v20 }
  0x16   :  { %21 = vsyncpa [#allocation5], 0  ;;  %586 = vmatpush.bf16.msra.mxu0 %v1915_v21  ;;  %v1914_v25 = vld [vmem:[%s2891_s2 + $0x8] sm:$0xff]  ;;  %v1913_v29 = vld [vmem:[%s2891_s2] sm:$0xff]  ;;  %vm781_vm0 = vcmask 1044480   ;;  %vm1321_vm1 = vcmask 33792  }
  0x17   :  { %599 = vmatpush.bf16.msra.mxu1 %v1923_v22  ;;  %v1922_v26 = vld [vmem:[%s2891_s2 + $0x48] sm:$0xff]  ;;  %v1921_v30 = vld [vmem:[%s2891_s2 + $0x40] sm:$0xff]  ;;  %v1952_v33 = vld [vmem:[%s2891_s2 + $0x138] sm:$0xff]  ;;  %vm777_vm2 = vcmask 39936   ;;  %s1370_s22 = sshll.u32 %s2901_s12, 4  ;;  %vm1339_vm3 = vcmask 1040384   ;;  %s1371_s22 = int_to_ptr.hbm [resolvable:$true] %s1370_s22 }
  0x18   :  { %612 = vmatpush.bf16.msra.mxu2 %v1931_v23  ;;  %v1930_v27 = vld [vmem:[%s2891_s2 + $0x88] sm:$0xff]  ;;  %v1929_v31 = vld [vmem:[%s2891_s2 + $0x80] sm:$0xff]  ;;  %v1960_v34 = vld [vmem:[%s2891_s2 + $0x178] sm:$0xff]  ;;  %vm1343_vm4 = vcmask 1042434   ;;  %vm1347_vm5 = vcmask 1041408   ;;  %vm1353_vm6 = vcmask 1046534  }
  0x19   :  { %625 = vmatpush.bf16.msra.mxu3 %v1939_v24  ;;  %v1938_v28 = vld [vmem:[%s2891_s2 + $0xc8] sm:$0xff]  ;;  %v1937_v32 = vld [vmem:[%s2891_s2 + $0xc0] sm:$0xff]  ;;  %v1968_v35 = vld [vmem:[%s2891_s2 + $0x1b8] sm:$0xff]  ;;  %vm1349_vm7 = vcmask 1044484   ;;  %vm1357_vm8 = vcmask 1045508   ;;  %vm1359_vm9 = vcmask 1043456  }
  0x1a   :  { %587 = vmatpush.bf16.msra.mxu0 %v1914_v25  ;;  %v1976_v36 = vld [vmem:[%s2891_s2 + $0x1f8] sm:$0xff]  ;;  %v1951_v37 = vld [vmem:[%s2891_s2 + $0x130] sm:$0xff]  ;;  %v181_v39 = vld [vmem:[#allocation1] sm:$0xff] }
  0x1b   :  { %600 = vmatpush.bf16.msra.mxu1 %v1922_v26  ;;  %v183_v38 = vld [vmem:[#allocation1 + $0x12] sm:$0xff]  ;;  %v184_v41 = vld [vmem:[#allocation1 + $0x1b] sm:$0xff]  ;;  %v182_v42 = vld [vmem:[#allocation1 + $0x9] sm:$0xff] }
  0x1c   :  { %613 = vmatpush.bf16.msra.mxu2 %v1930_v27  ;;  %v1959_v40 = vld [vmem:[%s2891_s2 + $0x170] sm:$0xff]  ;;  %v1950_v45 = vld [vmem:[%s2891_s2 + $0x128] sm:$0xff]  ;;  %v1949_v49 = vld [vmem:[%s2891_s2 + $0x120] sm:$0xff] }
  0x1d   :  { %626 = vmatpush.bf16.msra.mxu3 %v1938_v28  ;;  %v1967_v43 = vld [vmem:[%s2891_s2 + $0x1b0] sm:$0xff]  ;;  %v1958_v46 = vld [vmem:[%s2891_s2 + $0x168] sm:$0xff]  ;;  %v1957_v50 = vld [vmem:[%s2891_s2 + $0x160] sm:$0xff] }
  0x1e   :  { %588 = vmatpush.bf16.msra.mxu0 %v1913_v29  ;;  %v1975_v44 = vld [vmem:[%s2891_s2 + $0x1f0] sm:$0xff]  ;;  %v1966_v47 = vld [vmem:[%s2891_s2 + $0x1a8] sm:$0xff]  ;;  %v1965_v51 = vld [vmem:[%s2891_s2 + $0x1a0] sm:$0xff] }
  0x1f   :  { %601 = vmatpush.bf16.msra.mxu1 %v1921_v30  ;;  %v1974_v48 = vld [vmem:[%s2891_s2 + $0x1e8] sm:$0xff]  ;;  %v1973_v52 = vld [vmem:[%s2891_s2 + $0x1e0] sm:$0xff]  ;;  %v1948_v53 = vld [vmem:[%s2891_s2 + $0x118] sm:$0xff] }
  0x20   :  { %614 = vmatpush.bf16.msra.mxu2 %v1929_v31  ;;  %v1956_v54 = vld [vmem:[%s2891_s2 + $0x158] sm:$0xff]  ;;  %v1947_v57 = vld [vmem:[%s2891_s2 + $0x110] sm:$0xff]  ;;  %v1946_v61 = vld [vmem:[%s2891_s2 + $0x108] sm:$0xff] }
  0x21   :  { %627 = vmatpush.bf16.msra.mxu3 %v1937_v32  ;;  %589 = vmatmul.bf16.vlgmr.msra.gmra.mxu0 %v181_v39  ;;  %v1964_v55 = vld [vmem:[%s2891_s2 + $0x198] sm:$0xff]  ;;  %v1955_v58 = vld [vmem:[%s2891_s2 + $0x150] sm:$0xff]  ;;  %v1954_v62 = vld [vmem:[%s2891_s2 + $0x148] sm:$0xff] }
  0x22   :  { %633 = vmatpush.bf16.msrb.mxu0 %v1952_v33  ;;  %602 = vmatmul.bf16.vlgmr.msra.gmra.mxu1 %v182_v42  ;;  %v1972_v56 = vld [vmem:[%s2891_s2 + $0x1d8] sm:$0xff]  ;;  %v1963_v59 = vld [vmem:[%s2891_s2 + $0x190] sm:$0xff]  ;;  %v1962_v63 = vld [vmem:[%s2891_s2 + $0x188] sm:$0xff] }
  0x23   :  { %646 = vmatpush.bf16.msrb.mxu1 %v1960_v34  ;;  %615 = vmatmul.bf16.vlgmr.msra.gmra.mxu2 %v183_v38  ;;  %v1971_v60 = vld [vmem:[%s2891_s2 + $0x1d0] sm:$0xff]  ;;  %v1970_v0 = vld [vmem:[%s2891_s2 + $0x1c8] sm:$0xff]  ;;  %v1945_v1 = vld [vmem:[%s2891_s2 + $0x100] sm:$0xff] }
  0x24   :  { %659 = vmatpush.bf16.msrb.mxu2 %v1968_v35  ;;  %628 = vmatmul.bf16.vlgmr.msra.gmra.mxu3 %v184_v41  ;;  %v1953_v2 = vld [vmem:[%s2891_s2 + $0x140] sm:$0xff]  ;;  %v186_v6 = vld [vmem:[#allocation1 + $0x2d] sm:$0xff]  ;;  %v187_v7 = vld [vmem:[#allocation1 + $0x36] sm:$0xff] }
  0x25   :  { %672 = vmatpush.bf16.msrb.mxu3 %v1976_v36  ;;  %v1961_v3 = vld [vmem:[%s2891_s2 + $0x180] sm:$0xff]  ;;  %v701_v9 = vld [vmem:[%s2893_s4 + $0x78] sm:$0xff]  ;;  %v700_v11 = vld [vmem:[%s2893_s4 + $0x70] sm:$0xff] }
  0x26   :  { %634 = vmatpush.bf16.msrb.mxu0 %v1951_v37  ;;  %v1969_v4 = vld [vmem:[%s2891_s2 + $0x1c0] sm:$0xff]  ;;  %v741_v10 = vld [vmem:[%s2895_s6 + $0x78] sm:$0xff]  ;;  %v740_v12 = vld [vmem:[%s2895_s6 + $0x70] sm:$0xff] }
  0x27   :  { %647 = vmatpush.bf16.msrb.mxu1 %v1959_v40  ;;  %v185_v5 = vld [vmem:[#allocation1 + $0x24] sm:$0xff]  ;;  %v697_v17 = vld [vmem:[%s2893_s4 + $0x58] sm:$0xff]  ;;  %v696_v19 = vld [vmem:[%s2893_s4 + $0x50] sm:$0xff] }
  0x28   :  { %660 = vmatpush.bf16.msrb.mxu2 %v1967_v43  ;;  %v188_v8 = vld [vmem:[#allocation1 + $0x3f] sm:$0xff]  ;;  %v699_v13 = vld [vmem:[%s2893_s4 + $0x68] sm:$0xff]  ;;  %v736_v20 = vld [vmem:[%s2895_s6 + $0x50] sm:$0xff] }
  0x29   :  { %673 = vmatpush.bf16.msrb.mxu3 %v1975_v44  ;;  %v739_v14 = vld [vmem:[%s2895_s6 + $0x68] sm:$0xff]  ;;  %v698_v15 = vld [vmem:[%s2893_s4 + $0x60] sm:$0xff]  ;;  %v737_v18 = vld [vmem:[%s2895_s6 + $0x58] sm:$0xff] }
  0x2a   :  { %635 = vmatpush.bf16.msrb.mxu0 %v1950_v45  ;;  %v738_v16 = vld [vmem:[%s2895_s6 + $0x60] sm:$0xff]  ;;  %v695_v21 = vld [vmem:[%s2893_s4 + $0x48] sm:$0xff]  ;;  %v693_v25 = vld [vmem:[%s2893_s4 + $0x38] sm:$0xff] }
  0x2b   :  { %648 = vmatpush.bf16.msrb.mxu1 %v1958_v46  ;;  %v735_v22 = vld [vmem:[%s2895_s6 + $0x48] sm:$0xff]  ;;  %v694_v23 = vld [vmem:[%s2893_s4 + $0x40] sm:$0xff]  ;;  %v733_v26 = vld [vmem:[%s2895_s6 + $0x38] sm:$0xff] }
  0x2c   :  { %661 = vmatpush.bf16.msrb.mxu2 %v1966_v47  ;;  %v734_v24 = vld [vmem:[%s2895_s6 + $0x40] sm:$0xff]  ;;  %v692_v27 = vld [vmem:[%s2893_s4 + $0x30] sm:$0xff]  ;;  %v691_v29 = vld [vmem:[%s2893_s4 + $0x28] sm:$0xff] }
  0x2d   :  { %674 = vmatpush.bf16.msrb.mxu3 %v1974_v48  ;;  %v732_v28 = vld [vmem:[%s2895_s6 + $0x30] sm:$0xff]  ;;  %v731_v30 = vld [vmem:[%s2895_s6 + $0x28] sm:$0xff]  ;;  %v690_v32 = vld [vmem:[%s2893_s4 + $0x20] sm:$0xff] }
  0x2e   :  { %636 = vmatpush.bf16.msrb.mxu0 %v1949_v49  ;;  %v730_v33 = vld [vmem:[%s2895_s6 + $0x20] sm:$0xff]  ;;  %v689_v35 = vld [vmem:[%s2893_s4 + $0x18] sm:$0xff]  ;;  %v688_v37 = vld [vmem:[%s2893_s4 + $0x10] sm:$0xff] }
  0x2f   :  { %649 = vmatpush.bf16.msrb.mxu1 %v1957_v50  ;;  %v729_v36 = vld [vmem:[%s2895_s6 + $0x18] sm:$0xff]  ;;  %v728_v38 = vld [vmem:[%s2895_s6 + $0x10] sm:$0xff]  ;;  %v687_v41 = vld [vmem:[%s2893_s4 + $0x8] sm:$0xff] }
  0x30   :  { %662 = vmatpush.bf16.msrb.mxu2 %v1965_v51  ;;  %v727_v42 = vld [vmem:[%s2895_s6 + $0x8] sm:$0xff]  ;;  %v686_v45 = vld [vmem:[%s2893_s4] sm:$0xff] }
  0x31   :  { %675 = vmatpush.bf16.msrb.mxu3 %v1973_v52  ;;  %v726_v46 = vld [vmem:[%s2895_s6] sm:$0xff] }
  0x32   :  { %637 = vmatpush.bf16.msrb.mxu0 %v1948_v53  ;;  %v2043_v47 = vld [vmem:[%s2892_s3] ss:$0 sm:$0xff] }
  0x33   :  { %650 = vmatpush.bf16.msrb.mxu1 %v1956_v54 }
  0x34   :  { %663 = vmatpush.bf16.msrb.mxu2 %v1964_v55 }
  0x35   :  { %676 = vmatpush.bf16.msrb.mxu3 %v1972_v56 }
  0x36   :  { %638 = vmatpush.bf16.msrb.mxu0 %v1947_v57 }
  0x37   :  { %651 = vmatpush.bf16.msrb.mxu1 %v1955_v58 }
  0x38   :  { %664 = vmatpush.bf16.msrb.mxu2 %v1963_v59 }
  0x39   :  { %677 = vmatpush.bf16.msrb.mxu3 %v1971_v60 }
  0x3a   :  { %639 = vmatpush.bf16.msrb.mxu0 %v1946_v61 }
  0x3b   :  { %652 = vmatpush.bf16.msrb.mxu1 %v1954_v62 }
  0x3c   :  { %665 = vmatpush.bf16.msrb.mxu2 %v1962_v63 }
  0x3d   :  { %678 = vmatpush.bf16.msrb.mxu3 %v1970_v0 }
  0x3e   :  { %640 = vmatpush.bf16.msrb.mxu0 %v1945_v1 }
  0x3f   :  { %653 = vmatpush.bf16.msrb.mxu1 %v1953_v2 }
  0x40   :  { %666 = vmatpush.bf16.msrb.mxu2 %v1961_v3  ;;  %v772_v3 = vld [vmem:[%s2897_s8] sm:$0x1f] }
  0x41   :  { %679 = vmatpush.bf16.msrb.mxu3 %v1969_v4  ;;  %641 = vmatmul.bf16.vlgmr.msrb.gmra.mxu0 %v185_v5  ;;  %v1883_v4 = vld [vmem:[%s2899_s10 + $0x1c0] sm:$0xf] }
  0x42   :  { %654 = vmatmul.bf16.vlgmr.msrb.gmra.mxu1 %v186_v6  ;;  %706 = vmatpush.msra.mxu0 %v701_v9  ;;  %v2037_v5 = vld [vmem:[%s2899_s10 + $0x1dc] sm:$0xf0]  ;;  %v2033_v6 = vld [vmem:[%s2899_s10 + $0x1c4] sm:$0xf]  ;;  %v1891_v9 = vld [vmem:[%s2899_s10 + $0x1c8] sm:$0xf] }
  0x43   :  { %667 = vmatmul.bf16.vlgmr.msrb.gmra.mxu2 %v187_v7  ;;  %746 = vmatpush.msra.mxu1 %v741_v10  ;;  %v1884_v7 = vor.u32 %v2037_v5, %v1883_v4  ;;  %v2038_v10 = vld [vmem:[%s2899_s10 + $0x1e4] sm:$0xf0]  ;;  %v1997_v4 = vld [vmem:[%s2899_s10 + $0x9c] sm:$0xf0] }
  0x44   :  { %680 = vmatmul.bf16.vlgmr.msrb.gmra.mxu3 %v188_v8  ;;  %707 = vmatpush.msra.mxu0 %v700_v11  ;;  %v1885_v8 = vld [vmem:[%s2899_s10 + $0x1e0] sm:$0xf0] }
  0x45   :  { %747 = vmatpush.msra.mxu1 %v740_v12  ;;  %1655 = vmatpush.msk.msra.mxu2 %vm781_vm0, %v772_v3  ;;  %v1888_v11 = vor.u32 %v2033_v6, %v1885_v8  ;;  %v1892_v12 = vor.u32 %v2038_v10, %v1891_v9  ;;  %v1723_v3 = vld [vmem:[%s2899_s10 + $0x80] sm:$0xf]  ;;  %v1725_v8 = vld [vmem:[%s2899_s10 + $0xa0] sm:$0xf0]  ;;  %v1731_v9 = vld [vmem:[%s2899_s10 + $0x88] sm:$0xf] }
  0x46   :  { %708 = vmatpush.msra.mxu0 %v699_v13  ;;  %v2034_v13 = vld [vmem:[%s2899_s10 + $0x1cc] sm:$0xf]  ;;  %1209 = vmatpush.bf16.msra.mxu3 %v1884_v7  ;;  %v1993_v7 = vld [vmem:[%s2899_s10 + $0x84] sm:$0xf] }
  0x47   :  { %748 = vmatpush.msra.mxu1 %v739_v14  ;;  %v1893_v14 = vld [vmem:[%s2899_s10 + $0x1e8] sm:$0xf0]  ;;  %1222 = vmatpush.bf16.msrb.mxu2 %v1888_v11 }
  0x48   :  { %709 = vmatpush.msra.mxu0 %v698_v15  ;;  %v1851_v15 = vld [vmem:[%s2899_s10 + $0x180] sm:$0xf] }
  0x49   :  { %749 = vmatpush.msra.mxu1 %v738_v16  ;;  %v1896_v16 = vor.u32 %v2034_v13, %v1893_v14  ;;  %v1994_v13 = vld [vmem:[%s2899_s10 + $0x8c] sm:$0xf] }
  0x4a   :  { %710 = vmatpush.msra.mxu0 %v697_v17  ;;  %v2029_v17 = vld [vmem:[%s2899_s10 + $0x19c] sm:$0xf0]  ;;  %v1733_v14 = vld [vmem:[%s2899_s10 + $0xa8] sm:$0xf0] }
  0x4b   :  { %750 = vmatpush.msra.mxu1 %v737_v18  ;;  %v2025_v18 = vld [vmem:[%s2899_s10 + $0x184] sm:$0xf] }
  0x4c   :  { %711 = vmatpush.msra.mxu0 %v696_v19  ;;  %v1853_v19 = vld [vmem:[%s2899_s10 + $0x1a0] sm:$0xf0] }
  0x4d   :  { %751 = vmatpush.msra.mxu1 %v736_v20  ;;  %v1852_v20 = vor.u32 %v2029_v17, %v1851_v15  ;;  %v1728_v17 = vor.u32 %v1993_v7, %v1725_v8  ;;  %v1835_v8 = vld [vmem:[%s2899_s10 + $0x150] sm:$0xf] }
  0x4e   :  { %712 = vmatpush.msra.mxu0 %v695_v21  ;;  %v1856_v21 = vor.u32 %v2025_v18, %v1853_v19  ;;  %v1691_v19 = vld [vmem:[%s2899_s10 + $0x40] sm:$0xf] }
  0x4f   :  { %752 = vmatpush.msra.mxu1 %v735_v22  ;;  %v1859_v22 = vld [vmem:[%s2899_s10 + $0x188] sm:$0xf]  ;;  %1210 = vmatpush.bf16.msra.mxu3 %v1852_v20  ;;  %v1989_v20 = vld [vmem:[%s2899_s10 + $0x5c] sm:$0xf0] }
  0x50   :  { %713 = vmatpush.msra.mxu0 %v694_v23  ;;  %v2030_v23 = vld [vmem:[%s2899_s10 + $0x1a4] sm:$0xf0]  ;;  %1223 = vmatpush.bf16.msrb.mxu2 %v1856_v21  ;;  %v1985_v21 = vld [vmem:[%s2899_s10 + $0x44] sm:$0xf] }
  0x51   :  { %753 = vmatpush.msra.mxu1 %v734_v24  ;;  %v2026_v24 = vld [vmem:[%s2899_s10 + $0x18c] sm:$0xf] }
  0x52   :  { %714 = vmatpush.msra.mxu0 %v693_v25  ;;  %v1860_v25 = vor.u32 %v2030_v23, %v1859_v22  ;;  %v1736_v22 = vor.u32 %v1994_v13, %v1733_v14  ;;  %v1693_v23 = vld [vmem:[%s2899_s10 + $0x60] sm:$0xf0]  ;;  %v1843_v13 = vld [vmem:[%s2899_s10 + $0x158] sm:$0xf] }
  0x53   :  { %754 = vmatpush.msra.mxu1 %v733_v26  ;;  %v1861_v26 = vld [vmem:[%s2899_s10 + $0x1a8] sm:$0xf0]  ;;  %v2024_v14 = vld [vmem:[%s2899_s10 + $0x174] sm:$0xf0] }
  0x54   :  { %715 = vmatpush.msra.mxu0 %v692_v27  ;;  %v1819_v27 = vld [vmem:[%s2899_s10 + $0x140] sm:$0xf] }
  0x55   :  { %755 = vmatpush.msra.mxu1 %v732_v28  ;;  %v2021_v28 = vld [vmem:[%s2899_s10 + $0x15c] sm:$0xf0] }
  0x56   :  { %716 = vmatpush.msra.mxu0 %v691_v29  ;;  %v1864_v29 = vor.u32 %v2026_v24, %v1861_v26  ;;  %v1699_v24 = vld [vmem:[%s2899_s10 + $0x48] sm:$0xf]  ;;  %v1986_v26 = vld [vmem:[%s2899_s10 + $0x4c] sm:$0xf] }
  0x57   :  { %756 = vmatpush.msra.mxu1 %v731_v30  ;;  %v2017_v30 = vld [vmem:[%s2899_s10 + $0x144] sm:$0xf] }
  0x58   :  { %717 = vmatpush.msra.mxu0 %v690_v32  ;;  %v1827_v32 = vld [vmem:[%s2899_s10 + $0x148] sm:$0xf] }
  0x59   :  { %757 = vmatpush.msra.mxu1 %v730_v33  ;;  %v1820_v33 = vor.u32 %v2021_v28, %v1819_v27  ;;  %v1701_v27 = vld [vmem:[%s2899_s10 + $0x68] sm:$0xf0]  ;;  %v769_v28 = vld [vmem:[%s2890_s1] sm:$0x3] }
  0x5a   :  { %718 = vmatpush.msra.mxu0 %v689_v35  ;;  %v2018_v35 = vld [vmem:[%s2899_s10 + $0x14c] sm:$0xf] }
  0x5b   :  { %758 = vmatpush.msra.mxu1 %v729_v36  ;;  %v1829_v36 = vld [vmem:[%s2899_s10 + $0x168] sm:$0xf0]  ;;  %1211 = vmatpush.bf16.msra.mxu3 %v1820_v33  ;;  %v1981_v33 = vld [vmem:[%s2899_s10 + $0x1c] sm:$0xf0] }
  0x5c   :  { %719 = vmatpush.msra.mxu0 %v688_v37 }
  0x5d   :  { %759 = vmatpush.msra.mxu1 %v728_v38 }
  0x5e   :  { %720 = vmatpush.msra.mxu0 %v687_v41  ;;  %v2009_v41 = vld [vmem:[%s2899_s10 + $0x104] sm:$0xf] }
  0x5f   :  { %760 = vmatpush.msra.mxu1 %v727_v42  ;;  %v1832_v42 = vor.u32 %v2018_v35, %v1829_v36  ;;  %v1661_v35 = vld [vmem:[%s2899_s10 + $0x20] sm:$0xf0]  ;;  %v1704_v36 = vor.u32 %v1986_v26, %v1701_v27  ;;  %v2016_v26 = vld [vmem:[%s2899_s10 + $0x134] sm:$0xf0] }
  0x60   :  { %721 = vmatpush.msra.mxu0 %v686_v45  ;;  %v2014_v45 = vld [vmem:[%s2899_s10 + $0x124] sm:$0xf0] }
  0x61   :  { %761 = vmatpush.msra.mxu1 %v726_v46  ;;  %v2010_v46 = vld [vmem:[%s2899_s10 + $0x10c] sm:$0xf] }
  0x62   :  { %1235 = vmatpush.bf16.msrb.mxu0 %v1892_v12  ;;  %v1998_v12 = vld [vmem:[%s2899_s10 + $0xa4] sm:$0xf0] }
  0x63   :  { %1248 = vmatpush.bf16.msrb.mxu1 %v1896_v16  ;;  %v1724_v16 = vor.u32 %v1997_v4, %v1723_v3  ;;  %v1732_v18 = vor.u32 %v1998_v12, %v1731_v9  ;;  %v1877_v3 = vld [vmem:[%s2899_s10 + $0x1b8] sm:$0xf0]  ;;  %v2023_v9 = vld [vmem:[%s2899_s10 + $0x16c] sm:$0xf0]  ;;  %v1837_v12 = vld [vmem:[%s2899_s10 + $0x170] sm:$0xf0] }
  0x66   :  { %1236 = vmatpush.bf16.msrb.mxu0 %v1860_v25  ;;  %v1990_v25 = vld [vmem:[%s2899_s10 + $0x64] sm:$0xf0] }
  0x67   :  { %1249 = vmatpush.bf16.msrb.mxu1 %v1864_v29  ;;  %v1692_v29 = vor.u32 %v1989_v20, %v1691_v19  ;;  %v1803_v20 = vld [vmem:[%s2899_s10 + $0x110] sm:$0xf] }
  0x6b   :  { %1250 = vmatpush.bf16.msrb.mxu1 %v1832_v42  ;;  %v2039_v42 = vld [vmem:[%s2899_s10 + $0x1ec] sm:$0xf0] }
  0x9e   :  { %v590_v31 = vpop.f32.mrf.mxu0 }
  0x9f   :  { %v603_v34 = vpop.f32.mrf.mxu1  ;;  %v591_v50 = vadd.f32 %v2043_v47, %v590_v31  ;;  %v1821_v31 = vld [vmem:[%s2899_s10 + $0x160] sm:$0xf0]  ;;  %v1797_v47 = vld [vmem:[%s2899_s10 + $0x128] sm:$0xf0] }
  0xa0   :  { %v1824_v37 = vor.u32 %v2017_v30, %v1821_v31  ;;  %v1659_v30 = vld [vmem:[%s2899_s10] sm:$0xf]  ;;  %v1696_v31 = vor.u32 %v1985_v21, %v1693_v23  ;;  %v2015_v21 = vld [vmem:[%s2899_s10 + $0x12c] sm:$0xf0] }
  0xa1   :  { %v604_v51 = vadd.f32 %v603_v34, %v591_v50  ;;  %v2022_v34 = vld [vmem:[%s2899_s10 + $0x164] sm:$0xf0]  ;;  %v1804_v23 = vor.u32 %v2015_v21, %v1803_v20 }
  0xa2   :  { %v1828_v38 = vor.u32 %v2022_v34, %v1827_v32  ;;  %1224 = vmatpush.bf16.msrb.mxu2 %v1824_v37  ;;  %v1700_v32 = vor.u32 %v1990_v25, %v1699_v24  ;;  %v1977_v34 = vld [vmem:[%s2899_s10 + $0x4] sm:$0xf]  ;;  %v1667_v37 = vld [vmem:[%s2899_s10 + $0x8] sm:$0xf]  ;;  %v1805_v24 = vld [vmem:[%s2899_s10 + $0x130] sm:$0xf0] }
  0xa3   :  { %v1811_v25 = vld [vmem:[%s2899_s10 + $0x118] sm:$0xf] }
  0xa4   :  { %1237 = vmatpush.bf16.msrb.mxu0 %v1828_v38  ;;  %v1982_v38 = vld [vmem:[%s2899_s10 + $0x24] sm:$0xf0] }
  0xa6   :  { %v616_v39 = vpop.f32.mrf.mxu2  ;;  %v592_v43 = vpop.f32.mrf.mxu0 }
  0xa7   :  { %v629_v40 = vpop.f32.mrf.mxu3  ;;  %v605_v44 = vpop.f32.mrf.mxu1  ;;  %v617_v52 = vadd.f32 %v616_v39, %v604_v51  ;;  %v1787_v39 = vld [vmem:[%s2899_s10 + $0x100] sm:$0xf]  ;;  %v1789_v43 = vld [vmem:[%s2899_s10 + $0x120] sm:$0xf0] }
  0xa8   :  { %v1795_v44 = vld [vmem:[%s2899_s10 + $0x108] sm:$0xf]  ;;  %v1792_v51 = vor.u32 %v2009_v41, %v1789_v43  ;;  %v1899_v41 = vld [vmem:[%s2899_s10 + $0x1d0] sm:$0xf] }
  0xa9   :  { %v630_v53 = vadd.f32 %v629_v40, %v617_v52  ;;  %v2013_v40 = vld [vmem:[%s2899_s10 + $0x11c] sm:$0xf0]  ;;  %v1796_v52 = vor.u32 %v2014_v45, %v1795_v44  ;;  %v1660_v44 = vor.u32 %v1981_v33, %v1659_v30  ;;  %v2035_v45 = vld [vmem:[%s2899_s10 + $0x1d4] sm:$0xf]  ;;  %v1813_v30 = vld [vmem:[%s2899_s10 + $0x138] sm:$0xf0] }
  0xaa   :  { %v1788_v50 = vor.u32 %v2013_v40, %v1787_v39  ;;  %1225 = vmatpush.bf16.msrb.mxu2 %v1792_v51  ;;  %v1978_v39 = vld [vmem:[%s2899_s10 + $0xc] sm:$0xf]  ;;  %v2036_v51 = vld [vmem:[%s2899_s10 + $0x1dc] sm:$0xf]  ;;  %v2007_v33 = vld [vmem:[%s2899_s10 + $0xec] sm:$0xf0] }
  0xab   :  { %1238 = vmatpush.bf16.msrb.mxu0 %v1796_v52  ;;  %v1669_v40 = vld [vmem:[%s2899_s10 + $0x28] sm:$0xf0]  ;;  %v1909_v52 = vld [vmem:[%s2899_s10 + $0x1f8] sm:$0xf0] }
  0xac   :  { %1212 = vmatpush.bf16.msra.mxu3 %v1788_v50  ;;  %v2040_v50 = vld [vmem:[%s2899_s10 + $0x1f4] sm:$0xf0] }
  0xae   :  { %v618_v48 = vpop.f32.mrf.mxu2 }
  0xaf   :  { %v631_v49 = vpop.f32.mrf.mxu3  ;;  %v2044_v48 = vld [vmem:[%s2894_s5] ss:$0 sm:$0xff]  ;;  %s1381_s5 = sshll.u32 %s2902_s13, 4  ;;  %s1382_s5 = int_to_ptr.hbm [resolvable:$true] %s1381_s5 }
  0xb0   :  { %v2045_v49 = vld [vmem:[%s2896_s7] ss:$0 sm:$0xff] }
  0xbe   :  { %v642_v54 = vpop.f32.mrf.mxu0 }
  0xbf   :  { %v655_v55 = vpop.f32.mrf.mxu1  ;;  %v643_v56 = vadd.f32 %v642_v54, %v630_v53  ;;  %v1755_v53 = vld [vmem:[%s2899_s10 + $0xc0] sm:$0xf] }
  0xc0   :  { %v2005_v54 = vld [vmem:[%s2899_s10 + $0xdc] sm:$0xf0] }
  0xc1   :  { %v656_v57 = vadd.f32 %v655_v55, %v643_v56  ;;  %v2001_v55 = vld [vmem:[%s2899_s10 + $0xc4] sm:$0xf]  ;;  %v1800_v56 = vor.u32 %v2010_v46, %v1797_v47  ;;  %v1901_v46 = vld [vmem:[%s2899_s10 + $0x1f0] sm:$0xf0]  ;;  %v1907_v47 = vld [vmem:[%s2899_s10 + $0x1d8] sm:$0xf] }
  0xc3   :  { %1251 = vmatpush.bf16.msrb.mxu1 %v1800_v56  ;;  %v1900_v56 = vor.u32 %v2039_v42, %v1899_v41  ;;  %v2004_v41 = vld [vmem:[%s2899_s10 + $0xdc] sm:$0xf] }
  0xc4   :  { %v1781_v42 = vld [vmem:[%s2899_s10 + $0xf8] sm:$0xf0] }
  0xc6   :  { %v668_v58 = vpop.f32.mrf.mxu2  ;;  %v644_v61 = vpop.f32.mrf.mxu0 }
  0xc7   :  { %v681_v59 = vpop.f32.mrf.mxu3  ;;  %v669_v60 = vadd.f32 %v668_v58, %v656_v57  ;;  %v657_v62 = vpop.f32.mrf.mxu1  ;;  %v1757_v57 = vld [vmem:[%s2899_s10 + $0xe0] sm:$0xf0]  ;;  %v1763_v58 = vld [vmem:[%s2899_s10 + $0xc8] sm:$0xf] }
  0xc8   :  { %v2002_v62 = vld [vmem:[%s2899_s10 + $0xcc] sm:$0xf]  ;;  %v1760_v5 = vor.u32 %v2001_v55, %v1757_v57  ;;  %v1904_v57 = vor.u32 %v2035_v45, %v1901_v46  ;;  %v1999_v45 = vld [vmem:[%s2899_s10 + $0xac] sm:$0xf0]  ;;  %v1995_v46 = vld [vmem:[%s2899_s10 + $0x94] sm:$0xf] }
  0xc9   :  { %v682_v63 = vadd.f32 %v681_v59, %v669_v60  ;;  %v2006_v59 = vld [vmem:[%s2899_s10 + $0xe4] sm:$0xf0] }
  0xca   :  { %v1764_v6 = vor.u32 %v2006_v59, %v1763_v58  ;;  %1226 = vmatpush.bf16.msrb.mxu2 %v1760_v5  ;;  %v1867_v58 = vld [vmem:[%s2899_s10 + $0x190] sm:$0xf] }
  0xcb   :  { %v685_v0 = vmax.f32 %v682_v63, 0.0  ;;  %v1765_v63 = vld [vmem:[%s2899_s10 + $0xe8] sm:$0xf0]  ;;  %v2031_v59 = vld [vmem:[%s2899_s10 + $0x1ac] sm:$0xf0] }
  0xcc   :  { %v1768_v11 = vor.u32 %v2002_v62, %v1765_v63  ;;  %1239 = vmatpush.bf16.msrb.mxu0 %v1764_v6  ;;  %v2027_v62 = vld [vmem:[%s2899_s10 + $0x194] sm:$0xf]  ;;  %v1868_v4 = vor.u32 %v2031_v59, %v1867_v58 }
  0xcd   :  { %722 = vmatmul.f32.vlgmr.msra.gmra.mxu0 %v685_v0  ;;  %762 = vmatmul.f32.vlgmr.msra.gmra.mxu1 %v685_v0  ;;  %v1869_v63 = vld [vmem:[%s2899_s10 + $0x1b0] sm:$0xf0] }
  0xce   :  { %v670_v1 = vpop.f32.mrf.mxu2  ;;  %1252 = vmatpush.bf16.msrb.mxu1 %v1768_v11  ;;  %1227 = vmatpush.bf16.msrb.mxu2 %v1728_v17  ;;  %v1872_v5 = vor.u32 %v2027_v62, %v1869_v63  ;;  %v1836_v11 = vor.u32 %v2023_v9, %v1835_v8  ;;  %v2020_v17 = vld [vmem:[%s2899_s10 + $0x15c] sm:$0xf]  ;;  %v1987_v58 = vld [vmem:[%s2899_s10 + $0x54] sm:$0xf]  ;;  %v1992_v62 = vld [vmem:[%s2899_s10 + $0x74] sm:$0xf0] }
  0xcf   :  { %v683_v2 = vpop.f32.mrf.mxu3  ;;  %v1709_v59 = vld [vmem:[%s2899_s10 + $0x70] sm:$0xf0]  ;;  %v1988_v63 = vld [vmem:[%s2899_s10 + $0x5c] sm:$0xf]  ;;  %v1683_v8 = vld [vmem:[%s2899_s10 + $0x18] sm:$0xf] }
  0xd0   :  { %v1756_v2 = vor.u32 %v2005_v54, %v1755_v53  ;;  %1240 = vmatpush.bf16.msrb.mxu0 %v1732_v18  ;;  %v1664_v53 = vor.u32 %v1977_v34, %v1661_v35  ;;  %v1672_v54 = vor.u32 %v1978_v39, %v1669_v40  ;;  %v1845_v18 = vld [vmem:[%s2899_s10 + $0x178] sm:$0xf0]  ;;  %v2003_v34 = vld [vmem:[%s2899_s10 + $0xd4] sm:$0xf]  ;;  %v1984_v9 = vld [vmem:[%s2899_s10 + $0x34] sm:$0xf0] }
  0xd1   :  { %v1848_v19 = vor.u32 %v2020_v17, %v1845_v18 }
  0xd2   :  { %1213 = vmatpush.bf16.msra.mxu3 %v1756_v2  ;;  %1253 = vmatpush.bf16.msrb.mxu1 %v1736_v22  ;;  %v2028_v2 = vld [vmem:[%s2899_s10 + $0x19c] sm:$0xf]  ;;  %v2011_v22 = vld [vmem:[%s2899_s10 + $0x114] sm:$0xf] }
  0xd3   :  { %1228 = vmatpush.bf16.msrb.mxu2 %v1696_v31  ;;  %v1880_v7 = vor.u32 %v2028_v2, %v1877_v3  ;;  %v1808_v27 = vor.u32 %v2011_v22, %v1805_v24  ;;  %v1675_v3 = vld [vmem:[%s2899_s10 + $0x10] sm:$0xf] }
  0xd4   :  { %1241 = vmatpush.bf16.msrb.mxu0 %v1700_v32  ;;  %v1771_v32 = vld [vmem:[%s2899_s10 + $0xd0] sm:$0xf] }
  0xd5   :  { %v1772_v35 = vor.u32 %v2007_v33, %v1771_v32 }
  0xd6   :  { %1214 = vmatpush.bf16.msra.mxu3 %v1724_v16  ;;  %1254 = vmatpush.bf16.msrb.mxu1 %v1704_v36  ;;  %v1844_v16 = vor.u32 %v2024_v14, %v1843_v13  ;;  %v1773_v36 = vld [vmem:[%s2899_s10 + $0xf0] sm:$0xf0]  ;;  %v1684_v14 = vor.u32 %v1984_v9, %v1683_v8 }
  0xd7   :  { %1229 = vmatpush.bf16.msrb.mxu2 %v1664_v53  ;;  %v1776_v39 = vor.u32 %v2003_v34, %v1773_v36 }
  0xda   :  { %1215 = vmatpush.bf16.msra.mxu3 %v1692_v29  ;;  %1255 = vmatpush.bf16.msrb.mxu1 %v1672_v54  ;;  %v2012_v29 = vld [vmem:[%s2899_s10 + $0x11c] sm:$0xf] }
  0xdb   :  { %v1816_v31 = vor.u32 %v2012_v29, %v1813_v30  ;;  %v1749_v54 = vld [vmem:[%s2899_s10 + $0xb8] sm:$0xf0] }
  0xde   :  { %1216 = vmatpush.bf16.msra.mxu3 %v1660_v44  ;;  %v1784_v44 = vor.u32 %v2004_v41, %v1781_v42 }
  0xe2   :  { %1261 = vmatpush.bf16.msrb.mxu3 %v1900_v56  ;;  %v1991_v56 = vld [vmem:[%s2899_s10 + $0x6c] sm:$0xf0] }
  0xe6   :  { %1262 = vmatpush.bf16.msrb.mxu3 %v1868_v4  ;;  %v1983_v4 = vld [vmem:[%s2899_s10 + $0x2c] sm:$0xf0] }
  0xea   :  { %1263 = vmatpush.bf16.msrb.mxu3 %v1836_v11  ;;  %v1685_v11 = vld [vmem:[%s2899_s10 + $0x38] sm:$0xf0] }
  0xee   :  { %1264 = vmatpush.bf16.msrb.mxu3 %v1804_v23 }
  0xf2   :  { %1265 = vmatpush.bf16.msrb.mxu3 %v1772_v35 }
 0x14a   :  { %v723_v60 = vpop.f32.mrf.mxu0  ;;  %v763_v61 = vpop.f32.mrf.mxu1 }
 0x14b   :  { %v2601_v0 = vadd.f32 %v2044_v48, %v723_v60  ;;  %v764_v1 = vadd.f32 %v2045_v49, %v763_v61  ;;  %v1668_v49 = vor.u32 %v1982_v38, %v1667_v37  ;;  %v1908_v60 = vor.u32 %v2040_v50, %v1907_v47  ;;  %v1779_v37 = vld [vmem:[%s2899_s10 + $0xd8] sm:$0xf]  ;;  %v1741_v47 = vld [vmem:[%s2899_s10 + $0xb0] sm:$0xf0] }
 0x14c   :  { %v1912_v61 = vor.u32 %v2036_v51, %v1909_v52  ;;  %v2008_v38 = vld [vmem:[%s2899_s10 + $0xf4] sm:$0xf0]  ;;  %v1996_v52 = vld [vmem:[%s2899_s10 + $0x9c] sm:$0xf] }
 0x14d   :  { %v766_v10 = vmul.f32 0.5, %v764_v1  ;;  %1323 = vst.msk [vmem:[#allocation4] sm:$0x3] %vm1321_vm1, %v764_v1  ;;  %1242 = vmatpush.bf16.msrb.mxu0 %v1668_v49  ;;  %v2032_v1 = vld [vmem:[%s2899_s10 + $0x1b4] sm:$0xf0]  ;;  %v1780_v40 = vor.u32 %v2008_v38, %v1779_v37  ;;  %v1744_v49 = vor.u32 %v1995_v46, %v1741_v47 }
 0x14e   :  { %1322 = vst.msk [vmem:[#allocation2] sm:$0x3] %vm1321_vm1, %v2601_v0  ;;  %1300 = vmatpush.bf16.msra.mxu1 %v1912_v61  ;;  %v1747_v50 = vld [vmem:[%s2899_s10 + $0x98] sm:$0xf] }
 0x14f   :  { %v767_v15 = vmul.f32 1.442695, %v766_v10  ;;  %v2019_v10 = vld [vmem:[%s2899_s10 + $0x154] sm:$0xf]  ;;  %v2000_v51 = vld [vmem:[%s2899_s10 + $0xb4] sm:$0xf0] }
 0x150   :  { %v1748_v53 = vor.u32 %v2000_v51, %v1747_v50 }
 0x151   :  { %2047 = vpow2.f32 %v767_v15  ;;  %1287 = vmatpush.bf16.msra.mxu0 %v1908_v60  ;;  %v1840_v15 = vor.u32 %v2019_v10, %v1837_v12  ;;  %v1715_v60 = vld [vmem:[%s2899_s10 + $0x58] sm:$0xf]  ;;  %v1980_v10 = vld [vmem:[%s2899_s10 + $0x1c] sm:$0xf]  ;;  %v1676_v12 = vor.u32 %v1983_v4, %v1675_v3 }
 0x152   :  { %1301 = vmatpush.bf16.msra.mxu1 %v1880_v7  ;;  %v1716_v2 = vor.u32 %v1992_v62, %v1715_v60  ;;  %v1677_v7 = vld [vmem:[%s2899_s10 + $0x30] sm:$0xf0] }
 0x156   :  { %1302 = vmatpush.bf16.msra.mxu1 %v1848_v19 }
 0x157   :  { %v2048_v43 = vpop.eup %2047 }
 0x158   :  { %v770_v48 = vmul.f32 %v2048_v43, %v769_v28  ;;  %v1812_v28 = vor.u32 %v2016_v26, %v1811_v25  ;;  %v1739_v43 = vld [vmem:[%s2899_s10 + $0x90] sm:$0xf]  ;;  %v871_v25 = vld [vmem:[%s2900_s11] sm:$0xff] }
 0x159   :  { %v873_v26 = vperm.slane %v871_v25, 0  ;;  %v875_v30 = vperm.slane %v871_v25, 2  ;;  %v879_v38 = vperm.slane %v871_v25, 6 }
 0x15a   :  { %v771_v55 = vadd.f32 %v770_v48, %v2601_v0  ;;  %v1875_v0 = vld [vmem:[%s2899_s10 + $0x198] sm:$0xf]  ;;  %1303 = vmatpush.bf16.msra.mxu1 %v1816_v31  ;;  %v1740_v48 = vor.u32 %v1999_v45, %v1739_v43  ;;  %v876_v31 = vperm.slane %v871_v25, 3 }
 0x15b   :  { %v1876_v6 = vor.u32 %v2032_v1, %v1875_v0  ;;  %v1717_v0 = vld [vmem:[%s2899_s10 + $0x78] sm:$0xf0]  ;;  %v1712_v1 = vor.u32 %v1987_v58, %v1709_v59 }
 0x15c   :  { %1656 = vmatmul.msk.f32.vlgmr.msra.gmra.mxu2 %vm777_vm2, %v771_v55  ;;  %v1707_v55 = vld [vmem:[%s2899_s10 + $0x50] sm:$0xf]  ;;  %1266 = vmatpush.bf16.msrb.mxu3 %v1740_v48  ;;  %v877_v48 = vperm.slane %v871_v25, 4 }
 0x15d   :  { %1274 = vmatpush.bf16.msra.mxu2 %v1904_v57  ;;  %1288 = vmatpush.bf16.msra.mxu0 %v1876_v6  ;;  %v1752_v57 = vor.u32 %v1996_v52, %v1749_v54  ;;  %v1708_v61 = vor.u32 %v1991_v56, %v1707_v55  ;;  %v1720_v6 = vor.u32 %v1988_v63, %v1717_v0 }
 0x15e   :  { %1304 = vmatpush.bf16.msra.mxu1 %v1784_v44 }
 0x160   :  { %1267 = vmatpush.bf16.msrb.mxu3 %v1708_v61 }
 0x161   :  { %1275 = vmatpush.bf16.msra.mxu2 %v1872_v5  ;;  %1289 = vmatpush.bf16.msra.mxu0 %v1844_v16  ;;  %v1979_v5 = vld [vmem:[%s2899_s10 + $0x14] sm:$0xf]  ;;  %v2046_v16 = vld [vmem:[%s2898_s9] ss:$0 sm:$0xff]  ;;  %s2101_s10 = smov [#allocation2]   ;;  %s2102_s9 = smov [#allocation4]  }
 0x162   :  { %1305 = vmatpush.bf16.msra.mxu1 %v1752_v57  ;;  %v1680_v13 = vor.u32 %v1979_v5, %v1677_v7  ;;  %s1368_s6 = sshll.u32 %s2101_s10, 4  ;;  %s1379_s0 = sshll.u32 %s2102_s9, 4  ;;  %s1369_s6 = int_to_ptr.vmem [resolvable:$true] %s1368_s6  ;;  %s1380_s0 = int_to_ptr.vmem [resolvable:$true] %s1379_s0 }
 0x163   :  { %1373 = dma.vmem_to_hbm [thread:$0]  %s1369_s6, 32, %s1371_s22, [#allocation3]  }
 0x164   :  { %1268 = vmatpush.bf16.msrb.mxu3 %v1676_v12  ;;  %1384 = dma.vmem_to_hbm [thread:$0]  %s1380_s0, 32, %s1382_s5, [#allocation5]  }
 0x165   :  { %1276 = vmatpush.bf16.msra.mxu2 %v1840_v15  ;;  %1290 = vmatpush.bf16.msra.mxu0 %v1812_v28  ;;  %v1688_v15 = vor.u32 %v1980_v10, %v1685_v11 }
 0x166   :  { %1306 = vmatpush.bf16.msra.mxu1 %v1720_v6 }
 0x169   :  { %1277 = vmatpush.bf16.msra.mxu2 %v1808_v27  ;;  %1291 = vmatpush.bf16.msra.mxu0 %v1780_v40  ;;  %v874_v27 = vperm.slane %v871_v25, 1 }
 0x16a   :  { %1307 = vmatpush.bf16.msra.mxu1 %v1688_v15 }
 0x16d   :  { %1278 = vmatpush.bf16.msra.mxu2 %v1776_v39  ;;  %1292 = vmatpush.bf16.msra.mxu0 %v1748_v53  ;;  %v880_v39 = vperm.slane %v871_v25, 7 }
 0x171   :  { %1279 = vmatpush.bf16.msra.mxu2 %v1744_v49  ;;  %1293 = vmatpush.bf16.msra.mxu0 %v1716_v2  ;;  %v878_v49 = vperm.slane %v871_v25, 5 }
 0x175   :  { %1280 = vmatpush.bf16.msra.mxu2 %v1712_v1  ;;  %1294 = vmatpush.bf16.msra.mxu0 %v1684_v14 }
 0x179   :  { %1281 = vmatpush.bf16.msra.mxu2 %v1680_v13 }
 0x1df   :  { %v802_v17 = vpop.f32.mrf.mxu2 }
 0x1e0   :  { %v803_v18 = vadd.f32 %v2046_v16, %v802_v17 }
 0x1e2   :  { %v805_v19 = vmax.f32 %v803_v18, 0.0 }
 0x1e4   :  { %v806_v20 = vpack.c.bf16 %v805_v19, %v805_v19 }
 0x1e6   :  { %1217 = vmatmul.bf16.vlgmr.msra.gmra.mxu3 %v806_v20  ;;  %1230 = vmatmul.bf16.vlgmr.msrb.gmra.mxu2 %v806_v20 }
 0x1e7   :  { %1243 = vmatmul.bf16.vlgmr.msrb.gmra.mxu0 %v806_v20  ;;  %1256 = vmatmul.bf16.vlgmr.msrb.gmra.mxu1 %v806_v20 }
 0x1f6   :  { %1269 = vmatmul.bf16.vlgmr.msrb.gmra.mxu3 %v806_v20  ;;  %1282 = vmatmul.bf16.vlgmr.msra.gmra.mxu2 %v806_v20 }
 0x1f7   :  { %1295 = vmatmul.bf16.vlgmr.msra.gmra.mxu0 %v806_v20  ;;  %1308 = vmatmul.bf16.vlgmr.msra.gmra.mxu1 %v806_v20 }
 0x264   :  { %v1244_v21 = vpop.f32.mrf.mxu0  ;;  %v1257_v22 = vpop.f32.mrf.mxu1 }
 0x265   :  { %v1245_v34 = vadd.f32 %v1244_v21, %v875_v30  ;;  %v1258_v35 = vadd.f32 %v1257_v22, %v876_v31 }
 0x267   :  { %v1315_v44 = vmax.f32 %v1245_v34, 0.0  ;;  %v1316_v45 = vmax.f32 %v1258_v35, 0.0 }
 0x269   :  { %v1218_v23 = vpop.f32.mrf.mxu3  ;;  %v1231_v24 = vpop.f32.mrf.mxu2  ;;  %v1325_v53 = vpack.c.bf16 %v1316_v45, %v1315_v44 }
 0x26a   :  { %v1219_v32 = vadd.f32 %v1218_v23, %v873_v26  ;;  %v1232_v33 = vadd.f32 %v1231_v24, %v874_v27 }
 0x26b   :  { %v1333_v0 = vrot.slane %v1325_v53, 6  ;;  %v1334_v1 = vrot.slane %v1325_v53, 1 }
 0x26c   :  { %v1246_v28 = vpop.f32.mrf.mxu0  ;;  %v1259_v29 = vpop.f32.mrf.mxu1  ;;  %v1313_v40 = vmax.f32 %v1219_v32, 0.0  ;;  %v1314_v41 = vmax.f32 %v1232_v33, 0.0 }
 0x26d   :  { %v1346_v10 = vsel %vm1343_vm4, %v1333_v0, %v1334_v1 }
 0x26e   :  { %v1324_v52 = vpack.c.bf16 %v1314_v41, %v1313_v40 }
 0x270   :  { %v1332_v59 = vrot.slane %v1324_v52, 3 }
 0x271   :  { %v1220_v36 = vpop.f32.mrf.mxu3  ;;  %v1233_v37 = vpop.f32.mrf.mxu2 }
 0x272   :  { %v1342_v5 = vsel %vm1339_vm3, %v1324_v52, %v1332_v59 }
 0x273   :  { %v1348_v13 = vsel %vm1347_vm5, %v1342_v5, %v1346_v10 }
 0x274   :  { %v1296_v42 = vpop.f32.mrf.mxu0  ;;  %v1309_v43 = vpop.f32.mrf.mxu1 }
 0x275   :  { %v1297_v46 = vadd.f32 %v1296_v42, %v879_v38  ;;  %v1310_v47 = vadd.f32 %v1309_v43, %v880_v39 }
 0x277   :  { %v1319_v50 = vmax.f32 %v1297_v46, 0.0  ;;  %v1320_v51 = vmax.f32 %v1310_v47, 0.0 }
 0x279   :  { %v1270_v54 = vpop.f32.mrf.mxu3  ;;  %v1283_v55 = vpop.f32.mrf.mxu2  ;;  %v1327_v56 = vpack.c.bf16 %v1320_v51, %v1319_v50 }
 0x27a   :  { %v1271_v57 = vadd.f32 %v1270_v54, %v877_v48  ;;  %v1284_v58 = vadd.f32 %v1283_v55, %v878_v49 }
 0x27b   :  { %v1337_v2 = vrot.slane %v1327_v56, 2  ;;  %v1338_v3 = vrot.slane %v1327_v56, 5 }
 0x27c   :  { %v1317_v60 = vmax.f32 %v1271_v57, 0.0  ;;  %v1318_v61 = vmax.f32 %v1284_v58, 0.0  ;;  %v1298_v62 = vpop.f32.mrf.mxu0  ;;  %v1311_v63 = vpop.f32.mrf.mxu1 }
 0x27d   :  { %v1356_v11 = vsel %vm1353_vm6, %v1337_v2, %v1338_v3 }
 0x27e   :  { %v1326_v4 = vpack.c.bf16 %v1318_v61, %v1317_v60 }
 0x280   :  { %v1335_v6 = vrot.slane %v1326_v4, 4  ;;  %v1336_v7 = vrot.slane %v1326_v4, 7 }
 0x281   :  { %v1272_v8 = vpop.f32.mrf.mxu3  ;;  %v1285_v9 = vpop.f32.mrf.mxu2 }
 0x282   :  { %v1352_v12 = vsel %vm1349_vm7, %v1335_v6, %v1336_v7 }
 0x283   :  { %v1358_v14 = vsel %vm1357_vm8, %v1352_v12, %v1356_v11 }
 0x284   :  { %v1360_v15 = vsel %vm1359_vm9, %v1348_v13, %v1358_v14 }
 0x285   :  { %1362 = vst [vmem:[%s2903_s14] sm:$0xff] %v1360_v15 }
 0x286   :  { %2097 = dma.done.wait [#allocation3], 32  }
 0x287   :  { %2098 = vsyncadd [#allocation3], 4294967264 }
 0x288   :  { %2099 = dma.done.wait [#allocation5], 32  }
 0x289   :  { %2100 = vsyncadd [#allocation5], 4294967264 }
 0x28a   :  { %1397 = vsyncpa [#allocation3], 1 }
 0x28b   :  { %1398 = vsyncpa [#allocation5], 1 }

// kernel: vae_conceptizer_forward.14
= control target key start
LH: loop header
LB: loop body
LE: loop exit
PB: predicated region body
PF: predicated region fallthrough
CT: control target
= control target key end

     0   :  { %s2544_s1 = inlined_call_operand.vmem [shape: bf16[128,2048], index: 1, kind: input, shape index: {}]   ;;  %s2545_s0 = inlined_call_operand.vmem [shape: bf16[16,128], index: 0, kind: input, shape index: {}]   ;;  %s2546_s2 = inlined_call_operand.vmem [shape: bf16[16,2048], index: 2, kind: output, shape index: {}]  }
   0x1   :  { %v1501_v0 = vld [vmem:[%s2544_s1 + $0x380] sm:$0xf]  ;;  %v1676_v2 = vld [vmem:[%s2544_s1 + $0x384] sm:$0xf]  ;;  %v1509_v5 = vld [vmem:[%s2544_s1 + $0x388] sm:$0xf] }
   0x2   :  { %v1684_v1 = vld [vmem:[%s2544_s1 + $0x3bc] sm:$0xf0]  ;;  %v1503_v4 = vld [vmem:[%s2544_s1 + $0x3c0] sm:$0xf0]  ;;  %v1685_v6 = vld [vmem:[%s2544_s1 + $0x3c4] sm:$0xf0] }
   0x3   :  { %v1502_v3 = vor.u32 %v1684_v1, %v1501_v0  ;;  %v1506_v7 = vor.u32 %v1676_v2, %v1503_v4  ;;  %v1510_v8 = vor.u32 %v1685_v6, %v1509_v5  ;;  %v1677_v9 = vld [vmem:[%s2544_s1 + $0x38c] sm:$0xf]  ;;  %v1437_v11 = vld [vmem:[%s2544_s1 + $0x300] sm:$0xf]  ;;  %v1660_v14 = vld [vmem:[%s2544_s1 + $0x304] sm:$0xf] }
   0x4   :  { %v1511_v10 = vld [vmem:[%s2544_s1 + $0x3c8] sm:$0xf0]  ;;  %v1668_v13 = vld [vmem:[%s2544_s1 + $0x33c] sm:$0xf0]  ;;  %v1439_v15 = vld [vmem:[%s2544_s1 + $0x340] sm:$0xf0] }
   0x5   :  { %787 = vmatpush.bf16.msra.mxu0 %v1502_v3  ;;  %v1514_v12 = vor.u32 %v1677_v9, %v1511_v10  ;;  %801 = vmatpush.bf16.msra.mxu1 %v1506_v7  ;;  %v1438_v16 = vor.u32 %v1668_v13, %v1437_v11  ;;  %v1442_v17 = vor.u32 %v1660_v14, %v1439_v15  ;;  %v1445_v18 = vld [vmem:[%s2544_s1 + $0x308] sm:$0xf]  ;;  %v1661_v20 = vld [vmem:[%s2544_s1 + $0x30c] sm:$0xf]  ;;  %v1373_v23 = vld [vmem:[%s2544_s1 + $0x280] sm:$0xf] }
   0x6   :  { %815 = vmatpush.bf16.msra.mxu2 %v1510_v8  ;;  %v1669_v19 = vld [vmem:[%s2544_s1 + $0x344] sm:$0xf0]  ;;  %v1447_v22 = vld [vmem:[%s2544_s1 + $0x348] sm:$0xf0]  ;;  %v1652_v24 = vld [vmem:[%s2544_s1 + $0x2bc] sm:$0xf0] }
   0x7   :  { %829 = vmatpush.bf16.msra.mxu3 %v1514_v12  ;;  %v1446_v21 = vor.u32 %v1669_v19, %v1445_v18  ;;  %v1450_v25 = vor.u32 %v1661_v20, %v1447_v22  ;;  %v1644_v26 = vld [vmem:[%s2544_s1 + $0x284] sm:$0xf]  ;;  %v1381_v28 = vld [vmem:[%s2544_s1 + $0x288] sm:$0xf]  ;;  %v1374_v29 = vor.u32 %v1652_v24, %v1373_v23  ;;  %v1645_v31 = vld [vmem:[%s2544_s1 + $0x28c] sm:$0xf] }
   0x8   :  { %v1375_v27 = vld [vmem:[%s2544_s1 + $0x2c0] sm:$0xf0]  ;;  %v1653_v30 = vld [vmem:[%s2544_s1 + $0x2c4] sm:$0xf0]  ;;  %v1383_v32 = vld [vmem:[%s2544_s1 + $0x2c8] sm:$0xf0] }
   0x9   :  { %788 = vmatpush.bf16.msra.mxu0 %v1438_v16  ;;  %802 = vmatpush.bf16.msra.mxu1 %v1442_v17  ;;  %v1378_v33 = vor.u32 %v1644_v26, %v1375_v27  ;;  %v1382_v34 = vor.u32 %v1653_v30, %v1381_v28  ;;  %v1309_v35 = vld [vmem:[%s2544_s1 + $0x200] sm:$0xf]  ;;  %v1628_v37 = vld [vmem:[%s2544_s1 + $0x204] sm:$0xf]  ;;  %v1386_v38 = vor.u32 %v1645_v31, %v1383_v32  ;;  %v1317_v40 = vld [vmem:[%s2544_s1 + $0x208] sm:$0xf] }
   0xa   :  { %816 = vmatpush.bf16.msra.mxu2 %v1446_v21  ;;  %v1636_v36 = vld [vmem:[%s2544_s1 + $0x23c] sm:$0xf0]  ;;  %v1311_v39 = vld [vmem:[%s2544_s1 + $0x240] sm:$0xf0]  ;;  %v1637_v41 = vld [vmem:[%s2544_s1 + $0x244] sm:$0xf0] }
   0xb   :  { %830 = vmatpush.bf16.msra.mxu3 %v1450_v25  ;;  %v1629_v42 = vld [vmem:[%s2544_s1 + $0x20c] sm:$0xf]  ;;  %v1310_v44 = vor.u32 %v1636_v36, %v1309_v35  ;;  %v1314_v45 = vor.u32 %v1628_v37, %v1311_v39  ;;  %v1318_v46 = vor.u32 %v1637_v41, %v1317_v40  ;;  %v1245_v47 = vld [vmem:[%s2544_s1 + $0x180] sm:$0xf]  ;;  %v1612_v49 = vld [vmem:[%s2544_s1 + $0x184] sm:$0xf] }
   0xc   :  { %v1319_v43 = vld [vmem:[%s2544_s1 + $0x248] sm:$0xf0]  ;;  %v1620_v48 = vld [vmem:[%s2544_s1 + $0x1bc] sm:$0xf0]  ;;  %v1247_v51 = vld [vmem:[%s2544_s1 + $0x1c0] sm:$0xf0] }
   0xd   :  { %789 = vmatpush.bf16.msra.mxu0 %v1374_v29  ;;  %803 = vmatpush.bf16.msra.mxu1 %v1378_v33  ;;  %v1322_v50 = vor.u32 %v1629_v42, %v1319_v43  ;;  %v1253_v52 = vld [vmem:[%s2544_s1 + $0x188] sm:$0xf]  ;;  %v1613_v54 = vld [vmem:[%s2544_s1 + $0x18c] sm:$0xf]  ;;  %v1246_v56 = vor.u32 %v1620_v48, %v1245_v47  ;;  %v1250_v57 = vor.u32 %v1612_v49, %v1247_v51  ;;  %v1181_v59 = vld [vmem:[%s2544_s1 + $0x100] sm:$0xf] }
   0xe   :  { %817 = vmatpush.bf16.msra.mxu2 %v1382_v34  ;;  %v1621_v53 = vld [vmem:[%s2544_s1 + $0x1c4] sm:$0xf0]  ;;  %v1255_v55 = vld [vmem:[%s2544_s1 + $0x1c8] sm:$0xf0]  ;;  %v1604_v60 = vld [vmem:[%s2544_s1 + $0x13c] sm:$0xf0] }
   0xf   :  { %831 = vmatpush.bf16.msra.mxu3 %v1386_v38  ;;  %v1254_v58 = vor.u32 %v1621_v53, %v1253_v52  ;;  %v1596_v61 = vld [vmem:[%s2544_s1 + $0x104] sm:$0xf]  ;;  %v1258_v62 = vor.u32 %v1613_v54, %v1255_v55  ;;  %v1189_v0 = vld [vmem:[%s2544_s1 + $0x108] sm:$0xf]  ;;  %v1597_v2 = vld [vmem:[%s2544_s1 + $0x10c] sm:$0xf]  ;;  %v1182_v4 = vor.u32 %v1604_v60, %v1181_v59 }
  0x10   :  { %v1183_v63 = vld [vmem:[%s2544_s1 + $0x140] sm:$0xf0]  ;;  %v1605_v1 = vld [vmem:[%s2544_s1 + $0x144] sm:$0xf0]  ;;  %v1191_v3 = vld [vmem:[%s2544_s1 + $0x148] sm:$0xf0] }
  0x11   :  { %790 = vmatpush.bf16.msra.mxu0 %v1310_v44  ;;  %804 = vmatpush.bf16.msra.mxu1 %v1314_v45  ;;  %v1186_v5 = vor.u32 %v1596_v61, %v1183_v63  ;;  %v1190_v6 = vor.u32 %v1605_v1, %v1189_v0  ;;  %v1117_v7 = vld [vmem:[%s2544_s1 + $0x80] sm:$0xf]  ;;  %v1580_v9 = vld [vmem:[%s2544_s1 + $0x84] sm:$0xf]  ;;  %v1194_v10 = vor.u32 %v1597_v2, %v1191_v3  ;;  %v1125_v12 = vld [vmem:[%s2544_s1 + $0x88] sm:$0xf] }
  0x12   :  { %818 = vmatpush.bf16.msra.mxu2 %v1318_v46  ;;  %v1588_v8 = vld [vmem:[%s2544_s1 + $0xbc] sm:$0xf0]  ;;  %v1119_v11 = vld [vmem:[%s2544_s1 + $0xc0] sm:$0xf0]  ;;  %v1589_v13 = vld [vmem:[%s2544_s1 + $0xc4] sm:$0xf0] }
  0x13   :  { %832 = vmatpush.bf16.msra.mxu3 %v1322_v50  ;;  %v1581_v14 = vld [vmem:[%s2544_s1 + $0x8c] sm:$0xf]  ;;  %v1118_v16 = vor.u32 %v1588_v8, %v1117_v7  ;;  %v1053_v17 = vld [vmem:[%s2544_s1] sm:$0xf]  ;;  %v1122_v19 = vor.u32 %v1580_v9, %v1119_v11  ;;  %v1126_v20 = vor.u32 %v1589_v13, %v1125_v12  ;;  %v1564_v21 = vld [vmem:[%s2544_s1 + $0x4] sm:$0xf] }
  0x14   :  { %v1127_v15 = vld [vmem:[%s2544_s1 + $0xc8] sm:$0xf0]  ;;  %v1572_v18 = vld [vmem:[%s2544_s1 + $0x3c] sm:$0xf0]  ;;  %v1055_v22 = vld [vmem:[%s2544_s1 + $0x40] sm:$0xf0] }
  0x15   :  { %791 = vmatpush.bf16.msra.mxu0 %v1246_v56  ;;  %805 = vmatpush.bf16.msra.mxu1 %v1250_v57  ;;  %v1061_v23 = vld [vmem:[%s2544_s1 + $0x8] sm:$0xf]  ;;  %v1130_v24 = vor.u32 %v1581_v14, %v1127_v15  ;;  %v1565_v26 = vld [vmem:[%s2544_s1 + $0xc] sm:$0xf]  ;;  %v1517_v28 = vld [vmem:[%s2544_s1 + $0x390] sm:$0xf]  ;;  %v1054_v31 = vor.u32 %v1572_v18, %v1053_v17  ;;  %v1058_v35 = vor.u32 %v1564_v21, %v1055_v22 }
  0x16   :  { %819 = vmatpush.bf16.msra.mxu2 %v1254_v58  ;;  %v1573_v25 = vld [vmem:[%s2544_s1 + $0x44] sm:$0xf0]  ;;  %v1063_v27 = vld [vmem:[%s2544_s1 + $0x48] sm:$0xf0]  ;;  %v1686_v29 = vld [vmem:[%s2544_s1 + $0x3cc] sm:$0xf0] }
  0x17   :  { %833 = vmatpush.bf16.msra.mxu3 %v1258_v62  ;;  %v1678_v30 = vld [vmem:[%s2544_s1 + $0x394] sm:$0xf]  ;;  %v1525_v33 = vld [vmem:[%s2544_s1 + $0x398] sm:$0xf]  ;;  %v1062_v36 = vor.u32 %v1573_v25, %v1061_v23  ;;  %v1679_v37 = vld [vmem:[%s2544_s1 + $0x39c] sm:$0xf]  ;;  %v1066_v39 = vor.u32 %v1565_v26, %v1063_v27  ;;  %v1518_v40 = vor.u32 %v1686_v29, %v1517_v28 }
  0x18   :  { %v1519_v32 = vld [vmem:[%s2544_s1 + $0x3d0] sm:$0xf0]  ;;  %v1687_v34 = vld [vmem:[%s2544_s1 + $0x3d4] sm:$0xf0]  ;;  %v1527_v38 = vld [vmem:[%s2544_s1 + $0x3d8] sm:$0xf0] }
  0x19   :  { %792 = vmatpush.bf16.msra.mxu0 %v1182_v4  ;;  %806 = vmatpush.bf16.msra.mxu1 %v1186_v5  ;;  %v1522_v41 = vor.u32 %v1678_v30, %v1519_v32  ;;  %v1526_v42 = vor.u32 %v1687_v34, %v1525_v33  ;;  %v1453_v43 = vld [vmem:[%s2544_s1 + $0x310] sm:$0xf]  ;;  %v1662_v45 = vld [vmem:[%s2544_s1 + $0x314] sm:$0xf]  ;;  %v1530_v46 = vor.u32 %v1679_v37, %v1527_v38  ;;  %v1461_v48 = vld [vmem:[%s2544_s1 + $0x318] sm:$0xf] }
  0x1a   :  { %820 = vmatpush.bf16.msra.mxu2 %v1190_v6  ;;  %v1670_v44 = vld [vmem:[%s2544_s1 + $0x34c] sm:$0xf0]  ;;  %v1455_v47 = vld [vmem:[%s2544_s1 + $0x350] sm:$0xf0]  ;;  %v1671_v49 = vld [vmem:[%s2544_s1 + $0x354] sm:$0xf0] }
  0x1b   :  { %834 = vmatpush.bf16.msra.mxu3 %v1194_v10  ;;  %v1663_v50 = vld [vmem:[%s2544_s1 + $0x31c] sm:$0xf]  ;;  %v1454_v52 = vor.u32 %v1670_v44, %v1453_v43  ;;  %v1458_v53 = vor.u32 %v1662_v45, %v1455_v47  ;;  %v1462_v54 = vor.u32 %v1671_v49, %v1461_v48  ;;  %v1389_v55 = vld [vmem:[%s2544_s1 + $0x290] sm:$0xf]  ;;  %v1646_v57 = vld [vmem:[%s2544_s1 + $0x294] sm:$0xf] }
  0x1c   :  { %v1463_v51 = vld [vmem:[%s2544_s1 + $0x358] sm:$0xf0]  ;;  %v1654_v56 = vld [vmem:[%s2544_s1 + $0x2cc] sm:$0xf0]  ;;  %v1391_v59 = vld [vmem:[%s2544_s1 + $0x2d0] sm:$0xf0] }
  0x1d   :  { %793 = vmatpush.bf16.msra.mxu0 %v1118_v16  ;;  %807 = vmatpush.bf16.msra.mxu1 %v1122_v19  ;;  %v1466_v58 = vor.u32 %v1663_v50, %v1463_v51  ;;  %v1397_v60 = vld [vmem:[%s2544_s1 + $0x298] sm:$0xf]  ;;  %v1647_v62 = vld [vmem:[%s2544_s1 + $0x29c] sm:$0xf]  ;;  %v1390_v0 = vor.u32 %v1654_v56, %v1389_v55  ;;  %v1974_v1 = vld [vmem:[%s2545_s0] sm:$0xff]  ;;  %v1394_v2 = vor.u32 %v1646_v57, %v1391_v59 }
  0x1e   :  { %821 = vmatpush.bf16.msra.mxu2 %v1126_v20  ;;  %v1655_v61 = vld [vmem:[%s2544_s1 + $0x2d4] sm:$0xf0]  ;;  %v1399_v63 = vld [vmem:[%s2544_s1 + $0x2d8] sm:$0xf0]  ;;  %v1325_v4 = vld [vmem:[%s2544_s1 + $0x210] sm:$0xf] }
  0x1f   :  { %835 = vmatpush.bf16.msra.mxu3 %v1130_v24  ;;  %v1398_v3 = vor.u32 %v1655_v61, %v1397_v60  ;;  %v1638_v5 = vld [vmem:[%s2544_s1 + $0x24c] sm:$0xf0]  ;;  %v1630_v6 = vld [vmem:[%s2544_s1 + $0x214] sm:$0xf]  ;;  %v1402_v7 = vor.u32 %v1647_v62, %v1399_v63  ;;  %v1333_v9 = vld [vmem:[%s2544_s1 + $0x218] sm:$0xf] }
  0x20   :  { %v1327_v8 = vld [vmem:[%s2544_s1 + $0x250] sm:$0xf0]  ;;  %v1639_v10 = vld [vmem:[%s2544_s1 + $0x254] sm:$0xf0]  ;;  %v1631_v11 = vld [vmem:[%s2544_s1 + $0x21c] sm:$0xf]  ;;  %v1326_v13 = vor.u32 %v1638_v5, %v1325_v4 }
  0x21   :  { %794 = vmatpush.bf16.msra.mxu0 %v1054_v31  ;;  %808 = vmatpush.bf16.msra.mxu1 %v1058_v35  ;;  %v1335_v12 = vld [vmem:[%s2544_s1 + $0x258] sm:$0xf0]  ;;  %v1330_v14 = vor.u32 %v1630_v6, %v1327_v8  ;;  %v1334_v15 = vor.u32 %v1639_v10, %v1333_v9  ;;  %v1261_v16 = vld [vmem:[%s2544_s1 + $0x190] sm:$0xf]  ;;  %v1614_v18 = vld [vmem:[%s2544_s1 + $0x194] sm:$0xf] }
  0x22   :  { %822 = vmatpush.bf16.msra.mxu2 %v1062_v36  ;;  %v1622_v17 = vld [vmem:[%s2544_s1 + $0x1cc] sm:$0xf0]  ;;  %v1338_v19 = vor.u32 %v1631_v11, %v1335_v12  ;;  %v1263_v20 = vld [vmem:[%s2544_s1 + $0x1d0] sm:$0xf0]  ;;  %v1269_v21 = vld [vmem:[%s2544_s1 + $0x198] sm:$0xf] }
  0x23   :  { %836 = vmatpush.bf16.msra.mxu3 %v1066_v39  ;;  %v1623_v22 = vld [vmem:[%s2544_s1 + $0x1d4] sm:$0xf0]  ;;  %v1615_v23 = vld [vmem:[%s2544_s1 + $0x19c] sm:$0xf]  ;;  %v1262_v25 = vor.u32 %v1622_v17, %v1261_v16  ;;  %v1266_v26 = vor.u32 %v1614_v18, %v1263_v20  ;;  %v1197_v28 = vld [vmem:[%s2544_s1 + $0x110] sm:$0xf] }
  0x24   :  { %795 = vmatmul.bf16.vlgmr.msra.gmra.mxu0 %v1974_v1  ;;  %809 = vmatmul.bf16.vlgmr.msra.gmra.mxu1 %v1974_v1  ;;  %v1271_v24 = vld [vmem:[%s2544_s1 + $0x1d8] sm:$0xf0]  ;;  %v1270_v27 = vor.u32 %v1623_v22, %v1269_v21  ;;  %v1606_v29 = vld [vmem:[%s2544_s1 + $0x14c] sm:$0xf0]  ;;  %v1598_v30 = vld [vmem:[%s2544_s1 + $0x114] sm:$0xf] }
  0x25   :  { %843 = vmatpush.bf16.msrb.mxu0 %v1518_v40  ;;  %857 = vmatpush.bf16.msrb.mxu1 %v1522_v41  ;;  %v1274_v31 = vor.u32 %v1615_v23, %v1271_v24  ;;  %v1199_v32 = vld [vmem:[%s2544_s1 + $0x150] sm:$0xf0]  ;;  %v1205_v33 = vld [vmem:[%s2544_s1 + $0x118] sm:$0xf]  ;;  %v1599_v35 = vld [vmem:[%s2544_s1 + $0x11c] sm:$0xf]  ;;  %v1198_v37 = vor.u32 %v1606_v29, %v1197_v28 }
  0x26   :  { %871 = vmatpush.bf16.msrb.mxu2 %v1526_v42  ;;  %837 = vmatmul.bf16.vlgmr.msra.gmra.mxu3 %v1974_v1  ;;  %v1607_v34 = vld [vmem:[%s2544_s1 + $0x154] sm:$0xf0]  ;;  %v1207_v36 = vld [vmem:[%s2544_s1 + $0x158] sm:$0xf0]  ;;  %v1202_v38 = vor.u32 %v1598_v30, %v1199_v32  ;;  %v1133_v40 = vld [vmem:[%s2544_s1 + $0x90] sm:$0xf] }
  0x27   :  { %885 = vmatpush.bf16.msrb.mxu3 %v1530_v46  ;;  %823 = vmatmul.bf16.vlgmr.msra.gmra.mxu2 %v1974_v1  ;;  %v1206_v39 = vor.u32 %v1607_v34, %v1205_v33  ;;  %v1590_v41 = vld [vmem:[%s2544_s1 + $0xcc] sm:$0xf0]  ;;  %v1582_v42 = vld [vmem:[%s2544_s1 + $0x94] sm:$0xf]  ;;  %v1210_v43 = vor.u32 %v1599_v35, %v1207_v36  ;;  %v1141_v45 = vld [vmem:[%s2544_s1 + $0x98] sm:$0xf] }
  0x28   :  { %v1135_v44 = vld [vmem:[%s2544_s1 + $0xd0] sm:$0xf0]  ;;  %v1591_v46 = vld [vmem:[%s2544_s1 + $0xd4] sm:$0xf0]  ;;  %v1583_v47 = vld [vmem:[%s2544_s1 + $0x9c] sm:$0xf]  ;;  %v1134_v49 = vor.u32 %v1590_v41, %v1133_v40 }
  0x29   :  { %844 = vmatpush.bf16.msrb.mxu0 %v1454_v52  ;;  %858 = vmatpush.bf16.msrb.mxu1 %v1458_v53  ;;  %v1143_v48 = vld [vmem:[%s2544_s1 + $0xd8] sm:$0xf0]  ;;  %v1069_v50 = vld [vmem:[%s2544_s1 + $0x10] sm:$0xf]  ;;  %v1138_v52 = vor.u32 %v1582_v42, %v1135_v44  ;;  %v1142_v53 = vor.u32 %v1591_v46, %v1141_v45  ;;  %v1071_v55 = vld [vmem:[%s2544_s1 + $0x50] sm:$0xf0] }
  0x2a   :  { %872 = vmatpush.bf16.msrb.mxu2 %v1462_v54  ;;  %v1574_v51 = vld [vmem:[%s2544_s1 + $0x4c] sm:$0xf0]  ;;  %v1566_v54 = vld [vmem:[%s2544_s1 + $0x14] sm:$0xf]  ;;  %v1077_v56 = vld [vmem:[%s2544_s1 + $0x18] sm:$0xf]  ;;  %v1146_v57 = vor.u32 %v1583_v47, %v1143_v48 }
  0x2b   :  { %886 = vmatpush.bf16.msrb.mxu3 %v1466_v58  ;;  %v1575_v58 = vld [vmem:[%s2544_s1 + $0x54] sm:$0xf0]  ;;  %v1567_v59 = vld [vmem:[%s2544_s1 + $0x1c] sm:$0xf]  ;;  %v1533_v61 = vld [vmem:[%s2544_s1 + $0x3a0] sm:$0xf]  ;;  %v1074_v5 = vor.u32 %v1566_v54, %v1071_v55 }
  0x2c   :  { %v1079_v60 = vld [vmem:[%s2544_s1 + $0x58] sm:$0xf0]  ;;  %v1688_v62 = vld [vmem:[%s2544_s1 + $0x3dc] sm:$0xf0]  ;;  %v1680_v63 = vld [vmem:[%s2544_s1 + $0x3a4] sm:$0xf]  ;;  %v1078_v6 = vor.u32 %v1575_v58, %v1077_v56 }
  0x2d   :  { %845 = vmatpush.bf16.msrb.mxu0 %v1390_v0  ;;  %859 = vmatpush.bf16.msrb.mxu1 %v1394_v2  ;;  %v1070_v0 = vor.u32 %v1574_v51, %v1069_v50  ;;  %v1535_v2 = vld [vmem:[%s2544_s1 + $0x3e0] sm:$0xf0]  ;;  %v1689_v4 = vld [vmem:[%s2544_s1 + $0x3e4] sm:$0xf0]  ;;  %v1543_v8 = vld [vmem:[%s2544_s1 + $0x3e8] sm:$0xf0]  ;;  %v1082_v9 = vor.u32 %v1567_v59, %v1079_v60  ;;  %v1534_v10 = vor.u32 %v1688_v62, %v1533_v61 }
  0x2e   :  { %873 = vmatpush.bf16.msrb.mxu2 %v1398_v3  ;;  %v1541_v3 = vld [vmem:[%s2544_s1 + $0x3a8] sm:$0xf]  ;;  %v1538_v11 = vor.u32 %v1680_v63, %v1535_v2  ;;  %v1471_v17 = vld [vmem:[%s2544_s1 + $0x360] sm:$0xf0]  ;;  %v1665_v20 = vld [vmem:[%s2544_s1 + $0x32c] sm:$0xf] }
  0x2f   :  { %887 = vmatpush.bf16.msrb.mxu3 %v1402_v7  ;;  %v1681_v7 = vld [vmem:[%s2544_s1 + $0x3ac] sm:$0xf]  ;;  %v1542_v12 = vor.u32 %v1689_v4, %v1541_v3  ;;  %v1477_v18 = vld [vmem:[%s2544_s1 + $0x328] sm:$0xf]  ;;  %v1407_v29 = vld [vmem:[%s2544_s1 + $0x2e0] sm:$0xf0] }
  0x30   :  { %v1546_v16 = vor.u32 %v1681_v7, %v1543_v8  ;;  %v1479_v21 = vld [vmem:[%s2544_s1 + $0x368] sm:$0xf0]  ;;  %v1413_v30 = vld [vmem:[%s2544_s1 + $0x2a8] sm:$0xf]  ;;  %v1343_v41 = vld [vmem:[%s2544_s1 + $0x260] sm:$0xf0] }
  0x31   :  { %846 = vmatpush.bf16.msrb.mxu0 %v1326_v13  ;;  %860 = vmatpush.bf16.msrb.mxu1 %v1330_v14  ;;  %v1469_v13 = vld [vmem:[%s2544_s1 + $0x320] sm:$0xf]  ;;  %v1482_v28 = vor.u32 %v1665_v20, %v1479_v21  ;;  %v1649_v32 = vld [vmem:[%s2544_s1 + $0x2ac] sm:$0xf]  ;;  %v1349_v42 = vld [vmem:[%s2544_s1 + $0x228] sm:$0xf] }
  0x32   :  { %874 = vmatpush.bf16.msrb.mxu2 %v1334_v15  ;;  %v1672_v14 = vld [vmem:[%s2544_s1 + $0x35c] sm:$0xf0]  ;;  %v1664_v15 = vld [vmem:[%s2544_s1 + $0x324] sm:$0xf]  ;;  %v1415_v33 = vld [vmem:[%s2544_s1 + $0x2e8] sm:$0xf0] }
  0x33   :  { %888 = vmatpush.bf16.msrb.mxu3 %v1338_v19  ;;  %v1673_v19 = vld [vmem:[%s2544_s1 + $0x364] sm:$0xf0]  ;;  %v1470_v22 = vor.u32 %v1672_v14, %v1469_v13  ;;  %v1474_v23 = vor.u32 %v1664_v15, %v1471_v17  ;;  %v1418_v40 = vor.u32 %v1649_v32, %v1415_v33  ;;  %v1633_v44 = vld [vmem:[%s2544_s1 + $0x22c] sm:$0xf]  ;;  %v1624_v50 = vld [vmem:[%s2544_s1 + $0x1dc] sm:$0xf0] }
  0x34   :  { %v1478_v24 = vor.u32 %v1673_v19, %v1477_v18  ;;  %v1351_v45 = vld [vmem:[%s2544_s1 + $0x268] sm:$0xf0]  ;;  %v1616_v51 = vld [vmem:[%s2544_s1 + $0x1a4] sm:$0xf]  ;;  %v1285_v54 = vld [vmem:[%s2544_s1 + $0x1a8] sm:$0xf] }
  0x35   :  { %847 = vmatpush.bf16.msrb.mxu0 %v1262_v25  ;;  %861 = vmatpush.bf16.msrb.mxu1 %v1266_v26  ;;  %v1405_v25 = vld [vmem:[%s2544_s1 + $0x2a0] sm:$0xf]  ;;  %v1625_v55 = vld [vmem:[%s2544_s1 + $0x1e4] sm:$0xf0]  ;;  %v1617_v56 = vld [vmem:[%s2544_s1 + $0x1ac] sm:$0xf] }
  0x36   :  { %875 = vmatpush.bf16.msrb.mxu2 %v1270_v27  ;;  %v1656_v26 = vld [vmem:[%s2544_s1 + $0x2dc] sm:$0xf0]  ;;  %v1648_v27 = vld [vmem:[%s2544_s1 + $0x2a4] sm:$0xf]  ;;  %v1286_v60 = vor.u32 %v1625_v55, %v1285_v54  ;;  %v1221_v3 = vld [vmem:[%s2544_s1 + $0x128] sm:$0xf] }
  0x37   :  { %889 = vmatpush.bf16.msrb.mxu3 %v1274_v31  ;;  %v1657_v31 = vld [vmem:[%s2544_s1 + $0x2e4] sm:$0xf0]  ;;  %v1406_v34 = vor.u32 %v1656_v26, %v1405_v25  ;;  %v1410_v35 = vor.u32 %v1648_v27, %v1407_v29  ;;  %v1213_v61 = vld [vmem:[%s2544_s1 + $0x120] sm:$0xf]  ;;  %v1600_v63 = vld [vmem:[%s2544_s1 + $0x124] sm:$0xf] }
  0x38   :  { %v1414_v36 = vor.u32 %v1657_v31, %v1413_v30  ;;  %v1608_v62 = vld [vmem:[%s2544_s1 + $0x15c] sm:$0xf0]  ;;  %v1215_v2 = vld [vmem:[%s2544_s1 + $0x160] sm:$0xf0]  ;;  %v1609_v4 = vld [vmem:[%s2544_s1 + $0x164] sm:$0xf0] }
  0x39   :  { %848 = vmatpush.bf16.msrb.mxu0 %v1198_v37  ;;  %862 = vmatpush.bf16.msrb.mxu1 %v1202_v38  ;;  %v1341_v37 = vld [vmem:[%s2544_s1 + $0x220] sm:$0xf]  ;;  %v1214_v7 = vor.u32 %v1608_v62, %v1213_v61  ;;  %v1218_v8 = vor.u32 %v1600_v63, %v1215_v2  ;;  %v1151_v14 = vld [vmem:[%s2544_s1 + $0xe0] sm:$0xf0]  ;;  %v1157_v15 = vld [vmem:[%s2544_s1 + $0xa8] sm:$0xf] }
  0x3a   :  { %876 = vmatpush.bf16.msrb.mxu2 %v1206_v39  ;;  %v1640_v38 = vld [vmem:[%s2544_s1 + $0x25c] sm:$0xf0]  ;;  %v1632_v39 = vld [vmem:[%s2544_s1 + $0x224] sm:$0xf]  ;;  %v1585_v17 = vld [vmem:[%s2544_s1 + $0xac] sm:$0xf] }
  0x3b   :  { %890 = vmatpush.bf16.msrb.mxu3 %v1210_v43  ;;  %v1641_v43 = vld [vmem:[%s2544_s1 + $0x264] sm:$0xf0]  ;;  %v1342_v46 = vor.u32 %v1640_v38, %v1341_v37  ;;  %v1346_v47 = vor.u32 %v1632_v39, %v1343_v41  ;;  %v1159_v18 = vld [vmem:[%s2544_s1 + $0xe8] sm:$0xf0]  ;;  %v1085_v20 = vld [vmem:[%s2544_s1 + $0x20] sm:$0xf] }
  0x3c   :  { %v1350_v48 = vor.u32 %v1641_v43, %v1349_v42  ;;  %v1576_v21 = vld [vmem:[%s2544_s1 + $0x5c] sm:$0xf0]  ;;  %v1087_v25 = vld [vmem:[%s2544_s1 + $0x60] sm:$0xf0]  ;;  %v1093_v26 = vld [vmem:[%s2544_s1 + $0x28] sm:$0xf]  ;;  %v1162_v27 = vor.u32 %v1585_v17, %v1159_v18 }
  0x3d   :  { %849 = vmatpush.bf16.msrb.mxu0 %v1134_v49  ;;  %863 = vmatpush.bf16.msrb.mxu1 %v1138_v52  ;;  %v1277_v49 = vld [vmem:[%s2544_s1 + $0x1a0] sm:$0xf]  ;;  %v1354_v52 = vor.u32 %v1633_v44, %v1351_v45  ;;  %v1569_v29 = vld [vmem:[%s2544_s1 + $0x2c] sm:$0xf]  ;;  %v1549_v31 = vld [vmem:[%s2544_s1 + $0x3b0] sm:$0xf] }
  0x3e   :  { %877 = vmatpush.bf16.msrb.mxu2 %v1142_v53  ;;  %v1279_v53 = vld [vmem:[%s2544_s1 + $0x1e0] sm:$0xf0]  ;;  %v1278_v58 = vor.u32 %v1624_v50, %v1277_v49  ;;  %v1095_v30 = vld [vmem:[%s2544_s1 + $0x68] sm:$0xf0]  ;;  %v1690_v32 = vld [vmem:[%s2544_s1 + $0x3ec] sm:$0xf0] }
  0x3f   :  { %891 = vmatpush.bf16.msrb.mxu3 %v1146_v57  ;;  %v1287_v57 = vld [vmem:[%s2544_s1 + $0x1e8] sm:$0xf0]  ;;  %v1282_v59 = vor.u32 %v1616_v51, %v1279_v53  ;;  %v1682_v33 = vld [vmem:[%s2544_s1 + $0x3b4] sm:$0xf]  ;;  %v1691_v37 = vld [vmem:[%s2544_s1 + $0x3f4] sm:$0xf0]  ;;  %v1098_v42 = vor.u32 %v1569_v29, %v1095_v30  ;;  %v1550_v43 = vor.u32 %v1690_v32, %v1549_v31 }
  0x40   :  { %v1559_v41 = vld [vmem:[%s2544_s1 + $0x3f8] sm:$0xf0]  ;;  %v1487_v50 = vld [vmem:[%s2544_s1 + $0x370] sm:$0xf0]  ;;  %v1493_v51 = vld [vmem:[%s2544_s1 + $0x338] sm:$0xf] }
  0x41   :  { %850 = vmatpush.bf16.msrb.mxu0 %v1070_v0  ;;  %864 = vmatpush.bf16.msrb.mxu1 %v1074_v5  ;;  %v1290_v0 = vor.u32 %v1617_v56, %v1287_v57  ;;  %v1601_v5 = vld [vmem:[%s2544_s1 + $0x12c] sm:$0xf]  ;;  %v1667_v53 = vld [vmem:[%s2544_s1 + $0x33c] sm:$0xf]  ;;  %v1423_v62 = vld [vmem:[%s2544_s1 + $0x2f0] sm:$0xf0] }
  0x42   :  { %878 = vmatpush.bf16.msrb.mxu2 %v1078_v6  ;;  %v1223_v6 = vld [vmem:[%s2544_s1 + $0x168] sm:$0xf0]  ;;  %v1495_v54 = vld [vmem:[%s2544_s1 + $0x378] sm:$0xf0]  ;;  %v1429_v63 = vld [vmem:[%s2544_s1 + $0x2b8] sm:$0xf] }
  0x43   :  { %892 = vmatpush.bf16.msrb.mxu3 %v1082_v9  ;;  %v1222_v9 = vor.u32 %v1609_v4, %v1221_v3  ;;  %v1226_v13 = vor.u32 %v1601_v5, %v1223_v6  ;;  %v1498_v61 = vor.u32 %v1667_v53, %v1495_v54  ;;  %v1651_v2 = vld [vmem:[%s2544_s1 + $0x2bc] sm:$0xf]  ;;  %v1229_v31 = vld [vmem:[%s2544_s1 + $0x130] sm:$0xf] }
  0x44   :  { %851 = vmatmul.bf16.vlgmr.msrb.gmra.mxu0 %v1974_v1  ;;  %865 = vmatmul.bf16.vlgmr.msrb.gmra.mxu1 %v1974_v1  ;;  %v1431_v3 = vld [vmem:[%s2544_s1 + $0x2f8] sm:$0xf0]  ;;  %v1610_v32 = vld [vmem:[%s2544_s1 + $0x16c] sm:$0xf0] }
  0x45   :  { %899 = vmatpush.bf16.msra.mxu0 %v1534_v10  ;;  %913 = vmatpush.bf16.msra.mxu1 %v1538_v11  ;;  %v1149_v10 = vld [vmem:[%s2544_s1 + $0xa0] sm:$0xf] }
  0x46   :  { %927 = vmatpush.bf16.msra.mxu2 %v1542_v12  ;;  %893 = vmatmul.bf16.vlgmr.msrb.gmra.mxu3 %v1974_v1  ;;  %v1592_v11 = vld [vmem:[%s2544_s1 + $0xdc] sm:$0xf0]  ;;  %v1584_v12 = vld [vmem:[%s2544_s1 + $0xa4] sm:$0xf] }
  0x47   :  { %941 = vmatpush.bf16.msra.mxu3 %v1546_v16  ;;  %879 = vmatmul.bf16.vlgmr.msrb.gmra.mxu2 %v1974_v1  ;;  %v1593_v16 = vld [vmem:[%s2544_s1 + $0xe4] sm:$0xf0]  ;;  %v1150_v19 = vor.u32 %v1592_v11, %v1149_v10  ;;  %v1434_v10 = vor.u32 %v1651_v2, %v1431_v3  ;;  %v1359_v11 = vld [vmem:[%s2544_s1 + $0x270] sm:$0xf0] }
  0x49   :  { %900 = vmatpush.bf16.msra.mxu0 %v1470_v22  ;;  %914 = vmatpush.bf16.msra.mxu1 %v1474_v23  ;;  %v1154_v22 = vor.u32 %v1584_v12, %v1151_v14  ;;  %v1158_v23 = vor.u32 %v1593_v16, %v1157_v15  ;;  %v1365_v12 = vld [vmem:[%s2544_s1 + $0x238] sm:$0xf]  ;;  %v1635_v14 = vld [vmem:[%s2544_s1 + $0x23c] sm:$0xf] }
  0x4a   :  { %928 = vmatpush.bf16.msra.mxu2 %v1478_v24  ;;  %v1568_v24 = vld [vmem:[%s2544_s1 + $0x24] sm:$0xf]  ;;  %v1367_v15 = vld [vmem:[%s2544_s1 + $0x278] sm:$0xf0] }
  0x4b   :  { %942 = vmatpush.bf16.msra.mxu3 %v1482_v28  ;;  %v1577_v28 = vld [vmem:[%s2544_s1 + $0x64] sm:$0xf0]  ;;  %v1090_v38 = vor.u32 %v1568_v24, %v1087_v25  ;;  %v1301_v24 = vld [vmem:[%s2544_s1 + $0x1b8] sm:$0xf] }
  0x4c   :  { %v1094_v39 = vor.u32 %v1577_v28, %v1093_v26  ;;  %v1627_v25 = vld [vmem:[%s2544_s1 + $0x1f4] sm:$0xf0]  ;;  %v1619_v26 = vld [vmem:[%s2544_s1 + $0x1bc] sm:$0xf] }
  0x4d   :  { %901 = vmatpush.bf16.msra.mxu0 %v1406_v34  ;;  %915 = vmatpush.bf16.msra.mxu1 %v1410_v35  ;;  %v1086_v34 = vor.u32 %v1576_v21, %v1085_v20  ;;  %v1551_v35 = vld [vmem:[%s2544_s1 + $0x3f0] sm:$0xf0]  ;;  %v1626_v20 = vld [vmem:[%s2544_s1 + $0x1ec] sm:$0xf0]  ;;  %v1302_v30 = vor.u32 %v1627_v25, %v1301_v24 }
  0x4e   :  { %929 = vmatpush.bf16.msra.mxu2 %v1414_v36  ;;  %v1557_v36 = vld [vmem:[%s2544_s1 + $0x3b8] sm:$0xf]  ;;  %v1554_v44 = vor.u32 %v1682_v33, %v1551_v35  ;;  %v1618_v21 = vld [vmem:[%s2544_s1 + $0x1b4] sm:$0xf] }
  0x4f   :  { %943 = vmatpush.bf16.msra.mxu3 %v1418_v40  ;;  %v1683_v40 = vld [vmem:[%s2544_s1 + $0x3bc] sm:$0xf]  ;;  %v1558_v45 = vor.u32 %v1691_v37, %v1557_v36  ;;  %v1602_v33 = vld [vmem:[%s2544_s1 + $0x134] sm:$0xf]  ;;  %v1237_v36 = vld [vmem:[%s2544_s1 + $0x138] sm:$0xf] }
  0x50   :  { %v1562_v49 = vor.u32 %v1683_v40, %v1559_v41  ;;  %v1231_v35 = vld [vmem:[%s2544_s1 + $0x170] sm:$0xf0]  ;;  %v1611_v37 = vld [vmem:[%s2544_s1 + $0x174] sm:$0xf0]  ;;  %v1230_v40 = vor.u32 %v1610_v32, %v1229_v31 }
  0x51   :  { %902 = vmatpush.bf16.msra.mxu0 %v1342_v46  ;;  %916 = vmatpush.bf16.msra.mxu1 %v1346_v47  ;;  %v1485_v46 = vld [vmem:[%s2544_s1 + $0x330] sm:$0xf]  ;;  %v1234_v41 = vor.u32 %v1602_v33, %v1231_v35 }
  0x52   :  { %930 = vmatpush.bf16.msra.mxu2 %v1350_v48  ;;  %v1674_v47 = vld [vmem:[%s2544_s1 + $0x36c] sm:$0xf0]  ;;  %v1666_v48 = vld [vmem:[%s2544_s1 + $0x334] sm:$0xf] }
  0x53   :  { %944 = vmatpush.bf16.msra.mxu3 %v1354_v52  ;;  %v1675_v52 = vld [vmem:[%s2544_s1 + $0x374] sm:$0xf0]  ;;  %v1486_v55 = vor.u32 %v1674_v47, %v1485_v46  ;;  %v1490_v56 = vor.u32 %v1666_v48, %v1487_v50  ;;  %v1167_v47 = vld [vmem:[%s2544_s1 + $0xf0] sm:$0xf0]  ;;  %v1587_v50 = vld [vmem:[%s2544_s1 + $0xbc] sm:$0xf] }
  0x54   :  { %v1494_v57 = vor.u32 %v1675_v52, %v1493_v51  ;;  %v1173_v48 = vld [vmem:[%s2544_s1 + $0xb8] sm:$0xf]  ;;  %v1175_v51 = vld [vmem:[%s2544_s1 + $0xf8] sm:$0xf0] }
  0x55   :  { %903 = vmatpush.bf16.msra.mxu0 %v1278_v58  ;;  %917 = vmatpush.bf16.msra.mxu1 %v1282_v59  ;;  %v1421_v58 = vld [vmem:[%s2544_s1 + $0x2b0] sm:$0xf] }
  0x56   :  { %931 = vmatpush.bf16.msra.mxu2 %v1286_v60  ;;  %v1658_v59 = vld [vmem:[%s2544_s1 + $0x2ec] sm:$0xf0]  ;;  %v1650_v60 = vld [vmem:[%s2544_s1 + $0x2b4] sm:$0xf] }
  0x57   :  { %945 = vmatpush.bf16.msra.mxu3 %v1290_v0  ;;  %v1659_v0 = vld [vmem:[%s2544_s1 + $0x2f4] sm:$0xf0]  ;;  %v1422_v4 = vor.u32 %v1658_v59, %v1421_v58  ;;  %v1426_v5 = vor.u32 %v1650_v60, %v1423_v62  ;;  %v1178_v58 = vor.u32 %v1587_v50, %v1175_v51  ;;  %v1103_v59 = vld [vmem:[%s2544_s1 + $0x70] sm:$0xf0]  ;;  %v1571_v62 = vld [vmem:[%s2544_s1 + $0x3c] sm:$0xf] }
  0x58   :  { %v1430_v6 = vor.u32 %v1659_v0, %v1429_v63  ;;  %v1109_v60 = vld [vmem:[%s2544_s1 + $0x38] sm:$0xf]  ;;  %v1111_v63 = vld [vmem:[%s2544_s1 + $0x78] sm:$0xf0] }
  0x59   :  { %904 = vmatpush.bf16.msra.mxu0 %v1214_v7  ;;  %918 = vmatpush.bf16.msra.mxu1 %v1218_v8  ;;  %v1357_v7 = vld [vmem:[%s2544_s1 + $0x230] sm:$0xf] }
  0x5a   :  { %932 = vmatpush.bf16.msra.mxu2 %v1222_v9  ;;  %v1642_v8 = vld [vmem:[%s2544_s1 + $0x26c] sm:$0xf0]  ;;  %v1634_v9 = vld [vmem:[%s2544_s1 + $0x234] sm:$0xf] }
  0x5b   :  { %946 = vmatpush.bf16.msra.mxu3 %v1226_v13  ;;  %v1643_v13 = vld [vmem:[%s2544_s1 + $0x274] sm:$0xf0]  ;;  %v1358_v16 = vor.u32 %v1642_v8, %v1357_v7  ;;  %v1362_v17 = vor.u32 %v1634_v9, %v1359_v11 }
  0x5c   :  { %v1366_v18 = vor.u32 %v1643_v13, %v1365_v12 }
  0x5d   :  { %905 = vmatpush.bf16.msra.mxu0 %v1150_v19  ;;  %919 = vmatpush.bf16.msra.mxu1 %v1154_v22  ;;  %v1293_v19 = vld [vmem:[%s2544_s1 + $0x1b0] sm:$0xf]  ;;  %v1370_v22 = vor.u32 %v1635_v14, %v1367_v15 }
  0x5e   :  { %933 = vmatpush.bf16.msra.mxu2 %v1158_v23  ;;  %v1295_v23 = vld [vmem:[%s2544_s1 + $0x1f0] sm:$0xf0]  ;;  %v1294_v28 = vor.u32 %v1626_v20, %v1293_v19 }
  0x5f   :  { %947 = vmatpush.bf16.msra.mxu3 %v1162_v27  ;;  %v1303_v27 = vld [vmem:[%s2544_s1 + $0x1f8] sm:$0xf0]  ;;  %v1298_v29 = vor.u32 %v1618_v21, %v1295_v23 }
  0x61   :  { %906 = vmatpush.bf16.msra.mxu0 %v1086_v34  ;;  %920 = vmatpush.bf16.msra.mxu1 %v1090_v38  ;;  %v1306_v34 = vor.u32 %v1619_v26, %v1303_v27  ;;  %v1603_v38 = vld [vmem:[%s2544_s1 + $0x13c] sm:$0xf] }
  0x62   :  { %934 = vmatpush.bf16.msra.mxu2 %v1094_v39  ;;  %v1239_v39 = vld [vmem:[%s2544_s1 + $0x178] sm:$0xf0] }
  0x63   :  { %948 = vmatpush.bf16.msra.mxu3 %v1098_v42  ;;  %v1238_v42 = vor.u32 %v1611_v37, %v1237_v36  ;;  %v1242_v46 = vor.u32 %v1603_v38, %v1239_v39 }
  0x64   :  { %907 = vmatmul.bf16.vlgmr.msra.gmra.mxu0 %v1974_v1  ;;  %921 = vmatmul.bf16.vlgmr.msra.gmra.mxu1 %v1974_v1 }
  0x65   :  { %955 = vmatpush.bf16.msrb.mxu0 %v1550_v43  ;;  %969 = vmatpush.bf16.msrb.mxu1 %v1554_v44  ;;  %v1165_v43 = vld [vmem:[%s2544_s1 + $0xb0] sm:$0xf] }
  0x66   :  { %983 = vmatpush.bf16.msrb.mxu2 %v1558_v45  ;;  %949 = vmatmul.bf16.vlgmr.msra.gmra.mxu3 %v1974_v1  ;;  %v1594_v44 = vld [vmem:[%s2544_s1 + $0xec] sm:$0xf0]  ;;  %v1586_v45 = vld [vmem:[%s2544_s1 + $0xb4] sm:$0xf] }
  0x67   :  { %997 = vmatpush.bf16.msrb.mxu3 %v1562_v49  ;;  %935 = vmatmul.bf16.vlgmr.msra.gmra.mxu2 %v1974_v1  ;;  %v1595_v49 = vld [vmem:[%s2544_s1 + $0xf4] sm:$0xf0]  ;;  %v1166_v52 = vor.u32 %v1594_v44, %v1165_v43  ;;  %v1170_v53 = vor.u32 %v1586_v45, %v1167_v47 }
  0x68   :  { %v1174_v54 = vor.u32 %v1595_v49, %v1173_v48 }
  0x69   :  { %956 = vmatpush.bf16.msrb.mxu0 %v1486_v55  ;;  %970 = vmatpush.bf16.msrb.mxu1 %v1490_v56  ;;  %v1101_v55 = vld [vmem:[%s2544_s1 + $0x30] sm:$0xf] }
  0x6a   :  { %984 = vmatpush.bf16.msrb.mxu2 %v1494_v57  ;;  %v1578_v56 = vld [vmem:[%s2544_s1 + $0x6c] sm:$0xf0]  ;;  %v1570_v57 = vld [vmem:[%s2544_s1 + $0x34] sm:$0xf] }
  0x6b   :  { %998 = vmatpush.bf16.msrb.mxu3 %v1498_v61  ;;  %v1579_v61 = vld [vmem:[%s2544_s1 + $0x74] sm:$0xf0]  ;;  %v1102_v0 = vor.u32 %v1578_v56, %v1101_v55  ;;  %v1106_v2 = vor.u32 %v1570_v57, %v1103_v59 }
  0x6c   :  { %v1110_v3 = vor.u32 %v1579_v61, %v1109_v60 }
  0x6d   :  { %957 = vmatpush.bf16.msrb.mxu0 %v1422_v4  ;;  %971 = vmatpush.bf16.msrb.mxu1 %v1426_v5  ;;  %v1114_v4 = vor.u32 %v1571_v62, %v1111_v63 }
  0x6e   :  { %985 = vmatpush.bf16.msrb.mxu2 %v1430_v6 }
  0x6f   :  { %999 = vmatpush.bf16.msrb.mxu3 %v1434_v10 }
  0x71   :  { %958 = vmatpush.bf16.msrb.mxu0 %v1358_v16  ;;  %972 = vmatpush.bf16.msrb.mxu1 %v1362_v17 }
  0x72   :  { %986 = vmatpush.bf16.msrb.mxu2 %v1366_v18 }
  0x73   :  { %1000 = vmatpush.bf16.msrb.mxu3 %v1370_v22 }
  0x75   :  { %959 = vmatpush.bf16.msrb.mxu0 %v1294_v28  ;;  %973 = vmatpush.bf16.msrb.mxu1 %v1298_v29 }
  0x76   :  { %987 = vmatpush.bf16.msrb.mxu2 %v1302_v30 }
  0x77   :  { %1001 = vmatpush.bf16.msrb.mxu3 %v1306_v34 }
  0x79   :  { %960 = vmatpush.bf16.msrb.mxu0 %v1230_v40  ;;  %974 = vmatpush.bf16.msrb.mxu1 %v1234_v41 }
  0x7a   :  { %988 = vmatpush.bf16.msrb.mxu2 %v1238_v42 }
  0x7b   :  { %1002 = vmatpush.bf16.msrb.mxu3 %v1242_v46 }
  0x7d   :  { %961 = vmatpush.bf16.msrb.mxu0 %v1166_v52  ;;  %975 = vmatpush.bf16.msrb.mxu1 %v1170_v53 }
  0x7e   :  { %989 = vmatpush.bf16.msrb.mxu2 %v1174_v54 }
  0x7f   :  { %1003 = vmatpush.bf16.msrb.mxu3 %v1178_v58 }
  0x81   :  { %962 = vmatpush.bf16.msrb.mxu0 %v1102_v0  ;;  %976 = vmatpush.bf16.msrb.mxu1 %v1106_v2 }
  0x82   :  { %990 = vmatpush.bf16.msrb.mxu2 %v1110_v3 }
  0x83   :  { %1004 = vmatpush.bf16.msrb.mxu3 %v1114_v4 }
  0x84   :  { %963 = vmatmul.bf16.vlgmr.msrb.gmra.mxu0 %v1974_v1  ;;  %977 = vmatmul.bf16.vlgmr.msrb.gmra.mxu1 %v1974_v1 }
  0x85   :  { %991 = vmatmul.bf16.vlgmr.msrb.gmra.mxu2 %v1974_v1 }
  0x86   :  { %1005 = vmatmul.bf16.vlgmr.msrb.gmra.mxu3 %v1974_v1 }
  0xa1   :  { %v796_v5 = vpop.f32.mrf.mxu0  ;;  %v810_v6 = vpop.f32.mrf.mxu1 }
  0xa2   :  { %v1011_v7 = vpack.c.bf16 %v810_v6, %v796_v5 }
  0xa4   :  { %1027 = vst [vmem:[%s2546_s2] sm:$0xff] %v1011_v7 }
  0xa9   :  { %v838_v9 = vpop.f32.mrf.mxu3  ;;  %v798_v11 = vpop.f32.mrf.mxu0 }
  0xaa   :  { %v824_v8 = vpop.f32.mrf.mxu2  ;;  %v812_v12 = vpop.f32.mrf.mxu1 }
  0xab   :  { %v1012_v10 = vpack.c.bf16 %v838_v9, %v824_v8  ;;  %v1019_v13 = vpack.c.bf16 %v812_v12, %v798_v11 }
  0xad   :  { %1028 = vst [vmem:[%s2546_s2 + $0x8] sm:$0xff] %v1012_v10 }
  0xae   :  { %1035 = vst [vmem:[%s2546_s2 + $0x40] sm:$0xff] %v1019_v13 }
  0xb1   :  { %v840_v14 = vpop.f32.mrf.mxu3 }
  0xb2   :  { %v826_v1 = vpop.f32.mrf.mxu2 }
  0xb3   :  { %v1020_v15 = vpack.c.bf16 %v840_v14, %v826_v1 }
  0xb5   :  { %1036 = vst [vmem:[%s2546_s2 + $0x48] sm:$0xff] %v1020_v15 }
  0xc1   :  { %v852_v16 = vpop.f32.mrf.mxu0  ;;  %v866_v17 = vpop.f32.mrf.mxu1 }
  0xc2   :  { %v1013_v18 = vpack.c.bf16 %v866_v17, %v852_v16 }
  0xc4   :  { %1029 = vst [vmem:[%s2546_s2 + $0x10] sm:$0xff] %v1013_v18 }
  0xc9   :  { %v894_v20 = vpop.f32.mrf.mxu3  ;;  %v854_v22 = vpop.f32.mrf.mxu0 }
  0xca   :  { %v880_v19 = vpop.f32.mrf.mxu2  ;;  %v868_v23 = vpop.f32.mrf.mxu1 }
  0xcb   :  { %v1014_v21 = vpack.c.bf16 %v894_v20, %v880_v19  ;;  %v1021_v24 = vpack.c.bf16 %v868_v23, %v854_v22 }
  0xcd   :  { %1030 = vst [vmem:[%s2546_s2 + $0x18] sm:$0xff] %v1014_v21 }
  0xce   :  { %1037 = vst [vmem:[%s2546_s2 + $0x50] sm:$0xff] %v1021_v24 }
  0xd1   :  { %v896_v26 = vpop.f32.mrf.mxu3 }
  0xd2   :  { %v882_v25 = vpop.f32.mrf.mxu2 }
  0xd3   :  { %v1022_v27 = vpack.c.bf16 %v896_v26, %v882_v25 }
  0xd5   :  { %1038 = vst [vmem:[%s2546_s2 + $0x58] sm:$0xff] %v1022_v27 }
  0xe1   :  { %v908_v28 = vpop.f32.mrf.mxu0  ;;  %v922_v29 = vpop.f32.mrf.mxu1 }
  0xe2   :  { %v1015_v30 = vpack.c.bf16 %v922_v29, %v908_v28 }
  0xe4   :  { %1031 = vst [vmem:[%s2546_s2 + $0x20] sm:$0xff] %v1015_v30 }
  0xe9   :  { %v950_v32 = vpop.f32.mrf.mxu3  ;;  %v910_v34 = vpop.f32.mrf.mxu0 }
  0xea   :  { %v936_v31 = vpop.f32.mrf.mxu2  ;;  %v924_v35 = vpop.f32.mrf.mxu1 }
  0xeb   :  { %v1016_v33 = vpack.c.bf16 %v950_v32, %v936_v31  ;;  %v1023_v36 = vpack.c.bf16 %v924_v35, %v910_v34 }
  0xed   :  { %1032 = vst [vmem:[%s2546_s2 + $0x28] sm:$0xff] %v1016_v33 }
  0xee   :  { %1039 = vst [vmem:[%s2546_s2 + $0x60] sm:$0xff] %v1023_v36 }
  0xf1   :  { %v952_v38 = vpop.f32.mrf.mxu3 }
  0xf2   :  { %v938_v37 = vpop.f32.mrf.mxu2 }
  0xf3   :  { %v1024_v39 = vpack.c.bf16 %v952_v38, %v938_v37 }
  0xf5   :  { %1040 = vst [vmem:[%s2546_s2 + $0x68] sm:$0xff] %v1024_v39 }
 0x101   :  { %v964_v40 = vpop.f32.mrf.mxu0  ;;  %v978_v41 = vpop.f32.mrf.mxu1 }
 0x102   :  { %v1017_v42 = vpack.c.bf16 %v978_v41, %v964_v40 }
 0x104   :  { %1033 = vst [vmem:[%s2546_s2 + $0x30] sm:$0xff] %v1017_v42 }
 0x108   :  { %v992_v43 = vpop.f32.mrf.mxu2 }
 0x109   :  { %v1006_v44 = vpop.f32.mrf.mxu3  ;;  %v966_v45 = vpop.f32.mrf.mxu0 }
 0x10a   :  { %v1018_v46 = vpack.c.bf16 %v1006_v44, %v992_v43  ;;  %v980_v47 = vpop.f32.mrf.mxu1 }
 0x10b   :  { %v1025_v48 = vpack.c.bf16 %v980_v47, %v966_v45 }
 0x10c   :  { %1034 = vst [vmem:[%s2546_s2 + $0x38] sm:$0xff] %v1018_v46 }
 0x10d   :  { %1041 = vst [vmem:[%s2546_s2 + $0x70] sm:$0xff] %v1025_v48 }
 0x110   :  { %v994_v49 = vpop.f32.mrf.mxu2 }
 0x111   :  { %v1008_v50 = vpop.f32.mrf.mxu3 }
 0x112   :  { %v1026_v51 = vpack.c.bf16 %v1008_v50, %v994_v49 }
 0x114   :  { %1042 = vst [vmem:[%s2546_s2 + $0x78] sm:$0xff] %v1026_v51 }

// kernel: vae_conceptizer_forward.15
= control target key start
LH: loop header
LB: loop body
LE: loop exit
PB: predicated region body
PF: predicated region fallthrough
CT: control target
= control target key end

     0   :  { %s1165_s9 = smov 0   ;;  %s1614_s0 = inlined_call_operand.vmem [shape: bf16[64,128], index: 0, kind: input, shape index: {}]   ;;  %s1615_s1 = inlined_call_operand.vmem [shape: bf16[128,1024], index: 1, kind: input, shape index: {}]   ;;  %s1616_s2 = inlined_call_operand.vmem [shape: bf16[64,1024], index: 2, kind: output, shape index: {}]  }
   0x1 LB: > { %s791_s10 = sadd.s32 4294967295, %s1148_s9   ;;  %p795_p0 = scmp.ge.s32.totalorder %s1148_s9, 1  ;;  %s1148_s9 = sphi %s1165_s9, %s12_s9  }
   0x2   : > { %p113_p1 = scmp.lt.s32.totalorder %s1148_s9, 3 }
   0x4   : > { %p114_p2 = pnand %p795_p0, %p113_p1 }
   0x5   : > { %s796_s15 = sshll.u32 (!%p114_p2), %s791_s10, 2 }
   0x6   : > { %117 = sbr.rel (%p114_p2) target bundleno = 239 (0xef), region = 28  ;;  %p137_p3 = scmp.lt.s32.totalorder (!%p114_p2), %s796_s15, 7 }
   0xb   : > { %v1035_v0 = vld [vmem:[%s1615_s1 + $0x1c0] sm:$0xf]  ;;  %v1126_v2 = vld [vmem:[%s1615_s1 + $0x1c4] sm:$0xf]  ;;  %v1043_v5 = vld [vmem:[%s1615_s1 + $0x1c8] sm:$0xf] }
   0xc   : > { %v1130_v1 = vld [vmem:[%s1615_s1 + $0x1dc] sm:$0xf0]  ;;  %v1037_v4 = vld [vmem:[%s1615_s1 + $0x1e0] sm:$0xf0]  ;;  %v1131_v6 = vld [vmem:[%s1615_s1 + $0x1e4] sm:$0xf0] }
   0xd   : > { %v1036_v3 = vor.u32 %v1130_v1, %v1035_v0  ;;  %v1040_v7 = vor.u32 %v1126_v2, %v1037_v4  ;;  %v1044_v8 = vor.u32 %v1131_v6, %v1043_v5  ;;  %v1127_v9 = vld [vmem:[%s1615_s1 + $0x1cc] sm:$0xf]  ;;  %v1003_v11 = vld [vmem:[%s1615_s1 + $0x180] sm:$0xf]  ;;  %v1118_v14 = vld [vmem:[%s1615_s1 + $0x184] sm:$0xf] }
   0xe   : > { %v1045_v10 = vld [vmem:[%s1615_s1 + $0x1e8] sm:$0xf0]  ;;  %v1122_v13 = vld [vmem:[%s1615_s1 + $0x19c] sm:$0xf0]  ;;  %v1005_v15 = vld [vmem:[%s1615_s1 + $0x1a0] sm:$0xf0] }
   0xf   : > { %549 = vmatpush.bf16.msra.mxu0 %v1036_v3  ;;  %v1048_v12 = vor.u32 %v1127_v9, %v1045_v10  ;;  %568 = vmatpush.bf16.msra.mxu1 %v1040_v7  ;;  %v1004_v16 = vor.u32 %v1122_v13, %v1003_v11  ;;  %v1008_v17 = vor.u32 %v1118_v14, %v1005_v15  ;;  %v1011_v18 = vld [vmem:[%s1615_s1 + $0x188] sm:$0xf]  ;;  %v1119_v20 = vld [vmem:[%s1615_s1 + $0x18c] sm:$0xf]  ;;  %v971_v23 = vld [vmem:[%s1615_s1 + $0x140] sm:$0xf] }
  0x10   : > { %587 = vmatpush.bf16.msra.mxu2 %v1044_v8  ;;  %v1123_v19 = vld [vmem:[%s1615_s1 + $0x1a4] sm:$0xf0]  ;;  %v1013_v22 = vld [vmem:[%s1615_s1 + $0x1a8] sm:$0xf0]  ;;  %v1114_v24 = vld [vmem:[%s1615_s1 + $0x15c] sm:$0xf0] }
  0x11   : > { %606 = vmatpush.bf16.msra.mxu3 %v1048_v12  ;;  %v1012_v21 = vor.u32 %v1123_v19, %v1011_v18  ;;  %v1016_v25 = vor.u32 %v1119_v20, %v1013_v22  ;;  %v1110_v26 = vld [vmem:[%s1615_s1 + $0x144] sm:$0xf]  ;;  %v979_v28 = vld [vmem:[%s1615_s1 + $0x148] sm:$0xf]  ;;  %v972_v29 = vor.u32 %v1114_v24, %v971_v23  ;;  %v1111_v31 = vld [vmem:[%s1615_s1 + $0x14c] sm:$0xf] }
  0x12   : > { %v973_v27 = vld [vmem:[%s1615_s1 + $0x160] sm:$0xf0]  ;;  %v1115_v30 = vld [vmem:[%s1615_s1 + $0x164] sm:$0xf0]  ;;  %v981_v32 = vld [vmem:[%s1615_s1 + $0x168] sm:$0xf0] }
  0x13   : > { %550 = vmatpush.bf16.msra.mxu0 %v1004_v16  ;;  %569 = vmatpush.bf16.msra.mxu1 %v1008_v17  ;;  %v976_v33 = vor.u32 %v1110_v26, %v973_v27  ;;  %v980_v34 = vor.u32 %v1115_v30, %v979_v28  ;;  %v939_v35 = vld [vmem:[%s1615_s1 + $0x100] sm:$0xf]  ;;  %v1102_v37 = vld [vmem:[%s1615_s1 + $0x104] sm:$0xf]  ;;  %v984_v38 = vor.u32 %v1111_v31, %v981_v32  ;;  %v947_v40 = vld [vmem:[%s1615_s1 + $0x108] sm:$0xf] }
  0x14   : > { %588 = vmatpush.bf16.msra.mxu2 %v1012_v21  ;;  %v1106_v36 = vld [vmem:[%s1615_s1 + $0x11c] sm:$0xf0]  ;;  %v941_v39 = vld [vmem:[%s1615_s1 + $0x120] sm:$0xf0]  ;;  %v1107_v41 = vld [vmem:[%s1615_s1 + $0x124] sm:$0xf0] }
  0x15   : > { %607 = vmatpush.bf16.msra.mxu3 %v1016_v25  ;;  %v1103_v42 = vld [vmem:[%s1615_s1 + $0x10c] sm:$0xf]  ;;  %v940_v44 = vor.u32 %v1106_v36, %v939_v35  ;;  %v944_v45 = vor.u32 %v1102_v37, %v941_v39  ;;  %v948_v46 = vor.u32 %v1107_v41, %v947_v40  ;;  %v907_v47 = vld [vmem:[%s1615_s1 + $0xc0] sm:$0xf]  ;;  %v1094_v49 = vld [vmem:[%s1615_s1 + $0xc4] sm:$0xf] }
  0x16   : > { %v949_v43 = vld [vmem:[%s1615_s1 + $0x128] sm:$0xf0]  ;;  %v1098_v48 = vld [vmem:[%s1615_s1 + $0xdc] sm:$0xf0]  ;;  %v909_v51 = vld [vmem:[%s1615_s1 + $0xe0] sm:$0xf0] }
  0x17   : > { %551 = vmatpush.bf16.msra.mxu0 %v972_v29  ;;  %570 = vmatpush.bf16.msra.mxu1 %v976_v33  ;;  %v952_v50 = vor.u32 %v1103_v42, %v949_v43  ;;  %v915_v52 = vld [vmem:[%s1615_s1 + $0xc8] sm:$0xf]  ;;  %v1095_v54 = vld [vmem:[%s1615_s1 + $0xcc] sm:$0xf]  ;;  %v908_v56 = vor.u32 %v1098_v48, %v907_v47  ;;  %v912_v57 = vor.u32 %v1094_v49, %v909_v51  ;;  %v875_v59 = vld [vmem:[%s1615_s1 + $0x80] sm:$0xf] }
  0x18   : > { %589 = vmatpush.bf16.msra.mxu2 %v980_v34  ;;  %v1099_v53 = vld [vmem:[%s1615_s1 + $0xe4] sm:$0xf0]  ;;  %v917_v55 = vld [vmem:[%s1615_s1 + $0xe8] sm:$0xf0]  ;;  %v1090_v60 = vld [vmem:[%s1615_s1 + $0x9c] sm:$0xf0] }
  0x19   : > { %608 = vmatpush.bf16.msra.mxu3 %v984_v38  ;;  %v916_v58 = vor.u32 %v1099_v53, %v915_v52  ;;  %v1086_v61 = vld [vmem:[%s1615_s1 + $0x84] sm:$0xf]  ;;  %v920_v62 = vor.u32 %v1095_v54, %v917_v55  ;;  %v883_v0 = vld [vmem:[%s1615_s1 + $0x88] sm:$0xf]  ;;  %v1087_v2 = vld [vmem:[%s1615_s1 + $0x8c] sm:$0xf]  ;;  %v876_v4 = vor.u32 %v1090_v60, %v875_v59 }
  0x1a   : > { %v877_v63 = vld [vmem:[%s1615_s1 + $0xa0] sm:$0xf0]  ;;  %v1091_v1 = vld [vmem:[%s1615_s1 + $0xa4] sm:$0xf0]  ;;  %v885_v3 = vld [vmem:[%s1615_s1 + $0xa8] sm:$0xf0] }
  0x1b   : > { %552 = vmatpush.bf16.msra.mxu0 %v940_v44  ;;  %571 = vmatpush.bf16.msra.mxu1 %v944_v45  ;;  %v843_v5 = vld [vmem:[%s1615_s1 + $0x40] sm:$0xf]  ;;  %v880_v6 = vor.u32 %v1086_v61, %v877_v63  ;;  %v884_v7 = vor.u32 %v1091_v1, %v883_v0  ;;  %v1078_v9 = vld [vmem:[%s1615_s1 + $0x44] sm:$0xf]  ;;  %v888_v11 = vor.u32 %v1087_v2, %v885_v3  ;;  %v851_v12 = vld [vmem:[%s1615_s1 + $0x48] sm:$0xf] }
  0x1c   : > { %590 = vmatpush.bf16.msra.mxu2 %v948_v46  ;;  %v1082_v8 = vld [vmem:[%s1615_s1 + $0x5c] sm:$0xf0]  ;;  %v845_v10 = vld [vmem:[%s1615_s1 + $0x60] sm:$0xf0]  ;;  %v1083_v13 = vld [vmem:[%s1615_s1 + $0x64] sm:$0xf0] }
  0x1d   : > { %609 = vmatpush.bf16.msra.mxu3 %v952_v50  ;;  %v1079_v14 = vld [vmem:[%s1615_s1 + $0x4c] sm:$0xf]  ;;  %v844_v16 = vor.u32 %v1082_v8, %v843_v5  ;;  %v811_v17 = vld [vmem:[%s1615_s1] sm:$0xf]  ;;  %v1070_v19 = vld [vmem:[%s1615_s1 + $0x4] sm:$0xf]  ;;  %v848_v20 = vor.u32 %v1078_v9, %v845_v10  ;;  %v852_v21 = vor.u32 %v1083_v13, %v851_v12 }
  0x1e   : > { %v853_v15 = vld [vmem:[%s1615_s1 + $0x68] sm:$0xf0]  ;;  %v1074_v18 = vld [vmem:[%s1615_s1 + $0x1c] sm:$0xf0]  ;;  %v813_v22 = vld [vmem:[%s1615_s1 + $0x20] sm:$0xf0] }
  0x1f   : > { %553 = vmatpush.bf16.msra.mxu0 %v908_v56  ;;  %572 = vmatpush.bf16.msra.mxu1 %v912_v57  ;;  %v819_v23 = vld [vmem:[%s1615_s1 + $0x8] sm:$0xf]  ;;  %s1618_s15 = smov (!%p137_p3, %s796_s15), 7  ;;  %v856_v24 = vor.u32 %v1079_v14, %v853_v15  ;;  %v1071_v26 = vld [vmem:[%s1615_s1 + $0xc] sm:$0xf]  ;;  %v812_v30 = vor.u32 %v1074_v18, %v811_v17  ;;  %v816_v33 = vor.u32 %v1070_v19, %v813_v22 }
  0x20   : > { %591 = vmatpush.bf16.msra.mxu2 %v916_v58  ;;  %v1075_v25 = vld [vmem:[%s1615_s1 + $0x24] sm:$0xf0]  ;;  %v821_v27 = vld [vmem:[%s1615_s1 + $0x28] sm:$0xf0]  ;;  %s797_s7 = sshll.u32 %s1618_s15, 2  ;;  %s1067_s13 = sshll.u32 %s1618_s15, 5 }
  0x21   : > { %610 = vmatpush.bf16.msra.mxu3 %v920_v62  ;;  %v1059_v28 = vld [vmem:[%s1615_s1 + $0x1d8] sm:$0xf]  ;;  %s1379_s17 = scalar_lea.vmem %s1614_s0, %s797_s7  ;;  %v1129_v31 = vld [vmem:[%s1615_s1 + $0x1dc] sm:$0xf]  ;;  %v820_v34 = vor.u32 %v1075_v25, %v819_v23  ;;  %v1051_v35 = vld [vmem:[%s1615_s1 + $0x1d0] sm:$0xf]  ;;  %v824_v36 = vor.u32 %v1071_v26, %v821_v27  ;;  %s1593_s16 = scalar_lea.vmem %s1616_s2, %s1067_s13 }
  0x22   : > { %v1133_v29 = vld [vmem:[%s1615_s1 + $0x1f4] sm:$0xf0]  ;;  %v1061_v32 = vld [vmem:[%s1615_s1 + $0x1f8] sm:$0xf0]  ;;  %v1132_v38 = vld [vmem:[%s1615_s1 + $0x1ec] sm:$0xf0] }
  0x23   : > { %554 = vmatpush.bf16.msra.mxu0 %v876_v4  ;;  %573 = vmatpush.bf16.msra.mxu1 %v880_v6  ;;  %v1060_v37 = vor.u32 %v1133_v29, %v1059_v28  ;;  %v1128_v39 = vld [vmem:[%s1615_s1 + $0x1d4] sm:$0xf]  ;;  %v1400_v41 = vld [vmem:[%s1379_s17] sm:$0xff]  ;;  %v1064_v42 = vor.u32 %v1129_v31, %v1061_v32  ;;  %v1027_v43 = vld [vmem:[%s1615_s1 + $0x198] sm:$0xf]  ;;  %v1052_v47 = vor.u32 %v1132_v38, %v1051_v35 }
  0x24   : > { %592 = vmatpush.bf16.msra.mxu2 %v884_v7  ;;  %v1053_v40 = vld [vmem:[%s1615_s1 + $0x1f0] sm:$0xf0]  ;;  %v1125_v44 = vld [vmem:[%s1615_s1 + $0x1b4] sm:$0xf0]  ;;  %v1121_v45 = vld [vmem:[%s1615_s1 + $0x19c] sm:$0xf] }
  0x25   : > { %611 = vmatpush.bf16.msra.mxu3 %v888_v11  ;;  %v1029_v46 = vld [vmem:[%s1615_s1 + $0x1b8] sm:$0xf0]  ;;  %v1056_v48 = vor.u32 %v1128_v39, %v1053_v40  ;;  %v1028_v49 = vor.u32 %v1125_v44, %v1027_v43  ;;  %v1019_v50 = vld [vmem:[%s1615_s1 + $0x190] sm:$0xf]  ;;  %v1120_v52 = vld [vmem:[%s1615_s1 + $0x194] sm:$0xf] }
  0x26   : > { %v1124_v51 = vld [vmem:[%s1615_s1 + $0x1ac] sm:$0xf0]  ;;  %v1032_v53 = vor.u32 %v1121_v45, %v1029_v46  ;;  %v1021_v54 = vld [vmem:[%s1615_s1 + $0x1b0] sm:$0xf0]  ;;  %v995_v55 = vld [vmem:[%s1615_s1 + $0x158] sm:$0xf] }
  0x27   : > { %555 = vmatpush.bf16.msra.mxu0 %v844_v16  ;;  %574 = vmatpush.bf16.msra.mxu1 %v848_v20  ;;  %v1117_v56 = vld [vmem:[%s1615_s1 + $0x174] sm:$0xf0]  ;;  %v1113_v57 = vld [vmem:[%s1615_s1 + $0x15c] sm:$0xf]  ;;  %v1020_v59 = vor.u32 %v1124_v51, %v1019_v50  ;;  %v1024_v60 = vor.u32 %v1120_v52, %v1021_v54  ;;  %v987_v62 = vld [vmem:[%s1615_s1 + $0x150] sm:$0xf] }
  0x28   : > { %593 = vmatpush.bf16.msra.mxu2 %v852_v21  ;;  %v997_v58 = vld [vmem:[%s1615_s1 + $0x178] sm:$0xf0]  ;;  %v996_v61 = vor.u32 %v1117_v56, %v995_v55  ;;  %v1116_v63 = vld [vmem:[%s1615_s1 + $0x16c] sm:$0xf0]  ;;  %v1112_v0 = vld [vmem:[%s1615_s1 + $0x154] sm:$0xf] }
  0x29   : > { %612 = vmatpush.bf16.msra.mxu3 %v856_v24  ;;  %v1000_v1 = vor.u32 %v1113_v57, %v997_v58  ;;  %v989_v2 = vld [vmem:[%s1615_s1 + $0x170] sm:$0xf0]  ;;  %v963_v3 = vld [vmem:[%s1615_s1 + $0x118] sm:$0xf]  ;;  %v1105_v5 = vld [vmem:[%s1615_s1 + $0x11c] sm:$0xf]  ;;  %v988_v7 = vor.u32 %v1116_v63, %v987_v62 }
  0x2a   : > { %v1109_v4 = vld [vmem:[%s1615_s1 + $0x134] sm:$0xf0]  ;;  %v965_v6 = vld [vmem:[%s1615_s1 + $0x138] sm:$0xf0]  ;;  %v992_v8 = vor.u32 %v1112_v0, %v989_v2  ;;  %v955_v10 = vld [vmem:[%s1615_s1 + $0x110] sm:$0xf] }
  0x2b   : > { %556 = vmatpush.bf16.msra.mxu0 %v812_v30  ;;  %575 = vmatpush.bf16.msra.mxu1 %v816_v33  ;;  %v964_v9 = vor.u32 %v1109_v4, %v963_v3  ;;  %v1108_v11 = vld [vmem:[%s1615_s1 + $0x12c] sm:$0xf0]  ;;  %v1104_v12 = vld [vmem:[%s1615_s1 + $0x114] sm:$0xf]  ;;  %v968_v13 = vor.u32 %v1105_v5, %v965_v6  ;;  %v931_v15 = vld [vmem:[%s1615_s1 + $0xd8] sm:$0xf] }
  0x2c   : > { %594 = vmatpush.bf16.msra.mxu2 %v820_v34  ;;  %v957_v14 = vld [vmem:[%s1615_s1 + $0x130] sm:$0xf0]  ;;  %v1101_v16 = vld [vmem:[%s1615_s1 + $0xf4] sm:$0xf0]  ;;  %v1097_v17 = vld [vmem:[%s1615_s1 + $0xdc] sm:$0xf]  ;;  %v956_v19 = vor.u32 %v1108_v11, %v955_v10 }
  0x2d   : > { %613 = vmatpush.bf16.msra.mxu3 %v824_v36  ;;  %v933_v18 = vld [vmem:[%s1615_s1 + $0xf8] sm:$0xf0]  ;;  %v1491_v20 = vld [vmem:[%s1379_s17 + $0x8] sm:$0xff]  ;;  %v960_v21 = vor.u32 %v1104_v12, %v957_v14  ;;  %v932_v22 = vor.u32 %v1101_v16, %v931_v15  ;;  %v923_v23 = vld [vmem:[%s1615_s1 + $0xd0] sm:$0xf] }
  0x2e   : > { %557 = vmatmul.bf16.vlgmr.msra.gmra.mxu0 %v1400_v41  ;;  %576 = vmatmul.bf16.vlgmr.msra.gmra.mxu1 %v1400_v41  ;;  %v1100_v24 = vld [vmem:[%s1615_s1 + $0xec] sm:$0xf0]  ;;  %v1096_v25 = vld [vmem:[%s1615_s1 + $0xd4] sm:$0xf]  ;;  %v936_v26 = vor.u32 %v1097_v17, %v933_v18  ;;  %v899_v28 = vld [vmem:[%s1615_s1 + $0x98] sm:$0xf] }
  0x2f   : > { %595 = vmatmul.bf16.vlgmr.msra.gmra.mxu2 %v1400_v41  ;;  %625 = vmatpush.bf16.msrb.mxu0 %v1052_v47  ;;  %v925_v27 = vld [vmem:[%s1615_s1 + $0xf0] sm:$0xf0]  ;;  %v1093_v29 = vld [vmem:[%s1615_s1 + $0xb4] sm:$0xf0]  ;;  %v1089_v30 = vld [vmem:[%s1615_s1 + $0x9c] sm:$0xf]  ;;  %v924_v32 = vor.u32 %v1100_v24, %v923_v23 }
  0x30   : > { %663 = vmatpush.bf16.msrb.mxu2 %v1060_v37  ;;  %614 = vmatmul.bf16.vlgmr.msra.gmra.mxu3 %v1400_v41  ;;  %v901_v31 = vld [vmem:[%s1615_s1 + $0xb8] sm:$0xf0]  ;;  %v928_v33 = vor.u32 %v1096_v25, %v925_v27  ;;  %v900_v34 = vor.u32 %v1093_v29, %v899_v28  ;;  %v891_v35 = vld [vmem:[%s1615_s1 + $0x90] sm:$0xf]  ;;  %v1088_v37 = vld [vmem:[%s1615_s1 + $0x94] sm:$0xf] }
  0x31   : > { %682 = vmatpush.bf16.msrb.mxu3 %v1064_v42  ;;  %644 = vmatpush.bf16.msrb.mxu1 %v1056_v48  ;;  %v1092_v36 = vld [vmem:[%s1615_s1 + $0xac] sm:$0xf0]  ;;  %v904_v38 = vor.u32 %v1089_v30, %v901_v31  ;;  %v893_v39 = vld [vmem:[%s1615_s1 + $0xb0] sm:$0xf0]  ;;  %v867_v40 = vld [vmem:[%s1615_s1 + $0x58] sm:$0xf] }
  0x32   : > { %v1085_v42 = vld [vmem:[%s1615_s1 + $0x74] sm:$0xf0]  ;;  %v1081_v43 = vld [vmem:[%s1615_s1 + $0x5c] sm:$0xf]  ;;  %v892_v45 = vor.u32 %v1092_v36, %v891_v35  ;;  %v896_v46 = vor.u32 %v1088_v37, %v893_v39  ;;  %v859_v48 = vld [vmem:[%s1615_s1 + $0x50] sm:$0xf] }
  0x33   : > { %626 = vmatpush.bf16.msrb.mxu0 %v1020_v59  ;;  %v869_v44 = vld [vmem:[%s1615_s1 + $0x78] sm:$0xf0]  ;;  %v868_v47 = vor.u32 %v1085_v42, %v867_v40  ;;  %v1080_v50 = vld [vmem:[%s1615_s1 + $0x54] sm:$0xf]  ;;  %v1077_v54 = vld [vmem:[%s1615_s1 + $0x34] sm:$0xf0] }
  0x34   : > { %664 = vmatpush.bf16.msrb.mxu2 %v1028_v49  ;;  %v1084_v49 = vld [vmem:[%s1615_s1 + $0x6c] sm:$0xf0]  ;;  %v872_v51 = vor.u32 %v1081_v43, %v869_v44  ;;  %v861_v52 = vld [vmem:[%s1615_s1 + $0x70] sm:$0xf0]  ;;  %v1073_v55 = vld [vmem:[%s1615_s1 + $0x1c] sm:$0xf] }
  0x35   : > { %683 = vmatpush.bf16.msrb.mxu3 %v1032_v53  ;;  %645 = vmatpush.bf16.msrb.mxu1 %v1024_v60  ;;  %v835_v53 = vld [vmem:[%s1615_s1 + $0x18] sm:$0xf]  ;;  %v837_v56 = vld [vmem:[%s1615_s1 + $0x38] sm:$0xf0]  ;;  %v860_v57 = vor.u32 %v1084_v49, %v859_v48  ;;  %v864_v58 = vor.u32 %v1080_v50, %v861_v52  ;;  %v827_v60 = vld [vmem:[%s1615_s1 + $0x10] sm:$0xf] }
  0x36   : > { %v836_v59 = vor.u32 %v1077_v54, %v835_v53  ;;  %v840_v62 = vor.u32 %v1073_v55, %v837_v56  ;;  %v1072_v63 = vld [vmem:[%s1615_s1 + $0x14] sm:$0xf] }
  0x37   : > { %627 = vmatpush.bf16.msrb.mxu0 %v988_v7  ;;  %v829_v0 = vld [vmem:[%s1615_s1 + $0x30] sm:$0xf0] }
  0x38   : > { %665 = vmatpush.bf16.msrb.mxu2 %v996_v61  ;;  %v1076_v61 = vld [vmem:[%s1615_s1 + $0x2c] sm:$0xf0]  ;;  %v832_v2 = vor.u32 %v1072_v63, %v829_v0 }
  0x39   : > { %684 = vmatpush.bf16.msrb.mxu3 %v1000_v1  ;;  %646 = vmatpush.bf16.msrb.mxu1 %v992_v8  ;;  %v828_v1 = vor.u32 %v1076_v61, %v827_v60 }
  0x3b   : > { %628 = vmatpush.bf16.msrb.mxu0 %v956_v19 }
  0x3c   : > { %666 = vmatpush.bf16.msrb.mxu2 %v964_v9 }
  0x3d   : > { %685 = vmatpush.bf16.msrb.mxu3 %v968_v13  ;;  %647 = vmatpush.bf16.msrb.mxu1 %v960_v21 }
  0x3e   : > { %562 = vmatmul.bf16.gmra.mxu0 %v1491_v20  ;;  %581 = vmatmul.bf16.gmra.mxu1 %v1491_v20 }
  0x3f   : > { %600 = vmatmul.bf16.gmra.mxu2 %v1491_v20  ;;  %629 = vmatpush.bf16.msrb.mxu0 %v924_v32 }
  0x40   : > { %667 = vmatpush.bf16.msrb.mxu2 %v932_v22  ;;  %619 = vmatmul.bf16.gmra.mxu3 %v1491_v20 }
  0x41   : > { %686 = vmatpush.bf16.msrb.mxu3 %v936_v26  ;;  %648 = vmatpush.bf16.msrb.mxu1 %v928_v33 }
  0x43   : > { %630 = vmatpush.bf16.msrb.mxu0 %v892_v45 }
  0x44   : > { %668 = vmatpush.bf16.msrb.mxu2 %v900_v34 }
  0x45   : > { %687 = vmatpush.bf16.msrb.mxu3 %v904_v38  ;;  %649 = vmatpush.bf16.msrb.mxu1 %v896_v46 }
  0x47   : > { %631 = vmatpush.bf16.msrb.mxu0 %v860_v57 }
  0x48   : > { %669 = vmatpush.bf16.msrb.mxu2 %v868_v47 }
  0x49   : > { %688 = vmatpush.bf16.msrb.mxu3 %v872_v51  ;;  %650 = vmatpush.bf16.msrb.mxu1 %v864_v58 }
  0x4b   : > { %632 = vmatpush.bf16.msrb.mxu0 %v828_v1 }
  0x4c   : > { %670 = vmatpush.bf16.msrb.mxu2 %v836_v59 }
  0x4d   : > { %689 = vmatpush.bf16.msrb.mxu3 %v840_v62  ;;  %651 = vmatpush.bf16.msrb.mxu1 %v832_v2 }
  0x4e   : > { %633 = vmatmul.bf16.vlgmr.msrb.gmra.mxu0 %v1400_v41 }
  0x4f   : > { %671 = vmatmul.bf16.vlgmr.msrb.gmra.mxu2 %v1400_v41 }
  0x50   : > { %652 = vmatmul.bf16.vlgmr.msrb.gmra.mxu1 %v1400_v41  ;;  %690 = vmatmul.bf16.vlgmr.msrb.gmra.mxu3 %v1400_v41 }
  0x5e   : > { %638 = vmatmul.bf16.gmra.mxu0 %v1491_v20 }
  0x5f   : > { %676 = vmatmul.bf16.gmra.mxu2 %v1491_v20 }
  0x60   : > { %657 = vmatmul.bf16.gmra.mxu1 %v1491_v20  ;;  %695 = vmatmul.bf16.gmra.mxu3 %v1491_v20 }
  0xab   : > { %v558_v3 = vpop.f32.mrf.mxu0  ;;  %v577_v4 = vpop.f32.mrf.mxu1 }
  0xac   : > { %v701_v41 = vpack.c.bf16 %v577_v4, %v558_v3 }
  0xae   : > { %717 = vst [vmem:[%s1593_s16] sm:$0xff] %v701_v41 }
  0xb2   : > { %v596_v5 = vpop.f32.mrf.mxu2 }
  0xb3   : > { %v615_v6 = vpop.f32.mrf.mxu3  ;;  %v560_v7 = vpop.f32.mrf.mxu0 }
  0xb4   : > { %v702_v8 = vpack.c.bf16 %v615_v6, %v596_v5  ;;  %v579_v9 = vpop.f32.mrf.mxu1 }
  0xb5   : > { %v705_v10 = vpack.c.bf16 %v579_v9, %v560_v7 }
  0xb6   : > { %718 = vst [vmem:[%s1593_s16 + $0x8] sm:$0xff] %v702_v8 }
  0xb7   : > { %721 = vst [vmem:[%s1593_s16 + $0x20] sm:$0xff] %v705_v10 }
  0xba   : > { %v598_v11 = vpop.f32.mrf.mxu2 }
  0xbb   : > { %v617_v12 = vpop.f32.mrf.mxu3  ;;  %v563_v13 = vpop.f32.mrf.mxu0 }
  0xbc   : > { %v706_v14 = vpack.c.bf16 %v617_v12, %v598_v11  ;;  %v582_v15 = vpop.f32.mrf.mxu1 }
  0xbd   : > { %v709_v16 = vpack.c.bf16 %v582_v15, %v563_v13 }
  0xbe   : > { %722 = vst [vmem:[%s1593_s16 + $0x28] sm:$0xff] %v706_v14 }
  0xbf   : > { %725 = vst [vmem:[%s1593_s16 + $0x40] sm:$0xff] %v709_v16 }
  0xc2   : > { %v601_v17 = vpop.f32.mrf.mxu2 }
  0xc3   : > { %v620_v18 = vpop.f32.mrf.mxu3  ;;  %v565_v19 = vpop.f32.mrf.mxu0 }
  0xc4   : > { %v710_v20 = vpack.c.bf16 %v620_v18, %v601_v17  ;;  %v584_v21 = vpop.f32.mrf.mxu1 }
  0xc5   : > { %v713_v22 = vpack.c.bf16 %v584_v21, %v565_v19 }
  0xc6   : > { %726 = vst [vmem:[%s1593_s16 + $0x48] sm:$0xff] %v710_v20 }
  0xc7   : > { %729 = vst [vmem:[%s1593_s16 + $0x60] sm:$0xff] %v713_v22 }
  0xca   : > { %v603_v23 = vpop.f32.mrf.mxu2 }
  0xcb   : > { %v622_v24 = vpop.f32.mrf.mxu3  ;;  %v634_v26 = vpop.f32.mrf.mxu0 }
  0xcc   : > { %v714_v25 = vpack.c.bf16 %v622_v24, %v603_v23 }
  0xcd   : > { %v653_v27 = vpop.f32.mrf.mxu1 }
  0xce   : > { %730 = vst [vmem:[%s1593_s16 + $0x68] sm:$0xff] %v714_v25  ;;  %v703_v28 = vpack.c.bf16 %v653_v27, %v634_v26 }
  0xd0   : > { %719 = vst [vmem:[%s1593_s16 + $0x10] sm:$0xff] %v703_v28 }
  0xd2   : > { %v672_v29 = vpop.f32.mrf.mxu2 }
  0xd3   : > { %v691_v30 = vpop.f32.mrf.mxu3  ;;  %v636_v32 = vpop.f32.mrf.mxu0 }
  0xd4   : > { %v704_v31 = vpack.c.bf16 %v691_v30, %v672_v29 }
  0xd5   : > { %v655_v33 = vpop.f32.mrf.mxu1 }
  0xd6   : > { %720 = vst [vmem:[%s1593_s16 + $0x18] sm:$0xff] %v704_v31  ;;  %v707_v34 = vpack.c.bf16 %v655_v33, %v636_v32 }
  0xd8   : > { %723 = vst [vmem:[%s1593_s16 + $0x30] sm:$0xff] %v707_v34 }
  0xda   : > { %v674_v35 = vpop.f32.mrf.mxu2 }
  0xdb   : > { %v693_v36 = vpop.f32.mrf.mxu3  ;;  %v639_v38 = vpop.f32.mrf.mxu0 }
  0xdc   : > { %v708_v37 = vpack.c.bf16 %v693_v36, %v674_v35 }
  0xdd   : > { %v658_v39 = vpop.f32.mrf.mxu1 }
  0xde   : > { %724 = vst [vmem:[%s1593_s16 + $0x38] sm:$0xff] %v708_v37  ;;  %v711_v40 = vpack.c.bf16 %v658_v39, %v639_v38 }
  0xe0   : > { %727 = vst [vmem:[%s1593_s16 + $0x50] sm:$0xff] %v711_v40 }
  0xe2   : > { %v677_v42 = vpop.f32.mrf.mxu2 }
  0xe3   : > { %v696_v43 = vpop.f32.mrf.mxu3  ;;  %v641_v45 = vpop.f32.mrf.mxu0 }
  0xe4   : > { %v712_v44 = vpack.c.bf16 %v696_v43, %v677_v42 }
  0xe5   : > { %v660_v46 = vpop.f32.mrf.mxu1 }
  0xe6   : > { %728 = vst [vmem:[%s1593_s16 + $0x58] sm:$0xff] %v712_v44  ;;  %v715_v47 = vpack.c.bf16 %v660_v46, %v641_v45 }
  0xe8   : > { %731 = vst [vmem:[%s1593_s16 + $0x70] sm:$0xff] %v715_v47 }
  0xea   : > { %v679_v48 = vpop.f32.mrf.mxu2 }
  0xeb   : > { %v698_v49 = vpop.f32.mrf.mxu3 }
  0xec   : > { %v716_v50 = vpack.c.bf16 %v698_v49, %v679_v48 }
  0xee   : > { %732 = vst [vmem:[%s1593_s16 + $0x78] sm:$0xff] %v716_v50 }
  0xef PF: > { %s12_s9 = sadd.s32 1, %s1148_s9  }
  0xf0   : > { %p9_p4 = scmp.ge.s32.totalorder %s12_s9, 4  }
  0xf2   :  { %11 = sbr.rel (!%p9_p4) target bundleno = 1 (0x1), region = 58 }

// kernel: vae_conceptizer_forward.16
= control target key start
LH: loop header
LB: loop body
LE: loop exit
PB: predicated region body
PF: predicated region fallthrough
CT: control target
= control target key end

     0   :  { %s2303_s9 = smov 0   ;;  %s3238_s0 = inlined_call_operand.vmem [shape: bf16[128,128], index: 0, kind: input, shape index: {}]   ;;  %s3239_s1 = inlined_call_operand.vmem [shape: bf16[128,2048], index: 1, kind: input, shape index: {}]   ;;  %s3240_s2 = inlined_call_operand.vmem [shape: bf16[128,2048], index: 2, kind: output, shape index: {}]  }
   0x1 LB: > { %s1599_s10 = sadd.s32 4294967295, %s2286_s9   ;;  %p1603_p0 = scmp.ge.s32.totalorder %s2286_s9, 1  ;;  %s2286_s9 = sphi %s2303_s9, %s12_s9  }
   0x2   : > { %p113_p1 = scmp.lt.s32.totalorder %s2286_s9, 3 }
   0x4   : > { %p114_p2 = pnand %p1603_p0, %p113_p1 }
   0x5   : > { %s1604_s15 = sshll.u32 (!%p114_p2), %s1599_s10, 3 }
   0x6   : > { %117 = sbr.rel (%p114_p2) target bundleno = 431 (0x1af), region = 28  ;;  %p137_p3 = scmp.lt.s32.totalorder (!%p114_p2), %s1604_s15, 15 }
   0xb   : > { %v2075_v0 = vld [vmem:[%s3239_s1 + $0x380] sm:$0xf]  ;;  %v2256_v2 = vld [vmem:[%s3239_s1 + $0x384] sm:$0xf]  ;;  %v2083_v5 = vld [vmem:[%s3239_s1 + $0x388] sm:$0xf] }
   0xc   : > { %v2264_v1 = vld [vmem:[%s3239_s1 + $0x3bc] sm:$0xf0]  ;;  %v2077_v4 = vld [vmem:[%s3239_s1 + $0x3c0] sm:$0xf0]  ;;  %v2265_v6 = vld [vmem:[%s3239_s1 + $0x3c4] sm:$0xf0] }
   0xd   : > { %v2076_v3 = vor.u32 %v2264_v1, %v2075_v0  ;;  %v2080_v7 = vor.u32 %v2256_v2, %v2077_v4  ;;  %v2084_v8 = vor.u32 %v2265_v6, %v2083_v5  ;;  %v2257_v9 = vld [vmem:[%s3239_s1 + $0x38c] sm:$0xf]  ;;  %v2011_v11 = vld [vmem:[%s3239_s1 + $0x300] sm:$0xf]  ;;  %v2240_v14 = vld [vmem:[%s3239_s1 + $0x304] sm:$0xf] }
   0xe   : > { %v2085_v10 = vld [vmem:[%s3239_s1 + $0x3c8] sm:$0xf0]  ;;  %v2248_v13 = vld [vmem:[%s3239_s1 + $0x33c] sm:$0xf0]  ;;  %v2013_v15 = vld [vmem:[%s3239_s1 + $0x340] sm:$0xf0] }
   0xf   : > { %949 = vmatpush.bf16.msra.mxu0 %v2076_v3  ;;  %v2088_v12 = vor.u32 %v2257_v9, %v2085_v10  ;;  %978 = vmatpush.bf16.msra.mxu1 %v2080_v7  ;;  %v2012_v16 = vor.u32 %v2248_v13, %v2011_v11  ;;  %v2016_v17 = vor.u32 %v2240_v14, %v2013_v15  ;;  %v2019_v18 = vld [vmem:[%s3239_s1 + $0x308] sm:$0xf]  ;;  %v2241_v20 = vld [vmem:[%s3239_s1 + $0x30c] sm:$0xf]  ;;  %v1947_v23 = vld [vmem:[%s3239_s1 + $0x280] sm:$0xf] }
  0x10   : > { %1007 = vmatpush.bf16.msra.mxu2 %v2084_v8  ;;  %v2249_v19 = vld [vmem:[%s3239_s1 + $0x344] sm:$0xf0]  ;;  %v2021_v22 = vld [vmem:[%s3239_s1 + $0x348] sm:$0xf0]  ;;  %v2232_v24 = vld [vmem:[%s3239_s1 + $0x2bc] sm:$0xf0] }
  0x11   : > { %1036 = vmatpush.bf16.msra.mxu3 %v2088_v12  ;;  %v2020_v21 = vor.u32 %v2249_v19, %v2019_v18  ;;  %v2024_v25 = vor.u32 %v2241_v20, %v2021_v22  ;;  %v2224_v26 = vld [vmem:[%s3239_s1 + $0x284] sm:$0xf]  ;;  %v1955_v28 = vld [vmem:[%s3239_s1 + $0x288] sm:$0xf]  ;;  %v1948_v29 = vor.u32 %v2232_v24, %v1947_v23  ;;  %v2225_v31 = vld [vmem:[%s3239_s1 + $0x28c] sm:$0xf] }
  0x12   : > { %v1949_v27 = vld [vmem:[%s3239_s1 + $0x2c0] sm:$0xf0]  ;;  %v2233_v30 = vld [vmem:[%s3239_s1 + $0x2c4] sm:$0xf0]  ;;  %v1957_v32 = vld [vmem:[%s3239_s1 + $0x2c8] sm:$0xf0] }
  0x13   : > { %950 = vmatpush.bf16.msra.mxu0 %v2012_v16  ;;  %979 = vmatpush.bf16.msra.mxu1 %v2016_v17  ;;  %v1952_v33 = vor.u32 %v2224_v26, %v1949_v27  ;;  %v1956_v34 = vor.u32 %v2233_v30, %v1955_v28  ;;  %v1883_v35 = vld [vmem:[%s3239_s1 + $0x200] sm:$0xf]  ;;  %v2208_v37 = vld [vmem:[%s3239_s1 + $0x204] sm:$0xf]  ;;  %v1960_v38 = vor.u32 %v2225_v31, %v1957_v32  ;;  %v1891_v40 = vld [vmem:[%s3239_s1 + $0x208] sm:$0xf] }
  0x14   : > { %1008 = vmatpush.bf16.msra.mxu2 %v2020_v21  ;;  %v2216_v36 = vld [vmem:[%s3239_s1 + $0x23c] sm:$0xf0]  ;;  %v1885_v39 = vld [vmem:[%s3239_s1 + $0x240] sm:$0xf0]  ;;  %v2217_v41 = vld [vmem:[%s3239_s1 + $0x244] sm:$0xf0] }
  0x15   : > { %1037 = vmatpush.bf16.msra.mxu3 %v2024_v25  ;;  %v2209_v42 = vld [vmem:[%s3239_s1 + $0x20c] sm:$0xf]  ;;  %v1884_v44 = vor.u32 %v2216_v36, %v1883_v35  ;;  %v1888_v45 = vor.u32 %v2208_v37, %v1885_v39  ;;  %v1892_v46 = vor.u32 %v2217_v41, %v1891_v40  ;;  %v1819_v47 = vld [vmem:[%s3239_s1 + $0x180] sm:$0xf]  ;;  %v2192_v49 = vld [vmem:[%s3239_s1 + $0x184] sm:$0xf] }
  0x16   : > { %v1893_v43 = vld [vmem:[%s3239_s1 + $0x248] sm:$0xf0]  ;;  %v2200_v48 = vld [vmem:[%s3239_s1 + $0x1bc] sm:$0xf0]  ;;  %v1821_v51 = vld [vmem:[%s3239_s1 + $0x1c0] sm:$0xf0] }
  0x17   : > { %951 = vmatpush.bf16.msra.mxu0 %v1948_v29  ;;  %980 = vmatpush.bf16.msra.mxu1 %v1952_v33  ;;  %v1896_v50 = vor.u32 %v2209_v42, %v1893_v43  ;;  %v1827_v52 = vld [vmem:[%s3239_s1 + $0x188] sm:$0xf]  ;;  %v2193_v54 = vld [vmem:[%s3239_s1 + $0x18c] sm:$0xf]  ;;  %v1820_v56 = vor.u32 %v2200_v48, %v1819_v47  ;;  %v1824_v57 = vor.u32 %v2192_v49, %v1821_v51  ;;  %v1755_v59 = vld [vmem:[%s3239_s1 + $0x100] sm:$0xf] }
  0x18   : > { %1009 = vmatpush.bf16.msra.mxu2 %v1956_v34  ;;  %v2201_v53 = vld [vmem:[%s3239_s1 + $0x1c4] sm:$0xf0]  ;;  %v1829_v55 = vld [vmem:[%s3239_s1 + $0x1c8] sm:$0xf0]  ;;  %v2184_v60 = vld [vmem:[%s3239_s1 + $0x13c] sm:$0xf0] }
  0x19   : > { %1038 = vmatpush.bf16.msra.mxu3 %v1960_v38  ;;  %v1828_v58 = vor.u32 %v2201_v53, %v1827_v52  ;;  %v2176_v61 = vld [vmem:[%s3239_s1 + $0x104] sm:$0xf]  ;;  %v1832_v62 = vor.u32 %v2193_v54, %v1829_v55  ;;  %v1763_v0 = vld [vmem:[%s3239_s1 + $0x108] sm:$0xf]  ;;  %v2177_v2 = vld [vmem:[%s3239_s1 + $0x10c] sm:$0xf]  ;;  %v1756_v4 = vor.u32 %v2184_v60, %v1755_v59 }
  0x1a   : > { %v1757_v63 = vld [vmem:[%s3239_s1 + $0x140] sm:$0xf0]  ;;  %v2185_v1 = vld [vmem:[%s3239_s1 + $0x144] sm:$0xf0]  ;;  %v1765_v3 = vld [vmem:[%s3239_s1 + $0x148] sm:$0xf0] }
  0x1b   : > { %952 = vmatpush.bf16.msra.mxu0 %v1884_v44  ;;  %981 = vmatpush.bf16.msra.mxu1 %v1888_v45  ;;  %v1691_v5 = vld [vmem:[%s3239_s1 + $0x80] sm:$0xf]  ;;  %v1760_v6 = vor.u32 %v2176_v61, %v1757_v63  ;;  %v1764_v7 = vor.u32 %v2185_v1, %v1763_v0  ;;  %v2160_v9 = vld [vmem:[%s3239_s1 + $0x84] sm:$0xf]  ;;  %v1768_v11 = vor.u32 %v2177_v2, %v1765_v3  ;;  %v1699_v12 = vld [vmem:[%s3239_s1 + $0x88] sm:$0xf] }
  0x1c   : > { %1010 = vmatpush.bf16.msra.mxu2 %v1892_v46  ;;  %v2168_v8 = vld [vmem:[%s3239_s1 + $0xbc] sm:$0xf0]  ;;  %v1693_v10 = vld [vmem:[%s3239_s1 + $0xc0] sm:$0xf0]  ;;  %v2169_v13 = vld [vmem:[%s3239_s1 + $0xc4] sm:$0xf0] }
  0x1d   : > { %1039 = vmatpush.bf16.msra.mxu3 %v1896_v50  ;;  %v2161_v14 = vld [vmem:[%s3239_s1 + $0x8c] sm:$0xf]  ;;  %v1692_v16 = vor.u32 %v2168_v8, %v1691_v5  ;;  %v1627_v17 = vld [vmem:[%s3239_s1] sm:$0xf]  ;;  %v2144_v19 = vld [vmem:[%s3239_s1 + $0x4] sm:$0xf]  ;;  %v1696_v20 = vor.u32 %v2160_v9, %v1693_v10  ;;  %v1700_v21 = vor.u32 %v2169_v13, %v1699_v12 }
  0x1e   : > { %v1701_v15 = vld [vmem:[%s3239_s1 + $0xc8] sm:$0xf0]  ;;  %v2152_v18 = vld [vmem:[%s3239_s1 + $0x3c] sm:$0xf0]  ;;  %v1629_v22 = vld [vmem:[%s3239_s1 + $0x40] sm:$0xf0] }
  0x1f   : > { %953 = vmatpush.bf16.msra.mxu0 %v1820_v56  ;;  %982 = vmatpush.bf16.msra.mxu1 %v1824_v57  ;;  %v1635_v23 = vld [vmem:[%s3239_s1 + $0x8] sm:$0xf]  ;;  %s3242_s15 = smov (!%p137_p3, %s1604_s15), 15  ;;  %v1704_v24 = vor.u32 %v2161_v14, %v1701_v15  ;;  %v2145_v26 = vld [vmem:[%s3239_s1 + $0xc] sm:$0xf]  ;;  %v1628_v30 = vor.u32 %v2152_v18, %v1627_v17  ;;  %v1632_v33 = vor.u32 %v2144_v19, %v1629_v22 }
  0x20   : > { %1011 = vmatpush.bf16.msra.mxu2 %v1828_v58  ;;  %v2153_v25 = vld [vmem:[%s3239_s1 + $0x44] sm:$0xf0]  ;;  %v1637_v27 = vld [vmem:[%s3239_s1 + $0x48] sm:$0xf0]  ;;  %s1605_s7 = sshll.u32 %s3242_s15, 2  ;;  %s2139_s14 = sshll.u32 %s3242_s15, 6 }
  0x21   : > { %1040 = vmatpush.bf16.msra.mxu3 %v1832_v62  ;;  %v2099_v28 = vld [vmem:[%s3239_s1 + $0x398] sm:$0xf]  ;;  %s2517_s17 = scalar_lea.vmem %s3238_s0, %s1605_s7  ;;  %v2259_v31 = vld [vmem:[%s3239_s1 + $0x39c] sm:$0xf]  ;;  %v1636_v34 = vor.u32 %v2153_v25, %v1635_v23  ;;  %v2091_v35 = vld [vmem:[%s3239_s1 + $0x390] sm:$0xf]  ;;  %v1640_v36 = vor.u32 %v2145_v26, %v1637_v27  ;;  %s3029_s23 = scalar_lea.vmem %s3240_s2, %s2139_s14 }
  0x22   : > { %v2267_v29 = vld [vmem:[%s3239_s1 + $0x3d4] sm:$0xf0]  ;;  %v2101_v32 = vld [vmem:[%s3239_s1 + $0x3d8] sm:$0xf0]  ;;  %v2266_v38 = vld [vmem:[%s3239_s1 + $0x3cc] sm:$0xf0] }
  0x23   : > { %954 = vmatpush.bf16.msra.mxu0 %v1756_v4  ;;  %983 = vmatpush.bf16.msra.mxu1 %v1760_v6  ;;  %v2100_v37 = vor.u32 %v2267_v29, %v2099_v28  ;;  %v2258_v39 = vld [vmem:[%s3239_s1 + $0x394] sm:$0xf]  ;;  %v2538_v41 = vld [vmem:[%s2517_s17] sm:$0xff]  ;;  %v2104_v42 = vor.u32 %v2259_v31, %v2101_v32  ;;  %v2035_v43 = vld [vmem:[%s3239_s1 + $0x318] sm:$0xf]  ;;  %v2092_v47 = vor.u32 %v2266_v38, %v2091_v35 }
  0x24   : > { %1012 = vmatpush.bf16.msra.mxu2 %v1764_v7  ;;  %v2093_v40 = vld [vmem:[%s3239_s1 + $0x3d0] sm:$0xf0]  ;;  %v2251_v44 = vld [vmem:[%s3239_s1 + $0x354] sm:$0xf0]  ;;  %v2243_v45 = vld [vmem:[%s3239_s1 + $0x31c] sm:$0xf] }
  0x25   : > { %1041 = vmatpush.bf16.msra.mxu3 %v1768_v11  ;;  %v2037_v46 = vld [vmem:[%s3239_s1 + $0x358] sm:$0xf0]  ;;  %v2096_v48 = vor.u32 %v2258_v39, %v2093_v40  ;;  %v2036_v49 = vor.u32 %v2251_v44, %v2035_v43  ;;  %v2027_v50 = vld [vmem:[%s3239_s1 + $0x310] sm:$0xf]  ;;  %v2242_v52 = vld [vmem:[%s3239_s1 + $0x314] sm:$0xf] }
  0x26   : > { %v2250_v51 = vld [vmem:[%s3239_s1 + $0x34c] sm:$0xf0]  ;;  %v2040_v53 = vor.u32 %v2243_v45, %v2037_v46  ;;  %v2029_v54 = vld [vmem:[%s3239_s1 + $0x350] sm:$0xf0]  ;;  %v1971_v55 = vld [vmem:[%s3239_s1 + $0x298] sm:$0xf] }
  0x27   : > { %955 = vmatpush.bf16.msra.mxu0 %v1692_v16  ;;  %984 = vmatpush.bf16.msra.mxu1 %v1696_v20  ;;  %v2235_v56 = vld [vmem:[%s3239_s1 + $0x2d4] sm:$0xf0]  ;;  %v2227_v57 = vld [vmem:[%s3239_s1 + $0x29c] sm:$0xf]  ;;  %v2028_v59 = vor.u32 %v2250_v51, %v2027_v50  ;;  %v2032_v60 = vor.u32 %v2242_v52, %v2029_v54  ;;  %v1963_v62 = vld [vmem:[%s3239_s1 + $0x290] sm:$0xf] }
  0x28   : > { %1013 = vmatpush.bf16.msra.mxu2 %v1700_v21  ;;  %v1973_v58 = vld [vmem:[%s3239_s1 + $0x2d8] sm:$0xf0]  ;;  %v1972_v61 = vor.u32 %v2235_v56, %v1971_v55  ;;  %v2234_v63 = vld [vmem:[%s3239_s1 + $0x2cc] sm:$0xf0]  ;;  %v2226_v0 = vld [vmem:[%s3239_s1 + $0x294] sm:$0xf] }
  0x29   : > { %1042 = vmatpush.bf16.msra.mxu3 %v1704_v24  ;;  %v1976_v1 = vor.u32 %v2227_v57, %v1973_v58  ;;  %v1965_v2 = vld [vmem:[%s3239_s1 + $0x2d0] sm:$0xf0]  ;;  %v1907_v3 = vld [vmem:[%s3239_s1 + $0x218] sm:$0xf]  ;;  %v2211_v5 = vld [vmem:[%s3239_s1 + $0x21c] sm:$0xf]  ;;  %v1964_v7 = vor.u32 %v2234_v63, %v1963_v62 }
  0x2a   : > { %v2219_v4 = vld [vmem:[%s3239_s1 + $0x254] sm:$0xf0]  ;;  %v1909_v6 = vld [vmem:[%s3239_s1 + $0x258] sm:$0xf0]  ;;  %v1968_v8 = vor.u32 %v2226_v0, %v1965_v2  ;;  %v1899_v10 = vld [vmem:[%s3239_s1 + $0x210] sm:$0xf] }
  0x2b   : > { %956 = vmatpush.bf16.msra.mxu0 %v1628_v30  ;;  %985 = vmatpush.bf16.msra.mxu1 %v1632_v33  ;;  %v1908_v9 = vor.u32 %v2219_v4, %v1907_v3  ;;  %v2218_v11 = vld [vmem:[%s3239_s1 + $0x24c] sm:$0xf0]  ;;  %v2210_v12 = vld [vmem:[%s3239_s1 + $0x214] sm:$0xf]  ;;  %v1912_v13 = vor.u32 %v2211_v5, %v1909_v6  ;;  %v1843_v15 = vld [vmem:[%s3239_s1 + $0x198] sm:$0xf] }
  0x2c   : > { %1014 = vmatpush.bf16.msra.mxu2 %v1636_v34  ;;  %v1901_v14 = vld [vmem:[%s3239_s1 + $0x250] sm:$0xf0]  ;;  %v2203_v16 = vld [vmem:[%s3239_s1 + $0x1d4] sm:$0xf0]  ;;  %v2195_v17 = vld [vmem:[%s3239_s1 + $0x19c] sm:$0xf]  ;;  %v1900_v20 = vor.u32 %v2218_v11, %v1899_v10 }
  0x2d   : > { %1043 = vmatpush.bf16.msra.mxu3 %v1640_v36  ;;  %v1845_v18 = vld [vmem:[%s3239_s1 + $0x1d8] sm:$0xf0]  ;;  %v2629_v19 = vld [vmem:[%s2517_s17 + $0x8] sm:$0xff]  ;;  %v1904_v21 = vor.u32 %v2210_v12, %v1901_v14  ;;  %v1844_v22 = vor.u32 %v2203_v16, %v1843_v15  ;;  %v1835_v23 = vld [vmem:[%s3239_s1 + $0x190] sm:$0xf] }
  0x2e   : > { %957 = vmatmul.bf16.vlgmr.msra.gmra.mxu0 %v2538_v41  ;;  %986 = vmatmul.bf16.vlgmr.msra.gmra.mxu1 %v2538_v41  ;;  %v2202_v24 = vld [vmem:[%s3239_s1 + $0x1cc] sm:$0xf0]  ;;  %v2194_v25 = vld [vmem:[%s3239_s1 + $0x194] sm:$0xf]  ;;  %v1848_v26 = vor.u32 %v2195_v17, %v1845_v18  ;;  %v1779_v28 = vld [vmem:[%s3239_s1 + $0x118] sm:$0xf] }
  0x2f   : > { %1015 = vmatmul.bf16.vlgmr.msra.gmra.mxu2 %v2538_v41  ;;  %1065 = vmatpush.bf16.msrb.mxu0 %v2092_v47  ;;  %v1837_v27 = vld [vmem:[%s3239_s1 + $0x1d0] sm:$0xf0]  ;;  %v2187_v29 = vld [vmem:[%s3239_s1 + $0x154] sm:$0xf0]  ;;  %v2179_v30 = vld [vmem:[%s3239_s1 + $0x11c] sm:$0xf]  ;;  %v1836_v32 = vor.u32 %v2202_v24, %v1835_v23 }
  0x30   : > { %1123 = vmatpush.bf16.msrb.mxu2 %v2100_v37  ;;  %1044 = vmatmul.bf16.vlgmr.msra.gmra.mxu3 %v2538_v41  ;;  %v1781_v31 = vld [vmem:[%s3239_s1 + $0x158] sm:$0xf0]  ;;  %v1840_v33 = vor.u32 %v2194_v25, %v1837_v27  ;;  %v1780_v34 = vor.u32 %v2187_v29, %v1779_v28  ;;  %v1771_v35 = vld [vmem:[%s3239_s1 + $0x110] sm:$0xf]  ;;  %v2178_v38 = vld [vmem:[%s3239_s1 + $0x114] sm:$0xf] }
  0x31   : > { %1152 = vmatpush.bf16.msrb.mxu3 %v2104_v42  ;;  %1094 = vmatpush.bf16.msrb.mxu1 %v2096_v48  ;;  %v2186_v36 = vld [vmem:[%s3239_s1 + $0x14c] sm:$0xf0]  ;;  %v1784_v37 = vor.u32 %v2179_v30, %v1781_v31  ;;  %v1773_v39 = vld [vmem:[%s3239_s1 + $0x150] sm:$0xf0]  ;;  %v1715_v42 = vld [vmem:[%s3239_s1 + $0x98] sm:$0xf] }
  0x32   : > { %v1772_v40 = vor.u32 %v2186_v36, %v1771_v35  ;;  %v2171_v43 = vld [vmem:[%s3239_s1 + $0xd4] sm:$0xf0]  ;;  %v2163_v44 = vld [vmem:[%s3239_s1 + $0x9c] sm:$0xf]  ;;  %v1776_v45 = vor.u32 %v2178_v38, %v1773_v39  ;;  %v1707_v48 = vld [vmem:[%s3239_s1 + $0x90] sm:$0xf] }
  0x33   : > { %1066 = vmatpush.bf16.msrb.mxu0 %v2028_v59  ;;  %v1716_v46 = vor.u32 %v2171_v43, %v1715_v42  ;;  %v1717_v47 = vld [vmem:[%s3239_s1 + $0xd8] sm:$0xf0]  ;;  %v2162_v51 = vld [vmem:[%s3239_s1 + $0x94] sm:$0xf]  ;;  %v2155_v54 = vld [vmem:[%s3239_s1 + $0x54] sm:$0xf0] }
  0x34   : > { %1124 = vmatpush.bf16.msrb.mxu2 %v2036_v49  ;;  %v2170_v49 = vld [vmem:[%s3239_s1 + $0xcc] sm:$0xf0]  ;;  %v1720_v50 = vor.u32 %v2163_v44, %v1717_v47  ;;  %v1709_v52 = vld [vmem:[%s3239_s1 + $0xd0] sm:$0xf0]  ;;  %v2147_v55 = vld [vmem:[%s3239_s1 + $0x1c] sm:$0xf] }
  0x35   : > { %1153 = vmatpush.bf16.msrb.mxu3 %v2040_v53  ;;  %1095 = vmatpush.bf16.msrb.mxu1 %v2032_v60  ;;  %v1651_v53 = vld [vmem:[%s3239_s1 + $0x18] sm:$0xf]  ;;  %v1653_v56 = vld [vmem:[%s3239_s1 + $0x58] sm:$0xf0]  ;;  %v1708_v57 = vor.u32 %v2170_v49, %v1707_v48  ;;  %v1712_v58 = vor.u32 %v2162_v51, %v1709_v52  ;;  %v1643_v60 = vld [vmem:[%s3239_s1 + $0x10] sm:$0xf] }
  0x36   : > { %v1652_v59 = vor.u32 %v2155_v54, %v1651_v53  ;;  %v1656_v62 = vor.u32 %v2147_v55, %v1653_v56  ;;  %v2146_v63 = vld [vmem:[%s3239_s1 + $0x14] sm:$0xf]  ;;  %v2115_v4 = vld [vmem:[%s3239_s1 + $0x3a8] sm:$0xf]  ;;  %v2261_v6 = vld [vmem:[%s3239_s1 + $0x3ac] sm:$0xf] }
  0x37   : > { %1067 = vmatpush.bf16.msrb.mxu0 %v1964_v7  ;;  %v1645_v0 = vld [vmem:[%s3239_s1 + $0x50] sm:$0xf0]  ;;  %v2269_v5 = vld [vmem:[%s3239_s1 + $0x3e4] sm:$0xf0]  ;;  %v2268_v10 = vld [vmem:[%s3239_s1 + $0x3dc] sm:$0xf0] }
  0x38   : > { %1125 = vmatpush.bf16.msrb.mxu2 %v1972_v61  ;;  %v2154_v61 = vld [vmem:[%s3239_s1 + $0x4c] sm:$0xf0]  ;;  %v1648_v2 = vor.u32 %v2146_v63, %v1645_v0  ;;  %v2116_v7 = vor.u32 %v2269_v5, %v2115_v4  ;;  %v2109_v14 = vld [vmem:[%s3239_s1 + $0x3e0] sm:$0xf0]  ;;  %v2051_v15 = vld [vmem:[%s3239_s1 + $0x328] sm:$0xf] }
  0x39   : > { %1154 = vmatpush.bf16.msrb.mxu3 %v1976_v1  ;;  %1096 = vmatpush.bf16.msrb.mxu1 %v1968_v8  ;;  %v1644_v1 = vor.u32 %v2154_v61, %v1643_v60  ;;  %v2720_v3 = vld [vmem:[%s2517_s17 + $0x10] sm:$0xff]  ;;  %v2117_v8 = vld [vmem:[%s3239_s1 + $0x3e8] sm:$0xf0]  ;;  %v2253_v17 = vld [vmem:[%s3239_s1 + $0x364] sm:$0xf0] }
  0x3a   : > { %v2120_v11 = vor.u32 %v2261_v6, %v2117_v8  ;;  %v2245_v18 = vld [vmem:[%s3239_s1 + $0x32c] sm:$0xf]  ;;  %v2043_v23 = vld [vmem:[%s3239_s1 + $0x320] sm:$0xf]  ;;  %v2244_v25 = vld [vmem:[%s3239_s1 + $0x324] sm:$0xf] }
  0x3b   : > { %1068 = vmatpush.bf16.msrb.mxu0 %v1900_v20  ;;  %v2053_v20 = vld [vmem:[%s3239_s1 + $0x368] sm:$0xf0]  ;;  %v2252_v24 = vld [vmem:[%s3239_s1 + $0x35c] sm:$0xf0]  ;;  %v2045_v27 = vld [vmem:[%s3239_s1 + $0x360] sm:$0xf0] }
  0x3c   : > { %1126 = vmatpush.bf16.msrb.mxu2 %v1908_v9  ;;  %v2107_v9 = vld [vmem:[%s3239_s1 + $0x3a0] sm:$0xf]  ;;  %v2048_v28 = vor.u32 %v2244_v25, %v2045_v27  ;;  %v2775_v29 = vld [vmem:[%s2517_s17 + $0x18] sm:$0xff]  ;;  %v1987_v30 = vld [vmem:[%s3239_s1 + $0x2a8] sm:$0xf] }
  0x3d   : > { %1155 = vmatpush.bf16.msrb.mxu3 %v1912_v13  ;;  %1097 = vmatpush.bf16.msrb.mxu1 %v1904_v21  ;;  %v2108_v12 = vor.u32 %v2268_v10, %v2107_v9  ;;  %v2260_v13 = vld [vmem:[%s3239_s1 + $0x3a4] sm:$0xf]  ;;  %v2052_v21 = vor.u32 %v2253_v17, %v2051_v15  ;;  %v2237_v31 = vld [vmem:[%s3239_s1 + $0x2e4] sm:$0xf0]  ;;  %v1979_v35 = vld [vmem:[%s3239_s1 + $0x2a0] sm:$0xf] }
  0x3e   : > { %962 = vmatmul.bf16.gmra.mxu0 %v2629_v19  ;;  %991 = vmatmul.bf16.gmra.mxu1 %v2629_v19  ;;  %v2112_v16 = vor.u32 %v2260_v13, %v2109_v14  ;;  %v2236_v36 = vld [vmem:[%s3239_s1 + $0x2dc] sm:$0xf0]  ;;  %v2228_v39 = vld [vmem:[%s3239_s1 + $0x2a4] sm:$0xf]  ;;  %v1923_v42 = vld [vmem:[%s3239_s1 + $0x228] sm:$0xf] }
  0x3f   : > { %1020 = vmatmul.bf16.gmra.mxu2 %v2629_v19  ;;  %1069 = vmatpush.bf16.msrb.mxu0 %v1836_v32  ;;  %v2229_v32 = vld [vmem:[%s3239_s1 + $0x2ac] sm:$0xf]  ;;  %v1980_v38 = vor.u32 %v2236_v36, %v1979_v35  ;;  %v2221_v44 = vld [vmem:[%s3239_s1 + $0x264] sm:$0xf0]  ;;  %v1915_v49 = vld [vmem:[%s3239_s1 + $0x220] sm:$0xf] }
  0x40   : > { %1127 = vmatpush.bf16.msrb.mxu2 %v1844_v22  ;;  %1049 = vmatmul.bf16.gmra.mxu3 %v2629_v19  ;;  %v2056_v22 = vor.u32 %v2245_v18, %v2053_v20  ;;  %v1924_v47 = vor.u32 %v2221_v44, %v1923_v42  ;;  %v2212_v51 = vld [vmem:[%s3239_s1 + $0x224] sm:$0xf]  ;;  %v1859_v55 = vld [vmem:[%s3239_s1 + $0x1a8] sm:$0xf]  ;;  %v1851_v60 = vld [vmem:[%s3239_s1 + $0x1a0] sm:$0xf] }
  0x41   : > { %1156 = vmatpush.bf16.msrb.mxu3 %v1848_v26  ;;  %1098 = vmatpush.bf16.msrb.mxu1 %v1840_v33  ;;  %v2044_v26 = vor.u32 %v2252_v24, %v2043_v23  ;;  %v1988_v33 = vor.u32 %v2237_v31, %v1987_v30  ;;  %v1917_v53 = vld [vmem:[%s3239_s1 + $0x260] sm:$0xf0]  ;;  %v2205_v56 = vld [vmem:[%s3239_s1 + $0x1e4] sm:$0xf0]  ;;  %v2204_v61 = vld [vmem:[%s3239_s1 + $0x1dc] sm:$0xf0] }
  0x42   : > { %v1920_v54 = vor.u32 %v2212_v51, %v1917_v53  ;;  %v1852_v63 = vor.u32 %v2204_v61, %v1851_v60  ;;  %v2196_v0 = vld [vmem:[%s3239_s1 + $0x1a4] sm:$0xf]  ;;  %v2189_v5 = vld [vmem:[%s3239_s1 + $0x164] sm:$0xf0]  ;;  %v2181_v6 = vld [vmem:[%s3239_s1 + $0x12c] sm:$0xf] }
  0x43   : > { %1070 = vmatpush.bf16.msrb.mxu0 %v1772_v40  ;;  %v1981_v40 = vld [vmem:[%s3239_s1 + $0x2e0] sm:$0xf0]  ;;  %v1787_v10 = vld [vmem:[%s3239_s1 + $0x120] sm:$0xf]  ;;  %v2173_v17 = vld [vmem:[%s3239_s1 + $0xe4] sm:$0xf0] }
  0x44   : > { %1128 = vmatpush.bf16.msrb.mxu2 %v1780_v34  ;;  %v1989_v34 = vld [vmem:[%s3239_s1 + $0x2e8] sm:$0xf0]  ;;  %v1984_v43 = vor.u32 %v2228_v39, %v1981_v40  ;;  %v1789_v14 = vld [vmem:[%s3239_s1 + $0x160] sm:$0xf0]  ;;  %v2172_v23 = vld [vmem:[%s3239_s1 + $0xdc] sm:$0xf0] }
  0x45   : > { %1157 = vmatpush.bf16.msrb.mxu3 %v1784_v37  ;;  %1099 = vmatpush.bf16.msrb.mxu1 %v1776_v45  ;;  %v1992_v37 = vor.u32 %v2229_v32, %v1989_v34  ;;  %v2213_v45 = vld [vmem:[%s3239_s1 + $0x22c] sm:$0xf]  ;;  %v1725_v27 = vld [vmem:[%s3239_s1 + $0xe0] sm:$0xf0]  ;;  %v2157_v31 = vld [vmem:[%s3239_s1 + $0x64] sm:$0xf0] }
  0x46   : > { %v2165_v18 = vld [vmem:[%s3239_s1 + $0xac] sm:$0xf]  ;;  %v1659_v36 = vld [vmem:[%s3239_s1 + $0x20] sm:$0xf]  ;;  %v1661_v40 = vld [vmem:[%s3239_s1 + $0x60] sm:$0xf0] }
  0x47   : > { %1071 = vmatpush.bf16.msrb.mxu0 %v1708_v57  ;;  %v2197_v57 = vld [vmem:[%s3239_s1 + $0x1ac] sm:$0xf]  ;;  %v2271_v44 = vld [vmem:[%s3239_s1 + $0x3f4] sm:$0xf0]  ;;  %v2262_v51 = vld [vmem:[%s3239_s1 + $0x3b4] sm:$0xf] }
  0x48   : > { %1129 = vmatpush.bf16.msrb.mxu2 %v1716_v46  ;;  %v1925_v46 = vld [vmem:[%s3239_s1 + $0x268] sm:$0xf0]  ;;  %v2125_v53 = vld [vmem:[%s3239_s1 + $0x3f0] sm:$0xf0]  ;;  %v2059_v61 = vld [vmem:[%s3239_s1 + $0x330] sm:$0xf] }
  0x49   : > { %1158 = vmatpush.bf16.msrb.mxu3 %v1720_v50  ;;  %1100 = vmatpush.bf16.msrb.mxu1 %v1712_v58  ;;  %v1928_v48 = vor.u32 %v2213_v45, %v1925_v46  ;;  %v2220_v50 = vld [vmem:[%s3239_s1 + $0x25c] sm:$0xf0]  ;;  %v1860_v58 = vor.u32 %v2205_v56, %v1859_v55  ;;  %v2149_v32 = vld [vmem:[%s3239_s1 + $0x2c] sm:$0xf]  ;;  %v2263_v45 = vld [vmem:[%s3239_s1 + $0x3bc] sm:$0xf]  ;;  %v2128_v56 = vor.u32 %v2262_v51, %v2125_v53 }
  0x4a   : > { %v1916_v52 = vor.u32 %v2220_v50, %v1915_v49  ;;  %v2123_v49 = vld [vmem:[%s3239_s1 + $0x3b0] sm:$0xf]  ;;  %v2255_v55 = vld [vmem:[%s3239_s1 + $0x374] sm:$0xf0] }
  0x4b   : > { %1072 = vmatpush.bf16.msrb.mxu0 %v1644_v1  ;;  %v1853_v1 = vld [vmem:[%s3239_s1 + $0x1e0] sm:$0xf0]  ;;  %v2270_v50 = vld [vmem:[%s3239_s1 + $0x3ec] sm:$0xf0]  ;;  %v1811_v51 = vld [vmem:[%s3239_s1 + $0x138] sm:$0xf] }
  0x4c   : > { %1130 = vmatpush.bf16.msrb.mxu2 %v1652_v59  ;;  %v1861_v59 = vld [vmem:[%s3239_s1 + $0x1e8] sm:$0xf0]  ;;  %v1856_v4 = vor.u32 %v2196_v0, %v1853_v1  ;;  %v2061_v1 = vld [vmem:[%s3239_s1 + $0x370] sm:$0xf0]  ;;  %v2191_v53 = vld [vmem:[%s3239_s1 + $0x174] sm:$0xf0] }
  0x4d   : > { %1159 = vmatpush.bf16.msrb.mxu3 %v1656_v62  ;;  %1101 = vmatpush.bf16.msrb.mxu1 %v1648_v2  ;;  %v1864_v62 = vor.u32 %v2197_v57, %v1861_v59  ;;  %v1795_v2 = vld [vmem:[%s3239_s1 + $0x128] sm:$0xf]  ;;  %v2069_v59 = vld [vmem:[%s3239_s1 + $0x378] sm:$0xf0] }
  0x4e   : > { %967 = vmatmul.bf16.gmra.mxu0 %v2720_v3  ;;  %996 = vmatmul.bf16.gmra.mxu1 %v2720_v3  ;;  %v1796_v8 = vor.u32 %v2189_v5, %v1795_v2  ;;  %v2003_v2 = vld [vmem:[%s3239_s1 + $0x2b8] sm:$0xf] }
  0x4f   : > { %1025 = vmatmul.bf16.gmra.mxu2 %v2720_v3  ;;  %1181 = vmatpush.bf16.msra.mxu0 %v2108_v12  ;;  %v2180_v12 = vld [vmem:[%s3239_s1 + $0x124] sm:$0xf] }
  0x50   : > { %1054 = vmatmul.bf16.gmra.mxu3 %v2720_v3  ;;  %1239 = vmatpush.bf16.msra.mxu2 %v2116_v7  ;;  %v1797_v7 = vld [vmem:[%s3239_s1 + $0x168] sm:$0xf0]  ;;  %v1792_v15 = vor.u32 %v2180_v12, %v1789_v14  ;;  %v2230_v12 = vld [vmem:[%s3239_s1 + $0x2b4] sm:$0xf] }
  0x51   : > { %1268 = vmatpush.bf16.msra.mxu3 %v2120_v11  ;;  %1210 = vmatpush.bf16.msra.mxu1 %v2112_v16  ;;  %v1800_v9 = vor.u32 %v2181_v6, %v1797_v7  ;;  %v2188_v11 = vld [vmem:[%s3239_s1 + $0x15c] sm:$0xf0]  ;;  %v1731_v16 = vld [vmem:[%s3239_s1 + $0xa8] sm:$0xf]  ;;  %v2231_v7 = vld [vmem:[%s3239_s1 + $0x2bc] sm:$0xf] }
  0x52   : > { %v1788_v13 = vor.u32 %v2188_v11, %v1787_v10  ;;  %v1732_v20 = vor.u32 %v2173_v17, %v1731_v16  ;;  %v1995_v10 = vld [vmem:[%s3239_s1 + $0x2b0] sm:$0xf]  ;;  %v1997_v14 = vld [vmem:[%s3239_s1 + $0x2f0] sm:$0xf0]  ;;  %v2223_v16 = vld [vmem:[%s3239_s1 + $0x274] sm:$0xf0] }
  0x53   : > { %1182 = vmatpush.bf16.msra.mxu0 %v2044_v26  ;;  %v2164_v26 = vld [vmem:[%s3239_s1 + $0xa4] sm:$0xf]  ;;  %v2238_v11 = vld [vmem:[%s3239_s1 + $0x2ec] sm:$0xf0]  ;;  %v2000_v17 = vor.u32 %v2230_v12, %v1997_v14 }
  0x54   : > { %1240 = vmatpush.bf16.msra.mxu2 %v2052_v21  ;;  %v1733_v21 = vld [vmem:[%s3239_s1 + $0xe8] sm:$0xf0]  ;;  %v1728_v30 = vor.u32 %v2164_v26, %v1725_v27  ;;  %v1931_v26 = vld [vmem:[%s3239_s1 + $0x230] sm:$0xf] }
  0x55   : > { %1269 = vmatpush.bf16.msra.mxu3 %v2056_v22  ;;  %1211 = vmatpush.bf16.msra.mxu1 %v2048_v28  ;;  %v1723_v22 = vld [vmem:[%s3239_s1 + $0xa0] sm:$0xf]  ;;  %v1736_v24 = vor.u32 %v2165_v18, %v1733_v21  ;;  %v1667_v28 = vld [vmem:[%s3239_s1 + $0x28] sm:$0xf]  ;;  %v1941_v21 = vld [vmem:[%s3239_s1 + $0x278] sm:$0xf0] }
  0x56   : > { %v1724_v25 = vor.u32 %v2172_v23, %v1723_v22  ;;  %v1668_v34 = vor.u32 %v2157_v31, %v1667_v28  ;;  %v2222_v27 = vld [vmem:[%s3239_s1 + $0x26c] sm:$0xf0]  ;;  %v2214_v28 = vld [vmem:[%s3239_s1 + $0x234] sm:$0xf] }
  0x57   : > { %1183 = vmatpush.bf16.msra.mxu0 %v1980_v38  ;;  %v2148_v38 = vld [vmem:[%s3239_s1 + $0x24] sm:$0xf]  ;;  %v1933_v31 = vld [vmem:[%s3239_s1 + $0x270] sm:$0xf0] }
  0x58   : > { %1241 = vmatpush.bf16.msra.mxu2 %v1988_v33  ;;  %v1669_v33 = vld [vmem:[%s3239_s1 + $0x68] sm:$0xf0]  ;;  %v1664_v42 = vor.u32 %v2148_v38, %v1661_v40 }
  0x59   : > { %1270 = vmatpush.bf16.msra.mxu3 %v1992_v37  ;;  %1212 = vmatpush.bf16.msra.mxu1 %v1984_v43  ;;  %v1672_v35 = vor.u32 %v2149_v32, %v1669_v33  ;;  %v2156_v37 = vld [vmem:[%s3239_s1 + $0x5c] sm:$0xf0]  ;;  %v2131_v43 = vld [vmem:[%s3239_s1 + $0x3b8] sm:$0xf] }
  0x5a   : > { %v1660_v39 = vor.u32 %v2156_v37, %v1659_v36  ;;  %v2132_v46 = vor.u32 %v2271_v44, %v2131_v43  ;;  %v1875_v32 = vld [vmem:[%s3239_s1 + $0x1b8] sm:$0xf]  ;;  %v2199_v36 = vld [vmem:[%s3239_s1 + $0x1bc] sm:$0xf] }
  0x5b   : > { %1184 = vmatpush.bf16.msra.mxu0 %v1916_v52  ;;  %v2124_v52 = vor.u32 %v2270_v50, %v2123_v49  ;;  %v2207_v33 = vld [vmem:[%s3239_s1 + $0x1f4] sm:$0xf0]  ;;  %v1877_v37 = vld [vmem:[%s3239_s1 + $0x1f8] sm:$0xf0]  ;;  %v2198_v49 = vld [vmem:[%s3239_s1 + $0x1b4] sm:$0xf] }
  0x5c   : > { %1242 = vmatpush.bf16.msra.mxu2 %v1924_v47  ;;  %v2133_v47 = vld [vmem:[%s3239_s1 + $0x3f8] sm:$0xf0]  ;;  %v1869_v50 = vld [vmem:[%s3239_s1 + $0x1f0] sm:$0xf0] }
  0x5d   : > { %1271 = vmatpush.bf16.msra.mxu3 %v1928_v48  ;;  %1213 = vmatpush.bf16.msra.mxu1 %v1920_v54  ;;  %v2136_v48 = vor.u32 %v2263_v45, %v2133_v47  ;;  %v2067_v54 = vld [vmem:[%s3239_s1 + $0x338] sm:$0xf]  ;;  %v2206_v47 = vld [vmem:[%s3239_s1 + $0x1ec] sm:$0xf0] }
  0x5e   : > { %972 = vmatmul.bf16.gmra.mxu0 %v2775_v29  ;;  %1001 = vmatmul.bf16.gmra.mxu1 %v2775_v29  ;;  %v2068_v57 = vor.u32 %v2255_v55, %v2067_v54  ;;  %v2183_v54 = vld [vmem:[%s3239_s1 + $0x13c] sm:$0xf] }
  0x5f   : > { %1030 = vmatmul.bf16.gmra.mxu2 %v2775_v29  ;;  %1185 = vmatpush.bf16.msra.mxu0 %v1852_v63  ;;  %v2246_v63 = vld [vmem:[%s3239_s1 + $0x334] sm:$0xf]  ;;  %v1813_v55 = vld [vmem:[%s3239_s1 + $0x178] sm:$0xf0] }
  0x60   : > { %1059 = vmatmul.bf16.gmra.mxu3 %v2775_v29  ;;  %1243 = vmatpush.bf16.msra.mxu2 %v1860_v58  ;;  %v2247_v58 = vld [vmem:[%s3239_s1 + $0x33c] sm:$0xf]  ;;  %v2064_v5 = vor.u32 %v2246_v63, %v2061_v1  ;;  %v2190_v1 = vld [vmem:[%s3239_s1 + $0x16c] sm:$0xf0] }
  0x61   : > { %1272 = vmatpush.bf16.msra.mxu3 %v1864_v62  ;;  %1214 = vmatpush.bf16.msra.mxu1 %v1856_v4  ;;  %v2072_v60 = vor.u32 %v2247_v58, %v2069_v59  ;;  %v2254_v62 = vld [vmem:[%s3239_s1 + $0x36c] sm:$0xf0]  ;;  %v2239_v4 = vld [vmem:[%s3239_s1 + $0x2f4] sm:$0xf0]  ;;  %v1816_v58 = vor.u32 %v2183_v54, %v1813_v55 }
  0x62   : > { %v2060_v0 = vor.u32 %v2254_v62, %v2059_v61  ;;  %v2004_v6 = vor.u32 %v2239_v4, %v2003_v2  ;;  %v2182_v4 = vld [vmem:[%s3239_s1 + $0x134] sm:$0xf] }
  0x63   : > { %1186 = vmatpush.bf16.msra.mxu0 %v1788_v13  ;;  %v1996_v13 = vor.u32 %v2238_v11, %v1995_v10  ;;  %v1749_v10 = vld [vmem:[%s3239_s1 + $0xf8] sm:$0xf0] }
  0x64   : > { %1244 = vmatpush.bf16.msra.mxu2 %v1796_v8  ;;  %v2005_v8 = vld [vmem:[%s3239_s1 + $0x2f8] sm:$0xf0] }
  0x65   : > { %1273 = vmatpush.bf16.msra.mxu3 %v1800_v9  ;;  %1215 = vmatpush.bf16.msra.mxu1 %v1792_v15  ;;  %v2008_v9 = vor.u32 %v2231_v7, %v2005_v8  ;;  %v1939_v15 = vld [vmem:[%s3239_s1 + $0x238] sm:$0xf] }
  0x66   : > { %v1940_v18 = vor.u32 %v2223_v16, %v1939_v15  ;;  %v2175_v8 = vld [vmem:[%s3239_s1 + $0xf4] sm:$0xf0] }
  0x67   : > { %1187 = vmatpush.bf16.msra.mxu0 %v1724_v25 }
  0x68   : > { %1245 = vmatpush.bf16.msra.mxu2 %v1732_v20  ;;  %v2215_v20 = vld [vmem:[%s3239_s1 + $0x23c] sm:$0xf] }
  0x69   : > { %1274 = vmatpush.bf16.msra.mxu3 %v1736_v24  ;;  %1216 = vmatpush.bf16.msra.mxu1 %v1728_v30  ;;  %v1944_v22 = vor.u32 %v2215_v20, %v1941_v21  ;;  %v1932_v30 = vor.u32 %v2222_v27, %v1931_v26  ;;  %v1739_v20 = vld [vmem:[%s3239_s1 + $0xb0] sm:$0xf]  ;;  %v1683_v26 = vld [vmem:[%s3239_s1 + $0x38] sm:$0xf] }
  0x6a   : > { %v2174_v21 = vld [vmem:[%s3239_s1 + $0xec] sm:$0xf0]  ;;  %v2159_v27 = vld [vmem:[%s3239_s1 + $0x74] sm:$0xf0] }
  0x6b   : > { %1188 = vmatpush.bf16.msra.mxu0 %v1660_v39  ;;  %v1880_v39 = vor.u32 %v2199_v36, %v1877_v37  ;;  %v2150_v36 = vld [vmem:[%s3239_s1 + $0x34] sm:$0xf] }
  0x6c   : > { %1246 = vmatpush.bf16.msra.mxu2 %v1668_v34  ;;  %v1936_v34 = vor.u32 %v2214_v28, %v1933_v31  ;;  %v2151_v28 = vld [vmem:[%s3239_s1 + $0x3c] sm:$0xf] }
  0x6d   : > { %1275 = vmatpush.bf16.msra.mxu3 %v1672_v35  ;;  %1217 = vmatpush.bf16.msra.mxu1 %v1664_v42  ;;  %v1876_v35 = vor.u32 %v2207_v33, %v1875_v32  ;;  %v1685_v31 = vld [vmem:[%s3239_s1 + $0x78] sm:$0xf0] }
  0x6e   : > { %1073 = vmatmul.bf16.vlgmr.msrb.gmra.mxu0 %v2538_v41  ;;  %1102 = vmatmul.bf16.vlgmr.msrb.gmra.mxu1 %v2538_v41  ;;  %v1688_v33 = vor.u32 %v2151_v28, %v1685_v31 }
  0x6f   : > { %1131 = vmatmul.bf16.vlgmr.msrb.gmra.mxu2 %v2538_v41  ;;  %1297 = vmatpush.bf16.msrb.mxu0 %v2124_v52  ;;  %v1872_v52 = vor.u32 %v2198_v49, %v1869_v50 }
  0x70   : > { %1160 = vmatmul.bf16.vlgmr.msrb.gmra.mxu3 %v2538_v41  ;;  %1355 = vmatpush.bf16.msrb.mxu2 %v2132_v46  ;;  %v1867_v46 = vld [vmem:[%s3239_s1 + $0x1b0] sm:$0xf] }
  0x71   : > { %1384 = vmatpush.bf16.msrb.mxu3 %v2136_v48  ;;  %1326 = vmatpush.bf16.msrb.mxu1 %v2128_v56  ;;  %v1868_v48 = vor.u32 %v2206_v47, %v1867_v46 }
  0x73   : > { %1298 = vmatpush.bf16.msrb.mxu0 %v2060_v0  ;;  %v1803_v0 = vld [vmem:[%s3239_s1 + $0x130] sm:$0xf] }
  0x74   : > { %1356 = vmatpush.bf16.msrb.mxu2 %v2068_v57  ;;  %v1812_v57 = vor.u32 %v2191_v53, %v1811_v51  ;;  %v1804_v2 = vor.u32 %v2190_v1, %v1803_v0 }
  0x75   : > { %1385 = vmatpush.bf16.msrb.mxu3 %v2072_v60  ;;  %1327 = vmatpush.bf16.msrb.mxu1 %v2064_v5  ;;  %v1805_v5 = vld [vmem:[%s3239_s1 + $0x170] sm:$0xf0] }
  0x76   : > { %v1808_v7 = vor.u32 %v2182_v4, %v1805_v5 }
  0x77   : > { %1299 = vmatpush.bf16.msrb.mxu0 %v1996_v13 }
  0x78   : > { %1357 = vmatpush.bf16.msrb.mxu2 %v2004_v6  ;;  %v1747_v6 = vld [vmem:[%s3239_s1 + $0xb8] sm:$0xf] }
  0x79   : > { %1386 = vmatpush.bf16.msrb.mxu3 %v2008_v9  ;;  %1328 = vmatpush.bf16.msrb.mxu1 %v2000_v17  ;;  %v2167_v9 = vld [vmem:[%s3239_s1 + $0xbc] sm:$0xf]  ;;  %v1748_v12 = vor.u32 %v2175_v8, %v1747_v6 }
  0x7a   : > { %v1752_v13 = vor.u32 %v2167_v9, %v1749_v10 }
  0x7b   : > { %1300 = vmatpush.bf16.msrb.mxu0 %v1932_v30  ;;  %v1684_v30 = vor.u32 %v2159_v27, %v1683_v26 }
  0x7c   : > { %1358 = vmatpush.bf16.msrb.mxu2 %v1940_v18 }
  0x7d   : > { %1387 = vmatpush.bf16.msrb.mxu3 %v1944_v22  ;;  %1329 = vmatpush.bf16.msrb.mxu1 %v1936_v34  ;;  %v1740_v22 = vor.u32 %v2174_v21, %v1739_v20  ;;  %v1675_v34 = vld [vmem:[%s3239_s1 + $0x30] sm:$0xf] }
  0x7e   : > { %1078 = vmatmul.bf16.gmra.mxu0 %v2629_v19  ;;  %1107 = vmatmul.bf16.gmra.mxu1 %v2629_v19 }
  0x7f   : > { %1136 = vmatmul.bf16.gmra.mxu2 %v2629_v19  ;;  %1301 = vmatpush.bf16.msrb.mxu0 %v1868_v48 }
  0x80   : > { %1165 = vmatmul.bf16.gmra.mxu3 %v2629_v19  ;;  %1359 = vmatpush.bf16.msrb.mxu2 %v1876_v35  ;;  %v2158_v35 = vld [vmem:[%s3239_s1 + $0x6c] sm:$0xf0] }
  0x81   : > { %1388 = vmatpush.bf16.msrb.mxu3 %v1880_v39  ;;  %1330 = vmatpush.bf16.msrb.mxu1 %v1872_v52  ;;  %v1676_v39 = vor.u32 %v2158_v35, %v1675_v34 }
  0x83   : > { %1302 = vmatpush.bf16.msrb.mxu0 %v1804_v2 }
  0x84   : > { %1360 = vmatpush.bf16.msrb.mxu2 %v1812_v57 }
  0x85   : > { %1389 = vmatpush.bf16.msrb.mxu3 %v1816_v58  ;;  %1331 = vmatpush.bf16.msrb.mxu1 %v1808_v7 }
  0x87   : > { %1303 = vmatpush.bf16.msrb.mxu0 %v1740_v22 }
  0x88   : > { %1361 = vmatpush.bf16.msrb.mxu2 %v1748_v12 }
  0x89   : > { %1390 = vmatpush.bf16.msrb.mxu3 %v1752_v13 }
  0x8b   : > { %1304 = vmatpush.bf16.msrb.mxu0 %v1676_v39 }
  0x8c   : > { %1362 = vmatpush.bf16.msrb.mxu2 %v1684_v30 }
  0x8d   : > { %1391 = vmatpush.bf16.msrb.mxu3 %v1688_v33 }
  0x8e   : > { %1083 = vmatmul.bf16.gmra.mxu0 %v2720_v3  ;;  %1112 = vmatmul.bf16.gmra.mxu1 %v2720_v3 }
  0x8f   : > { %1141 = vmatmul.bf16.gmra.mxu2 %v2720_v3 }
  0x90   : > { %1170 = vmatmul.bf16.gmra.mxu3 %v2720_v3 }
  0x9e   : > { %1088 = vmatmul.bf16.gmra.mxu0 %v2775_v29  ;;  %1117 = vmatmul.bf16.gmra.mxu1 %v2775_v29 }
  0x9f   : > { %1146 = vmatmul.bf16.gmra.mxu2 %v2775_v29 }
  0xa0   : > { %1175 = vmatmul.bf16.gmra.mxu3 %v2775_v29 }
  0xab   : > { %v958_v23 = vpop.f32.mrf.mxu0  ;;  %v987_v24 = vpop.f32.mrf.mxu1 }
  0xac   : > { %v1413_v25 = vpack.c.bf16 %v987_v24, %v958_v23  ;;  %v2166_v23 = vld [vmem:[%s3239_s1 + $0xb4] sm:$0xf] }
  0xad   : > { %v1741_v24 = vld [vmem:[%s3239_s1 + $0xf0] sm:$0xf0] }
  0xae   : > { %1189 = vmatmul.bf16.vlgmr.msra.gmra.mxu0 %v2538_v41  ;;  %1477 = vst [vmem:[%s3029_s23] sm:$0xff] %v1413_v25  ;;  %1218 = vmatmul.bf16.vlgmr.msra.gmra.mxu1 %v2538_v41  ;;  %v1744_v25 = vor.u32 %v2166_v23, %v1741_v24 }
  0xaf   : > { %1247 = vmatmul.bf16.vlgmr.msra.gmra.mxu2 %v2538_v41 }
  0xb0   : > { %1276 = vmatmul.bf16.vlgmr.msra.gmra.mxu3 %v2538_v41  ;;  %1332 = vmatpush.bf16.msrb.mxu1 %v1744_v25 }
  0xb2   : > { %v1016_v38 = vpop.f32.mrf.mxu2 }
  0xb3   : > { %v1045_v40 = vpop.f32.mrf.mxu3  ;;  %v960_v42 = vpop.f32.mrf.mxu0 }
  0xb4   : > { %v1414_v43 = vpack.c.bf16 %v1045_v40, %v1016_v38  ;;  %v989_v44 = vpop.f32.mrf.mxu1  ;;  %v1677_v40 = vld [vmem:[%s3239_s1 + $0x70] sm:$0xf0] }
  0xb5   : > { %v1421_v45 = vpack.c.bf16 %v989_v44, %v960_v42  ;;  %v1680_v44 = vor.u32 %v2150_v36, %v1677_v40 }
  0xb6   : > { %1478 = vst [vmem:[%s3029_s23 + $0x8] sm:$0xff] %v1414_v43 }
  0xb7   : > { %1485 = vst [vmem:[%s3029_s23 + $0x40] sm:$0xff] %v1421_v45  ;;  %1333 = vmatpush.bf16.msrb.mxu1 %v1680_v44 }
  0xba   : > { %v1018_v56 = vpop.f32.mrf.mxu2 }
  0xbb   : > { %v1047_v59 = vpop.f32.mrf.mxu3  ;;  %v963_v60 = vpop.f32.mrf.mxu0 }
  0xbc   : > { %v1422_v61 = vpack.c.bf16 %v1047_v59, %v1018_v56  ;;  %v992_v62 = vpop.f32.mrf.mxu1 }
  0xbd   : > { %v1429_v63 = vpack.c.bf16 %v992_v62, %v963_v60 }
  0xbe   : > { %1486 = vst [vmem:[%s3029_s23 + $0x48] sm:$0xff] %v1422_v61  ;;  %1194 = vmatmul.bf16.gmra.mxu0 %v2629_v19  ;;  %1223 = vmatmul.bf16.gmra.mxu1 %v2629_v19 }
  0xbf   : > { %1493 = vst [vmem:[%s3029_s23 + $0x80] sm:$0xff] %v1429_v63  ;;  %1252 = vmatmul.bf16.gmra.mxu2 %v2629_v19 }
  0xc0   : > { %1281 = vmatmul.bf16.gmra.mxu3 %v2629_v19 }
  0xc2   : > { %v1021_v11 = vpop.f32.mrf.mxu2 }
  0xc3   : > { %v1050_v14 = vpop.f32.mrf.mxu3  ;;  %v965_v15 = vpop.f32.mrf.mxu0 }
  0xc4   : > { %v1430_v16 = vpack.c.bf16 %v1050_v14, %v1021_v11  ;;  %v994_v17 = vpop.f32.mrf.mxu1 }
  0xc5   : > { %v1437_v18 = vpack.c.bf16 %v994_v17, %v965_v15 }
  0xc6   : > { %1494 = vst [vmem:[%s3029_s23 + $0x88] sm:$0xff] %v1430_v16 }
  0xc7   : > { %1501 = vst [vmem:[%s3029_s23 + $0xc0] sm:$0xff] %v1437_v18 }
  0xca   : > { %v1023_v32 = vpop.f32.mrf.mxu2 }
  0xcb   : > { %v1052_v37 = vpop.f32.mrf.mxu3  ;;  %v968_v38 = vpop.f32.mrf.mxu0 }
  0xcc   : > { %v1438_v42 = vpack.c.bf16 %v1052_v37, %v1023_v32  ;;  %v997_v43 = vpop.f32.mrf.mxu1 }
  0xcd   : > { %v1445_v45 = vpack.c.bf16 %v997_v43, %v968_v38 }
  0xce   : > { %1502 = vst [vmem:[%s3029_s23 + $0xc8] sm:$0xff] %v1438_v42  ;;  %1199 = vmatmul.bf16.gmra.mxu0 %v2720_v3  ;;  %1228 = vmatmul.bf16.gmra.mxu1 %v2720_v3 }
  0xcf   : > { %1509 = vst [vmem:[%s3029_s23 + $0x100] sm:$0xff] %v1445_v45  ;;  %1257 = vmatmul.bf16.gmra.mxu2 %v2720_v3 }
  0xd0   : > { %1286 = vmatmul.bf16.gmra.mxu3 %v2720_v3 }
  0xd2   : > { %v1026_v46 = vpop.f32.mrf.mxu2 }
  0xd3   : > { %v1055_v47 = vpop.f32.mrf.mxu3  ;;  %v970_v48 = vpop.f32.mrf.mxu0 }
  0xd4   : > { %v1446_v49 = vpack.c.bf16 %v1055_v47, %v1026_v46  ;;  %v999_v50 = vpop.f32.mrf.mxu1 }
  0xd5   : > { %v1453_v51 = vpack.c.bf16 %v999_v50, %v970_v48 }
  0xd6   : > { %1510 = vst [vmem:[%s3029_s23 + $0x108] sm:$0xff] %v1446_v49 }
  0xd7   : > { %1517 = vst [vmem:[%s3029_s23 + $0x140] sm:$0xff] %v1453_v51 }
  0xda   : > { %v1028_v52 = vpop.f32.mrf.mxu2 }
  0xdb   : > { %v1057_v53 = vpop.f32.mrf.mxu3  ;;  %v973_v54 = vpop.f32.mrf.mxu0 }
  0xdc   : > { %v1454_v55 = vpack.c.bf16 %v1057_v53, %v1028_v52  ;;  %v1002_v56 = vpop.f32.mrf.mxu1 }
  0xdd   : > { %v1461_v57 = vpack.c.bf16 %v1002_v56, %v973_v54 }
  0xde   : > { %1518 = vst [vmem:[%s3029_s23 + $0x148] sm:$0xff] %v1454_v55  ;;  %1204 = vmatmul.bf16.gmra.mxu0 %v2775_v29  ;;  %1233 = vmatmul.bf16.gmra.mxu1 %v2775_v29 }
  0xdf   : > { %1525 = vst [vmem:[%s3029_s23 + $0x180] sm:$0xff] %v1461_v57  ;;  %1262 = vmatmul.bf16.gmra.mxu2 %v2775_v29 }
  0xe0   : > { %1291 = vmatmul.bf16.gmra.mxu3 %v2775_v29 }
  0xe2   : > { %v1031_v58 = vpop.f32.mrf.mxu2 }
  0xe3   : > { %v1060_v59 = vpop.f32.mrf.mxu3  ;;  %v975_v60 = vpop.f32.mrf.mxu0 }
  0xe4   : > { %v1462_v61 = vpack.c.bf16 %v1060_v59, %v1031_v58  ;;  %v1004_v62 = vpop.f32.mrf.mxu1 }
  0xe5   : > { %v1469_v63 = vpack.c.bf16 %v1004_v62, %v975_v60 }
  0xe6   : > { %1526 = vst [vmem:[%s3029_s23 + $0x188] sm:$0xff] %v1462_v61 }
  0xe7   : > { %1533 = vst [vmem:[%s3029_s23 + $0x1c0] sm:$0xff] %v1469_v63 }
  0xea   : > { %v1033_v0 = vpop.f32.mrf.mxu2 }
  0xeb   : > { %v1062_v1 = vpop.f32.mrf.mxu3  ;;  %v1074_v2 = vpop.f32.mrf.mxu0 }
  0xec   : > { %v1470_v4 = vpack.c.bf16 %v1062_v1, %v1033_v0  ;;  %v1103_v5 = vpop.f32.mrf.mxu1 }
  0xed   : > { %v1415_v6 = vpack.c.bf16 %v1103_v5, %v1074_v2 }
  0xee   : > { %1534 = vst [vmem:[%s3029_s23 + $0x1c8] sm:$0xff] %v1470_v4  ;;  %1305 = vmatmul.bf16.vlgmr.msrb.gmra.mxu0 %v2538_v41  ;;  %1334 = vmatmul.bf16.vlgmr.msrb.gmra.mxu1 %v2538_v41 }
  0xef   : > { %1479 = vst [vmem:[%s3029_s23 + $0x10] sm:$0xff] %v1415_v6  ;;  %1363 = vmatmul.bf16.vlgmr.msrb.gmra.mxu2 %v2538_v41 }
  0xf0   : > { %1392 = vmatmul.bf16.vlgmr.msrb.gmra.mxu3 %v2538_v41 }
  0xf2   : > { %v1132_v7 = vpop.f32.mrf.mxu2 }
  0xf3   : > { %v1161_v8 = vpop.f32.mrf.mxu3  ;;  %v1076_v9 = vpop.f32.mrf.mxu0 }
  0xf4   : > { %v1416_v10 = vpack.c.bf16 %v1161_v8, %v1132_v7  ;;  %v1105_v11 = vpop.f32.mrf.mxu1 }
  0xf5   : > { %v1423_v12 = vpack.c.bf16 %v1105_v11, %v1076_v9 }
  0xf6   : > { %1480 = vst [vmem:[%s3029_s23 + $0x18] sm:$0xff] %v1416_v10 }
  0xf7   : > { %1487 = vst [vmem:[%s3029_s23 + $0x50] sm:$0xff] %v1423_v12 }
  0xfa   : > { %v1134_v13 = vpop.f32.mrf.mxu2 }
  0xfb   : > { %v1163_v14 = vpop.f32.mrf.mxu3  ;;  %v1079_v15 = vpop.f32.mrf.mxu0 }
  0xfc   : > { %v1424_v16 = vpack.c.bf16 %v1163_v14, %v1134_v13  ;;  %v1108_v17 = vpop.f32.mrf.mxu1 }
  0xfd   : > { %v1431_v18 = vpack.c.bf16 %v1108_v17, %v1079_v15 }
  0xfe   : > { %1488 = vst [vmem:[%s3029_s23 + $0x58] sm:$0xff] %v1424_v16  ;;  %1310 = vmatmul.bf16.gmra.mxu0 %v2629_v19  ;;  %1339 = vmatmul.bf16.gmra.mxu1 %v2629_v19 }
  0xff   : > { %1495 = vst [vmem:[%s3029_s23 + $0x90] sm:$0xff] %v1431_v18  ;;  %1368 = vmatmul.bf16.gmra.mxu2 %v2629_v19 }
 0x100   : > { %1397 = vmatmul.bf16.gmra.mxu3 %v2629_v19 }
 0x102   : > { %v1137_v41 = vpop.f32.mrf.mxu2 }
 0x103   : > { %v1166_v20 = vpop.f32.mrf.mxu3  ;;  %v1081_v21 = vpop.f32.mrf.mxu0 }
 0x104   : > { %v1432_v22 = vpack.c.bf16 %v1166_v20, %v1137_v41  ;;  %v1110_v23 = vpop.f32.mrf.mxu1 }
 0x105   : > { %v1439_v24 = vpack.c.bf16 %v1110_v23, %v1081_v21 }
 0x106   : > { %1496 = vst [vmem:[%s3029_s23 + $0x98] sm:$0xff] %v1432_v22 }
 0x107   : > { %1503 = vst [vmem:[%s3029_s23 + $0xd0] sm:$0xff] %v1439_v24 }
 0x10a   : > { %v1139_v25 = vpop.f32.mrf.mxu2 }
 0x10b   : > { %v1168_v26 = vpop.f32.mrf.mxu3  ;;  %v1084_v27 = vpop.f32.mrf.mxu0 }
 0x10c   : > { %v1440_v28 = vpack.c.bf16 %v1168_v26, %v1139_v25  ;;  %v1113_v30 = vpop.f32.mrf.mxu1 }
 0x10d   : > { %v1447_v31 = vpack.c.bf16 %v1113_v30, %v1084_v27 }
 0x10e   : > { %1504 = vst [vmem:[%s3029_s23 + $0xd8] sm:$0xff] %v1440_v28  ;;  %1315 = vmatmul.bf16.gmra.mxu0 %v2720_v3  ;;  %1344 = vmatmul.bf16.gmra.mxu1 %v2720_v3 }
 0x10f   : > { %1511 = vst [vmem:[%s3029_s23 + $0x110] sm:$0xff] %v1447_v31  ;;  %1373 = vmatmul.bf16.gmra.mxu2 %v2720_v3 }
 0x110   : > { %1402 = vmatmul.bf16.gmra.mxu3 %v2720_v3 }
 0x112   : > { %v1142_v19 = vpop.f32.mrf.mxu2 }
 0x113   : > { %v1171_v32 = vpop.f32.mrf.mxu3  ;;  %v1086_v33 = vpop.f32.mrf.mxu0 }
 0x114   : > { %v1448_v34 = vpack.c.bf16 %v1171_v32, %v1142_v19  ;;  %v1115_v35 = vpop.f32.mrf.mxu1 }
 0x115   : > { %v1455_v36 = vpack.c.bf16 %v1115_v35, %v1086_v33 }
 0x116   : > { %1512 = vst [vmem:[%s3029_s23 + $0x118] sm:$0xff] %v1448_v34 }
 0x117   : > { %1519 = vst [vmem:[%s3029_s23 + $0x150] sm:$0xff] %v1455_v36 }
 0x11a   : > { %v1144_v37 = vpop.f32.mrf.mxu2 }
 0x11b   : > { %v1173_v38 = vpop.f32.mrf.mxu3  ;;  %v1089_v39 = vpop.f32.mrf.mxu0 }
 0x11c   : > { %v1456_v40 = vpack.c.bf16 %v1173_v38, %v1144_v37  ;;  %v1118_v42 = vpop.f32.mrf.mxu1 }
 0x11d   : > { %v1463_v43 = vpack.c.bf16 %v1118_v42, %v1089_v39 }
 0x11e   : > { %1520 = vst [vmem:[%s3029_s23 + $0x158] sm:$0xff] %v1456_v40  ;;  %1320 = vmatmul.bf16.gmra.mxu0 %v2775_v29  ;;  %1349 = vmatmul.bf16.gmra.mxu1 %v2775_v29 }
 0x11f   : > { %1527 = vst [vmem:[%s3029_s23 + $0x190] sm:$0xff] %v1463_v43  ;;  %1378 = vmatmul.bf16.gmra.mxu2 %v2775_v29 }
 0x120   : > { %1407 = vmatmul.bf16.gmra.mxu3 %v2775_v29 }
 0x122   : > { %v1147_v3 = vpop.f32.mrf.mxu2 }
 0x123   : > { %v1176_v44 = vpop.f32.mrf.mxu3  ;;  %v1091_v45 = vpop.f32.mrf.mxu0 }
 0x124   : > { %v1464_v46 = vpack.c.bf16 %v1176_v44, %v1147_v3  ;;  %v1120_v47 = vpop.f32.mrf.mxu1 }
 0x125   : > { %v1471_v48 = vpack.c.bf16 %v1120_v47, %v1091_v45 }
 0x126   : > { %1528 = vst [vmem:[%s3029_s23 + $0x198] sm:$0xff] %v1464_v46 }
 0x127   : > { %1535 = vst [vmem:[%s3029_s23 + $0x1d0] sm:$0xff] %v1471_v48 }
 0x12a   : > { %v1149_v49 = vpop.f32.mrf.mxu2 }
 0x12b   : > { %v1178_v50 = vpop.f32.mrf.mxu3  ;;  %v1190_v51 = vpop.f32.mrf.mxu0 }
 0x12c   : > { %v1472_v52 = vpack.c.bf16 %v1178_v50, %v1149_v49  ;;  %v1219_v53 = vpop.f32.mrf.mxu1 }
 0x12d   : > { %v1417_v54 = vpack.c.bf16 %v1219_v53, %v1190_v51 }
 0x12e   : > { %1536 = vst [vmem:[%s3029_s23 + $0x1d8] sm:$0xff] %v1472_v52 }
 0x12f   : > { %1481 = vst [vmem:[%s3029_s23 + $0x20] sm:$0xff] %v1417_v54 }
 0x132   : > { %v1248_v29 = vpop.f32.mrf.mxu2 }
 0x133   : > { %v1277_v55 = vpop.f32.mrf.mxu3  ;;  %v1192_v56 = vpop.f32.mrf.mxu0 }
 0x134   : > { %v1418_v57 = vpack.c.bf16 %v1277_v55, %v1248_v29  ;;  %v1221_v58 = vpop.f32.mrf.mxu1 }
 0x135   : > { %v1425_v59 = vpack.c.bf16 %v1221_v58, %v1192_v56 }
 0x136   : > { %1482 = vst [vmem:[%s3029_s23 + $0x28] sm:$0xff] %v1418_v57 }
 0x137   : > { %1489 = vst [vmem:[%s3029_s23 + $0x60] sm:$0xff] %v1425_v59 }
 0x13a   : > { %v1250_v60 = vpop.f32.mrf.mxu2 }
 0x13b   : > { %v1279_v61 = vpop.f32.mrf.mxu3  ;;  %v1195_v62 = vpop.f32.mrf.mxu0 }
 0x13c   : > { %v1426_v63 = vpack.c.bf16 %v1279_v61, %v1250_v60  ;;  %v1224_v0 = vpop.f32.mrf.mxu1 }
 0x13d   : > { %v1433_v1 = vpack.c.bf16 %v1224_v0, %v1195_v62 }
 0x13e   : > { %1490 = vst [vmem:[%s3029_s23 + $0x68] sm:$0xff] %v1426_v63 }
 0x13f   : > { %1497 = vst [vmem:[%s3029_s23 + $0xa0] sm:$0xff] %v1433_v1 }
 0x142   : > { %v1253_v2 = vpop.f32.mrf.mxu2 }
 0x143   : > { %v1282_v4 = vpop.f32.mrf.mxu3  ;;  %v1197_v5 = vpop.f32.mrf.mxu0 }
 0x144   : > { %v1434_v6 = vpack.c.bf16 %v1282_v4, %v1253_v2  ;;  %v1226_v7 = vpop.f32.mrf.mxu1 }
 0x145   : > { %v1441_v8 = vpack.c.bf16 %v1226_v7, %v1197_v5 }
 0x146   : > { %1498 = vst [vmem:[%s3029_s23 + $0xa8] sm:$0xff] %v1434_v6 }
 0x147   : > { %1505 = vst [vmem:[%s3029_s23 + $0xe0] sm:$0xff] %v1441_v8 }
 0x14a   : > { %v1255_v9 = vpop.f32.mrf.mxu2 }
 0x14b   : > { %v1284_v10 = vpop.f32.mrf.mxu3  ;;  %v1200_v11 = vpop.f32.mrf.mxu0 }
 0x14c   : > { %v1442_v12 = vpack.c.bf16 %v1284_v10, %v1255_v9  ;;  %v1229_v13 = vpop.f32.mrf.mxu1 }
 0x14d   : > { %v1449_v14 = vpack.c.bf16 %v1229_v13, %v1200_v11 }
 0x14e   : > { %1506 = vst [vmem:[%s3029_s23 + $0xe8] sm:$0xff] %v1442_v12 }
 0x14f   : > { %1513 = vst [vmem:[%s3029_s23 + $0x120] sm:$0xff] %v1449_v14 }
 0x152   : > { %v1258_v15 = vpop.f32.mrf.mxu2 }
 0x153   : > { %v1287_v16 = vpop.f32.mrf.mxu3  ;;  %v1202_v17 = vpop.f32.mrf.mxu0 }
 0x154   : > { %v1450_v18 = vpack.c.bf16 %v1287_v16, %v1258_v15  ;;  %v1231_v41 = vpop.f32.mrf.mxu1 }
 0x155   : > { %v1457_v20 = vpack.c.bf16 %v1231_v41, %v1202_v17 }
 0x156   : > { %1514 = vst [vmem:[%s3029_s23 + $0x128] sm:$0xff] %v1450_v18 }
 0x157   : > { %1521 = vst [vmem:[%s3029_s23 + $0x160] sm:$0xff] %v1457_v20 }
 0x15a   : > { %v1260_v21 = vpop.f32.mrf.mxu2 }
 0x15b   : > { %v1289_v22 = vpop.f32.mrf.mxu3  ;;  %v1205_v23 = vpop.f32.mrf.mxu0 }
 0x15c   : > { %v1458_v24 = vpack.c.bf16 %v1289_v22, %v1260_v21  ;;  %v1234_v25 = vpop.f32.mrf.mxu1 }
 0x15d   : > { %v1465_v26 = vpack.c.bf16 %v1234_v25, %v1205_v23 }
 0x15e   : > { %1522 = vst [vmem:[%s3029_s23 + $0x168] sm:$0xff] %v1458_v24 }
 0x15f   : > { %1529 = vst [vmem:[%s3029_s23 + $0x1a0] sm:$0xff] %v1465_v26 }
 0x162   : > { %v1263_v27 = vpop.f32.mrf.mxu2 }
 0x163   : > { %v1292_v28 = vpop.f32.mrf.mxu3  ;;  %v1207_v30 = vpop.f32.mrf.mxu0 }
 0x164   : > { %v1466_v31 = vpack.c.bf16 %v1292_v28, %v1263_v27  ;;  %v1236_v19 = vpop.f32.mrf.mxu1 }
 0x165   : > { %v1473_v32 = vpack.c.bf16 %v1236_v19, %v1207_v30 }
 0x166   : > { %1530 = vst [vmem:[%s3029_s23 + $0x1a8] sm:$0xff] %v1466_v31 }
 0x167   : > { %1537 = vst [vmem:[%s3029_s23 + $0x1e0] sm:$0xff] %v1473_v32 }
 0x16a   : > { %v1265_v33 = vpop.f32.mrf.mxu2 }
 0x16b   : > { %v1294_v34 = vpop.f32.mrf.mxu3  ;;  %v1306_v35 = vpop.f32.mrf.mxu0 }
 0x16c   : > { %v1474_v36 = vpack.c.bf16 %v1294_v34, %v1265_v33  ;;  %v1335_v37 = vpop.f32.mrf.mxu1 }
 0x16d   : > { %v1419_v38 = vpack.c.bf16 %v1335_v37, %v1306_v35 }
 0x16e   : > { %1538 = vst [vmem:[%s3029_s23 + $0x1e8] sm:$0xff] %v1474_v36 }
 0x16f   : > { %1483 = vst [vmem:[%s3029_s23 + $0x30] sm:$0xff] %v1419_v38 }
 0x172   : > { %v1364_v39 = vpop.f32.mrf.mxu2 }
 0x173   : > { %v1393_v40 = vpop.f32.mrf.mxu3  ;;  %v1308_v42 = vpop.f32.mrf.mxu0 }
 0x174   : > { %v1420_v43 = vpack.c.bf16 %v1393_v40, %v1364_v39  ;;  %v1337_v3 = vpop.f32.mrf.mxu1 }
 0x175   : > { %v1427_v44 = vpack.c.bf16 %v1337_v3, %v1308_v42 }
 0x176   : > { %1484 = vst [vmem:[%s3029_s23 + $0x38] sm:$0xff] %v1420_v43 }
 0x177   : > { %1491 = vst [vmem:[%s3029_s23 + $0x70] sm:$0xff] %v1427_v44 }
 0x17a   : > { %v1366_v45 = vpop.f32.mrf.mxu2 }
 0x17b   : > { %v1395_v46 = vpop.f32.mrf.mxu3  ;;  %v1311_v47 = vpop.f32.mrf.mxu0 }
 0x17c   : > { %v1428_v48 = vpack.c.bf16 %v1395_v46, %v1366_v45  ;;  %v1340_v49 = vpop.f32.mrf.mxu1 }
 0x17d   : > { %v1435_v50 = vpack.c.bf16 %v1340_v49, %v1311_v47 }
 0x17e   : > { %1492 = vst [vmem:[%s3029_s23 + $0x78] sm:$0xff] %v1428_v48 }
 0x17f   : > { %1499 = vst [vmem:[%s3029_s23 + $0xb0] sm:$0xff] %v1435_v50 }
 0x182   : > { %v1369_v51 = vpop.f32.mrf.mxu2 }
 0x183   : > { %v1398_v52 = vpop.f32.mrf.mxu3  ;;  %v1313_v53 = vpop.f32.mrf.mxu0 }
 0x184   : > { %v1436_v54 = vpack.c.bf16 %v1398_v52, %v1369_v51  ;;  %v1342_v29 = vpop.f32.mrf.mxu1 }
 0x185   : > { %v1443_v55 = vpack.c.bf16 %v1342_v29, %v1313_v53 }
 0x186   : > { %1500 = vst [vmem:[%s3029_s23 + $0xb8] sm:$0xff] %v1436_v54 }
 0x187   : > { %1507 = vst [vmem:[%s3029_s23 + $0xf0] sm:$0xff] %v1443_v55 }
 0x18a   : > { %v1371_v56 = vpop.f32.mrf.mxu2 }
 0x18b   : > { %v1400_v57 = vpop.f32.mrf.mxu3  ;;  %v1316_v58 = vpop.f32.mrf.mxu0 }
 0x18c   : > { %v1444_v59 = vpack.c.bf16 %v1400_v57, %v1371_v56  ;;  %v1345_v60 = vpop.f32.mrf.mxu1 }
 0x18d   : > { %v1451_v61 = vpack.c.bf16 %v1345_v60, %v1316_v58 }
 0x18e   : > { %1508 = vst [vmem:[%s3029_s23 + $0xf8] sm:$0xff] %v1444_v59 }
 0x18f   : > { %1515 = vst [vmem:[%s3029_s23 + $0x130] sm:$0xff] %v1451_v61 }
 0x192   : > { %v1374_v62 = vpop.f32.mrf.mxu2 }
 0x193   : > { %v1403_v63 = vpop.f32.mrf.mxu3  ;;  %v1318_v0 = vpop.f32.mrf.mxu0 }
 0x194   : > { %v1452_v1 = vpack.c.bf16 %v1403_v63, %v1374_v62  ;;  %v1347_v2 = vpop.f32.mrf.mxu1 }
 0x195   : > { %v1459_v4 = vpack.c.bf16 %v1347_v2, %v1318_v0 }
 0x196   : > { %1516 = vst [vmem:[%s3029_s23 + $0x138] sm:$0xff] %v1452_v1 }
 0x197   : > { %1523 = vst [vmem:[%s3029_s23 + $0x170] sm:$0xff] %v1459_v4 }
 0x19a   : > { %v1376_v5 = vpop.f32.mrf.mxu2 }
 0x19b   : > { %v1405_v6 = vpop.f32.mrf.mxu3  ;;  %v1321_v7 = vpop.f32.mrf.mxu0 }
 0x19c   : > { %v1460_v8 = vpack.c.bf16 %v1405_v6, %v1376_v5  ;;  %v1350_v9 = vpop.f32.mrf.mxu1 }
 0x19d   : > { %v1467_v10 = vpack.c.bf16 %v1350_v9, %v1321_v7 }
 0x19e   : > { %1524 = vst [vmem:[%s3029_s23 + $0x178] sm:$0xff] %v1460_v8 }
 0x19f   : > { %1531 = vst [vmem:[%s3029_s23 + $0x1b0] sm:$0xff] %v1467_v10 }
 0x1a2   : > { %v1379_v11 = vpop.f32.mrf.mxu2 }
 0x1a3   : > { %v1408_v12 = vpop.f32.mrf.mxu3  ;;  %v1323_v13 = vpop.f32.mrf.mxu0 }
 0x1a4   : > { %v1468_v14 = vpack.c.bf16 %v1408_v12, %v1379_v11  ;;  %v1352_v15 = vpop.f32.mrf.mxu1 }
 0x1a5   : > { %v1475_v16 = vpack.c.bf16 %v1352_v15, %v1323_v13 }
 0x1a6   : > { %1532 = vst [vmem:[%s3029_s23 + $0x1b8] sm:$0xff] %v1468_v14 }
 0x1a7   : > { %1539 = vst [vmem:[%s3029_s23 + $0x1f0] sm:$0xff] %v1475_v16 }
 0x1aa   : > { %v1381_v17 = vpop.f32.mrf.mxu2 }
 0x1ab   : > { %v1410_v18 = vpop.f32.mrf.mxu3 }
 0x1ac   : > { %v1476_v41 = vpack.c.bf16 %v1410_v18, %v1381_v17 }
 0x1ae   : > { %1540 = vst [vmem:[%s3029_s23 + $0x1f8] sm:$0xff] %v1476_v41 }
 0x1af PF: > { %s12_s9 = sadd.s32 1, %s2286_s9  }
 0x1b0   : > { %p9_p4 = scmp.ge.s32.totalorder %s12_s9, 4  }
 0x1b2   :  { %11 = sbr.rel (!%p9_p4) target bundleno = 1 (0x1), region = 58 }

// kernel: vae_conceptizer_forward.17
= control target key start
LH: loop header
LB: loop body
LE: loop exit
PB: predicated region body
PF: predicated region fallthrough
CT: control target
= control target key end

     0   :  { %s827_s9 = smov 0   ;;  %s940_s0 = inlined_call_operand.vmem [shape: bf16[256,256], index: 0, kind: input, shape index: {}]   ;;  %s941_s1 = inlined_call_operand.vmem [shape: bf16[256,128], index: 1, kind: input, shape index: {}]   ;;  %s942_s2 = inlined_call_operand.vmem [shape: bf16[256,128], index: 2, kind: output, shape index: {}]  }
   0x1 LB: > { %s560_s10 = sadd.s32 4294967295, %s810_s9   ;;  %p564_p0 = scmp.ge.s32.totalorder %s810_s9, 1  ;;  %s810_s9 = sphi %s827_s9, %s12_s9  }
   0x2   : > { %p114_p1 = scmp.lt.s32.totalorder %s810_s9, 3 }
   0x4   : > { %p115_p2 = pnand %p564_p0, %p114_p1 }
   0x5   : > { %s565_s23 = sshll.u32 (!%p115_p2), %s560_s10, 4 }
   0x6   : > { %118 = sbr.rel (%p115_p2) target bundleno = 237 (0xed), region = 28  ;;  %p138_p3 = scmp.lt.s32.totalorder (!%p115_p2), %s565_s23, 31 }
   0xb   : > { %v724_v0 = vld [vmem:[%s941_s1 + $0x38] sm:$0xff]  ;;  %v723_v2 = vld [vmem:[%s941_s1 + $0x30] sm:$0xff]  ;;  %v722_v4 = vld [vmem:[%s941_s1 + $0x28] sm:$0xff]  ;;  %s944_s23 = smov (!%p138_p3, %s565_s23), 31 }
   0xc   : > { %v732_v1 = vld [vmem:[%s941_s1 + $0x78] sm:$0xff]  ;;  %374 = vmatpush.bf16.msra.mxu0 %v724_v0  ;;  %780 = vmatpush.bf16.msra.mxu2 %v724_v0  ;;  %v731_v3 = vld [vmem:[%s941_s1 + $0x70] sm:$0xff]  ;;  %v730_v5 = vld [vmem:[%s941_s1 + $0x68] sm:$0xff]  ;;  %s700_s8 = sshll.u32 %s944_s23, 3  ;;  %s569_s21 = sshll.u32 %s944_s23, 2 }
   0xd   : > { %423 = vmatpush.bf16.msra.mxu1 %v732_v1  ;;  %788 = vmatpush.bf16.msra.mxu3 %v732_v1  ;;  %v721_v6 = vld [vmem:[%s941_s1 + $0x20] sm:$0xff]  ;;  %v720_v8 = vld [vmem:[%s941_s1 + $0x18] sm:$0xff]  ;;  %v719_v10 = vld [vmem:[%s941_s1 + $0x10] sm:$0xff]  ;;  %s880_s14 = scalar_lea.vmem %s940_s0, %s700_s8  ;;  %s927_s25 = scalar_lea.vmem %s942_s2, %s569_s21 }
   0xe   : > { %v729_v7 = vld [vmem:[%s941_s1 + $0x60] sm:$0xff]  ;;  %v728_v9 = vld [vmem:[%s941_s1 + $0x58] sm:$0xff]  ;;  %v727_v11 = vld [vmem:[%s941_s1 + $0x50] sm:$0xff] }
   0xf   : > { %v718_v12 = vld [vmem:[%s941_s1 + $0x8] sm:$0xff]  ;;  %v717_v14 = vld [vmem:[%s941_s1] sm:$0xff]  ;;  %v580_v28 = vld [vmem:[%s880_s14 + $0x10] sm:$0xf] }
  0x10   : > { %375 = vmatpush.bf16.msra.mxu0 %v723_v2  ;;  %781 = vmatpush.bf16.msra.mxu2 %v723_v2  ;;  %v726_v13 = vld [vmem:[%s941_s1 + $0x48] sm:$0xff]  ;;  %v725_v15 = vld [vmem:[%s941_s1 + $0x40] sm:$0xff]  ;;  %v704_v29 = vld [vmem:[%s880_s14 + $0x14] sm:$0xf0] }
  0x11   : > { %424 = vmatpush.bf16.msra.mxu1 %v731_v3  ;;  %789 = vmatpush.bf16.msra.mxu3 %v731_v3  ;;  %v572_v16 = vld [vmem:[%s880_s14] sm:$0xf]  ;;  %v702_v17 = vld [vmem:[%s880_s14 + $0x4] sm:$0xf0]  ;;  %v701_v20 = vld [vmem:[%s880_s14 + $0x4] sm:$0xf]  ;;  %v581_v36 = vor.u32 %v704_v29, %v580_v28 }
  0x12   : > { %v604_v18 = vld [vmem:[%s880_s14 + $0x40] sm:$0xf]  ;;  %v710_v19 = vld [vmem:[%s880_s14 + $0x44] sm:$0xf0]  ;;  %v574_v21 = vld [vmem:[%s880_s14 + $0x8] sm:$0xf0]  ;;  %v573_v24 = vor.u32 %v702_v17, %v572_v16 }
  0x13   : > { %v709_v22 = vld [vmem:[%s880_s14 + $0x44] sm:$0xf]  ;;  %v606_v23 = vld [vmem:[%s880_s14 + $0x48] sm:$0xf0]  ;;  %v605_v25 = vor.u32 %v710_v19, %v604_v18  ;;  %v577_v26 = vor.u32 %v701_v20, %v574_v21  ;;  %v612_v30 = vld [vmem:[%s880_s14 + $0x50] sm:$0xf] }
  0x14   : > { %376 = vmatpush.bf16.msra.mxu0 %v722_v4  ;;  %782 = vmatpush.bf16.msra.mxu2 %v722_v4  ;;  %v609_v27 = vor.u32 %v709_v22, %v606_v23  ;;  %v712_v31 = vld [vmem:[%s880_s14 + $0x54] sm:$0xf0]  ;;  %v703_v32 = vld [vmem:[%s880_s14 + $0x14] sm:$0xf]  ;;  %v582_v33 = vld [vmem:[%s880_s14 + $0x18] sm:$0xf0] }
  0x15   : > { %425 = vmatpush.bf16.msra.mxu1 %v730_v5  ;;  %790 = vmatpush.bf16.msra.mxu3 %v730_v5  ;;  %v711_v34 = vld [vmem:[%s880_s14 + $0x54] sm:$0xf]  ;;  %v614_v35 = vld [vmem:[%s880_s14 + $0x58] sm:$0xf0]  ;;  %v613_v37 = vor.u32 %v712_v31, %v612_v30  ;;  %v585_v38 = vor.u32 %v703_v32, %v582_v33  ;;  %v588_v40 = vld [vmem:[%s880_s14 + $0x20] sm:$0xf] }
  0x16   : > { %v617_v39 = vor.u32 %v711_v34, %v614_v35  ;;  %v706_v41 = vld [vmem:[%s880_s14 + $0x24] sm:$0xf0]  ;;  %v620_v42 = vld [vmem:[%s880_s14 + $0x60] sm:$0xf]  ;;  %v705_v44 = vld [vmem:[%s880_s14 + $0x24] sm:$0xf] }
  0x17   : > { %v714_v43 = vld [vmem:[%s880_s14 + $0x64] sm:$0xf0]  ;;  %v590_v45 = vld [vmem:[%s880_s14 + $0x28] sm:$0xf0]  ;;  %v713_v46 = vld [vmem:[%s880_s14 + $0x64] sm:$0xf]  ;;  %v589_v48 = vor.u32 %v706_v41, %v588_v40 }
  0x18   : > { %377 = vmatpush.bf16.msra.mxu0 %v721_v6  ;;  %783 = vmatpush.bf16.msra.mxu2 %v721_v6  ;;  %v622_v47 = vld [vmem:[%s880_s14 + $0x68] sm:$0xf0]  ;;  %v621_v49 = vor.u32 %v714_v43, %v620_v42  ;;  %v593_v50 = vor.u32 %v705_v44, %v590_v45  ;;  %v596_v52 = vld [vmem:[%s880_s14 + $0x30] sm:$0xf]  ;;  %v708_v53 = vld [vmem:[%s880_s14 + $0x34] sm:$0xf0] }
  0x19   : > { %426 = vmatpush.bf16.msra.mxu1 %v729_v7  ;;  %791 = vmatpush.bf16.msra.mxu3 %v729_v7  ;;  %v625_v51 = vor.u32 %v713_v46, %v622_v47  ;;  %v628_v54 = vld [vmem:[%s880_s14 + $0x70] sm:$0xf]  ;;  %v716_v55 = vld [vmem:[%s880_s14 + $0x74] sm:$0xf0]  ;;  %v707_v56 = vld [vmem:[%s880_s14 + $0x34] sm:$0xf]  ;;  %v597_v60 = vor.u32 %v708_v53, %v596_v52 }
  0x1a   : > { %v598_v57 = vld [vmem:[%s880_s14 + $0x38] sm:$0xf0]  ;;  %v715_v58 = vld [vmem:[%s880_s14 + $0x74] sm:$0xf]  ;;  %v629_v61 = vor.u32 %v716_v55, %v628_v54 }
  0x1b   : > { %v630_v59 = vld [vmem:[%s880_s14 + $0x78] sm:$0xf0]  ;;  %v601_v62 = vor.u32 %v707_v56, %v598_v57 }
  0x1c   : > { %378 = vmatpush.bf16.msra.mxu0 %v720_v8  ;;  %784 = vmatpush.bf16.msra.mxu2 %v720_v8  ;;  %v633_v63 = vor.u32 %v715_v58, %v630_v59 }
  0x1d   : > { %427 = vmatpush.bf16.msra.mxu1 %v728_v9  ;;  %792 = vmatpush.bf16.msra.mxu3 %v728_v9 }
  0x20   : > { %379 = vmatpush.bf16.msra.mxu0 %v719_v10  ;;  %785 = vmatpush.bf16.msra.mxu2 %v719_v10 }
  0x21   : > { %428 = vmatpush.bf16.msra.mxu1 %v727_v11  ;;  %793 = vmatpush.bf16.msra.mxu3 %v727_v11 }
  0x24   : > { %380 = vmatpush.bf16.msra.mxu0 %v718_v12  ;;  %786 = vmatpush.bf16.msra.mxu2 %v718_v12 }
  0x25   : > { %429 = vmatpush.bf16.msra.mxu1 %v726_v13  ;;  %794 = vmatpush.bf16.msra.mxu3 %v726_v13 }
  0x28   : > { %381 = vmatpush.bf16.msra.mxu0 %v717_v14  ;;  %787 = vmatpush.bf16.msra.mxu2 %v717_v14 }
  0x29   : > { %430 = vmatpush.bf16.msra.mxu1 %v725_v15  ;;  %795 = vmatpush.bf16.msra.mxu3 %v725_v15 }
  0x2b   : > { %382 = vmatmul.bf16.vlgmr.msra.gmra.mxu0 %v573_v24  ;;  %402 = vmatmul.bf16.vlgmr.msra.gmra.mxu2 %v605_v25 }
  0x2c   : > { %431 = vmatmul.bf16.vlgmr.msra.gmra.mxu1 %v577_v26  ;;  %451 = vmatmul.bf16.vlgmr.msra.gmra.mxu3 %v609_v27 }
  0x3b   : > { %387 = vmatmul.bf16.gmra.mxu0 %v581_v36  ;;  %407 = vmatmul.bf16.gmra.mxu2 %v613_v37 }
  0x3c   : > { %436 = vmatmul.bf16.gmra.mxu1 %v585_v38  ;;  %456 = vmatmul.bf16.gmra.mxu3 %v617_v39 }
  0x4b   : > { %392 = vmatmul.bf16.gmra.mxu0 %v589_v48  ;;  %412 = vmatmul.bf16.gmra.mxu2 %v621_v49 }
  0x4c   : > { %441 = vmatmul.bf16.gmra.mxu1 %v593_v50  ;;  %461 = vmatmul.bf16.gmra.mxu3 %v625_v51 }
  0x5b   : > { %397 = vmatmul.bf16.gmra.mxu0 %v597_v60  ;;  %417 = vmatmul.bf16.gmra.mxu2 %v629_v61 }
  0x5c   : > { %446 = vmatmul.bf16.gmra.mxu1 %v601_v62  ;;  %466 = vmatmul.bf16.gmra.mxu3 %v633_v63 }
  0xa8   : > { %v383_v0 = vpop.f32.mrf.mxu0 }
  0xa9   : > { %v432_v1 = vpop.f32.mrf.mxu1 }
  0xaa   : > { %v433_v6 = vadd.f32 %v432_v1, %v383_v0 }
  0xae   : > { %v403_v2 = vpop.f32.mrf.mxu2 }
  0xaf   : > { %v452_v3 = vpop.f32.mrf.mxu3 }
  0xb0   : > { %v385_v4 = vpop.f32.mrf.mxu0  ;;  %v453_v11 = vadd.f32 %v452_v3, %v403_v2 }
  0xb1   : > { %v434_v5 = vpop.f32.mrf.mxu1 }
  0xb2   : > { %v435_v7 = vadd.f32 %v434_v5, %v385_v4 }
  0xb4   : > { %v736_v8 = vpack.c.bf16 %v435_v7, %v433_v6 }
  0xb6   : > { %737 = vst [vmem:[%s927_s25] sm:$0xff] %v736_v8   ;;  %v405_v9 = vpop.f32.mrf.mxu2 }
  0xb7   : > { %v454_v10 = vpop.f32.mrf.mxu3 }
  0xb8   : > { %v455_v12 = vadd.f32 %v454_v10, %v405_v9  ;;  %v388_v13 = vpop.f32.mrf.mxu0 }
  0xb9   : > { %v437_v14 = vpop.f32.mrf.mxu1 }
  0xba   : > { %v756_v15 = vpack.c.bf16 %v455_v12, %v453_v11  ;;  %v438_v20 = vadd.f32 %v437_v14, %v388_v13 }
  0xbc   : > { %776 = vst [vmem:[%s927_s25 + $0x20] sm:$0xff] %v756_v15  }
  0xbe   : > { %v408_v16 = vpop.f32.mrf.mxu2 }
  0xbf   : > { %v457_v17 = vpop.f32.mrf.mxu3 }
  0xc0   : > { %v390_v18 = vpop.f32.mrf.mxu0  ;;  %v458_v25 = vadd.f32 %v457_v17, %v408_v16 }
  0xc1   : > { %v439_v19 = vpop.f32.mrf.mxu1 }
  0xc2   : > { %v440_v21 = vadd.f32 %v439_v19, %v390_v18 }
  0xc4   : > { %v741_v22 = vpack.c.bf16 %v440_v21, %v438_v20 }
  0xc6   : > { %773 = vst [vmem:[%s927_s25 + $0x8] sm:$0xff] %v741_v22   ;;  %v410_v23 = vpop.f32.mrf.mxu2 }
  0xc7   : > { %v459_v24 = vpop.f32.mrf.mxu3 }
  0xc8   : > { %v460_v26 = vadd.f32 %v459_v24, %v410_v23  ;;  %v393_v27 = vpop.f32.mrf.mxu0 }
  0xc9   : > { %v442_v28 = vpop.f32.mrf.mxu1 }
  0xca   : > { %v761_v29 = vpack.c.bf16 %v460_v26, %v458_v25  ;;  %v443_v34 = vadd.f32 %v442_v28, %v393_v27 }
  0xcc   : > { %777 = vst [vmem:[%s927_s25 + $0x28] sm:$0xff] %v761_v29  }
  0xce   : > { %v413_v30 = vpop.f32.mrf.mxu2 }
  0xcf   : > { %v462_v31 = vpop.f32.mrf.mxu3 }
  0xd0   : > { %v395_v32 = vpop.f32.mrf.mxu0  ;;  %v463_v39 = vadd.f32 %v462_v31, %v413_v30 }
  0xd1   : > { %v444_v33 = vpop.f32.mrf.mxu1 }
  0xd2   : > { %v445_v35 = vadd.f32 %v444_v33, %v395_v32 }
  0xd4   : > { %v746_v36 = vpack.c.bf16 %v445_v35, %v443_v34 }
  0xd6   : > { %774 = vst [vmem:[%s927_s25 + $0x10] sm:$0xff] %v746_v36   ;;  %v415_v37 = vpop.f32.mrf.mxu2 }
  0xd7   : > { %v464_v38 = vpop.f32.mrf.mxu3 }
  0xd8   : > { %v465_v40 = vadd.f32 %v464_v38, %v415_v37  ;;  %v398_v41 = vpop.f32.mrf.mxu0 }
  0xd9   : > { %v447_v42 = vpop.f32.mrf.mxu1 }
  0xda   : > { %v766_v43 = vpack.c.bf16 %v465_v40, %v463_v39  ;;  %v448_v48 = vadd.f32 %v447_v42, %v398_v41 }
  0xdc   : > { %778 = vst [vmem:[%s927_s25 + $0x30] sm:$0xff] %v766_v43  }
  0xde   : > { %v418_v44 = vpop.f32.mrf.mxu2 }
  0xdf   : > { %v467_v45 = vpop.f32.mrf.mxu3 }
  0xe0   : > { %v400_v46 = vpop.f32.mrf.mxu0  ;;  %v468_v53 = vadd.f32 %v467_v45, %v418_v44 }
  0xe1   : > { %v449_v47 = vpop.f32.mrf.mxu1 }
  0xe2   : > { %v450_v49 = vadd.f32 %v449_v47, %v400_v46 }
  0xe4   : > { %v751_v50 = vpack.c.bf16 %v450_v49, %v448_v48 }
  0xe6   : > { %775 = vst [vmem:[%s927_s25 + $0x18] sm:$0xff] %v751_v50   ;;  %v420_v51 = vpop.f32.mrf.mxu2 }
  0xe7   : > { %v469_v52 = vpop.f32.mrf.mxu3 }
  0xe8   : > { %v470_v54 = vadd.f32 %v469_v52, %v420_v51 }
  0xea   : > { %v771_v55 = vpack.c.bf16 %v470_v54, %v468_v53 }
  0xec   : > { %779 = vst [vmem:[%s927_s25 + $0x38] sm:$0xff] %v771_v55  }
  0xed PF: > { %s12_s9 = sadd.s32 1, %s810_s9  }
  0xee   : > { %p9_p4 = scmp.ge.s32.totalorder %s12_s9, 4  }
  0xf0   :  { %11 = sbr.rel (!%p9_p4) target bundleno = 1 (0x1), region = 58 }

</bundles_post_ra>
